<compile_context>
chip_gen: v7x
topology: tpu7x:2x2x1
jax: 0.10.0
libtpu: 0.0.40
codegen_flags: <defaults>
</compile_context>

<pallas_src>
import jax
import jax.numpy as jnp
import numpy as np
from jax.experimental import pallas as pl
from jax.experimental.pallas import tpu as pltpu

# ---------------- static geometry (input 44x44 so that fc1 sees 320 = 80*2*2) ----------
K = 5                       # conv kernel size (all layers)
H0 = 44                     # input spatial size
C1, C2, C3 = 40, 120, 80    # real conv output channels
CP = 128                    # every channel dim padded to one full lane tile
PH_U, PH_V = 10, 16         # conv1-output polyphase grid: 10x10 real, v padded to 16
ROWS_PER_B = 4 * PH_U * PH_V   # conv1 im2col rows per batch element (= 640)


# ----------------------------------------------------------------------------
# Kernel 1: conv1 -> ReLU -> pool -> conv2 -> ReLU -> pool   (one batch elem / grid step)
# ----------------------------------------------------------------------------
def conv1_conv2_kernel(p1_ref, w1_ref, b1_ref, w2_ref, b2_ref, o_ref, h1_scr):
    nrows = p1_ref.shape[1]                                   # 640
    # ---- conv1: ONE merged im2col matmul over the 4 pool quadrants, then quadrant max
    y = jnp.dot(p1_ref[...].reshape(4 * nrows, p1_ref.shape[2]), w1_ref[...],
                preferred_element_type=jnp.float32)           # (2560, 128)
    y = jnp.max(y.reshape(4, nrows, CP), axis=0)              # 2x2 max pool
    h1 = jnp.maximum(y + b1_ref[...], 0.0)                    # bias + ReLU hoisted after max
    # polyphase layout: [phase = 2*alpha+beta, u, v, c] holds h1 at (p, q) = (2u+a, 2v+b)
    h1_scr[...] = h1.reshape(4, PH_U, PH_V, CP)

    # ---- conv2: 25 shifted-window matmuls on the VMEM-resident polyphase activation;
    #      the 2x2 pool uses one accumulator per output quadrant, max-reduced at the end.
    acc = [jnp.zeros((64, CP), jnp.float32) for _ in range(4)]
    for ih in range(K):
        for iw in range(K):
            w_slab = w2_ref[ih * K + iw]                      # (cin=128, cout=128) bf16
            for e1 in range(2):
                for e2 in range(2):
                    a, c = e1 + ih, e2 + iw                   # offset on the 20x20 grid
                    xs = h1_scr[(a & 1) * 2 + (c & 1),
                                (a >> 1):(a >> 1) + 8,
                                (c >> 1):(c >> 1) + 8, :]      # (8, 8, 128)
                    xs = xs.reshape(64, CP).astype(jnp.bfloat16)
                    acc[e1 * 2 + e2] = acc[e1 * 2 + e2] + jnp.dot(
                        xs, w_slab, preferred_element_type=jnp.float32)
    pooled = jnp.maximum(jnp.maximum(acc[0], acc[1]), jnp.maximum(acc[2], acc[3]))
    o_ref[...] = jnp.maximum(pooled + b2_ref[...], 0.0).astype(o_ref.dtype)


# ----------------------------------------------------------------------------
# Kernel 2: conv3 -> ReLU -> pool -> flatten -> fc1 -> ReLU -> fc2 -> ReLU -> softmax
# ----------------------------------------------------------------------------
def conv3_head_kernel(p3_ref, w3_ref, b3_ref, w1r_ref, b1f_ref, w2f_ref, b2f_ref,
                      o_ref, h3_scr):
    nb = o_ref.shape[0]                 # batch
    s_rows = h3_scr.shape[0]            # 4 * batch  (2x2 pooled conv3 positions x batch)
    # conv3: merged quadrant im2col matmul + pool max + bias + ReLU (hoisted)
    y = jnp.dot(p3_ref[...], w3_ref[...], preferred_element_type=jnp.float32)
    h3_scr[...] = jnp.maximum(jnp.max(y.reshape(4, s_rows, CP), axis=0) + b3_ref[...], 0.0)
    # fc1 (+ torch NCHW flatten folded into the weight layout) + ReLU
    acc = jnp.zeros((nb, CP), jnp.float32)
    for s in range(4):                  # s = h*2 + w of the 2x2 pooled conv3 map
        xs = h3_scr[s * nb:(s + 1) * nb, :].astype(jnp.bfloat16)
        acc = acc + jnp.dot(xs, w1r_ref[s], preferred_element_type=jnp.float32)
    h = jnp.maximum(acc + b1f_ref[...], 0.0).astype(jnp.bfloat16)
    # fc2 + ReLU + softmax over the 3 real classes (cols >= 3 are lane padding)
    z = jnp.dot(h, w2f_ref[...], preferred_element_type=jnp.float32) + b2f_ref[...]
    z = jnp.maximum(z, 0.0)
    m = jnp.max(z, axis=-1, keepdims=True)
    col = jax.lax.broadcasted_iota(jnp.int32, z.shape, 1)
    e = jnp.where(col < 3, jnp.exp(z - m), 0.0)
    o_ref[...] = e * pl.reciprocal(jnp.sum(e, axis=-1, keepdims=True), approx=True)


# ----------------------------------------------------------------------------
# Wrapper-side layout glue (tiny tensors only)
# ----------------------------------------------------------------------------
def _conv1_quadrant_patches(x_nhwc):
    """conv1 im2col grouped by pool quadrant; rows ordered (b, phase=2a+b, u, v_pad16).

    Row (b, phase, u, v) of quadrant (d1, d2) holds the 5x5 patch for conv1-output
    position (4u + 2*alpha + d1, 4v + 2*beta + d2).  Only conv1's im2col is built
    host/XLA side (input is 44x44x1, so this is tiny); conv2's lives in the kernel.
    """
    B = x_nhwc.shape[0]
    ho = H0 - K + 1                                       # 40
    x = x_nhwc[..., 0]                                    # in_channels == 1
    rows = []
    for ih in range(K):
        cols = [x[:, ih:ih + ho, iw:iw + ho] for iw in range(K)]
        rows.append(jnp.stack(cols, axis=-1))             # (B, 40, 40, 5)   [iw]
    pat = jnp.stack(rows, axis=3).reshape(B, ho, ho, K * K)   # k = ih*5 + iw
    quads = []
    for d1 in range(2):
        for d2 in range(2):
            phases = []
            for al in range(2):
                for be in range(2):
                    blk = pat[:, (2 * al + d1)::4, (2 * be + d2)::4, :]    # (B,10,10,25)
                    blk = jnp.pad(blk, ((0, 0), (0, 0), (0, PH_V - PH_U), (0, 0)))
                    phases.append(blk)                                      # (B,10,16,25)
            ph = jnp.stack(phases, axis=1)                                  # (B,4,10,16,25)
            quads.append(ph.reshape(B * ROWS_PER_B, K * K))
    return jnp.stack(quads, axis=0).astype(jnp.bfloat16)                    # (4, B*640, 25)


def _conv3_quadrant_patches(h2_bhwc):
    """conv3 im2col grouped by pool quadrant; rows ordered (quad, P, Q, b)."""
    B = h2_bhwc.shape[0]
    ho = 8 - K + 1                                        # 4
    rows = []
    for ih in range(K):
        cols = [h2_bhwc[:, ih:ih + ho, iw:iw + ho, :] for iw in range(K)]
        rows.append(jnp.stack(cols, axis=3))              # (B, 4, 4, 5, 120)  [iw]
    pat = jnp.stack(rows, axis=3).reshape(B, ho, ho, K * K * C2)   # k = (ih*5+iw)*120 + ci
    quads = []
    for f1 in range(2):
        for f2 in range(2):
            q = pat[:, f1::2, f2::2, :]                   # (B, 2, 2, 3000)
            quads.append(jnp.transpose(q, (1, 2, 0, 3)).reshape(4 * B, K * K * C2))
    return jnp.concatenate(quads, axis=0)                 # (16B, 3000) bf16


def prepare_params(params):
    """Pre-transpose / pad / bf16-cast all weights once (not per forward call)."""
    f32, bf16 = jnp.float32, jnp.bfloat16
    # conv1: (40,1,5,5) -> (25, 40) -> pad to (25, 128)
    w1 = jnp.transpose(params["conv1_w"].astype(f32), (2, 3, 1, 0)).reshape(K * K, C1)
    w1 = jnp.pad(w1, ((0, 0), (0, CP - C1))).astype(bf16)
    b1 = jnp.pad(params["conv1_b"].astype(f32), (0, CP - C1)).reshape(1, CP)
    # conv2: (120,40,5,5) -> (25, 40, 120) -> pad to (25, 128, 128)
    w2 = jnp.transpose(params["conv2_w"].astype(f32), (2, 3, 1, 0)).reshape(K * K, C1, C2)
    w2 = jnp.pad(w2, ((0, 0), (0, CP - C1), (0, CP - C2))).astype(bf16)
    b2 = jnp.pad(params["conv2_b"].astype(f32), (0, CP - C2)).reshape(1, CP)
    # conv3: (80,120,5,5) -> (3000, 80) -> pad to (3000, 128)
    w3 = jnp.transpose(params["conv3_w"].astype(f32), (2, 3, 1, 0)).reshape(K * K * C2, C3)
    w3 = jnp.pad(w3, ((0, 0), (0, CP - C3))).astype(bf16)
    b3 = jnp.pad(params["conv3_b"].astype(f32), (0, CP - C3)).reshape(1, CP)
    # fc1: (70, 320); torch flatten index = c*4 + s  ->  w1r[s, c, o] = fc1_w[o, c*4+s]
    w1r = jnp.transpose(params["fc1_w"].astype(f32).reshape(70, C3, 4), (2, 1, 0))
    w1r = jnp.pad(w1r, ((0, 0), (0, CP - C3), (0, CP - 70))).astype(bf16)       # (4,128,128)
    b1f = jnp.pad(params["fc1_b"].astype(f32), (0, CP - 70)).reshape(1, CP)
    # fc2: (3, 70) -> (70, 3) -> pad to (128, 128)
    w2f = jnp.pad(params["fc2_w"].astype(f32).T, ((0, CP - 70), (0, CP - 3))).astype(bf16)
    b2f = jnp.pad(params["fc2_b"].astype(f32), (0, CP - 3)).reshape(1, CP)
    return dict(w1=w1, b1=b1, w2=w2, b2=b2, w3=w3, b3=b3,
                w1r=w1r, b1f=b1f, w2f=w2f, b2f=b2f)


def radu_g_forward(x_nchw, prep):
    B = x_nchw.shape[0]
    x = jnp.transpose(x_nchw, (0, 2, 3, 1)).astype(jnp.float32)      # NHWC (B,44,44,1)
    p1 = _conv1_quadrant_patches(x)                                  # (4, B*640, 25) bf16

    h2 = pl.pallas_call(
        conv1_conv2_kernel,
        out_shape=jax.ShapeDtypeStruct((B * 64, CP), jnp.bfloat16),
        grid=(B,),
        in_specs=[
            pl.BlockSpec((4, ROWS_PER_B, K * K), lambda b: (0, b, 0)),
            pl.BlockSpec((K * K, CP), lambda b: (0, 0)),
            pl.BlockSpec((1, CP), lambda b: (0, 0)),
            pl.BlockSpec((K * K, CP, CP), lambda b: (0, 0, 0)),
            pl.BlockSpec((1, CP), lambda b: (0, 0)),
        ],
        out_specs=pl.BlockSpec((64, CP), lambda b: (b, 0)),
        scratch_shapes=[pltpu.VMEM((4, PH_U, PH_V, CP), jnp.float32)],
        compiler_params=pltpu.CompilerParams(
            dimension_semantics=("parallel",),
            vmem_limit_bytes=32 * 1024 * 1024),
    )(p1, prep["w1"], prep["b1"], prep["w2"], prep["b2"])

    h2s = h2.reshape(B, 8, 8, CP)[..., :C2]                          # drop channel pad
    p3 = _conv3_quadrant_patches(h2s)                                # (16B, 3000) bf16

    out = pl.pallas_call(
        conv3_head_kernel,
        out_shape=jax.ShapeDtypeStruct((B, CP), jnp.float32),
        in_specs=[pl.BlockSpec(memory_space=pltpu.MemorySpace.VMEM)] * 7,
        out_specs=pl.BlockSpec(memory_space=pltpu.MemorySpace.VMEM),
        scratch_shapes=[pltpu.VMEM((4 * B, CP), jnp.float32)],
    )(p3, prep["w3"], prep["b3"], prep["w1r"], prep["b1f"], prep["w2f"], prep["b2f"])
    return out[:, :3]


# ----------------------------------------------------------------------------
# Pure-JAX reference (PyTorch forward semantics) and deterministic init
# ----------------------------------------------------------------------------
def reference_forward(x_nchw, params):
    def conv(x, w, b):
        y = jax.lax.conv_general_dilated(
            x, w, window_strides=(1, 1), padding="VALID",
            dimension_numbers=("NCHW", "OIHW", "NCHW"))
        return y + b[None, :, None, None]

    def pool(x):
        return jax.lax.reduce_window(
            x, -jnp.inf, jax.lax.max, (1, 1, 2, 2), (1, 1, 2, 2), "VALID")

    x = pool(jax.nn.relu(conv(x_nchw, params["conv1_w"], params["conv1_b"])))
    x = pool(jax.nn.relu(conv(x, params["conv2_w"], params["conv2_b"])))
    x = pool(jax.nn.relu(conv(x, params["conv3_w"], params["conv3_b"])))
    x = x.reshape(x.shape[0], -1)
    x = jax.nn.relu(x @ params["fc1_w"].T + params["fc1_b"])
    x = jax.nn.relu(x @ params["fc2_w"].T + params["fc2_b"])
    return jax.nn.softmax(x, axis=1)


def init_params(key):
    ks = jax.random.split(key, 10)

    def u(k, shape, fan_in):
        bound = 1.0 / np.sqrt(fan_in)
        return jax.random.uniform(k, shape, jnp.float32, -bound, bound)

    return {
        "conv1_w": u(ks[0], (40, 1, 5, 5), 1 * 25),
        "conv1_b": u(ks[1], (40,), 1 * 25),
        "conv2_w": u(ks[2], (120, 40, 5, 5), 40 * 25),
        "conv2_b": u(ks[3], (120,), 40 * 25),
        "conv3_w": u(ks[4], (80, 120, 5, 5), 120 * 25),
        "conv3_b": u(ks[5], (80,), 120 * 25),
        "fc1_w": u(ks[6], (70, 320), 320),
        "fc1_b": u(ks[7], (70,), 320),
        "fc2_w": u(ks[8], (3, 70), 70),
        "fc2_b": u(ks[9], (3,), 70),
    }


if __name__ == "__main__":
    key = jax.random.PRNGKey(0)
    k_x, k_p = jax.random.split(key)
    # fc1 expects 320 = 80*2*2 features -> spatial input must be 44x44.
    x = jax.random.normal(k_x, (2, 1, 44, 44), jnp.float32)
    params = init_params(k_p)
    prep = prepare_params(params)

    fwd = jax.jit(radu_g_forward)
    out = jax.block_until_ready(fwd(x, prep))
    ref = jax.block_until_ready(reference_forward(x, params))

    assert out.shape == (2, 3)
    # bf16 MXU inputs (f32 accumulation) => slightly looser tolerance than pure-f32.
    np.testing.assert_allclose(np.asarray(out), np.asarray(ref), rtol=3e-2, atol=3e-2)
    print("KERNEL_OK")
</pallas_src>

<mosaic_0001>
module attributes {stable_mosaic.version = 11 : i64} {
  func.func @conv1_conv2_kernel(%arg0: i32, %arg1: memref<4x640x25xbf16, #tpu.memory_space<vmem>>, %arg2: memref<25x128xbf16, #tpu.memory_space<vmem>>, %arg3: memref<1x128xf32, #tpu.memory_space<vmem>>, %arg4: memref<25x128x128xbf16, #tpu.memory_space<vmem>>, %arg5: memref<1x128xf32, #tpu.memory_space<vmem>>, %arg6: memref<64x128xbf16, #tpu.memory_space<vmem>>, %arg7: memref<4x10x16x128xf32, #tpu.memory_space<vmem>>) attributes {dimension_semantics = [#tpu.dimension_semantics<parallel>], iteration_bounds = array<i64: 2>, scalar_prefetch = 0 : i64, scratch_operands = 1 : i64, tpu.core_type = #tpu.core_type<tc>, window_params = [{transform_indices = @transform_0, window_bounds = array<i64: 4, 640, 25>}, {pipeline_mode = #tpu.pipeline_mode<synchronous>, transform_indices = @transform_1, window_bounds = array<i64: 25, 128>}, {pipeline_mode = #tpu.pipeline_mode<synchronous>, transform_indices = @transform_2, window_bounds = array<i64: 1, 128>}, {pipeline_mode = #tpu.pipeline_mode<synchronous>, transform_indices = @transform_3, window_bounds = array<i64: 25, 128, 128>}, {pipeline_mode = #tpu.pipeline_mode<synchronous>, transform_indices = @transform_4, window_bounds = array<i64: 1, 128>}, {transform_indices = @transform_5, window_bounds = array<i64: 64, 128>}]} {
    %c0 = arith.constant 0 : index
    %c0_0 = arith.constant 0 : index
    %c0_1 = arith.constant 0 : index
    %0 = vector.load %arg1[%c0, %c0_0, %c0_1] : memref<4x640x25xbf16, #tpu.memory_space<vmem>>, vector<4x640x25xbf16>
    %1 = vector.shape_cast %0 : vector<4x640x25xbf16> to vector<2560x25xbf16>
    %c0_2 = arith.constant 0 : index
    %c0_3 = arith.constant 0 : index
    %2 = vector.load %arg2[%c0_2, %c0_3] : memref<25x128xbf16, #tpu.memory_space<vmem>>, vector<25x128xbf16>
    %cst = arith.constant dense<0.000000e+00> : vector<2560x128xf32>
    %3 = tpu.matmul %1, %2, %cst {dimension_numbers = #tpu.dot_dimension_numbers<[1], [0], [0], [1], [0, 0, 1, 1], [], []>} : vector<2560x25xbf16>, vector<25x128xbf16>, vector<2560x128xf32> -> vector<2560x128xf32>
    %4 = vector.shape_cast %3 : vector<2560x128xf32> to vector<4x640x128xf32>
    %cst_4 = arith.constant dense<0xFF800000> : vector<640x128xf32>
    %5 = vector.multi_reduction <maximumf>, %4, %cst_4 [0] : vector<4x640x128xf32> to vector<640x128xf32>
    %c0_5 = arith.constant 0 : index
    %c0_6 = arith.constant 0 : index
    %6 = vector.load %arg3[%c0_5, %c0_6] : memref<1x128xf32, #tpu.memory_space<vmem>>, vector<1x128xf32>
    %7 = vector.broadcast %6 : vector<1x128xf32> to vector<640x128xf32>
    %8 = arith.addf %5, %7 : vector<640x128xf32>
    %cst_7 = arith.constant 0.000000e+00 : f32
    %9 = vector.broadcast %cst_7 : f32 to vector<640x128xf32>
    %10 = arith.maximumf %8, %9 : vector<640x128xf32>
    %11 = vector.shape_cast %10 : vector<640x128xf32> to vector<4x10x16x128xf32>
    %c0_8 = arith.constant 0 : index
    %c0_9 = arith.constant 0 : index
    %c0_10 = arith.constant 0 : index
    %c0_11 = arith.constant 0 : index
    %12 = vector.load %arg7[%c0_8, %c0_9, %c0_10, %c0_11] : memref<4x10x16x128xf32, #tpu.memory_space<vmem>>, vector<4x10x16x128xf32>
    tpu.vector_store %arg7[%c0_8, %c0_9, %c0_10, %c0_11], %11 {strides = array<i32>} : memref<4x10x16x128xf32, #tpu.memory_space<vmem>>, vector<4x10x16x128xf32>,
    %cst_12 = arith.constant 0.000000e+00 : f32
    %13 = vector.broadcast %cst_12 : f32 to vector<64x128xf32>
    %cst_13 = arith.constant 0.000000e+00 : f32
    %14 = vector.broadcast %cst_13 : f32 to vector<64x128xf32>
    %cst_14 = arith.constant 0.000000e+00 : f32
    %15 = vector.broadcast %cst_14 : f32 to vector<64x128xf32>
    %cst_15 = arith.constant 0.000000e+00 : f32
    %16 = vector.broadcast %cst_15 : f32 to vector<64x128xf32>
    %c0_16 = arith.constant 0 : index
    %c0_17 = arith.constant 0 : index
    %c0_18 = arith.constant 0 : index
    %17 = vector.load %arg4[%c0_16, %c0_17, %c0_18] : memref<25x128x128xbf16, #tpu.memory_space<vmem>>, vector<1x128x128xbf16>
    %18 = vector.shape_cast %17 : vector<1x128x128xbf16> to vector<128x128xbf16>
    %c0_19 = arith.constant 0 : index
    %c0_20 = arith.constant 0 : index
    %c0_21 = arith.constant 0 : index
    %c0_22 = arith.constant 0 : index
    %19 = vector.load %arg7[%c0_19, %c0_20, %c0_21, %c0_22] : memref<4x10x16x128xf32, #tpu.memory_space<vmem>>, vector<1x8x8x128xf32>
    %20 = vector.shape_cast %19 : vector<1x8x8x128xf32> to vector<8x8x128xf32>
    %21 = vector.shape_cast %20 : vector<8x8x128xf32> to vector<64x128xf32>
    %22 = arith.truncf %21 : vector<64x128xf32> to vector<64x128xbf16>
    %cst_23 = arith.constant dense<0.000000e+00> : vector<64x128xf32>
    %23 = tpu.matmul %22, %18, %cst_23 {dimension_numbers = #tpu.dot_dimension_numbers<[1], [0], [0], [1], [0, 0, 1, 1], [], []>} : vector<64x128xbf16>, vector<128x128xbf16>, vector<64x128xf32> -> vector<64x128xf32>
    %24 = arith.addf %13, %23 : vector<64x128xf32>
    %c1 = arith.constant 1 : index
    %c0_24 = arith.constant 0 : index
    %c0_25 = arith.constant 0 : index
    %c0_26 = arith.constant 0 : index
    %25 = vector.load %arg7[%c1, %c0_24, %c0_25, %c0_26] : memref<4x10x16x128xf32, #tpu.memory_space<vmem>>, vector<1x8x8x128xf32>
    %26 = vector.shape_cast %25 : vector<1x8x8x128xf32> to vector<8x8x128xf32>
    %27 = vector.shape_cast %26 : vector<8x8x128xf32> to vector<64x128xf32>
    %28 = arith.truncf %27 : vector<64x128xf32> to vector<64x128xbf16>
    %cst_27 = arith.constant dense<0.000000e+00> : vector<64x128xf32>
    %29 = tpu.matmul %28, %18, %cst_27 {dimension_numbers = #tpu.dot_dimension_numbers<[1], [0], [0], [1], [0, 0, 1, 1], [], []>} : vector<64x128xbf16>, vector<128x128xbf16>, vector<64x128xf32> -> vector<64x128xf32>
    %30 = arith.addf %14, %29 : vector<64x128xf32>
    %c2 = arith.constant 2 : index
    %c0_28 = arith.constant 0 : index
    %c0_29 = arith.constant 0 : index
    %c0_30 = arith.constant 0 : index
    %31 = vector.load %arg7[%c2, %c0_28, %c0_29, %c0_30] : memref<4x10x16x128xf32, #tpu.memory_space<vmem>>, vector<1x8x8x128xf32>
    %32 = vector.shape_cast %31 : vector<1x8x8x128xf32> to vector<8x8x128xf32>
    %33 = vector.shape_cast %32 : vector<8x8x128xf32> to vector<64x128xf32>
    %34 = arith.truncf %33 : vector<64x128xf32> to vector<64x128xbf16>
    %cst_31 = arith.constant dense<0.000000e+00> : vector<64x128xf32>
    %35 = tpu.matmul %34, %18, %cst_31 {dimension_numbers = #tpu.dot_dimension_numbers<[1], [0], [0], [1], [0, 0, 1, 1], [], []>} : vector<64x128xbf16>, vector<128x128xbf16>, vector<64x128xf32> -> vector<64x128xf32>
    %36 = arith.addf %15, %35 : vector<64x128xf32>
    %c3 = arith.constant 3 : index
    %c0_32 = arith.constant 0 : index
    %c0_33 = arith.constant 0 : index
    %c0_34 = arith.constant 0 : index
    %37 = vector.load %arg7[%c3, %c0_32, %c0_33, %c0_34] : memref<4x10x16x128xf32, #tpu.memory_space<vmem>>, vector<1x8x8x128xf32>
    %38 = vector.shape_cast %37 : vector<1x8x8x128xf32> to vector<8x8x128xf32>
    %39 = vector.shape_cast %38 : vector<8x8x128xf32> to vector<64x128xf32>
    %40 = arith.truncf %39 : vector<64x128xf32> to vector<64x128xbf16>
    %cst_35 = arith.constant dense<0.000000e+00> : vector<64x128xf32>
    %41 = tpu.matmul %40, %18, %cst_35 {dimension_numbers = #tpu.dot_dimension_numbers<[1], [0], [0], [1], [0, 0, 1, 1], [], []>} : vector<64x128xbf16>, vector<128x128xbf16>, vector<64x128xf32> -> vector<64x128xf32>
    %42 = arith.addf %16, %41 : vector<64x128xf32>
    %c1_36 = arith.constant 1 : index
    %c0_37 = arith.constant 0 : index
    %c0_38 = arith.constant 0 : index
    %43 = vector.load %arg4[%c1_36, %c0_37, %c0_38] : memref<25x128x128xbf16, #tpu.memory_space<vmem>>, vector<1x128x128xbf16>
    %44 = vector.shape_cast %43 : vector<1x128x128xbf16> to vector<128x128xbf16>
    %c1_39 = arith.constant 1 : index
    %c0_40 = arith.constant 0 : index
    %c0_41 = arith.constant 0 : index
    %c0_42 = arith.constant 0 : index
    %45 = vector.load %arg7[%c1_39, %c0_40, %c0_41, %c0_42] : memref<4x10x16x128xf32, #tpu.memory_space<vmem>>, vector<1x8x8x128xf32>
    %46 = vector.shape_cast %45 : vector<1x8x8x128xf32> to vector<8x8x128xf32>
    %47 = vector.shape_cast %46 : vector<8x8x128xf32> to vector<64x128xf32>
    %48 = arith.truncf %47 : vector<64x128xf32> to vector<64x128xbf16>
    %cst_43 = arith.constant dense<0.000000e+00> : vector<64x128xf32>
    %49 = tpu.matmul %48, %44, %cst_43 {dimension_numbers = #tpu.dot_dimension_numbers<[1], [0], [0], [1], [0, 0, 1, 1], [], []>} : vector<64x128xbf16>, vector<128x128xbf16>, vector<64x128xf32> -> vector<64x128xf32>
    %50 = arith.addf %24, %49 : vector<64x128xf32>
    %c0_44 = arith.constant 0 : index
    %c0_45 = arith.constant 0 : index
    %c1_46 = arith.constant 1 : index
    %c0_47 = arith.constant 0 : index
    %51 = vector.load %arg7[%c0_44, %c0_45, %c1_46, %c0_47] : memref<4x10x16x128xf32, #tpu.memory_space<vmem>>, vector<1x8x8x128xf32>
    %52 = vector.shape_cast %51 : vector<1x8x8x128xf32> to vector<8x8x128xf32>
    %53 = vector.shape_cast %52 : vector<8x8x128xf32> to vector<64x128xf32>
    %54 = arith.truncf %53 : vector<64x128xf32> to vector<64x128xbf16>
    %cst_48 = arith.constant dense<0.000000e+00> : vector<64x128xf32>
    %55 = tpu.matmul %54, %44, %cst_48 {dimension_numbers = #tpu.dot_dimension_numbers<[1], [0], [0], [1], [0, 0, 1, 1], [], []>} : vector<64x128xbf16>, vector<128x128xbf16>, vector<64x128xf32> -> vector<64x128xf32>
    %56 = arith.addf %30, %55 : vector<64x128xf32>
    %c3_49 = arith.constant 3 : index
    %c0_50 = arith.constant 0 : index
    %c0_51 = arith.constant 0 : index
    %c0_52 = arith.constant 0 : index
    %57 = vector.load %arg7[%c3_49, %c0_50, %c0_51, %c0_52] : memref<4x10x16x128xf32, #tpu.memory_space<vmem>>, vector<1x8x8x128xf32>
    %58 = vector.shape_cast %57 : vector<1x8x8x128xf32> to vector<8x8x128xf32>
    %59 = vector.shape_cast %58 : vector<8x8x128xf32> to vector<64x128xf32>
    %60 = arith.truncf %59 : vector<64x128xf32> to vector<64x128xbf16>
    %cst_53 = arith.constant dense<0.000000e+00> : vector<64x128xf32>
    %61 = tpu.matmul %60, %44, %cst_53 {dimension_numbers = #tpu.dot_dimension_numbers<[1], [0], [0], [1], [0, 0, 1, 1], [], []>} : vector<64x128xbf16>, vector<128x128xbf16>, vector<64x128xf32> -> vector<64x128xf32>
    %62 = arith.addf %36, %61 : vector<64x128xf32>
    %c2_54 = arith.constant 2 : index
    %c0_55 = arith.constant 0 : index
    %c1_56 = arith.constant 1 : index
    %c0_57 = arith.constant 0 : index
    %63 = vector.load %arg7[%c2_54, %c0_55, %c1_56, %c0_57] : memref<4x10x16x128xf32, #tpu.memory_space<vmem>>, vector<1x8x8x128xf32>
    %64 = vector.shape_cast %63 : vector<1x8x8x128xf32> to vector<8x8x128xf32>
    %65 = vector.shape_cast %64 : vector<8x8x128xf32> to vector<64x128xf32>
    %66 = arith.truncf %65 : vector<64x128xf32> to vector<64x128xbf16>
    %cst_58 = arith.constant dense<0.000000e+00> : vector<64x128xf32>
    %67 = tpu.matmul %66, %44, %cst_58 {dimension_numbers = #tpu.dot_dimension_numbers<[1], [0], [0], [1], [0, 0, 1, 1], [], []>} : vector<64x128xbf16>, vector<128x128xbf16>, vector<64x128xf32> -> vector<64x128xf32>
    %68 = arith.addf %42, %67 : vector<64x128xf32>
    %c2_59 = arith.constant 2 : index
    %c0_60 = arith.constant 0 : index
    %c0_61 = arith.constant 0 : index
    %69 = vector.load %arg4[%c2_59, %c0_60, %c0_61] : memref<25x128x128xbf16, #tpu.memory_space<vmem>>, vector<1x128x128xbf16>
    %70 = vector.shape_cast %69 : vector<1x128x128xbf16> to vector<128x128xbf16>
    %c0_62 = arith.constant 0 : index
    %c0_63 = arith.constant 0 : index
    %c1_64 = arith.constant 1 : index
    %c0_65 = arith.constant 0 : index
    %71 = vector.load %arg7[%c0_62, %c0_63, %c1_64, %c0_65] : memref<4x10x16x128xf32, #tpu.memory_space<vmem>>, vector<1x8x8x128xf32>
    %72 = vector.shape_cast %71 : vector<1x8x8x128xf32> to vector<8x8x128xf32>
    %73 = vector.shape_cast %72 : vector<8x8x128xf32> to vector<64x128xf32>
    %74 = arith.truncf %73 : vector<64x128xf32> to vector<64x128xbf16>
    %cst_66 = arith.constant dense<0.000000e+00> : vector<64x128xf32>
    %75 = tpu.matmul %74, %70, %cst_66 {dimension_numbers = #tpu.dot_dimension_numbers<[1], [0], [0], [1], [0, 0, 1, 1], [], []>} : vector<64x128xbf16>, vector<128x128xbf16>, vector<64x128xf32> -> vector<64x128xf32>
    %76 = arith.addf %50, %75 : vector<64x128xf32>
    %c1_67 = arith.constant 1 : index
    %c0_68 = arith.constant 0 : index
    %c1_69 = arith.constant 1 : index
    %c0_70 = arith.constant 0 : index
    %77 = vector.load %arg7[%c1_67, %c0_68, %c1_69, %c0_70] : memref<4x10x16x128xf32, #tpu.memory_space<vmem>>, vector<1x8x8x128xf32>
    %78 = vector.shape_cast %77 : vector<1x8x8x128xf32> to vector<8x8x128xf32>
    %79 = vector.shape_cast %78 : vector<8x8x128xf32> to vector<64x128xf32>
    %80 = arith.truncf %79 : vector<64x128xf32> to vector<64x128xbf16>
    %cst_71 = arith.constant dense<0.000000e+00> : vector<64x128xf32>
    %81 = tpu.matmul %80, %70, %cst_71 {dimension_numbers = #tpu.dot_dimension_numbers<[1], [0], [0], [1], [0, 0, 1, 1], [], []>} : vector<64x128xbf16>, vector<128x128xbf16>, vector<64x128xf32> -> vector<64x128xf32>
    %82 = arith.addf %56, %81 : vector<64x128xf32>
    %c2_72 = arith.constant 2 : index
    %c0_73 = arith.constant 0 : index
    %c1_74 = arith.constant 1 : index
    %c0_75 = arith.constant 0 : index
    %83 = vector.load %arg7[%c2_72, %c0_73, %c1_74, %c0_75] : memref<4x10x16x128xf32, #tpu.memory_space<vmem>>, vector<1x8x8x128xf32>
    %84 = vector.shape_cast %83 : vector<1x8x8x128xf32> to vector<8x8x128xf32>
    %85 = vector.shape_cast %84 : vector<8x8x128xf32> to vector<64x128xf32>
    %86 = arith.truncf %85 : vector<64x128xf32> to vector<64x128xbf16>
    %cst_76 = arith.constant dense<0.000000e+00> : vector<64x128xf32>
    %87 = tpu.matmul %86, %70, %cst_76 {dimension_numbers = #tpu.dot_dimension_numbers<[1], [0], [0], [1], [0, 0, 1, 1], [], []>} : vector<64x128xbf16>, vector<128x128xbf16>, vector<64x128xf32> -> vector<64x128xf32>
    %88 = arith.addf %62, %87 : vector<64x128xf32>
    %c3_77 = arith.constant 3 : index
    %c0_78 = arith.constant 0 : index
    %c1_79 = arith.constant 1 : index
    %c0_80 = arith.constant 0 : index
    %89 = vector.load %arg7[%c3_77, %c0_78, %c1_79, %c0_80] : memref<4x10x16x128xf32, #tpu.memory_space<vmem>>, vector<1x8x8x128xf32>
    %90 = vector.shape_cast %89 : vector<1x8x8x128xf32> to vector<8x8x128xf32>
    %91 = vector.shape_cast %90 : vector<8x8x128xf32> to vector<64x128xf32>
    %92 = arith.truncf %91 : vector<64x128xf32> to vector<64x128xbf16>
    %cst_81 = arith.constant dense<0.000000e+00> : vector<64x128xf32>
    %93 = tpu.matmul %92, %70, %cst_81 {dimension_numbers = #tpu.dot_dimension_numbers<[1], [0], [0], [1], [0, 0, 1, 1], [], []>} : vector<64x128xbf16>, vector<128x128xbf16>, vector<64x128xf32> -> vector<64x128xf32>
    %94 = arith.addf %68, %93 : vector<64x128xf32>
    %c3_82 = arith.constant 3 : index
    %c0_83 = arith.constant 0 : index
    %c0_84 = arith.constant 0 : index
    %95 = vector.load %arg4[%c3_82, %c0_83, %c0_84] : memref<25x128x128xbf16, #tpu.memory_space<vmem>>, vector<1x128x128xbf16>
    %96 = vector.shape_cast %95 : vector<1x128x128xbf16> to vector<128x128xbf16>
    %c1_85 = arith.constant 1 : index
    %c0_86 = arith.constant 0 : index
    %c1_87 = arith.constant 1 : index
    %c0_88 = arith.constant 0 : index
    %97 = vector.load %arg7[%c1_85, %c0_86, %c1_87, %c0_88] : memref<4x10x16x128xf32, #tpu.memory_space<vmem>>, vector<1x8x8x128xf32>
    %98 = vector.shape_cast %97 : vector<1x8x8x128xf32> to vector<8x8x128xf32>
    %99 = vector.shape_cast %98 : vector<8x8x128xf32> to vector<64x128xf32>
    %100 = arith.truncf %99 : vector<64x128xf32> to vector<64x128xbf16>
    %cst_89 = arith.constant dense<0.000000e+00> : vector<64x128xf32>
    %101 = tpu.matmul %100, %96, %cst_89 {dimension_numbers = #tpu.dot_dimension_numbers<[1], [0], [0], [1], [0, 0, 1, 1], [], []>} : vector<64x128xbf16>, vector<128x128xbf16>, vector<64x128xf32> -> vector<64x128xf32>
    %102 = arith.addf %76, %101 : vector<64x128xf32>
    %c0_90 = arith.constant 0 : index
    %c0_91 = arith.constant 0 : index
    %c2_92 = arith.constant 2 : index
    %c0_93 = arith.constant 0 : index
    %103 = vector.load %arg7[%c0_90, %c0_91, %c2_92, %c0_93] : memref<4x10x16x128xf32, #tpu.memory_space<vmem>>, vector<1x8x8x128xf32>
    %104 = vector.shape_cast %103 : vector<1x8x8x128xf32> to vector<8x8x128xf32>
    %105 = vector.shape_cast %104 : vector<8x8x128xf32> to vector<64x128xf32>
    %106 = arith.truncf %105 : vector<64x128xf32> to vector<64x128xbf16>
    %cst_94 = arith.constant dense<0.000000e+00> : vector<64x128xf32>
    %107 = tpu.matmul %106, %96, %cst_94 {dimension_numbers = #tpu.dot_dimension_numbers<[1], [0], [0], [1], [0, 0, 1, 1], [], []>} : vector<64x128xbf16>, vector<128x128xbf16>, vector<64x128xf32> -> vector<64x128xf32>
    %108 = arith.addf %82, %107 : vector<64x128xf32>
    %c3_95 = arith.constant 3 : index
    %c0_96 = arith.constant 0 : index
    %c1_97 = arith.constant 1 : index
    %c0_98 = arith.constant 0 : index
    %109 = vector.load %arg7[%c3_95, %c0_96, %c1_97, %c0_98] : memref<4x10x16x128xf32, #tpu.memory_space<vmem>>, vector<1x8x8x128xf32>
    %110 = vector.shape_cast %109 : vector<1x8x8x128xf32> to vector<8x8x128xf32>
    %111 = vector.shape_cast %110 : vector<8x8x128xf32> to vector<64x128xf32>
    %112 = arith.truncf %111 : vector<64x128xf32> to vector<64x128xbf16>
    %cst_99 = arith.constant dense<0.000000e+00> : vector<64x128xf32>
    %113 = tpu.matmul %112, %96, %cst_99 {dimension_numbers = #tpu.dot_dimension_numbers<[1], [0], [0], [1], [0, 0, 1, 1], [], []>} : vector<64x128xbf16>, vector<128x128xbf16>, vector<64x128xf32> -> vector<64x128xf32>
    %114 = arith.addf %88, %113 : vector<64x128xf32>
    %c2_100 = arith.constant 2 : index
    %c0_101 = arith.constant 0 : index
    %c2_102 = arith.constant 2 : index
    %c0_103 = arith.constant 0 : index
    %115 = vector.load %arg7[%c2_100, %c0_101, %c2_102, %c0_103] : memref<4x10x16x128xf32, #tpu.memory_space<vmem>>, vector<1x8x8x128xf32>
    %116 = vector.shape_cast %115 : vector<1x8x8x128xf32> to vector<8x8x128xf32>
    %117 = vector.shape_cast %116 : vector<8x8x128xf32> to vector<64x128xf32>
    %118 = arith.truncf %117 : vector<64x128xf32> to vector<64x128xbf16>
    %cst_104 = arith.constant dense<0.000000e+00> : vector<64x128xf32>
    %119 = tpu.matmul %118, %96, %cst_104 {dimension_numbers = #tpu.dot_dimension_numbers<[1], [0], [0], [1], [0, 0, 1, 1], [], []>} : vector<64x128xbf16>, vector<128x128xbf16>, vector<64x128xf32> -> vector<64x128xf32>
    %120 = arith.addf %94, %119 : vector<64x128xf32>
    %c4 = arith.constant 4 : index
    %c0_105 = arith.constant 0 : index
    %c0_106 = arith.constant 0 : index
    %121 = vector.load %arg4[%c4, %c0_105, %c0_106] : memref<25x128x128xbf16, #tpu.memory_space<vmem>>, vector<1x128x128xbf16>
    %122 = vector.shape_cast %121 : vector<1x128x128xbf16> to vector<128x128xbf16>
    %c0_107 = arith.constant 0 : index
    %c0_108 = arith.constant 0 : index
    %c2_109 = arith.constant 2 : index
    %c0_110 = arith.constant 0 : index
    %123 = vector.load %arg7[%c0_107, %c0_108, %c2_109, %c0_110] : memref<4x10x16x128xf32, #tpu.memory_space<vmem>>, vector<1x8x8x128xf32>
    %124 = vector.shape_cast %123 : vector<1x8x8x128xf32> to vector<8x8x128xf32>
    %125 = vector.shape_cast %124 : vector<8x8x128xf32> to vector<64x128xf32>
    %126 = arith.truncf %125 : vector<64x128xf32> to vector<64x128xbf16>
    %cst_111 = arith.constant dense<0.000000e+00> : vector<64x128xf32>
    %127 = tpu.matmul %126, %122, %cst_111 {dimension_numbers = #tpu.dot_dimension_numbers<[1], [0], [0], [1], [0, 0, 1, 1], [], []>} : vector<64x128xbf16>, vector<128x128xbf16>, vector<64x128xf32> -> vector<64x128xf32>
    %128 = arith.addf %102, %127 : vector<64x128xf32>
    %c1_112 = arith.constant 1 : index
    %c0_113 = arith.constant 0 : index
    %c2_114 = arith.constant 2 : index
    %c0_115 = arith.constant 0 : index
    %129 = vector.load %arg7[%c1_112, %c0_113, %c2_114, %c0_115] : memref<4x10x16x128xf32, #tpu.memory_space<vmem>>, vector<1x8x8x128xf32>
    %130 = vector.shape_cast %129 : vector<1x8x8x128xf32> to vector<8x8x128xf32>
    %131 = vector.shape_cast %130 : vector<8x8x128xf32> to vector<64x128xf32>
    %132 = arith.truncf %131 : vector<64x128xf32> to vector<64x128xbf16>
    %cst_116 = arith.constant dense<0.000000e+00> : vector<64x128xf32>
    %133 = tpu.matmul %132, %122, %cst_116 {dimension_numbers = #tpu.dot_dimension_numbers<[1], [0], [0], [1], [0, 0, 1, 1], [], []>} : vector<64x128xbf16>, vector<128x128xbf16>, vector<64x128xf32> -> vector<64x128xf32>
    %134 = arith.addf %108, %133 : vector<64x128xf32>
    %c2_117 = arith.constant 2 : index
    %c0_118 = arith.constant 0 : index
    %c2_119 = arith.constant 2 : index
    %c0_120 = arith.constant 0 : index
    %135 = vector.load %arg7[%c2_117, %c0_118, %c2_119, %c0_120] : memref<4x10x16x128xf32, #tpu.memory_space<vmem>>, vector<1x8x8x128xf32>
    %136 = vector.shape_cast %135 : vector<1x8x8x128xf32> to vector<8x8x128xf32>
    %137 = vector.shape_cast %136 : vector<8x8x128xf32> to vector<64x128xf32>
    %138 = arith.truncf %137 : vector<64x128xf32> to vector<64x128xbf16>
    %cst_121 = arith.constant dense<0.000000e+00> : vector<64x128xf32>
    %139 = tpu.matmul %138, %122, %cst_121 {dimension_numbers = #tpu.dot_dimension_numbers<[1], [0], [0], [1], [0, 0, 1, 1], [], []>} : vector<64x128xbf16>, vector<128x128xbf16>, vector<64x128xf32> -> vector<64x128xf32>
    %140 = arith.addf %114, %139 : vector<64x128xf32>
    %c3_122 = arith.constant 3 : index
    %c0_123 = arith.constant 0 : index
    %c2_124 = arith.constant 2 : index
    %c0_125 = arith.constant 0 : index
    %141 = vector.load %arg7[%c3_122, %c0_123, %c2_124, %c0_125] : memref<4x10x16x128xf32, #tpu.memory_space<vmem>>, vector<1x8x8x128xf32>
    %142 = vector.shape_cast %141 : vector<1x8x8x128xf32> to vector<8x8x128xf32>
    %143 = vector.shape_cast %142 : vector<8x8x128xf32> to vector<64x128xf32>
    %144 = arith.truncf %143 : vector<64x128xf32> to vector<64x128xbf16>
    %cst_126 = arith.constant dense<0.000000e+00> : vector<64x128xf32>
    %145 = tpu.matmul %144, %122, %cst_126 {dimension_numbers = #tpu.dot_dimension_numbers<[1], [0], [0], [1], [0, 0, 1, 1], [], []>} : vector<64x128xbf16>, vector<128x128xbf16>, vector<64x128xf32> -> vector<64x128xf32>
    %146 = arith.addf %120, %145 : vector<64x128xf32>
    %c5 = arith.constant 5 : index
    %c0_127 = arith.constant 0 : index
    %c0_128 = arith.constant 0 : index
    %147 = vector.load %arg4[%c5, %c0_127, %c0_128] : memref<25x128x128xbf16, #tpu.memory_space<vmem>>, vector<1x128x128xbf16>
    %148 = vector.shape_cast %147 : vector<1x128x128xbf16> to vector<128x128xbf16>
    %c2_129 = arith.constant 2 : index
    %c0_130 = arith.constant 0 : index
    %c0_131 = arith.constant 0 : index
    %c0_132 = arith.constant 0 : index
    %149 = vector.load %arg7[%c2_129, %c0_130, %c0_131, %c0_132] : memref<4x10x16x128xf32, #tpu.memory_space<vmem>>, vector<1x8x8x128xf32>
    %150 = vector.shape_cast %149 : vector<1x8x8x128xf32> to vector<8x8x128xf32>
    %151 = vector.shape_cast %150 : vector<8x8x128xf32> to vector<64x128xf32>
    %152 = arith.truncf %151 : vector<64x128xf32> to vector<64x128xbf16>
    %cst_133 = arith.constant dense<0.000000e+00> : vector<64x128xf32>
    %153 = tpu.matmul %152, %148, %cst_133 {dimension_numbers = #tpu.dot_dimension_numbers<[1], [0], [0], [1], [0, 0, 1, 1], [], []>} : vector<64x128xbf16>, vector<128x128xbf16>, vector<64x128xf32> -> vector<64x128xf32>
    %154 = arith.addf %128, %153 : vector<64x128xf32>
    %c3_134 = arith.constant 3 : index
    %c0_135 = arith.constant 0 : index
    %c0_136 = arith.constant 0 : index
    %c0_137 = arith.constant 0 : index
    %155 = vector.load %arg7[%c3_134, %c0_135, %c0_136, %c0_137] : memref<4x10x16x128xf32, #tpu.memory_space<vmem>>, vector<1x8x8x128xf32>
    %156 = vector.shape_cast %155 : vector<1x8x8x128xf32> to vector<8x8x128xf32>
    %157 = vector.shape_cast %156 : vector<8x8x128xf32> to vector<64x128xf32>
    %158 = arith.truncf %157 : vector<64x128xf32> to vector<64x128xbf16>
    %cst_138 = arith.constant dense<0.000000e+00> : vector<64x128xf32>
    %159 = tpu.matmul %158, %148, %cst_138 {dimension_numbers = #tpu.dot_dimension_numbers<[1], [0], [0], [1], [0, 0, 1, 1], [], []>} : vector<64x128xbf16>, vector<128x128xbf16>, vector<64x128xf32> -> vector<64x128xf32>
    %160 = arith.addf %134, %159 : vector<64x128xf32>
    %c0_139 = arith.constant 0 : index
    %c1_140 = arith.constant 1 : index
    %c0_141 = arith.constant 0 : index
    %c0_142 = arith.constant 0 : index
    %161 = vector.load %arg7[%c0_139, %c1_140, %c0_141, %c0_142] : memref<4x10x16x128xf32, #tpu.memory_space<vmem>>, vector<1x8x8x128xf32>
    %162 = vector.shape_cast %161 : vector<1x8x8x128xf32> to vector<8x8x128xf32>
    %163 = vector.shape_cast %162 : vector<8x8x128xf32> to vector<64x128xf32>
    %164 = arith.truncf %163 : vector<64x128xf32> to vector<64x128xbf16>
    %cst_143 = arith.constant dense<0.000000e+00> : vector<64x128xf32>
    %165 = tpu.matmul %164, %148, %cst_143 {dimension_numbers = #tpu.dot_dimension_numbers<[1], [0], [0], [1], [0, 0, 1, 1], [], []>} : vector<64x128xbf16>, vector<128x128xbf16>, vector<64x128xf32> -> vector<64x128xf32>
    %166 = arith.addf %140, %165 : vector<64x128xf32>
    %c1_144 = arith.constant 1 : index
    %c1_145 = arith.constant 1 : index
    %c0_146 = arith.constant 0 : index
    %c0_147 = arith.constant 0 : index
    %167 = vector.load %arg7[%c1_144, %c1_145, %c0_146, %c0_147] : memref<4x10x16x128xf32, #tpu.memory_space<vmem>>, vector<1x8x8x128xf32>
    %168 = vector.shape_cast %167 : vector<1x8x8x128xf32> to vector<8x8x128xf32>
    %169 = vector.shape_cast %168 : vector<8x8x128xf32> to vector<64x128xf32>
    %170 = arith.truncf %169 : vector<64x128xf32> to vector<64x128xbf16>
    %cst_148 = arith.constant dense<0.000000e+00> : vector<64x128xf32>
    %171 = tpu.matmul %170, %148, %cst_148 {dimension_numbers = #tpu.dot_dimension_numbers<[1], [0], [0], [1], [0, 0, 1, 1], [], []>} : vector<64x128xbf16>, vector<128x128xbf16>, vector<64x128xf32> -> vector<64x128xf32>
    %172 = arith.addf %146, %171 : vector<64x128xf32>
    %c6 = arith.constant 6 : index
    %c0_149 = arith.constant 0 : index
    %c0_150 = arith.constant 0 : index
    %173 = vector.load %arg4[%c6, %c0_149, %c0_150] : memref<25x128x128xbf16, #tpu.memory_space<vmem>>, vector<1x128x128xbf16>
    %174 = vector.shape_cast %173 : vector<1x128x128xbf16> to vector<128x128xbf16>
    %c3_151 = arith.constant 3 : index
    %c0_152 = arith.constant 0 : index
    %c0_153 = arith.constant 0 : index
    %c0_154 = arith.constant 0 : index
    %175 = vector.load %arg7[%c3_151, %c0_152, %c0_153, %c0_154] : memref<4x10x16x128xf32, #tpu.memory_space<vmem>>, vector<1x8x8x128xf32>
    %176 = vector.shape_cast %175 : vector<1x8x8x128xf32> to vector<8x8x128xf32>
    %177 = vector.shape_cast %176 : vector<8x8x128xf32> to vector<64x128xf32>
    %178 = arith.truncf %177 : vector<64x128xf32> to vector<64x128xbf16>
    %cst_155 = arith.constant dense<0.000000e+00> : vector<64x128xf32>
    %179 = tpu.matmul %178, %174, %cst_155 {dimension_numbers = #tpu.dot_dimension_numbers<[1], [0], [0], [1], [0, 0, 1, 1], [], []>} : vector<64x128xbf16>, vector<128x128xbf16>, vector<64x128xf32> -> vector<64x128xf32>
    %180 = arith.addf %154, %179 : vector<64x128xf32>
    %c2_156 = arith.constant 2 : index
    %c0_157 = arith.constant 0 : index
    %c1_158 = arith.constant 1 : index
    %c0_159 = arith.constant 0 : index
    %181 = vector.load %arg7[%c2_156, %c0_157, %c1_158, %c0_159] : memref<4x10x16x128xf32, #tpu.memory_space<vmem>>, vector<1x8x8x128xf32>
    %182 = vector.shape_cast %181 : vector<1x8x8x128xf32> to vector<8x8x128xf32>
    %183 = vector.shape_cast %182 : vector<8x8x128xf32> to vector<64x128xf32>
    %184 = arith.truncf %183 : vector<64x128xf32> to vector<64x128xbf16>
    %cst_160 = arith.constant dense<0.000000e+00> : vector<64x128xf32>
    %185 = tpu.matmul %184, %174, %cst_160 {dimension_numbers = #tpu.dot_dimension_numbers<[1], [0], [0], [1], [0, 0, 1, 1], [], []>} : vector<64x128xbf16>, vector<128x128xbf16>, vector<64x128xf32> -> vector<64x128xf32>
    %186 = arith.addf %160, %185 : vector<64x128xf32>
    %c1_161 = arith.constant 1 : index
    %c1_162 = arith.constant 1 : index
    %c0_163 = arith.constant 0 : index
    %c0_164 = arith.constant 0 : index
    %187 = vector.load %arg7[%c1_161, %c1_162, %c0_163, %c0_164] : memref<4x10x16x128xf32, #tpu.memory_space<vmem>>, vector<1x8x8x128xf32>
    %188 = vector.shape_cast %187 : vector<1x8x8x128xf32> to vector<8x8x128xf32>
    %189 = vector.shape_cast %188 : vector<8x8x128xf32> to vector<64x128xf32>
    %190 = arith.truncf %189 : vector<64x128xf32> to vector<64x128xbf16>
    %cst_165 = arith.constant dense<0.000000e+00> : vector<64x128xf32>
    %191 = tpu.matmul %190, %174, %cst_165 {dimension_numbers = #tpu.dot_dimension_numbers<[1], [0], [0], [1], [0, 0, 1, 1], [], []>} : vector<64x128xbf16>, vector<128x128xbf16>, vector<64x128xf32> -> vector<64x128xf32>
    %192 = arith.addf %166, %191 : vector<64x128xf32>
    %c0_166 = arith.constant 0 : index
    %c1_167 = arith.constant 1 : index
    %c1_168 = arith.constant 1 : index
    %c0_169 = arith.constant 0 : index
    %193 = vector.load %arg7[%c0_166, %c1_167, %c1_168, %c0_169] : memref<4x10x16x128xf32, #tpu.memory_space<vmem>>, vector<1x8x8x128xf32>
    %194 = vector.shape_cast %193 : vector<1x8x8x128xf32> to vector<8x8x128xf32>
    %195 = vector.shape_cast %194 : vector<8x8x128xf32> to vector<64x128xf32>
    %196 = arith.truncf %195 : vector<64x128xf32> to vector<64x128xbf16>
    %cst_170 = arith.constant dense<0.000000e+00> : vector<64x128xf32>
    %197 = tpu.matmul %196, %174, %cst_170 {dimension_numbers = #tpu.dot_dimension_numbers<[1], [0], [0], [1], [0, 0, 1, 1], [], []>} : vector<64x128xbf16>, vector<128x128xbf16>, vector<64x128xf32> -> vector<64x128xf32>
    %198 = arith.addf %172, %197 : vector<64x128xf32>
    %c7 = arith.constant 7 : index
    %c0_171 = arith.constant 0 : index
    %c0_172 = arith.constant 0 : index
    %199 = vector.load %arg4[%c7, %c0_171, %c0_172] : memref<25x128x128xbf16, #tpu.memory_space<vmem>>, vector<1x128x128xbf16>
    %200 = vector.shape_cast %199 : vector<1x128x128xbf16> to vector<128x128xbf16>
    %c2_173 = arith.constant 2 : index
    %c0_174 = arith.constant 0 : index
    %c1_175 = arith.constant 1 : index
    %c0_176 = arith.constant 0 : index
    %201 = vector.load %arg7[%c2_173, %c0_174, %c1_175, %c0_176] : memref<4x10x16x128xf32, #tpu.memory_space<vmem>>, vector<1x8x8x128xf32>
    %202 = vector.shape_cast %201 : vector<1x8x8x128xf32> to vector<8x8x128xf32>
    %203 = vector.shape_cast %202 : vector<8x8x128xf32> to vector<64x128xf32>
    %204 = arith.truncf %203 : vector<64x128xf32> to vector<64x128xbf16>
    %cst_177 = arith.constant dense<0.000000e+00> : vector<64x128xf32>
    %205 = tpu.matmul %204, %200, %cst_177 {dimension_numbers = #tpu.dot_dimension_numbers<[1], [0], [0], [1], [0, 0, 1, 1], [], []>} : vector<64x128xbf16>, vector<128x128xbf16>, vector<64x128xf32> -> vector<64x128xf32>
    %206 = arith.addf %180, %205 : vector<64x128xf32>
    %c3_178 = arith.constant 3 : index
    %c0_179 = arith.constant 0 : index
    %c1_180 = arith.constant 1 : index
    %c0_181 = arith.constant 0 : index
    %207 = vector.load %arg7[%c3_178, %c0_179, %c1_180, %c0_181] : memref<4x10x16x128xf32, #tpu.memory_space<vmem>>, vector<1x8x8x128xf32>
    %208 = vector.shape_cast %207 : vector<1x8x8x128xf32> to vector<8x8x128xf32>
    %209 = vector.shape_cast %208 : vector<8x8x128xf32> to vector<64x128xf32>
    %210 = arith.truncf %209 : vector<64x128xf32> to vector<64x128xbf16>
    %cst_182 = arith.constant dense<0.000000e+00> : vector<64x128xf32>
    %211 = tpu.matmul %210, %200, %cst_182 {dimension_numbers = #tpu.dot_dimension_numbers<[1], [0], [0], [1], [0, 0, 1, 1], [], []>} : vector<64x128xbf16>, vector<128x128xbf16>, vector<64x128xf32> -> vector<64x128xf32>
    %212 = arith.addf %186, %211 : vector<64x128xf32>
    %c0_183 = arith.constant 0 : index
    %c1_184 = arith.constant 1 : index
    %c1_185 = arith.constant 1 : index
    %c0_186 = arith.constant 0 : index
    %213 = vector.load %arg7[%c0_183, %c1_184, %c1_185, %c0_186] : memref<4x10x16x128xf32, #tpu.memory_space<vmem>>, vector<1x8x8x128xf32>
    %214 = vector.shape_cast %213 : vector<1x8x8x128xf32> to vector<8x8x128xf32>
    %215 = vector.shape_cast %214 : vector<8x8x128xf32> to vector<64x128xf32>
    %216 = arith.truncf %215 : vector<64x128xf32> to vector<64x128xbf16>
    %cst_187 = arith.constant dense<0.000000e+00> : vector<64x128xf32>
    %217 = tpu.matmul %216, %200, %cst_187 {dimension_numbers = #tpu.dot_dimension_numbers<[1], [0], [0], [1], [0, 0, 1, 1], [], []>} : vector<64x128xbf16>, vector<128x128xbf16>, vector<64x128xf32> -> vector<64x128xf32>
    %218 = arith.addf %192, %217 : vector<64x128xf32>
    %c1_188 = arith.constant 1 : index
    %c1_189 = arith.constant 1 : index
    %c1_190 = arith.constant 1 : index
    %c0_191 = arith.constant 0 : index
    %219 = vector.load %arg7[%c1_188, %c1_189, %c1_190, %c0_191] : memref<4x10x16x128xf32, #tpu.memory_space<vmem>>, vector<1x8x8x128xf32>
    %220 = vector.shape_cast %219 : vector<1x8x8x128xf32> to vector<8x8x128xf32>
    %221 = vector.shape_cast %220 : vector<8x8x128xf32> to vector<64x128xf32>
    %222 = arith.truncf %221 : vector<64x128xf32> to vector<64x128xbf16>
    %cst_192 = arith.constant dense<0.000000e+00> : vector<64x128xf32>
    %223 = tpu.matmul %222, %200, %cst_192 {dimension_numbers = #tpu.dot_dimension_numbers<[1], [0], [0], [1], [0, 0, 1, 1], [], []>} : vector<64x128xbf16>, vector<128x128xbf16>, vector<64x128xf32> -> vector<64x128xf32>
    %224 = arith.addf %198, %223 : vector<64x128xf32>
    %c8 = arith.constant 8 : index
    %c0_193 = arith.constant 0 : index
    %c0_194 = arith.constant 0 : index
    %225 = vector.load %arg4[%c8, %c0_193, %c0_194] : memref<25x128x128xbf16, #tpu.memory_space<vmem>>, vector<1x128x128xbf16>
    %226 = vector.shape_cast %225 : vector<1x128x128xbf16> to vector<128x128xbf16>
    %c3_195 = arith.constant 3 : index
    %c0_196 = arith.constant 0 : index
    %c1_197 = arith.constant 1 : index
    %c0_198 = arith.constant 0 : index
    %227 = vector.load %arg7[%c3_195, %c0_196, %c1_197, %c0_198] : memref<4x10x16x128xf32, #tpu.memory_space<vmem>>, vector<1x8x8x128xf32>
    %228 = vector.shape_cast %227 : vector<1x8x8x128xf32> to vector<8x8x128xf32>
    %229 = vector.shape_cast %228 : vector<8x8x128xf32> to vector<64x128xf32>
    %230 = arith.truncf %229 : vector<64x128xf32> to vector<64x128xbf16>
    %cst_199 = arith.constant dense<0.000000e+00> : vector<64x128xf32>
    %231 = tpu.matmul %230, %226, %cst_199 {dimension_numbers = #tpu.dot_dimension_numbers<[1], [0], [0], [1], [0, 0, 1, 1], [], []>} : vector<64x128xbf16>, vector<128x128xbf16>, vector<64x128xf32> -> vector<64x128xf32>
    %232 = arith.addf %206, %231 : vector<64x128xf32>
    %c2_200 = arith.constant 2 : index
    %c0_201 = arith.constant 0 : index
    %c2_202 = arith.constant 2 : index
    %c0_203 = arith.constant 0 : index
    %233 = vector.load %arg7[%c2_200, %c0_201, %c2_202, %c0_203] : memref<4x10x16x128xf32, #tpu.memory_space<vmem>>, vector<1x8x8x128xf32>
    %234 = vector.shape_cast %233 : vector<1x8x8x128xf32> to vector<8x8x128xf32>
    %235 = vector.shape_cast %234 : vector<8x8x128xf32> to vector<64x128xf32>
    %236 = arith.truncf %235 : vector<64x128xf32> to vector<64x128xbf16>
    %cst_204 = arith.constant dense<0.000000e+00> : vector<64x128xf32>
    %237 = tpu.matmul %236, %226, %cst_204 {dimension_numbers = #tpu.dot_dimension_numbers<[1], [0], [0], [1], [0, 0, 1, 1], [], []>} : vector<64x128xbf16>, vector<128x128xbf16>, vector<64x128xf32> -> vector<64x128xf32>
    %238 = arith.addf %212, %237 : vector<64x128xf32>
    %c1_205 = arith.constant 1 : index
    %c1_206 = arith.constant 1 : index
    %c1_207 = arith.constant 1 : index
    %c0_208 = arith.constant 0 : index
    %239 = vector.load %arg7[%c1_205, %c1_206, %c1_207, %c0_208] : memref<4x10x16x128xf32, #tpu.memory_space<vmem>>, vector<1x8x8x128xf32>
    %240 = vector.shape_cast %239 : vector<1x8x8x128xf32> to vector<8x8x128xf32>
    %241 = vector.shape_cast %240 : vector<8x8x128xf32> to vector<64x128xf32>
    %242 = arith.truncf %241 : vector<64x128xf32> to vector<64x128xbf16>
    %cst_209 = arith.constant dense<0.000000e+00> : vector<64x128xf32>
    %243 = tpu.matmul %242, %226, %cst_209 {dimension_numbers = #tpu.dot_dimension_numbers<[1], [0], [0], [1], [0, 0, 1, 1], [], []>} : vector<64x128xbf16>, vector<128x128xbf16>, vector<64x128xf32> -> vector<64x128xf32>
    %244 = arith.addf %218, %243 : vector<64x128xf32>
    %c0_210 = arith.constant 0 : index
    %c1_211 = arith.constant 1 : index
    %c2_212 = arith.constant 2 : index
    %c0_213 = arith.constant 0 : index
    %245 = vector.load %arg7[%c0_210, %c1_211, %c2_212, %c0_213] : memref<4x10x16x128xf32, #tpu.memory_space<vmem>>, vector<1x8x8x128xf32>
    %246 = vector.shape_cast %245 : vector<1x8x8x128xf32> to vector<8x8x128xf32>
    %247 = vector.shape_cast %246 : vector<8x8x128xf32> to vector<64x128xf32>
    %248 = arith.truncf %247 : vector<64x128xf32> to vector<64x128xbf16>
    %cst_214 = arith.constant dense<0.000000e+00> : vector<64x128xf32>
    %249 = tpu.matmul %248, %226, %cst_214 {dimension_numbers = #tpu.dot_dimension_numbers<[1], [0], [0], [1], [0, 0, 1, 1], [], []>} : vector<64x128xbf16>, vector<128x128xbf16>, vector<64x128xf32> -> vector<64x128xf32>
    %250 = arith.addf %224, %249 : vector<64x128xf32>
    %c9 = arith.constant 9 : index
    %c0_215 = arith.constant 0 : index
    %c0_216 = arith.constant 0 : index
    %251 = vector.load %arg4[%c9, %c0_215, %c0_216] : memref<25x128x128xbf16, #tpu.memory_space<vmem>>, vector<1x128x128xbf16>
    %252 = vector.shape_cast %251 : vector<1x128x128xbf16> to vector<128x128xbf16>
    %c2_217 = arith.constant 2 : index
    %c0_218 = arith.constant 0 : index
    %c2_219 = arith.constant 2 : index
    %c0_220 = arith.constant 0 : index
    %253 = vector.load %arg7[%c2_217, %c0_218, %c2_219, %c0_220] : memref<4x10x16x128xf32, #tpu.memory_space<vmem>>, vector<1x8x8x128xf32>
    %254 = vector.shape_cast %253 : vector<1x8x8x128xf32> to vector<8x8x128xf32>
    %255 = vector.shape_cast %254 : vector<8x8x128xf32> to vector<64x128xf32>
    %256 = arith.truncf %255 : vector<64x128xf32> to vector<64x128xbf16>
    %cst_221 = arith.constant dense<0.000000e+00> : vector<64x128xf32>
    %257 = tpu.matmul %256, %252, %cst_221 {dimension_numbers = #tpu.dot_dimension_numbers<[1], [0], [0], [1], [0, 0, 1, 1], [], []>} : vector<64x128xbf16>, vector<128x128xbf16>, vector<64x128xf32> -> vector<64x128xf32>
    %258 = arith.addf %232, %257 : vector<64x128xf32>
    %c3_222 = arith.constant 3 : index
    %c0_223 = arith.constant 0 : index
    %c2_224 = arith.constant 2 : index
    %c0_225 = arith.constant 0 : index
    %259 = vector.load %arg7[%c3_222, %c0_223, %c2_224, %c0_225] : memref<4x10x16x128xf32, #tpu.memory_space<vmem>>, vector<1x8x8x128xf32>
    %260 = vector.shape_cast %259 : vector<1x8x8x128xf32> to vector<8x8x128xf32>
    %261 = vector.shape_cast %260 : vector<8x8x128xf32> to vector<64x128xf32>
    %262 = arith.truncf %261 : vector<64x128xf32> to vector<64x128xbf16>
    %cst_226 = arith.constant dense<0.000000e+00> : vector<64x128xf32>
    %263 = tpu.matmul %262, %252, %cst_226 {dimension_numbers = #tpu.dot_dimension_numbers<[1], [0], [0], [1], [0, 0, 1, 1], [], []>} : vector<64x128xbf16>, vector<128x128xbf16>, vector<64x128xf32> -> vector<64x128xf32>
    %264 = arith.addf %238, %263 : vector<64x128xf32>
    %c0_227 = arith.constant 0 : index
    %c1_228 = arith.constant 1 : index
    %c2_229 = arith.constant 2 : index
    %c0_230 = arith.constant 0 : index
    %265 = vector.load %arg7[%c0_227, %c1_228, %c2_229, %c0_230] : memref<4x10x16x128xf32, #tpu.memory_space<vmem>>, vector<1x8x8x128xf32>
    %266 = vector.shape_cast %265 : vector<1x8x8x128xf32> to vector<8x8x128xf32>
    %267 = vector.shape_cast %266 : vector<8x8x128xf32> to vector<64x128xf32>
    %268 = arith.truncf %267 : vector<64x128xf32> to vector<64x128xbf16>
    %cst_231 = arith.constant dense<0.000000e+00> : vector<64x128xf32>
    %269 = tpu.matmul %268, %252, %cst_231 {dimension_numbers = #tpu.dot_dimension_numbers<[1], [0], [0], [1], [0, 0, 1, 1], [], []>} : vector<64x128xbf16>, vector<128x128xbf16>, vector<64x128xf32> -> vector<64x128xf32>
    %270 = arith.addf %244, %269 : vector<64x128xf32>
    %c1_232 = arith.constant 1 : index
    %c1_233 = arith.constant 1 : index
    %c2_234 = arith.constant 2 : index
    %c0_235 = arith.constant 0 : index
    %271 = vector.load %arg7[%c1_232, %c1_233, %c2_234, %c0_235] : memref<4x10x16x128xf32, #tpu.memory_space<vmem>>, vector<1x8x8x128xf32>
    %272 = vector.shape_cast %271 : vector<1x8x8x128xf32> to vector<8x8x128xf32>
    %273 = vector.shape_cast %272 : vector<8x8x128xf32> to vector<64x128xf32>
    %274 = arith.truncf %273 : vector<64x128xf32> to vector<64x128xbf16>
    %cst_236 = arith.constant dense<0.000000e+00> : vector<64x128xf32>
    %275 = tpu.matmul %274, %252, %cst_236 {dimension_numbers = #tpu.dot_dimension_numbers<[1], [0], [0], [1], [0, 0, 1, 1], [], []>} : vector<64x128xbf16>, vector<128x128xbf16>, vector<64x128xf32> -> vector<64x128xf32>
    %276 = arith.addf %250, %275 : vector<64x128xf32>
    %c10 = arith.constant 10 : index
    %c0_237 = arith.constant 0 : index
    %c0_238 = arith.constant 0 : index
    %277 = vector.load %arg4[%c10, %c0_237, %c0_238] : memref<25x128x128xbf16, #tpu.memory_space<vmem>>, vector<1x128x128xbf16>
    %278 = vector.shape_cast %277 : vector<1x128x128xbf16> to vector<128x128xbf16>
    %c0_239 = arith.constant 0 : index
    %c1_240 = arith.constant 1 : index
    %c0_241 = arith.constant 0 : index
    %c0_242 = arith.constant 0 : index
    %279 = vector.load %arg7[%c0_239, %c1_240, %c0_241, %c0_242] : memref<4x10x16x128xf32, #tpu.memory_space<vmem>>, vector<1x8x8x128xf32>
    %280 = vector.shape_cast %279 : vector<1x8x8x128xf32> to vector<8x8x128xf32>
    %281 = vector.shape_cast %280 : vector<8x8x128xf32> to vector<64x128xf32>
    %282 = arith.truncf %281 : vector<64x128xf32> to vector<64x128xbf16>
    %cst_243 = arith.constant dense<0.000000e+00> : vector<64x128xf32>
    %283 = tpu.matmul %282, %278, %cst_243 {dimension_numbers = #tpu.dot_dimension_numbers<[1], [0], [0], [1], [0, 0, 1, 1], [], []>} : vector<64x128xbf16>, vector<128x128xbf16>, vector<64x128xf32> -> vector<64x128xf32>
    %284 = arith.addf %258, %283 : vector<64x128xf32>
    %c1_244 = arith.constant 1 : index
    %c1_245 = arith.constant 1 : index
    %c0_246 = arith.constant 0 : index
    %c0_247 = arith.constant 0 : index
    %285 = vector.load %arg7[%c1_244, %c1_245, %c0_246, %c0_247] : memref<4x10x16x128xf32, #tpu.memory_space<vmem>>, vector<1x8x8x128xf32>
    %286 = vector.shape_cast %285 : vector<1x8x8x128xf32> to vector<8x8x128xf32>
    %287 = vector.shape_cast %286 : vector<8x8x128xf32> to vector<64x128xf32>
    %288 = arith.truncf %287 : vector<64x128xf32> to vector<64x128xbf16>
    %cst_248 = arith.constant dense<0.000000e+00> : vector<64x128xf32>
    %289 = tpu.matmul %288, %278, %cst_248 {dimension_numbers = #tpu.dot_dimension_numbers<[1], [0], [0], [1], [0, 0, 1, 1], [], []>} : vector<64x128xbf16>, vector<128x128xbf16>, vector<64x128xf32> -> vector<64x128xf32>
    %290 = arith.addf %264, %289 : vector<64x128xf32>
    %c2_249 = arith.constant 2 : index
    %c1_250 = arith.constant 1 : index
    %c0_251 = arith.constant 0 : index
    %c0_252 = arith.constant 0 : index
    %291 = vector.load %arg7[%c2_249, %c1_250, %c0_251, %c0_252] : memref<4x10x16x128xf32, #tpu.memory_space<vmem>>, vector<1x8x8x128xf32>
    %292 = vector.shape_cast %291 : vector<1x8x8x128xf32> to vector<8x8x128xf32>
    %293 = vector.shape_cast %292 : vector<8x8x128xf32> to vector<64x128xf32>
    %294 = arith.truncf %293 : vector<64x128xf32> to vector<64x128xbf16>
    %cst_253 = arith.constant dense<0.000000e+00> : vector<64x128xf32>
    %295 = tpu.matmul %294, %278, %cst_253 {dimension_numbers = #tpu.dot_dimension_numbers<[1], [0], [0], [1], [0, 0, 1, 1], [], []>} : vector<64x128xbf16>, vector<128x128xbf16>, vector<64x128xf32> -> vector<64x128xf32>
    %296 = arith.addf %270, %295 : vector<64x128xf32>
    %c3_254 = arith.constant 3 : index
    %c1_255 = arith.constant 1 : index
    %c0_256 = arith.constant 0 : index
    %c0_257 = arith.constant 0 : index
    %297 = vector.load %arg7[%c3_254, %c1_255, %c0_256, %c0_257] : memref<4x10x16x128xf32, #tpu.memory_space<vmem>>, vector<1x8x8x128xf32>
    %298 = vector.shape_cast %297 : vector<1x8x8x128xf32> to vector<8x8x128xf32>
    %299 = vector.shape_cast %298 : vector<8x8x128xf32> to vector<64x128xf32>
    %300 = arith.truncf %299 : vector<64x128xf32> to vector<64x128xbf16>
    %cst_258 = arith.constant dense<0.000000e+00> : vector<64x128xf32>
    %301 = tpu.matmul %300, %278, %cst_258 {dimension_numbers = #tpu.dot_dimension_numbers<[1], [0], [0], [1], [0, 0, 1, 1], [], []>} : vector<64x128xbf16>, vector<128x128xbf16>, vector<64x128xf32> -> vector<64x128xf32>
    %302 = arith.addf %276, %301 : vector<64x128xf32>
    %c11 = arith.constant 11 : index
    %c0_259 = arith.constant 0 : index
    %c0_260 = arith.constant 0 : index
    %303 = vector.load %arg4[%c11, %c0_259, %c0_260] : memref<25x128x128xbf16, #tpu.memory_space<vmem>>, vector<1x128x128xbf16>
    %304 = vector.shape_cast %303 : vector<1x128x128xbf16> to vector<128x128xbf16>
    %c1_261 = arith.constant 1 : index
    %c1_262 = arith.constant 1 : index
    %c0_263 = arith.constant 0 : index
    %c0_264 = arith.constant 0 : index
    %305 = vector.load %arg7[%c1_261, %c1_262, %c0_263, %c0_264] : memref<4x10x16x128xf32, #tpu.memory_space<vmem>>, vector<1x8x8x128xf32>
    %306 = vector.shape_cast %305 : vector<1x8x8x128xf32> to vector<8x8x128xf32>
    %307 = vector.shape_cast %306 : vector<8x8x128xf32> to vector<64x128xf32>
    %308 = arith.truncf %307 : vector<64x128xf32> to vector<64x128xbf16>
    %cst_265 = arith.constant dense<0.000000e+00> : vector<64x128xf32>
    %309 = tpu.matmul %308, %304, %cst_265 {dimension_numbers = #tpu.dot_dimension_numbers<[1], [0], [0], [1], [0, 0, 1, 1], [], []>} : vector<64x128xbf16>, vector<128x128xbf16>, vector<64x128xf32> -> vector<64x128xf32>
    %310 = arith.addf %284, %309 : vector<64x128xf32>
    %c0_266 = arith.constant 0 : index
    %c1_267 = arith.constant 1 : index
    %c1_268 = arith.constant 1 : index
    %c0_269 = arith.constant 0 : index
    %311 = vector.load %arg7[%c0_266, %c1_267, %c1_268, %c0_269] : memref<4x10x16x128xf32, #tpu.memory_space<vmem>>, vector<1x8x8x128xf32>
    %312 = vector.shape_cast %311 : vector<1x8x8x128xf32> to vector<8x8x128xf32>
    %313 = vector.shape_cast %312 : vector<8x8x128xf32> to vector<64x128xf32>
    %314 = arith.truncf %313 : vector<64x128xf32> to vector<64x128xbf16>
    %cst_270 = arith.constant dense<0.000000e+00> : vector<64x128xf32>
    %315 = tpu.matmul %314, %304, %cst_270 {dimension_numbers = #tpu.dot_dimension_numbers<[1], [0], [0], [1], [0, 0, 1, 1], [], []>} : vector<64x128xbf16>, vector<128x128xbf16>, vector<64x128xf32> -> vector<64x128xf32>
    %316 = arith.addf %290, %315 : vector<64x128xf32>
    %c3_271 = arith.constant 3 : index
    %c1_272 = arith.constant 1 : index
    %c0_273 = arith.constant 0 : index
    %c0_274 = arith.constant 0 : index
    %317 = vector.load %arg7[%c3_271, %c1_272, %c0_273, %c0_274] : memref<4x10x16x128xf32, #tpu.memory_space<vmem>>, vector<1x8x8x128xf32>
    %318 = vector.shape_cast %317 : vector<1x8x8x128xf32> to vector<8x8x128xf32>
    %319 = vector.shape_cast %318 : vector<8x8x128xf32> to vector<64x128xf32>
    %320 = arith.truncf %319 : vector<64x128xf32> to vector<64x128xbf16>
    %cst_275 = arith.constant dense<0.000000e+00> : vector<64x128xf32>
    %321 = tpu.matmul %320, %304, %cst_275 {dimension_numbers = #tpu.dot_dimension_numbers<[1], [0], [0], [1], [0, 0, 1, 1], [], []>} : vector<64x128xbf16>, vector<128x128xbf16>, vector<64x128xf32> -> vector<64x128xf32>
    %322 = arith.addf %296, %321 : vector<64x128xf32>
    %c2_276 = arith.constant 2 : index
    %c1_277 = arith.constant 1 : index
    %c1_278 = arith.constant 1 : index
    %c0_279 = arith.constant 0 : index
    %323 = vector.load %arg7[%c2_276, %c1_277, %c1_278, %c0_279] : memref<4x10x16x128xf32, #tpu.memory_space<vmem>>, vector<1x8x8x128xf32>
    %324 = vector.shape_cast %323 : vector<1x8x8x128xf32> to vector<8x8x128xf32>
    %325 = vector.shape_cast %324 : vector<8x8x128xf32> to vector<64x128xf32>
    %326 = arith.truncf %325 : vector<64x128xf32> to vector<64x128xbf16>
    %cst_280 = arith.constant dense<0.000000e+00> : vector<64x128xf32>
    %327 = tpu.matmul %326, %304, %cst_280 {dimension_numbers = #tpu.dot_dimension_numbers<[1], [0], [0], [1], [0, 0, 1, 1], [], []>} : vector<64x128xbf16>, vector<128x128xbf16>, vector<64x128xf32> -> vector<64x128xf32>
    %328 = arith.addf %302, %327 : vector<64x128xf32>
    %c12 = arith.constant 12 : index
    %c0_281 = arith.constant 0 : index
    %c0_282 = arith.constant 0 : index
    %329 = vector.load %arg4[%c12, %c0_281, %c0_282] : memref<25x128x128xbf16, #tpu.memory_space<vmem>>, vector<1x128x128xbf16>
    %330 = vector.shape_cast %329 : vector<1x128x128xbf16> to vector<128x128xbf16>
    %c0_283 = arith.constant 0 : index
    %c1_284 = arith.constant 1 : index
    %c1_285 = arith.constant 1 : index
    %c0_286 = arith.constant 0 : index
    %331 = vector.load %arg7[%c0_283, %c1_284, %c1_285, %c0_286] : memref<4x10x16x128xf32, #tpu.memory_space<vmem>>, vector<1x8x8x128xf32>
    %332 = vector.shape_cast %331 : vector<1x8x8x128xf32> to vector<8x8x128xf32>
    %333 = vector.shape_cast %332 : vector<8x8x128xf32> to vector<64x128xf32>
    %334 = arith.truncf %333 : vector<64x128xf32> to vector<64x128xbf16>
    %cst_287 = arith.constant dense<0.000000e+00> : vector<64x128xf32>
    %335 = tpu.matmul %334, %330, %cst_287 {dimension_numbers = #tpu.dot_dimension_numbers<[1], [0], [0], [1], [0, 0, 1, 1], [], []>} : vector<64x128xbf16>, vector<128x128xbf16>, vector<64x128xf32> -> vector<64x128xf32>
    %336 = arith.addf %310, %335 : vector<64x128xf32>
    %c1_288 = arith.constant 1 : index
    %c1_289 = arith.constant 1 : index
    %c1_290 = arith.constant 1 : index
    %c0_291 = arith.constant 0 : index
    %337 = vector.load %arg7[%c1_288, %c1_289, %c1_290, %c0_291] : memref<4x10x16x128xf32, #tpu.memory_space<vmem>>, vector<1x8x8x128xf32>
    %338 = vector.shape_cast %337 : vector<1x8x8x128xf32> to vector<8x8x128xf32>
    %339 = vector.shape_cast %338 : vector<8x8x128xf32> to vector<64x128xf32>
    %340 = arith.truncf %339 : vector<64x128xf32> to vector<64x128xbf16>
    %cst_292 = arith.constant dense<0.000000e+00> : vector<64x128xf32>
    %341 = tpu.matmul %340, %330, %cst_292 {dimension_numbers = #tpu.dot_dimension_numbers<[1], [0], [0], [1], [0, 0, 1, 1], [], []>} : vector<64x128xbf16>, vector<128x128xbf16>, vector<64x128xf32> -> vector<64x128xf32>
    %342 = arith.addf %316, %341 : vector<64x128xf32>
    %c2_293 = arith.constant 2 : index
    %c1_294 = arith.constant 1 : index
    %c1_295 = arith.constant 1 : index
    %c0_296 = arith.constant 0 : index
    %343 = vector.load %arg7[%c2_293, %c1_294, %c1_295, %c0_296] : memref<4x10x16x128xf32, #tpu.memory_space<vmem>>, vector<1x8x8x128xf32>
    %344 = vector.shape_cast %343 : vector<1x8x8x128xf32> to vector<8x8x128xf32>
    %345 = vector.shape_cast %344 : vector<8x8x128xf32> to vector<64x128xf32>
    %346 = arith.truncf %345 : vector<64x128xf32> to vector<64x128xbf16>
    %cst_297 = arith.constant dense<0.000000e+00> : vector<64x128xf32>
    %347 = tpu.matmul %346, %330, %cst_297 {dimension_numbers = #tpu.dot_dimension_numbers<[1], [0], [0], [1], [0, 0, 1, 1], [], []>} : vector<64x128xbf16>, vector<128x128xbf16>, vector<64x128xf32> -> vector<64x128xf32>
    %348 = arith.addf %322, %347 : vector<64x128xf32>
    %c3_298 = arith.constant 3 : index
    %c1_299 = arith.constant 1 : index
    %c1_300 = arith.constant 1 : index
    %c0_301 = arith.constant 0 : index
    %349 = vector.load %arg7[%c3_298, %c1_299, %c1_300, %c0_301] : memref<4x10x16x128xf32, #tpu.memory_space<vmem>>, vector<1x8x8x128xf32>
    %350 = vector.shape_cast %349 : vector<1x8x8x128xf32> to vector<8x8x128xf32>
    %351 = vector.shape_cast %350 : vector<8x8x128xf32> to vector<64x128xf32>
    %352 = arith.truncf %351 : vector<64x128xf32> to vector<64x128xbf16>
    %cst_302 = arith.constant dense<0.000000e+00> : vector<64x128xf32>
    %353 = tpu.matmul %352, %330, %cst_302 {dimension_numbers = #tpu.dot_dimension_numbers<[1], [0], [0], [1], [0, 0, 1, 1], [], []>} : vector<64x128xbf16>, vector<128x128xbf16>, vector<64x128xf32> -> vector<64x128xf32>
    %354 = arith.addf %328, %353 : vector<64x128xf32>
    %c13 = arith.constant 13 : index
    %c0_303 = arith.constant 0 : index
    %c0_304 = arith.constant 0 : index
    %355 = vector.load %arg4[%c13, %c0_303, %c0_304] : memref<25x128x128xbf16, #tpu.memory_space<vmem>>, vector<1x128x128xbf16>
    %356 = vector.shape_cast %355 : vector<1x128x128xbf16> to vector<128x128xbf16>
    %c1_305 = arith.constant 1 : index
    %c1_306 = arith.constant 1 : index
    %c1_307 = arith.constant 1 : index
    %c0_308 = arith.constant 0 : index
    %357 = vector.load %arg7[%c1_305, %c1_306, %c1_307, %c0_308] : memref<4x10x16x128xf32, #tpu.memory_space<vmem>>, vector<1x8x8x128xf32>
    %358 = vector.shape_cast %357 : vector<1x8x8x128xf32> to vector<8x8x128xf32>
    %359 = vector.shape_cast %358 : vector<8x8x128xf32> to vector<64x128xf32>
    %360 = arith.truncf %359 : vector<64x128xf32> to vector<64x128xbf16>
    %cst_309 = arith.constant dense<0.000000e+00> : vector<64x128xf32>
    %361 = tpu.matmul %360, %356, %cst_309 {dimension_numbers = #tpu.dot_dimension_numbers<[1], [0], [0], [1], [0, 0, 1, 1], [], []>} : vector<64x128xbf16>, vector<128x128xbf16>, vector<64x128xf32> -> vector<64x128xf32>
    %362 = arith.addf %336, %361 : vector<64x128xf32>
    %c0_310 = arith.constant 0 : index
    %c1_311 = arith.constant 1 : index
    %c2_312 = arith.constant 2 : index
    %c0_313 = arith.constant 0 : index
    %363 = vector.load %arg7[%c0_310, %c1_311, %c2_312, %c0_313] : memref<4x10x16x128xf32, #tpu.memory_space<vmem>>, vector<1x8x8x128xf32>
    %364 = vector.shape_cast %363 : vector<1x8x8x128xf32> to vector<8x8x128xf32>
    %365 = vector.shape_cast %364 : vector<8x8x128xf32> to vector<64x128xf32>
    %366 = arith.truncf %365 : vector<64x128xf32> to vector<64x128xbf16>
    %cst_314 = arith.constant dense<0.000000e+00> : vector<64x128xf32>
    %367 = tpu.matmul %366, %356, %cst_314 {dimension_numbers = #tpu.dot_dimension_numbers<[1], [0], [0], [1], [0, 0, 1, 1], [], []>} : vector<64x128xbf16>, vector<128x128xbf16>, vector<64x128xf32> -> vector<64x128xf32>
    %368 = arith.addf %342, %367 : vector<64x128xf32>
    %c3_315 = arith.constant 3 : index
    %c1_316 = arith.constant 1 : index
    %c1_317 = arith.constant 1 : index
    %c0_318 = arith.constant 0 : index
    %369 = vector.load %arg7[%c3_315, %c1_316, %c1_317, %c0_318] : memref<4x10x16x128xf32, #tpu.memory_space<vmem>>, vector<1x8x8x128xf32>
    %370 = vector.shape_cast %369 : vector<1x8x8x128xf32> to vector<8x8x128xf32>
    %371 = vector.shape_cast %370 : vector<8x8x128xf32> to vector<64x128xf32>
    %372 = arith.truncf %371 : vector<64x128xf32> to vector<64x128xbf16>
    %cst_319 = arith.constant dense<0.000000e+00> : vector<64x128xf32>
    %373 = tpu.matmul %372, %356, %cst_319 {dimension_numbers = #tpu.dot_dimension_numbers<[1], [0], [0], [1], [0, 0, 1, 1], [], []>} : vector<64x128xbf16>, vector<128x128xbf16>, vector<64x128xf32> -> vector<64x128xf32>
    %374 = arith.addf %348, %373 : vector<64x128xf32>
    %c2_320 = arith.constant 2 : index
    %c1_321 = arith.constant 1 : index
    %c2_322 = arith.constant 2 : index
    %c0_323 = arith.constant 0 : index
    %375 = vector.load %arg7[%c2_320, %c1_321, %c2_322, %c0_323] : memref<4x10x16x128xf32, #tpu.memory_space<vmem>>, vector<1x8x8x128xf32>
    %376 = vector.shape_cast %375 : vector<1x8x8x128xf32> to vector<8x8x128xf32>
    %377 = vector.shape_cast %376 : vector<8x8x128xf32> to vector<64x128xf32>
    %378 = arith.truncf %377 : vector<64x128xf32> to vector<64x128xbf16>
    %cst_324 = arith.constant dense<0.000000e+00> : vector<64x128xf32>
    %379 = tpu.matmul %378, %356, %cst_324 {dimension_numbers = #tpu.dot_dimension_numbers<[1], [0], [0], [1], [0, 0, 1, 1], [], []>} : vector<64x128xbf16>, vector<128x128xbf16>, vector<64x128xf32> -> vector<64x128xf32>
    %380 = arith.addf %354, %379 : vector<64x128xf32>
    %c14 = arith.constant 14 : index
    %c0_325 = arith.constant 0 : index
    %c0_326 = arith.constant 0 : index
    %381 = vector.load %arg4[%c14, %c0_325, %c0_326] : memref<25x128x128xbf16, #tpu.memory_space<vmem>>, vector<1x128x128xbf16>
    %382 = vector.shape_cast %381 : vector<1x128x128xbf16> to vector<128x128xbf16>
    %c0_327 = arith.constant 0 : index
    %c1_328 = arith.constant 1 : index
    %c2_329 = arith.constant 2 : index
    %c0_330 = arith.constant 0 : index
    %383 = vector.load %arg7[%c0_327, %c1_328, %c2_329, %c0_330] : memref<4x10x16x128xf32, #tpu.memory_space<vmem>>, vector<1x8x8x128xf32>
    %384 = vector.shape_cast %383 : vector<1x8x8x128xf32> to vector<8x8x128xf32>
    %385 = vector.shape_cast %384 : vector<8x8x128xf32> to vector<64x128xf32>
    %386 = arith.truncf %385 : vector<64x128xf32> to vector<64x128xbf16>
    %cst_331 = arith.constant dense<0.000000e+00> : vector<64x128xf32>
    %387 = tpu.matmul %386, %382, %cst_331 {dimension_numbers = #tpu.dot_dimension_numbers<[1], [0], [0], [1], [0, 0, 1, 1], [], []>} : vector<64x128xbf16>, vector<128x128xbf16>, vector<64x128xf32> -> vector<64x128xf32>
    %388 = arith.addf %362, %387 : vector<64x128xf32>
    %c1_332 = arith.constant 1 : index
    %c1_333 = arith.constant 1 : index
    %c2_334 = arith.constant 2 : index
    %c0_335 = arith.constant 0 : index
    %389 = vector.load %arg7[%c1_332, %c1_333, %c2_334, %c0_335] : memref<4x10x16x128xf32, #tpu.memory_space<vmem>>, vector<1x8x8x128xf32>
    %390 = vector.shape_cast %389 : vector<1x8x8x128xf32> to vector<8x8x128xf32>
    %391 = vector.shape_cast %390 : vector<8x8x128xf32> to vector<64x128xf32>
    %392 = arith.truncf %391 : vector<64x128xf32> to vector<64x128xbf16>
    %cst_336 = arith.constant dense<0.000000e+00> : vector<64x128xf32>
    %393 = tpu.matmul %392, %382, %cst_336 {dimension_numbers = #tpu.dot_dimension_numbers<[1], [0], [0], [1], [0, 0, 1, 1], [], []>} : vector<64x128xbf16>, vector<128x128xbf16>, vector<64x128xf32> -> vector<64x128xf32>
    %394 = arith.addf %368, %393 : vector<64x128xf32>
    %c2_337 = arith.constant 2 : index
    %c1_338 = arith.constant 1 : index
    %c2_339 = arith.constant 2 : index
    %c0_340 = arith.constant 0 : index
    %395 = vector.load %arg7[%c2_337, %c1_338, %c2_339, %c0_340] : memref<4x10x16x128xf32, #tpu.memory_space<vmem>>, vector<1x8x8x128xf32>
    %396 = vector.shape_cast %395 : vector<1x8x8x128xf32> to vector<8x8x128xf32>
    %397 = vector.shape_cast %396 : vector<8x8x128xf32> to vector<64x128xf32>
    %398 = arith.truncf %397 : vector<64x128xf32> to vector<64x128xbf16>
    %cst_341 = arith.constant dense<0.000000e+00> : vector<64x128xf32>
    %399 = tpu.matmul %398, %382, %cst_341 {dimension_numbers = #tpu.dot_dimension_numbers<[1], [0], [0], [1], [0, 0, 1, 1], [], []>} : vector<64x128xbf16>, vector<128x128xbf16>, vector<64x128xf32> -> vector<64x128xf32>
    %400 = arith.addf %374, %399 : vector<64x128xf32>
    %c3_342 = arith.constant 3 : index
    %c1_343 = arith.constant 1 : index
    %c2_344 = arith.constant 2 : index
    %c0_345 = arith.constant 0 : index
    %401 = vector.load %arg7[%c3_342, %c1_343, %c2_344, %c0_345] : memref<4x10x16x128xf32, #tpu.memory_space<vmem>>, vector<1x8x8x128xf32>
    %402 = vector.shape_cast %401 : vector<1x8x8x128xf32> to vector<8x8x128xf32>
    %403 = vector.shape_cast %402 : vector<8x8x128xf32> to vector<64x128xf32>
    %404 = arith.truncf %403 : vector<64x128xf32> to vector<64x128xbf16>
    %cst_346 = arith.constant dense<0.000000e+00> : vector<64x128xf32>
    %405 = tpu.matmul %404, %382, %cst_346 {dimension_numbers = #tpu.dot_dimension_numbers<[1], [0], [0], [1], [0, 0, 1, 1], [], []>} : vector<64x128xbf16>, vector<128x128xbf16>, vector<64x128xf32> -> vector<64x128xf32>
    %406 = arith.addf %380, %405 : vector<64x128xf32>
    %c15 = arith.constant 15 : index
    %c0_347 = arith.constant 0 : index
    %c0_348 = arith.constant 0 : index
    %407 = vector.load %arg4[%c15, %c0_347, %c0_348] : memref<25x128x128xbf16, #tpu.memory_space<vmem>>, vector<1x128x128xbf16>
    %408 = vector.shape_cast %407 : vector<1x128x128xbf16> to vector<128x128xbf16>
    %c2_349 = arith.constant 2 : index
    %c1_350 = arith.constant 1 : index
    %c0_351 = arith.constant 0 : index
    %c0_352 = arith.constant 0 : index
    %409 = vector.load %arg7[%c2_349, %c1_350, %c0_351, %c0_352] : memref<4x10x16x128xf32, #tpu.memory_space<vmem>>, vector<1x8x8x128xf32>
    %410 = vector.shape_cast %409 : vector<1x8x8x128xf32> to vector<8x8x128xf32>
    %411 = vector.shape_cast %410 : vector<8x8x128xf32> to vector<64x128xf32>
    %412 = arith.truncf %411 : vector<64x128xf32> to vector<64x128xbf16>
    %cst_353 = arith.constant dense<0.000000e+00> : vector<64x128xf32>
    %413 = tpu.matmul %412, %408, %cst_353 {dimension_numbers = #tpu.dot_dimension_numbers<[1], [0], [0], [1], [0, 0, 1, 1], [], []>} : vector<64x128xbf16>, vector<128x128xbf16>, vector<64x128xf32> -> vector<64x128xf32>
    %414 = arith.addf %388, %413 : vector<64x128xf32>
    %c3_354 = arith.constant 3 : index
    %c1_355 = arith.constant 1 : index
    %c0_356 = arith.constant 0 : index
    %c0_357 = arith.constant 0 : index
    %415 = vector.load %arg7[%c3_354, %c1_355, %c0_356, %c0_357] : memref<4x10x16x128xf32, #tpu.memory_space<vmem>>, vector<1x8x8x128xf32>
    %416 = vector.shape_cast %415 : vector<1x8x8x128xf32> to vector<8x8x128xf32>
    %417 = vector.shape_cast %416 : vector<8x8x128xf32> to vector<64x128xf32>
    %418 = arith.truncf %417 : vector<64x128xf32> to vector<64x128xbf16>
    %cst_358 = arith.constant dense<0.000000e+00> : vector<64x128xf32>
    %419 = tpu.matmul %418, %408, %cst_358 {dimension_numbers = #tpu.dot_dimension_numbers<[1], [0], [0], [1], [0, 0, 1, 1], [], []>} : vector<64x128xbf16>, vector<128x128xbf16>, vector<64x128xf32> -> vector<64x128xf32>
    %420 = arith.addf %394, %419 : vector<64x128xf32>
    %c0_359 = arith.constant 0 : index
    %c2_360 = arith.constant 2 : index
    %c0_361 = arith.constant 0 : index
    %c0_362 = arith.constant 0 : index
    %421 = vector.load %arg7[%c0_359, %c2_360, %c0_361, %c0_362] : memref<4x10x16x128xf32, #tpu.memory_space<vmem>>, vector<1x8x8x128xf32>
    %422 = vector.shape_cast %421 : vector<1x8x8x128xf32> to vector<8x8x128xf32>
    %423 = vector.shape_cast %422 : vector<8x8x128xf32> to vector<64x128xf32>
    %424 = arith.truncf %423 : vector<64x128xf32> to vector<64x128xbf16>
    %cst_363 = arith.constant dense<0.000000e+00> : vector<64x128xf32>
    %425 = tpu.matmul %424, %408, %cst_363 {dimension_numbers = #tpu.dot_dimension_numbers<[1], [0], [0], [1], [0, 0, 1, 1], [], []>} : vector<64x128xbf16>, vector<128x128xbf16>, vector<64x128xf32> -> vector<64x128xf32>
    %426 = arith.addf %400, %425 : vector<64x128xf32>
    %c1_364 = arith.constant 1 : index
    %c2_365 = arith.constant 2 : index
    %c0_366 = arith.constant 0 : index
    %c0_367 = arith.constant 0 : index
    %427 = vector.load %arg7[%c1_364, %c2_365, %c0_366, %c0_367] : memref<4x10x16x128xf32, #tpu.memory_space<vmem>>, vector<1x8x8x128xf32>
    %428 = vector.shape_cast %427 : vector<1x8x8x128xf32> to vector<8x8x128xf32>
    %429 = vector.shape_cast %428 : vector<8x8x128xf32> to vector<64x128xf32>
    %430 = arith.truncf %429 : vector<64x128xf32> to vector<64x128xbf16>
    %cst_368 = arith.constant dense<0.000000e+00> : vector<64x128xf32>
    %431 = tpu.matmul %430, %408, %cst_368 {dimension_numbers = #tpu.dot_dimension_numbers<[1], [0], [0], [1], [0, 0, 1, 1], [], []>} : vector<64x128xbf16>, vector<128x128xbf16>, vector<64x128xf32> -> vector<64x128xf32>
    %432 = arith.addf %406, %431 : vector<64x128xf32>
    %c16 = arith.constant 16 : index
    %c0_369 = arith.constant 0 : index
    %c0_370 = arith.constant 0 : index
    %433 = vector.load %arg4[%c16, %c0_369, %c0_370] : memref<25x128x128xbf16, #tpu.memory_space<vmem>>, vector<1x128x128xbf16>
    %434 = vector.shape_cast %433 : vector<1x128x128xbf16> to vector<128x128xbf16>
    %c3_371 = arith.constant 3 : index
    %c1_372 = arith.constant 1 : index
    %c0_373 = arith.constant 0 : index
    %c0_374 = arith.constant 0 : index
    %435 = vector.load %arg7[%c3_371, %c1_372, %c0_373, %c0_374] : memref<4x10x16x128xf32, #tpu.memory_space<vmem>>, vector<1x8x8x128xf32>
    %436 = vector.shape_cast %435 : vector<1x8x8x128xf32> to vector<8x8x128xf32>
    %437 = vector.shape_cast %436 : vector<8x8x128xf32> to vector<64x128xf32>
    %438 = arith.truncf %437 : vector<64x128xf32> to vector<64x128xbf16>
    %cst_375 = arith.constant dense<0.000000e+00> : vector<64x128xf32>
    %439 = tpu.matmul %438, %434, %cst_375 {dimension_numbers = #tpu.dot_dimension_numbers<[1], [0], [0], [1], [0, 0, 1, 1], [], []>} : vector<64x128xbf16>, vector<128x128xbf16>, vector<64x128xf32> -> vector<64x128xf32>
    %440 = arith.addf %414, %439 : vector<64x128xf32>
    %c2_376 = arith.constant 2 : index
    %c1_377 = arith.constant 1 : index
    %c1_378 = arith.constant 1 : index
    %c0_379 = arith.constant 0 : index
    %441 = vector.load %arg7[%c2_376, %c1_377, %c1_378, %c0_379] : memref<4x10x16x128xf32, #tpu.memory_space<vmem>>, vector<1x8x8x128xf32>
    %442 = vector.shape_cast %441 : vector<1x8x8x128xf32> to vector<8x8x128xf32>
    %443 = vector.shape_cast %442 : vector<8x8x128xf32> to vector<64x128xf32>
    %444 = arith.truncf %443 : vector<64x128xf32> to vector<64x128xbf16>
    %cst_380 = arith.constant dense<0.000000e+00> : vector<64x128xf32>
    %445 = tpu.matmul %444, %434, %cst_380 {dimension_numbers = #tpu.dot_dimension_numbers<[1], [0], [0], [1], [0, 0, 1, 1], [], []>} : vector<64x128xbf16>, vector<128x128xbf16>, vector<64x128xf32> -> vector<64x128xf32>
    %446 = arith.addf %420, %445 : vector<64x128xf32>
    %c1_381 = arith.constant 1 : index
    %c2_382 = arith.constant 2 : index
    %c0_383 = arith.constant 0 : index
    %c0_384 = arith.constant 0 : index
    %447 = vector.load %arg7[%c1_381, %c2_382, %c0_383, %c0_384] : memref<4x10x16x128xf32, #tpu.memory_space<vmem>>, vector<1x8x8x128xf32>
    %448 = vector.shape_cast %447 : vector<1x8x8x128xf32> to vector<8x8x128xf32>
    %449 = vector.shape_cast %448 : vector<8x8x128xf32> to vector<64x128xf32>
    %450 = arith.truncf %449 : vector<64x128xf32> to vector<64x128xbf16>
    %cst_385 = arith.constant dense<0.000000e+00> : vector<64x128xf32>
    %451 = tpu.matmul %450, %434, %cst_385 {dimension_numbers = #tpu.dot_dimension_numbers<[1], [0], [0], [1], [0, 0, 1, 1], [], []>} : vector<64x128xbf16>, vector<128x128xbf16>, vector<64x128xf32> -> vector<64x128xf32>
    %452 = arith.addf %426, %451 : vector<64x128xf32>
    %c0_386 = arith.constant 0 : index
    %c2_387 = arith.constant 2 : index
    %c1_388 = arith.constant 1 : index
    %c0_389 = arith.constant 0 : index
    %453 = vector.load %arg7[%c0_386, %c2_387, %c1_388, %c0_389] : memref<4x10x16x128xf32, #tpu.memory_space<vmem>>, vector<1x8x8x128xf32>
    %454 = vector.shape_cast %453 : vector<1x8x8x128xf32> to vector<8x8x128xf32>
    %455 = vector.shape_cast %454 : vector<8x8x128xf32> to vector<64x128xf32>
    %456 = arith.truncf %455 : vector<64x128xf32> to vector<64x128xbf16>
    %cst_390 = arith.constant dense<0.000000e+00> : vector<64x128xf32>
    %457 = tpu.matmul %456, %434, %cst_390 {dimension_numbers = #tpu.dot_dimension_numbers<[1], [0], [0], [1], [0, 0, 1, 1], [], []>} : vector<64x128xbf16>, vector<128x128xbf16>, vector<64x128xf32> -> vector<64x128xf32>
    %458 = arith.addf %432, %457 : vector<64x128xf32>
    %c17 = arith.constant 17 : index
    %c0_391 = arith.constant 0 : index
    %c0_392 = arith.constant 0 : index
    %459 = vector.load %arg4[%c17, %c0_391, %c0_392] : memref<25x128x128xbf16, #tpu.memory_space<vmem>>, vector<1x128x128xbf16>
    %460 = vector.shape_cast %459 : vector<1x128x128xbf16> to vector<128x128xbf16>
    %c2_393 = arith.constant 2 : index
    %c1_394 = arith.constant 1 : index
    %c1_395 = arith.constant 1 : index
    %c0_396 = arith.constant 0 : index
    %461 = vector.load %arg7[%c2_393, %c1_394, %c1_395, %c0_396] : memref<4x10x16x128xf32, #tpu.memory_space<vmem>>, vector<1x8x8x128xf32>
    %462 = vector.shape_cast %461 : vector<1x8x8x128xf32> to vector<8x8x128xf32>
    %463 = vector.shape_cast %462 : vector<8x8x128xf32> to vector<64x128xf32>
    %464 = arith.truncf %463 : vector<64x128xf32> to vector<64x128xbf16>
    %cst_397 = arith.constant dense<0.000000e+00> : vector<64x128xf32>
    %465 = tpu.matmul %464, %460, %cst_397 {dimension_numbers = #tpu.dot_dimension_numbers<[1], [0], [0], [1], [0, 0, 1, 1], [], []>} : vector<64x128xbf16>, vector<128x128xbf16>, vector<64x128xf32> -> vector<64x128xf32>
    %466 = arith.addf %440, %465 : vector<64x128xf32>
    %c3_398 = arith.constant 3 : index
    %c1_399 = arith.constant 1 : index
    %c1_400 = arith.constant 1 : index
    %c0_401 = arith.constant 0 : index
    %467 = vector.load %arg7[%c3_398, %c1_399, %c1_400, %c0_401] : memref<4x10x16x128xf32, #tpu.memory_space<vmem>>, vector<1x8x8x128xf32>
    %468 = vector.shape_cast %467 : vector<1x8x8x128xf32> to vector<8x8x128xf32>
    %469 = vector.shape_cast %468 : vector<8x8x128xf32> to vector<64x128xf32>
    %470 = arith.truncf %469 : vector<64x128xf32> to vector<64x128xbf16>
    %cst_402 = arith.constant dense<0.000000e+00> : vector<64x128xf32>
    %471 = tpu.matmul %470, %460, %cst_402 {dimension_numbers = #tpu.dot_dimension_numbers<[1], [0], [0], [1], [0, 0, 1, 1], [], []>} : vector<64x128xbf16>, vector<128x128xbf16>, vector<64x128xf32> -> vector<64x128xf32>
    %472 = arith.addf %446, %471 : vector<64x128xf32>
    %c0_403 = arith.constant 0 : index
    %c2_404 = arith.constant 2 : index
    %c1_405 = arith.constant 1 : index
    %c0_406 = arith.constant 0 : index
    %473 = vector.load %arg7[%c0_403, %c2_404, %c1_405, %c0_406] : memref<4x10x16x128xf32, #tpu.memory_space<vmem>>, vector<1x8x8x128xf32>
    %474 = vector.shape_cast %473 : vector<1x8x8x128xf32> to vector<8x8x128xf32>
    %475 = vector.shape_cast %474 : vector<8x8x128xf32> to vector<64x128xf32>
    %476 = arith.truncf %475 : vector<64x128xf32> to vector<64x128xbf16>
    %cst_407 = arith.constant dense<0.000000e+00> : vector<64x128xf32>
    %477 = tpu.matmul %476, %460, %cst_407 {dimension_numbers = #tpu.dot_dimension_numbers<[1], [0], [0], [1], [0, 0, 1, 1], [], []>} : vector<64x128xbf16>, vector<128x128xbf16>, vector<64x128xf32> -> vector<64x128xf32>
    %478 = arith.addf %452, %477 : vector<64x128xf32>
    %c1_408 = arith.constant 1 : index
    %c2_409 = arith.constant 2 : index
    %c1_410 = arith.constant 1 : index
    %c0_411 = arith.constant 0 : index
    %479 = vector.load %arg7[%c1_408, %c2_409, %c1_410, %c0_411] : memref<4x10x16x128xf32, #tpu.memory_space<vmem>>, vector<1x8x8x128xf32>
    %480 = vector.shape_cast %479 : vector<1x8x8x128xf32> to vector<8x8x128xf32>
    %481 = vector.shape_cast %480 : vector<8x8x128xf32> to vector<64x128xf32>
    %482 = arith.truncf %481 : vector<64x128xf32> to vector<64x128xbf16>
    %cst_412 = arith.constant dense<0.000000e+00> : vector<64x128xf32>
    %483 = tpu.matmul %482, %460, %cst_412 {dimension_numbers = #tpu.dot_dimension_numbers<[1], [0], [0], [1], [0, 0, 1, 1], [], []>} : vector<64x128xbf16>, vector<128x128xbf16>, vector<64x128xf32> -> vector<64x128xf32>
    %484 = arith.addf %458, %483 : vector<64x128xf32>
    %c18 = arith.constant 18 : index
    %c0_413 = arith.constant 0 : index
    %c0_414 = arith.constant 0 : index
    %485 = vector.load %arg4[%c18, %c0_413, %c0_414] : memref<25x128x128xbf16, #tpu.memory_space<vmem>>, vector<1x128x128xbf16>
    %486 = vector.shape_cast %485 : vector<1x128x128xbf16> to vector<128x128xbf16>
    %c3_415 = arith.constant 3 : index
    %c1_416 = arith.constant 1 : index
    %c1_417 = arith.constant 1 : index
    %c0_418 = arith.constant 0 : index
    %487 = vector.load %arg7[%c3_415, %c1_416, %c1_417, %c0_418] : memref<4x10x16x128xf32, #tpu.memory_space<vmem>>, vector<1x8x8x128xf32>
    %488 = vector.shape_cast %487 : vector<1x8x8x128xf32> to vector<8x8x128xf32>
    %489 = vector.shape_cast %488 : vector<8x8x128xf32> to vector<64x128xf32>
    %490 = arith.truncf %489 : vector<64x128xf32> to vector<64x128xbf16>
    %cst_419 = arith.constant dense<0.000000e+00> : vector<64x128xf32>
    %491 = tpu.matmul %490, %486, %cst_419 {dimension_numbers = #tpu.dot_dimension_numbers<[1], [0], [0], [1], [0, 0, 1, 1], [], []>} : vector<64x128xbf16>, vector<128x128xbf16>, vector<64x128xf32> -> vector<64x128xf32>
    %492 = arith.addf %466, %491 : vector<64x128xf32>
    %c2_420 = arith.constant 2 : index
    %c1_421 = arith.constant 1 : index
    %c2_422 = arith.constant 2 : index
    %c0_423 = arith.constant 0 : index
    %493 = vector.load %arg7[%c2_420, %c1_421, %c2_422, %c0_423] : memref<4x10x16x128xf32, #tpu.memory_space<vmem>>, vector<1x8x8x128xf32>
    %494 = vector.shape_cast %493 : vector<1x8x8x128xf32> to vector<8x8x128xf32>
    %495 = vector.shape_cast %494 : vector<8x8x128xf32> to vector<64x128xf32>
    %496 = arith.truncf %495 : vector<64x128xf32> to vector<64x128xbf16>
    %cst_424 = arith.constant dense<0.000000e+00> : vector<64x128xf32>
    %497 = tpu.matmul %496, %486, %cst_424 {dimension_numbers = #tpu.dot_dimension_numbers<[1], [0], [0], [1], [0, 0, 1, 1], [], []>} : vector<64x128xbf16>, vector<128x128xbf16>, vector<64x128xf32> -> vector<64x128xf32>
    %498 = arith.addf %472, %497 : vector<64x128xf32>
    %c1_425 = arith.constant 1 : index
    %c2_426 = arith.constant 2 : index
    %c1_427 = arith.constant 1 : index
    %c0_428 = arith.constant 0 : index
    %499 = vector.load %arg7[%c1_425, %c2_426, %c1_427, %c0_428] : memref<4x10x16x128xf32, #tpu.memory_space<vmem>>, vector<1x8x8x128xf32>
    %500 = vector.shape_cast %499 : vector<1x8x8x128xf32> to vector<8x8x128xf32>
    %501 = vector.shape_cast %500 : vector<8x8x128xf32> to vector<64x128xf32>
    %502 = arith.truncf %501 : vector<64x128xf32> to vector<64x128xbf16>
    %cst_429 = arith.constant dense<0.000000e+00> : vector<64x128xf32>
    %503 = tpu.matmul %502, %486, %cst_429 {dimension_numbers = #tpu.dot_dimension_numbers<[1], [0], [0], [1], [0, 0, 1, 1], [], []>} : vector<64x128xbf16>, vector<128x128xbf16>, vector<64x128xf32> -> vector<64x128xf32>
    %504 = arith.addf %478, %503 : vector<64x128xf32>
    %c0_430 = arith.constant 0 : index
    %c2_431 = arith.constant 2 : index
    %c2_432 = arith.constant 2 : index
    %c0_433 = arith.constant 0 : index
    %505 = vector.load %arg7[%c0_430, %c2_431, %c2_432, %c0_433] : memref<4x10x16x128xf32, #tpu.memory_space<vmem>>, vector<1x8x8x128xf32>
    %506 = vector.shape_cast %505 : vector<1x8x8x128xf32> to vector<8x8x128xf32>
    %507 = vector.shape_cast %506 : vector<8x8x128xf32> to vector<64x128xf32>
    %508 = arith.truncf %507 : vector<64x128xf32> to vector<64x128xbf16>
    %cst_434 = arith.constant dense<0.000000e+00> : vector<64x128xf32>
    %509 = tpu.matmul %508, %486, %cst_434 {dimension_numbers = #tpu.dot_dimension_numbers<[1], [0], [0], [1], [0, 0, 1, 1], [], []>} : vector<64x128xbf16>, vector<128x128xbf16>, vector<64x128xf32> -> vector<64x128xf32>
    %510 = arith.addf %484, %509 : vector<64x128xf32>
    %c19 = arith.constant 19 : index
    %c0_435 = arith.constant 0 : index
    %c0_436 = arith.constant 0 : index
    %511 = vector.load %arg4[%c19, %c0_435, %c0_436] : memref<25x128x128xbf16, #tpu.memory_space<vmem>>, vector<1x128x128xbf16>
    %512 = vector.shape_cast %511 : vector<1x128x128xbf16> to vector<128x128xbf16>
    %c2_437 = arith.constant 2 : index
    %c1_438 = arith.constant 1 : index
    %c2_439 = arith.constant 2 : index
    %c0_440 = arith.constant 0 : index
    %513 = vector.load %arg7[%c2_437, %c1_438, %c2_439, %c0_440] : memref<4x10x16x128xf32, #tpu.memory_space<vmem>>, vector<1x8x8x128xf32>
    %514 = vector.shape_cast %513 : vector<1x8x8x128xf32> to vector<8x8x128xf32>
    %515 = vector.shape_cast %514 : vector<8x8x128xf32> to vector<64x128xf32>
    %516 = arith.truncf %515 : vector<64x128xf32> to vector<64x128xbf16>
    %cst_441 = arith.constant dense<0.000000e+00> : vector<64x128xf32>
    %517 = tpu.matmul %516, %512, %cst_441 {dimension_numbers = #tpu.dot_dimension_numbers<[1], [0], [0], [1], [0, 0, 1, 1], [], []>} : vector<64x128xbf16>, vector<128x128xbf16>, vector<64x128xf32> -> vector<64x128xf32>
    %518 = arith.addf %492, %517 : vector<64x128xf32>
    %c3_442 = arith.constant 3 : index
    %c1_443 = arith.constant 1 : index
    %c2_444 = arith.constant 2 : index
    %c0_445 = arith.constant 0 : index
    %519 = vector.load %arg7[%c3_442, %c1_443, %c2_444, %c0_445] : memref<4x10x16x128xf32, #tpu.memory_space<vmem>>, vector<1x8x8x128xf32>
    %520 = vector.shape_cast %519 : vector<1x8x8x128xf32> to vector<8x8x128xf32>
    %521 = vector.shape_cast %520 : vector<8x8x128xf32> to vector<64x128xf32>
    %522 = arith.truncf %521 : vector<64x128xf32> to vector<64x128xbf16>
    %cst_446 = arith.constant dense<0.000000e+00> : vector<64x128xf32>
    %523 = tpu.matmul %522, %512, %cst_446 {dimension_numbers = #tpu.dot_dimension_numbers<[1], [0], [0], [1], [0, 0, 1, 1], [], []>} : vector<64x128xbf16>, vector<128x128xbf16>, vector<64x128xf32> -> vector<64x128xf32>
    %524 = arith.addf %498, %523 : vector<64x128xf32>
    %c0_447 = arith.constant 0 : index
    %c2_448 = arith.constant 2 : index
    %c2_449 = arith.constant 2 : index
    %c0_450 = arith.constant 0 : index
    %525 = vector.load %arg7[%c0_447, %c2_448, %c2_449, %c0_450] : memref<4x10x16x128xf32, #tpu.memory_space<vmem>>, vector<1x8x8x128xf32>
    %526 = vector.shape_cast %525 : vector<1x8x8x128xf32> to vector<8x8x128xf32>
    %527 = vector.shape_cast %526 : vector<8x8x128xf32> to vector<64x128xf32>
    %528 = arith.truncf %527 : vector<64x128xf32> to vector<64x128xbf16>
    %cst_451 = arith.constant dense<0.000000e+00> : vector<64x128xf32>
    %529 = tpu.matmul %528, %512, %cst_451 {dimension_numbers = #tpu.dot_dimension_numbers<[1], [0], [0], [1], [0, 0, 1, 1], [], []>} : vector<64x128xbf16>, vector<128x128xbf16>, vector<64x128xf32> -> vector<64x128xf32>
    %530 = arith.addf %504, %529 : vector<64x128xf32>
    %c1_452 = arith.constant 1 : index
    %c2_453 = arith.constant 2 : index
    %c2_454 = arith.constant 2 : index
    %c0_455 = arith.constant 0 : index
    %531 = vector.load %arg7[%c1_452, %c2_453, %c2_454, %c0_455] : memref<4x10x16x128xf32, #tpu.memory_space<vmem>>, vector<1x8x8x128xf32>
    %532 = vector.shape_cast %531 : vector<1x8x8x128xf32> to vector<8x8x128xf32>
    %533 = vector.shape_cast %532 : vector<8x8x128xf32> to vector<64x128xf32>
    %534 = arith.truncf %533 : vector<64x128xf32> to vector<64x128xbf16>
    %cst_456 = arith.constant dense<0.000000e+00> : vector<64x128xf32>
    %535 = tpu.matmul %534, %512, %cst_456 {dimension_numbers = #tpu.dot_dimension_numbers<[1], [0], [0], [1], [0, 0, 1, 1], [], []>} : vector<64x128xbf16>, vector<128x128xbf16>, vector<64x128xf32> -> vector<64x128xf32>
    %536 = arith.addf %510, %535 : vector<64x128xf32>
    %c20 = arith.constant 20 : index
    %c0_457 = arith.constant 0 : index
    %c0_458 = arith.constant 0 : index
    %537 = vector.load %arg4[%c20, %c0_457, %c0_458] : memref<25x128x128xbf16, #tpu.memory_space<vmem>>, vector<1x128x128xbf16>
    %538 = vector.shape_cast %537 : vector<1x128x128xbf16> to vector<128x128xbf16>
    %c0_459 = arith.constant 0 : index
    %c2_460 = arith.constant 2 : index
    %c0_461 = arith.constant 0 : index
    %c0_462 = arith.constant 0 : index
    %539 = vector.load %arg7[%c0_459, %c2_460, %c0_461, %c0_462] : memref<4x10x16x128xf32, #tpu.memory_space<vmem>>, vector<1x8x8x128xf32>
    %540 = vector.shape_cast %539 : vector<1x8x8x128xf32> to vector<8x8x128xf32>
    %541 = vector.shape_cast %540 : vector<8x8x128xf32> to vector<64x128xf32>
    %542 = arith.truncf %541 : vector<64x128xf32> to vector<64x128xbf16>
    %cst_463 = arith.constant dense<0.000000e+00> : vector<64x128xf32>
    %543 = tpu.matmul %542, %538, %cst_463 {dimension_numbers = #tpu.dot_dimension_numbers<[1], [0], [0], [1], [0, 0, 1, 1], [], []>} : vector<64x128xbf16>, vector<128x128xbf16>, vector<64x128xf32> -> vector<64x128xf32>
    %544 = arith.addf %518, %543 : vector<64x128xf32>
    %c1_464 = arith.constant 1 : index
    %c2_465 = arith.constant 2 : index
    %c0_466 = arith.constant 0 : index
    %c0_467 = arith.constant 0 : index
    %545 = vector.load %arg7[%c1_464, %c2_465, %c0_466, %c0_467] : memref<4x10x16x128xf32, #tpu.memory_space<vmem>>, vector<1x8x8x128xf32>
    %546 = vector.shape_cast %545 : vector<1x8x8x128xf32> to vector<8x8x128xf32>
    %547 = vector.shape_cast %546 : vector<8x8x128xf32> to vector<64x128xf32>
    %548 = arith.truncf %547 : vector<64x128xf32> to vector<64x128xbf16>
    %cst_468 = arith.constant dense<0.000000e+00> : vector<64x128xf32>
    %549 = tpu.matmul %548, %538, %cst_468 {dimension_numbers = #tpu.dot_dimension_numbers<[1], [0], [0], [1], [0, 0, 1, 1], [], []>} : vector<64x128xbf16>, vector<128x128xbf16>, vector<64x128xf32> -> vector<64x128xf32>
    %550 = arith.addf %524, %549 : vector<64x128xf32>
    %c2_469 = arith.constant 2 : index
    %c2_470 = arith.constant 2 : index
    %c0_471 = arith.constant 0 : index
    %c0_472 = arith.constant 0 : index
    %551 = vector.load %arg7[%c2_469, %c2_470, %c0_471, %c0_472] : memref<4x10x16x128xf32, #tpu.memory_space<vmem>>, vector<1x8x8x128xf32>
    %552 = vector.shape_cast %551 : vector<1x8x8x128xf32> to vector<8x8x128xf32>
    %553 = vector.shape_cast %552 : vector<8x8x128xf32> to vector<64x128xf32>
    %554 = arith.truncf %553 : vector<64x128xf32> to vector<64x128xbf16>
    %cst_473 = arith.constant dense<0.000000e+00> : vector<64x128xf32>
    %555 = tpu.matmul %554, %538, %cst_473 {dimension_numbers = #tpu.dot_dimension_numbers<[1], [0], [0], [1], [0, 0, 1, 1], [], []>} : vector<64x128xbf16>, vector<128x128xbf16>, vector<64x128xf32> -> vector<64x128xf32>
    %556 = arith.addf %530, %555 : vector<64x128xf32>
    %c3_474 = arith.constant 3 : index
    %c2_475 = arith.constant 2 : index
    %c0_476 = arith.constant 0 : index
    %c0_477 = arith.constant 0 : index
    %557 = vector.load %arg7[%c3_474, %c2_475, %c0_476, %c0_477] : memref<4x10x16x128xf32, #tpu.memory_space<vmem>>, vector<1x8x8x128xf32>
    %558 = vector.shape_cast %557 : vector<1x8x8x128xf32> to vector<8x8x128xf32>
    %559 = vector.shape_cast %558 : vector<8x8x128xf32> to vector<64x128xf32>
    %560 = arith.truncf %559 : vector<64x128xf32> to vector<64x128xbf16>
    %cst_478 = arith.constant dense<0.000000e+00> : vector<64x128xf32>
    %561 = tpu.matmul %560, %538, %cst_478 {dimension_numbers = #tpu.dot_dimension_numbers<[1], [0], [0], [1], [0, 0, 1, 1], [], []>} : vector<64x128xbf16>, vector<128x128xbf16>, vector<64x128xf32> -> vector<64x128xf32>
    %562 = arith.addf %536, %561 : vector<64x128xf32>
    %c21 = arith.constant 21 : index
    %c0_479 = arith.constant 0 : index
    %c0_480 = arith.constant 0 : index
    %563 = vector.load %arg4[%c21, %c0_479, %c0_480] : memref<25x128x128xbf16, #tpu.memory_space<vmem>>, vector<1x128x128xbf16>
    %564 = vector.shape_cast %563 : vector<1x128x128xbf16> to vector<128x128xbf16>
    %c1_481 = arith.constant 1 : index
    %c2_482 = arith.constant 2 : index
    %c0_483 = arith.constant 0 : index
    %c0_484 = arith.constant 0 : index
    %565 = vector.load %arg7[%c1_481, %c2_482, %c0_483, %c0_484] : memref<4x10x16x128xf32, #tpu.memory_space<vmem>>, vector<1x8x8x128xf32>
    %566 = vector.shape_cast %565 : vector<1x8x8x128xf32> to vector<8x8x128xf32>
    %567 = vector.shape_cast %566 : vector<8x8x128xf32> to vector<64x128xf32>
    %568 = arith.truncf %567 : vector<64x128xf32> to vector<64x128xbf16>
    %cst_485 = arith.constant dense<0.000000e+00> : vector<64x128xf32>
    %569 = tpu.matmul %568, %564, %cst_485 {dimension_numbers = #tpu.dot_dimension_numbers<[1], [0], [0], [1], [0, 0, 1, 1], [], []>} : vector<64x128xbf16>, vector<128x128xbf16>, vector<64x128xf32> -> vector<64x128xf32>
    %570 = arith.addf %544, %569 : vector<64x128xf32>
    %c0_486 = arith.constant 0 : index
    %c2_487 = arith.constant 2 : index
    %c1_488 = arith.constant 1 : index
    %c0_489 = arith.constant 0 : index
    %571 = vector.load %arg7[%c0_486, %c2_487, %c1_488, %c0_489] : memref<4x10x16x128xf32, #tpu.memory_space<vmem>>, vector<1x8x8x128xf32>
    %572 = vector.shape_cast %571 : vector<1x8x8x128xf32> to vector<8x8x128xf32>
    %573 = vector.shape_cast %572 : vector<8x8x128xf32> to vector<64x128xf32>
    %574 = arith.truncf %573 : vector<64x128xf32> to vector<64x128xbf16>
    %cst_490 = arith.constant dense<0.000000e+00> : vector<64x128xf32>
    %575 = tpu.matmul %574, %564, %cst_490 {dimension_numbers = #tpu.dot_dimension_numbers<[1], [0], [0], [1], [0, 0, 1, 1], [], []>} : vector<64x128xbf16>, vector<128x128xbf16>, vector<64x128xf32> -> vector<64x128xf32>
    %576 = arith.addf %550, %575 : vector<64x128xf32>
    %c3_491 = arith.constant 3 : index
    %c2_492 = arith.constant 2 : index
    %c0_493 = arith.constant 0 : index
    %c0_494 = arith.constant 0 : index
    %577 = vector.load %arg7[%c3_491, %c2_492, %c0_493, %c0_494] : memref<4x10x16x128xf32, #tpu.memory_space<vmem>>, vector<1x8x8x128xf32>
    %578 = vector.shape_cast %577 : vector<1x8x8x128xf32> to vector<8x8x128xf32>
    %579 = vector.shape_cast %578 : vector<8x8x128xf32> to vector<64x128xf32>
    %580 = arith.truncf %579 : vector<64x128xf32> to vector<64x128xbf16>
    %cst_495 = arith.constant dense<0.000000e+00> : vector<64x128xf32>
    %581 = tpu.matmul %580, %564, %cst_495 {dimension_numbers = #tpu.dot_dimension_numbers<[1], [0], [0], [1], [0, 0, 1, 1], [], []>} : vector<64x128xbf16>, vector<128x128xbf16>, vector<64x128xf32> -> vector<64x128xf32>
    %582 = arith.addf %556, %581 : vector<64x128xf32>
    %c2_496 = arith.constant 2 : index
    %c2_497 = arith.constant 2 : index
    %c1_498 = arith.constant 1 : index
    %c0_499 = arith.constant 0 : index
    %583 = vector.load %arg7[%c2_496, %c2_497, %c1_498, %c0_499] : memref<4x10x16x128xf32, #tpu.memory_space<vmem>>, vector<1x8x8x128xf32>
    %584 = vector.shape_cast %583 : vector<1x8x8x128xf32> to vector<8x8x128xf32>
    %585 = vector.shape_cast %584 : vector<8x8x128xf32> to vector<64x128xf32>
    %586 = arith.truncf %585 : vector<64x128xf32> to vector<64x128xbf16>
    %cst_500 = arith.constant dense<0.000000e+00> : vector<64x128xf32>
    %587 = tpu.matmul %586, %564, %cst_500 {dimension_numbers = #tpu.dot_dimension_numbers<[1], [0], [0], [1], [0, 0, 1, 1], [], []>} : vector<64x128xbf16>, vector<128x128xbf16>, vector<64x128xf32> -> vector<64x128xf32>
    %588 = arith.addf %562, %587 : vector<64x128xf32>
    %c22 = arith.constant 22 : index
    %c0_501 = arith.constant 0 : index
    %c0_502 = arith.constant 0 : index
    %589 = vector.load %arg4[%c22, %c0_501, %c0_502] : memref<25x128x128xbf16, #tpu.memory_space<vmem>>, vector<1x128x128xbf16>
    %590 = vector.shape_cast %589 : vector<1x128x128xbf16> to vector<128x128xbf16>
    %c0_503 = arith.constant 0 : index
    %c2_504 = arith.constant 2 : index
    %c1_505 = arith.constant 1 : index
    %c0_506 = arith.constant 0 : index
    %591 = vector.load %arg7[%c0_503, %c2_504, %c1_505, %c0_506] : memref<4x10x16x128xf32, #tpu.memory_space<vmem>>, vector<1x8x8x128xf32>
    %592 = vector.shape_cast %591 : vector<1x8x8x128xf32> to vector<8x8x128xf32>
    %593 = vector.shape_cast %592 : vector<8x8x128xf32> to vector<64x128xf32>
    %594 = arith.truncf %593 : vector<64x128xf32> to vector<64x128xbf16>
    %cst_507 = arith.constant dense<0.000000e+00> : vector<64x128xf32>
    %595 = tpu.matmul %594, %590, %cst_507 {dimension_numbers = #tpu.dot_dimension_numbers<[1], [0], [0], [1], [0, 0, 1, 1], [], []>} : vector<64x128xbf16>, vector<128x128xbf16>, vector<64x128xf32> -> vector<64x128xf32>
    %596 = arith.addf %570, %595 : vector<64x128xf32>
    %c1_508 = arith.constant 1 : index
    %c2_509 = arith.constant 2 : index
    %c1_510 = arith.constant 1 : index
    %c0_511 = arith.constant 0 : index
    %597 = vector.load %arg7[%c1_508, %c2_509, %c1_510, %c0_511] : memref<4x10x16x128xf32, #tpu.memory_space<vmem>>, vector<1x8x8x128xf32>
    %598 = vector.shape_cast %597 : vector<1x8x8x128xf32> to vector<8x8x128xf32>
    %599 = vector.shape_cast %598 : vector<8x8x128xf32> to vector<64x128xf32>
    %600 = arith.truncf %599 : vector<64x128xf32> to vector<64x128xbf16>
    %cst_512 = arith.constant dense<0.000000e+00> : vector<64x128xf32>
    %601 = tpu.matmul %600, %590, %cst_512 {dimension_numbers = #tpu.dot_dimension_numbers<[1], [0], [0], [1], [0, 0, 1, 1], [], []>} : vector<64x128xbf16>, vector<128x128xbf16>, vector<64x128xf32> -> vector<64x128xf32>
    %602 = arith.addf %576, %601 : vector<64x128xf32>
    %c2_513 = arith.constant 2 : index
    %c2_514 = arith.constant 2 : index
    %c1_515 = arith.constant 1 : index
    %c0_516 = arith.constant 0 : index
    %603 = vector.load %arg7[%c2_513, %c2_514, %c1_515, %c0_516] : memref<4x10x16x128xf32, #tpu.memory_space<vmem>>, vector<1x8x8x128xf32>
    %604 = vector.shape_cast %603 : vector<1x8x8x128xf32> to vector<8x8x128xf32>
    %605 = vector.shape_cast %604 : vector<8x8x128xf32> to vector<64x128xf32>
    %606 = arith.truncf %605 : vector<64x128xf32> to vector<64x128xbf16>
    %cst_517 = arith.constant dense<0.000000e+00> : vector<64x128xf32>
    %607 = tpu.matmul %606, %590, %cst_517 {dimension_numbers = #tpu.dot_dimension_numbers<[1], [0], [0], [1], [0, 0, 1, 1], [], []>} : vector<64x128xbf16>, vector<128x128xbf16>, vector<64x128xf32> -> vector<64x128xf32>
    %608 = arith.addf %582, %607 : vector<64x128xf32>
    %c3_518 = arith.constant 3 : index
    %c2_519 = arith.constant 2 : index
    %c1_520 = arith.constant 1 : index
    %c0_521 = arith.constant 0 : index
    %609 = vector.load %arg7[%c3_518, %c2_519, %c1_520, %c0_521] : memref<4x10x16x128xf32, #tpu.memory_space<vmem>>, vector<1x8x8x128xf32>
    %610 = vector.shape_cast %609 : vector<1x8x8x128xf32> to vector<8x8x128xf32>
    %611 = vector.shape_cast %610 : vector<8x8x128xf32> to vector<64x128xf32>
    %612 = arith.truncf %611 : vector<64x128xf32> to vector<64x128xbf16>
    %cst_522 = arith.constant dense<0.000000e+00> : vector<64x128xf32>
    %613 = tpu.matmul %612, %590, %cst_522 {dimension_numbers = #tpu.dot_dimension_numbers<[1], [0], [0], [1], [0, 0, 1, 1], [], []>} : vector<64x128xbf16>, vector<128x128xbf16>, vector<64x128xf32> -> vector<64x128xf32>
    %614 = arith.addf %588, %613 : vector<64x128xf32>
    %c23 = arith.constant 23 : index
    %c0_523 = arith.constant 0 : index
    %c0_524 = arith.constant 0 : index
    %615 = vector.load %arg4[%c23, %c0_523, %c0_524] : memref<25x128x128xbf16, #tpu.memory_space<vmem>>, vector<1x128x128xbf16>
    %616 = vector.shape_cast %615 : vector<1x128x128xbf16> to vector<128x128xbf16>
    %c1_525 = arith.constant 1 : index
    %c2_526 = arith.constant 2 : index
    %c1_527 = arith.constant 1 : index
    %c0_528 = arith.constant 0 : index
    %617 = vector.load %arg7[%c1_525, %c2_526, %c1_527, %c0_528] : memref<4x10x16x128xf32, #tpu.memory_space<vmem>>, vector<1x8x8x128xf32>
    %618 = vector.shape_cast %617 : vector<1x8x8x128xf32> to vector<8x8x128xf32>
    %619 = vector.shape_cast %618 : vector<8x8x128xf32> to vector<64x128xf32>
    %620 = arith.truncf %619 : vector<64x128xf32> to vector<64x128xbf16>
    %cst_529 = arith.constant dense<0.000000e+00> : vector<64x128xf32>
    %621 = tpu.matmul %620, %616, %cst_529 {dimension_numbers = #tpu.dot_dimension_numbers<[1], [0], [0], [1], [0, 0, 1, 1], [], []>} : vector<64x128xbf16>, vector<128x128xbf16>, vector<64x128xf32> -> vector<64x128xf32>
    %622 = arith.addf %596, %621 : vector<64x128xf32>
    %c0_530 = arith.constant 0 : index
    %c2_531 = arith.constant 2 : index
    %c2_532 = arith.constant 2 : index
    %c0_533 = arith.constant 0 : index
    %623 = vector.load %arg7[%c0_530, %c2_531, %c2_532, %c0_533] : memref<4x10x16x128xf32, #tpu.memory_space<vmem>>, vector<1x8x8x128xf32>
    %624 = vector.shape_cast %623 : vector<1x8x8x128xf32> to vector<8x8x128xf32>
    %625 = vector.shape_cast %624 : vector<8x8x128xf32> to vector<64x128xf32>
    %626 = arith.truncf %625 : vector<64x128xf32> to vector<64x128xbf16>
    %cst_534 = arith.constant dense<0.000000e+00> : vector<64x128xf32>
    %627 = tpu.matmul %626, %616, %cst_534 {dimension_numbers = #tpu.dot_dimension_numbers<[1], [0], [0], [1], [0, 0, 1, 1], [], []>} : vector<64x128xbf16>, vector<128x128xbf16>, vector<64x128xf32> -> vector<64x128xf32>
    %628 = arith.addf %602, %627 : vector<64x128xf32>
    %c3_535 = arith.constant 3 : index
    %c2_536 = arith.constant 2 : index
    %c1_537 = arith.constant 1 : index
    %c0_538 = arith.constant 0 : index
    %629 = vector.load %arg7[%c3_535, %c2_536, %c1_537, %c0_538] : memref<4x10x16x128xf32, #tpu.memory_space<vmem>>, vector<1x8x8x128xf32>
    %630 = vector.shape_cast %629 : vector<1x8x8x128xf32> to vector<8x8x128xf32>
    %631 = vector.shape_cast %630 : vector<8x8x128xf32> to vector<64x128xf32>
    %632 = arith.truncf %631 : vector<64x128xf32> to vector<64x128xbf16>
    %cst_539 = arith.constant dense<0.000000e+00> : vector<64x128xf32>
    %633 = tpu.matmul %632, %616, %cst_539 {dimension_numbers = #tpu.dot_dimension_numbers<[1], [0], [0], [1], [0, 0, 1, 1], [], []>} : vector<64x128xbf16>, vector<128x128xbf16>, vector<64x128xf32> -> vector<64x128xf32>
    %634 = arith.addf %608, %633 : vector<64x128xf32>
    %c2_540 = arith.constant 2 : index
    %c2_541 = arith.constant 2 : index
    %c2_542 = arith.constant 2 : index
    %c0_543 = arith.constant 0 : index
    %635 = vector.load %arg7[%c2_540, %c2_541, %c2_542, %c0_543] : memref<4x10x16x128xf32, #tpu.memory_space<vmem>>, vector<1x8x8x128xf32>
    %636 = vector.shape_cast %635 : vector<1x8x8x128xf32> to vector<8x8x128xf32>
    %637 = vector.shape_cast %636 : vector<8x8x128xf32> to vector<64x128xf32>
    %638 = arith.truncf %637 : vector<64x128xf32> to vector<64x128xbf16>
    %cst_544 = arith.constant dense<0.000000e+00> : vector<64x128xf32>
    %639 = tpu.matmul %638, %616, %cst_544 {dimension_numbers = #tpu.dot_dimension_numbers<[1], [0], [0], [1], [0, 0, 1, 1], [], []>} : vector<64x128xbf16>, vector<128x128xbf16>, vector<64x128xf32> -> vector<64x128xf32>
    %640 = arith.addf %614, %639 : vector<64x128xf32>
    %c24 = arith.constant 24 : index
    %c0_545 = arith.constant 0 : index
    %c0_546 = arith.constant 0 : index
    %641 = vector.load %arg4[%c24, %c0_545, %c0_546] : memref<25x128x128xbf16, #tpu.memory_space<vmem>>, vector<1x128x128xbf16>
    %642 = vector.shape_cast %641 : vector<1x128x128xbf16> to vector<128x128xbf16>
    %c0_547 = arith.constant 0 : index
    %c2_548 = arith.constant 2 : index
    %c2_549 = arith.constant 2 : index
    %c0_550 = arith.constant 0 : index
    %643 = vector.load %arg7[%c0_547, %c2_548, %c2_549, %c0_550] : memref<4x10x16x128xf32, #tpu.memory_space<vmem>>, vector<1x8x8x128xf32>
    %644 = vector.shape_cast %643 : vector<1x8x8x128xf32> to vector<8x8x128xf32>
    %645 = vector.shape_cast %644 : vector<8x8x128xf32> to vector<64x128xf32>
    %646 = arith.truncf %645 : vector<64x128xf32> to vector<64x128xbf16>
    %cst_551 = arith.constant dense<0.000000e+00> : vector<64x128xf32>
    %647 = tpu.matmul %646, %642, %cst_551 {dimension_numbers = #tpu.dot_dimension_numbers<[1], [0], [0], [1], [0, 0, 1, 1], [], []>} : vector<64x128xbf16>, vector<128x128xbf16>, vector<64x128xf32> -> vector<64x128xf32>
    %648 = arith.addf %622, %647 : vector<64x128xf32>
    %c1_552 = arith.constant 1 : index
    %c2_553 = arith.constant 2 : index
    %c2_554 = arith.constant 2 : index
    %c0_555 = arith.constant 0 : index
    %649 = vector.load %arg7[%c1_552, %c2_553, %c2_554, %c0_555] : memref<4x10x16x128xf32, #tpu.memory_space<vmem>>, vector<1x8x8x128xf32>
    %650 = vector.shape_cast %649 : vector<1x8x8x128xf32> to vector<8x8x128xf32>
    %651 = vector.shape_cast %650 : vector<8x8x128xf32> to vector<64x128xf32>
    %652 = arith.truncf %651 : vector<64x128xf32> to vector<64x128xbf16>
    %cst_556 = arith.constant dense<0.000000e+00> : vector<64x128xf32>
    %653 = tpu.matmul %652, %642, %cst_556 {dimension_numbers = #tpu.dot_dimension_numbers<[1], [0], [0], [1], [0, 0, 1, 1], [], []>} : vector<64x128xbf16>, vector<128x128xbf16>, vector<64x128xf32> -> vector<64x128xf32>
    %654 = arith.addf %628, %653 : vector<64x128xf32>
    %c2_557 = arith.constant 2 : index
    %c2_558 = arith.constant 2 : index
    %c2_559 = arith.constant 2 : index
    %c0_560 = arith.constant 0 : index
    %655 = vector.load %arg7[%c2_557, %c2_558, %c2_559, %c0_560] : memref<4x10x16x128xf32, #tpu.memory_space<vmem>>, vector<1x8x8x128xf32>
    %656 = vector.shape_cast %655 : vector<1x8x8x128xf32> to vector<8x8x128xf32>
    %657 = vector.shape_cast %656 : vector<8x8x128xf32> to vector<64x128xf32>
    %658 = arith.truncf %657 : vector<64x128xf32> to vector<64x128xbf16>
    %cst_561 = arith.constant dense<0.000000e+00> : vector<64x128xf32>
    %659 = tpu.matmul %658, %642, %cst_561 {dimension_numbers = #tpu.dot_dimension_numbers<[1], [0], [0], [1], [0, 0, 1, 1], [], []>} : vector<64x128xbf16>, vector<128x128xbf16>, vector<64x128xf32> -> vector<64x128xf32>
    %660 = arith.addf %634, %659 : vector<64x128xf32>
    %c3_562 = arith.constant 3 : index
    %c2_563 = arith.constant 2 : index
    %c2_564 = arith.constant 2 : index
    %c0_565 = arith.constant 0 : index
    %661 = vector.load %arg7[%c3_562, %c2_563, %c2_564, %c0_565] : memref<4x10x16x128xf32, #tpu.memory_space<vmem>>, vector<1x8x8x128xf32>
    %662 = vector.shape_cast %661 : vector<1x8x8x128xf32> to vector<8x8x128xf32>
    %663 = vector.shape_cast %662 : vector<8x8x128xf32> to vector<64x128xf32>
    %664 = arith.truncf %663 : vector<64x128xf32> to vector<64x128xbf16>
    %cst_566 = arith.constant dense<0.000000e+00> : vector<64x128xf32>
    %665 = tpu.matmul %664, %642, %cst_566 {dimension_numbers = #tpu.dot_dimension_numbers<[1], [0], [0], [1], [0, 0, 1, 1], [], []>} : vector<64x128xbf16>, vector<128x128xbf16>, vector<64x128xf32> -> vector<64x128xf32>
    %666 = arith.addf %640, %665 : vector<64x128xf32>
    %667 = arith.maximumf %648, %654 : vector<64x128xf32>
    %668 = arith.maximumf %660, %666 : vector<64x128xf32>
    %669 = arith.maximumf %667, %668 : vector<64x128xf32>
    %c0_567 = arith.constant 0 : index
    %c0_568 = arith.constant 0 : index
    %670 = vector.load %arg5[%c0_567, %c0_568] : memref<1x128xf32, #tpu.memory_space<vmem>>, vector<1x128xf32>
    %671 = vector.broadcast %670 : vector<1x128xf32> to vector<64x128xf32>
    %672 = arith.addf %669, %671 : vector<64x128xf32>
    %cst_569 = arith.constant 0.000000e+00 : f32
    %673 = vector.broadcast %cst_569 : f32 to vector<64x128xf32>
    %674 = arith.maximumf %672, %673 : vector<64x128xf32>
    %675 = arith.truncf %674 : vector<64x128xf32> to vector<64x128xbf16>
    %c0_570 = arith.constant 0 : index
    %c0_571 = arith.constant 0 : index
    %676 = vector.load %arg6[%c0_570, %c0_571] : memref<64x128xbf16, #tpu.memory_space<vmem>>, vector<64x128xbf16>
    tpu.vector_store %arg6[%c0_570, %c0_571], %675 {strides = array<i32>} : memref<64x128xbf16, #tpu.memory_space<vmem>>, vector<64x128xbf16>,
    return
  }
  func.func @transform_0(%arg0: i32) -> (i32, i32, i32) {
    %c0_i32 = arith.constant 0 : i32
    %c0_i32_0 = arith.constant 0 : i32
    %c0_i32_1 = arith.constant 0 : i32
    return %c0_i32, %arg0, %c0_i32_0 : i32, i32, i32
  }
  func.func @transform_1(%arg0: i32) -> (i32, i32) {
    %c0_i32 = arith.constant 0 : i32
    %c0_i32_0 = arith.constant 0 : i32
    %c0_i32_1 = arith.constant 0 : i32
    return %c0_i32, %c0_i32_0 : i32, i32
  }
  func.func @transform_2(%arg0: i32) -> (i32, i32) {
    %c0_i32 = arith.constant 0 : i32
    %c0_i32_0 = arith.constant 0 : i32
    %c0_i32_1 = arith.constant 0 : i32
    return %c0_i32, %c0_i32_0 : i32, i32
  }
  func.func @transform_3(%arg0: i32) -> (i32, i32, i32) {
    %c0_i32 = arith.constant 0 : i32
    %c0_i32_0 = arith.constant 0 : i32
    %c0_i32_1 = arith.constant 0 : i32
    %c0_i32_2 = arith.constant 0 : i32
    return %c0_i32, %c0_i32_0, %c0_i32_1 : i32, i32, i32
  }
  func.func @transform_4(%arg0: i32) -> (i32, i32) {
    %c0_i32 = arith.constant 0 : i32
    %c0_i32_0 = arith.constant 0 : i32
    %c0_i32_1 = arith.constant 0 : i32
    return %c0_i32, %c0_i32_0 : i32, i32
  }
  func.func @transform_5(%arg0: i32) -> (i32, i32) {
    %c0_i32 = arith.constant 0 : i32
    %c0_i32_0 = arith.constant 0 : i32
    return %arg0, %c0_i32 : i32, i32
  }
}

module attributes {stable_mosaic.version = 11 : i64} {
  func.func @conv3_head_kernel(%arg0: memref<32x3000xbf16, #tpu.memory_space<vmem>>, %arg1: memref<3000x128xbf16, #tpu.memory_space<vmem>>, %arg2: memref<1x128xf32, #tpu.memory_space<vmem>>, %arg3: memref<4x128x128xbf16, #tpu.memory_space<vmem>>, %arg4: memref<1x128xf32, #tpu.memory_space<vmem>>, %arg5: memref<128x128xbf16, #tpu.memory_space<vmem>>, %arg6: memref<1x128xf32, #tpu.memory_space<vmem>>, %arg7: memref<2x128xf32, #tpu.memory_space<vmem>>, %arg8: memref<8x128xf32, #tpu.memory_space<vmem>>) attributes {dimension_semantics = [], scalar_prefetch = 0 : i64, scratch_operands = 1 : i64, tpu.core_type = #tpu.core_type<tc>} {
    %c0 = arith.constant 0 : index
    %c0_0 = arith.constant 0 : index
    %0 = vector.load %arg0[%c0, %c0_0] : memref<32x3000xbf16, #tpu.memory_space<vmem>>, vector<32x3000xbf16>
    %c0_1 = arith.constant 0 : index
    %c0_2 = arith.constant 0 : index
    %1 = vector.load %arg1[%c0_1, %c0_2] : memref<3000x128xbf16, #tpu.memory_space<vmem>>, vector<3000x128xbf16>
    %cst = arith.constant dense<0.000000e+00> : vector<32x128xf32>
    %2 = tpu.matmul %0, %1, %cst {dimension_numbers = #tpu.dot_dimension_numbers<[1], [0], [0], [1], [0, 0, 1, 1], [], []>} : vector<32x3000xbf16>, vector<3000x128xbf16>, vector<32x128xf32> -> vector<32x128xf32>
    %3 = vector.shape_cast %2 : vector<32x128xf32> to vector<4x8x128xf32>
    %cst_3 = arith.constant dense<0xFF800000> : vector<8x128xf32>
    %4 = vector.multi_reduction <maximumf>, %3, %cst_3 [0] : vector<4x8x128xf32> to vector<8x128xf32>
    %c0_4 = arith.constant 0 : index
    %c0_5 = arith.constant 0 : index
    %5 = vector.load %arg2[%c0_4, %c0_5] : memref<1x128xf32, #tpu.memory_space<vmem>>, vector<1x128xf32>
    %6 = vector.broadcast %5 : vector<1x128xf32> to vector<8x128xf32>
    %7 = arith.addf %4, %6 : vector<8x128xf32>
    %cst_6 = arith.constant 0.000000e+00 : f32
    %8 = vector.broadcast %cst_6 : f32 to vector<8x128xf32>
    %9 = arith.maximumf %7, %8 : vector<8x128xf32>
    %c0_7 = arith.constant 0 : index
    %c0_8 = arith.constant 0 : index
    %10 = vector.load %arg8[%c0_7, %c0_8] : memref<8x128xf32, #tpu.memory_space<vmem>>, vector<8x128xf32>
    tpu.vector_store %arg8[%c0_7, %c0_8], %9 {strides = array<i32>} : memref<8x128xf32, #tpu.memory_space<vmem>>, vector<8x128xf32>,
    %cst_9 = arith.constant 0.000000e+00 : f32
    %11 = vector.broadcast %cst_9 : f32 to vector<2x128xf32>
    %c0_10 = arith.constant 0 : index
    %c0_11 = arith.constant 0 : index
    %12 = vector.load %arg8[%c0_10, %c0_11] : memref<8x128xf32, #tpu.memory_space<vmem>>, vector<2x128xf32>
    %13 = arith.truncf %12 : vector<2x128xf32> to vector<2x128xbf16>
    %c0_12 = arith.constant 0 : index
    %c0_13 = arith.constant 0 : index
    %c0_14 = arith.constant 0 : index
    %14 = vector.load %arg3[%c0_12, %c0_13, %c0_14] : memref<4x128x128xbf16, #tpu.memory_space<vmem>>, vector<1x128x128xbf16>
    %15 = vector.shape_cast %14 : vector<1x128x128xbf16> to vector<128x128xbf16>
    %cst_15 = arith.constant dense<0.000000e+00> : vector<2x128xf32>
    %16 = tpu.matmul %13, %15, %cst_15 {dimension_numbers = #tpu.dot_dimension_numbers<[1], [0], [0], [1], [0, 0, 1, 1], [], []>} : vector<2x128xbf16>, vector<128x128xbf16>, vector<2x128xf32> -> vector<2x128xf32>
    %17 = arith.addf %11, %16 : vector<2x128xf32>
    %c2 = arith.constant 2 : index
    %c0_16 = arith.constant 0 : index
    %18 = vector.load %arg8[%c2, %c0_16] : memref<8x128xf32, #tpu.memory_space<vmem>>, vector<2x128xf32>
    %19 = arith.truncf %18 : vector<2x128xf32> to vector<2x128xbf16>
    %c1 = arith.constant 1 : index
    %c0_17 = arith.constant 0 : index
    %c0_18 = arith.constant 0 : index
    %20 = vector.load %arg3[%c1, %c0_17, %c0_18] : memref<4x128x128xbf16, #tpu.memory_space<vmem>>, vector<1x128x128xbf16>
    %21 = vector.shape_cast %20 : vector<1x128x128xbf16> to vector<128x128xbf16>
    %cst_19 = arith.constant dense<0.000000e+00> : vector<2x128xf32>
    %22 = tpu.matmul %19, %21, %cst_19 {dimension_numbers = #tpu.dot_dimension_numbers<[1], [0], [0], [1], [0, 0, 1, 1], [], []>} : vector<2x128xbf16>, vector<128x128xbf16>, vector<2x128xf32> -> vector<2x128xf32>
    %23 = arith.addf %17, %22 : vector<2x128xf32>
    %c4 = arith.constant 4 : index
    %c0_20 = arith.constant 0 : index
    %24 = vector.load %arg8[%c4, %c0_20] : memref<8x128xf32, #tpu.memory_space<vmem>>, vector<2x128xf32>
    %25 = arith.truncf %24 : vector<2x128xf32> to vector<2x128xbf16>
    %c2_21 = arith.constant 2 : index
    %c0_22 = arith.constant 0 : index
    %c0_23 = arith.constant 0 : index
    %26 = vector.load %arg3[%c2_21, %c0_22, %c0_23] : memref<4x128x128xbf16, #tpu.memory_space<vmem>>, vector<1x128x128xbf16>
    %27 = vector.shape_cast %26 : vector<1x128x128xbf16> to vector<128x128xbf16>
    %cst_24 = arith.constant dense<0.000000e+00> : vector<2x128xf32>
    %28 = tpu.matmul %25, %27, %cst_24 {dimension_numbers = #tpu.dot_dimension_numbers<[1], [0], [0], [1], [0, 0, 1, 1], [], []>} : vector<2x128xbf16>, vector<128x128xbf16>, vector<2x128xf32> -> vector<2x128xf32>
    %29 = arith.addf %23, %28 : vector<2x128xf32>
    %c6 = arith.constant 6 : index
    %c0_25 = arith.constant 0 : index
    %30 = vector.load %arg8[%c6, %c0_25] : memref<8x128xf32, #tpu.memory_space<vmem>>, vector<2x128xf32>
    %31 = arith.truncf %30 : vector<2x128xf32> to vector<2x128xbf16>
    %c3 = arith.constant 3 : index
    %c0_26 = arith.constant 0 : index
    %c0_27 = arith.constant 0 : index
    %32 = vector.load %arg3[%c3, %c0_26, %c0_27] : memref<4x128x128xbf16, #tpu.memory_space<vmem>>, vector<1x128x128xbf16>
    %33 = vector.shape_cast %32 : vector<1x128x128xbf16> to vector<128x128xbf16>
    %cst_28 = arith.constant dense<0.000000e+00> : vector<2x128xf32>
    %34 = tpu.matmul %31, %33, %cst_28 {dimension_numbers = #tpu.dot_dimension_numbers<[1], [0], [0], [1], [0, 0, 1, 1], [], []>} : vector<2x128xbf16>, vector<128x128xbf16>, vector<2x128xf32> -> vector<2x128xf32>
    %35 = arith.addf %29, %34 : vector<2x128xf32>
    %c0_29 = arith.constant 0 : index
    %c0_30 = arith.constant 0 : index
    %36 = vector.load %arg4[%c0_29, %c0_30] : memref<1x128xf32, #tpu.memory_space<vmem>>, vector<1x128xf32>
    %37 = vector.broadcast %36 : vector<1x128xf32> to vector<2x128xf32>
    %38 = arith.addf %35, %37 : vector<2x128xf32>
    %cst_31 = arith.constant 0.000000e+00 : f32
    %39 = vector.broadcast %cst_31 : f32 to vector<2x128xf32>
    %40 = arith.maximumf %38, %39 : vector<2x128xf32>
    %41 = arith.truncf %40 : vector<2x128xf32> to vector<2x128xbf16>
    %c0_32 = arith.constant 0 : index
    %c0_33 = arith.constant 0 : index
    %42 = vector.load %arg5[%c0_32, %c0_33] : memref<128x128xbf16, #tpu.memory_space<vmem>>, vector<128x128xbf16>
    %cst_34 = arith.constant dense<0.000000e+00> : vector<2x128xf32>
    %43 = tpu.matmul %41, %42, %cst_34 {dimension_numbers = #tpu.dot_dimension_numbers<[1], [0], [0], [1], [0, 0, 1, 1], [], []>} : vector<2x128xbf16>, vector<128x128xbf16>, vector<2x128xf32> -> vector<2x128xf32>
    %c0_35 = arith.constant 0 : index
    %c0_36 = arith.constant 0 : index
    %44 = vector.load %arg6[%c0_35, %c0_36] : memref<1x128xf32, #tpu.memory_space<vmem>>, vector<1x128xf32>
    %45 = vector.broadcast %44 : vector<1x128xf32> to vector<2x128xf32>
    %46 = arith.addf %43, %45 : vector<2x128xf32>
    %cst_37 = arith.constant 0.000000e+00 : f32
    %47 = vector.broadcast %cst_37 : f32 to vector<2x128xf32>
    %48 = arith.maximumf %46, %47 : vector<2x128xf32>
    %cst_38 = arith.constant dense<0xFF800000> : vector<2xf32>
    %49 = vector.multi_reduction <maximumf>, %48, %cst_38 [1] : vector<2x128xf32> to vector<2xf32>
    %50 = vector.shape_cast %49 : vector<2xf32> to vector<2x1xf32>
    %51 = tpu.iota {dimensions = array<i32: 1>} : vector<2x128xi32>
    %c3_i32 = arith.constant 3 : i32
    %52 = vector.broadcast %c3_i32 : i32 to vector<2x128xi32>
    %53 = arith.cmpi slt, %51, %52 : vector<2x128xi32>
    %54 = vector.broadcast %50 : vector<2x1xf32> to vector<2x128xf32>
    %55 = arith.subf %48, %54 : vector<2x128xf32>
    %56 = math.exp %55 : vector<2x128xf32>
    %cst_39 = arith.constant 0.000000e+00 : f32
    %57 = vector.broadcast %cst_39 : f32 to vector<2x128xf32>
    %58 = arith.select %53, %56, %57 : vector<2x128xi1>, vector<2x128xf32>
    %cst_40 = arith.constant dense<0.000000e+00> : vector<2xf32>
    %59 = vector.multi_reduction <add>, %58, %cst_40 [1] : vector<2x128xf32> to vector<2xf32>
    %60 = vector.shape_cast %59 : vector<2xf32> to vector<2x1xf32>
    %61 = tpu.reciprocal %60 {approx = true} : vector<2x1xf32> -> vector<2x1xf32>
    %62 = vector.broadcast %61 : vector<2x1xf32> to vector<2x128xf32>
    %63 = arith.mulf %58, %62 : vector<2x128xf32>
    %c0_41 = arith.constant 0 : index
    %c0_42 = arith.constant 0 : index
    %64 = vector.load %arg7[%c0_41, %c0_42] : memref<2x128xf32, #tpu.memory_space<vmem>>, vector<2x128xf32>
    tpu.vector_store %arg7[%c0_41, %c0_42], %63 {strides = array<i32>} : memref<2x128xf32, #tpu.memory_space<vmem>>, vector<2x128xf32>,
    return
  }
}

</mosaic_0001>

<bundles_post_ra>
// kernel: radu_g_forward.3
= control target key start
LH: loop header
LB: loop body
LE: loop exit
PB: predicated region body
PF: predicated region fallthrough
CT: control target
= control target key end

     0   :  { %vm1821_vm0 = vcmask 1043456   ;;  %vm1814_vm1 = vcmask 457728   ;;  %s5013_s0 = inlined_call_operand.vmem [shape: bf16[32,3000], index: 0, kind: input, shape index: {}]   ;;  %s5014_s1 = inlined_call_operand.vmem [shape: bf16[3000,128], index: 1, kind: input, shape index: {}]   ;;  %s5015_s2 = inlined_call_operand.vmem [shape: f32[1,128], index: 2, kind: input, shape index: {}]   ;;  %s5016_s3 = inlined_call_operand.vmem [shape: bf16[4,128,128], index: 3, kind: input, shape index: {}]   ;;  %s5017_s4 = inlined_call_operand.vmem [shape: f32[1,128], index: 4, kind: input, shape index: {}]   ;;  %s5018_s5 = inlined_call_operand.vmem [shape: bf16[128,128], index: 5, kind: input, shape index: {}]   ;;  %s5019_s6 = inlined_call_operand.vmem [shape: f32[1,128], index: 6, kind: input, shape index: {}]   ;;  %s5020_s7 = inlined_call_operand.hbm [shape: f32[2,128], index: 7, kind: output, shape index: {}]  }
   0x1   :  { %v3794_v0 = vld [vmem:[%s5014_s1 + $0x40] sm:$0xff]   ;;  %v3798_v4 = vld [vmem:[%s5014_s1 + $0x48] sm:$0xff]   ;;  %v3802_v8 = vld [vmem:[%s5014_s1 + $0x50] sm:$0xff]  }
   0x2   :  { %v3795_v1 = vld [vmem:[%s5014_s1 + $0xc0] sm:$0xff]   ;;  %3337 = vmatprep.subr.bf16.mxu0 %v3794_v0  ;;  %v3799_v5 = vld [vmem:[%s5014_s1 + $0xc8] sm:$0xff]   ;;  %v3803_v9 = vld [vmem:[%s5014_s1 + $0xd0] sm:$0xff]  }
   0x3   :  { %v3796_v2 = vld [vmem:[%s5014_s1] sm:$0xff]   ;;  %3365 = vmatprep.subr.bf16.mxu1 %v3795_v1  ;;  %v3800_v6 = vld [vmem:[%s5014_s1 + $0x8] sm:$0xff]   ;;  %v3804_v10 = vld [vmem:[%s5014_s1 + $0x10] sm:$0xff]  }
   0x4   :  { %v3797_v3 = vld [vmem:[%s5014_s1 + $0x80] sm:$0xff]   ;;  %3338 = vmatpush3.bf16.msra.mxu0 %v3796_v2  ;;  %v3801_v7 = vld [vmem:[%s5014_s1 + $0x88] sm:$0xff]   ;;  %v3805_v11 = vld [vmem:[%s5014_s1 + $0x90] sm:$0xff]  }
   0x5   :  { %3366 = vmatpush3.bf16.msra.mxu1 %v3797_v3  ;;  %3339 = vmatprep.subr.bf16.mxu0 %v3798_v4  ;;  %v3806_v12 = vld [vmem:[%s5014_s1 + $0x58] sm:$0xff]   ;;  %v3810_v16 = vld [vmem:[%s5014_s1 + $0x60] sm:$0xff]   ;;  %v3814_v20 = vld [vmem:[%s5014_s1 + $0x68] sm:$0xff]  }
   0x6   :  { %3367 = vmatprep.subr.bf16.mxu1 %v3799_v5  ;;  %v3807_v13 = vld [vmem:[%s5014_s1 + $0xd8] sm:$0xff]   ;;  %v3811_v17 = vld [vmem:[%s5014_s1 + $0xe0] sm:$0xff]   ;;  %v3815_v21 = vld [vmem:[%s5014_s1 + $0xe8] sm:$0xff]  }
   0x7   :  { %v3808_v14 = vld [vmem:[%s5014_s1 + $0x18] sm:$0xff]   ;;  %v3812_v18 = vld [vmem:[%s5014_s1 + $0x20] sm:$0xff]   ;;  %v3816_v22 = vld [vmem:[%s5014_s1 + $0x28] sm:$0xff]  }
   0x8   :  { %3340 = vmatpush3.bf16.msra.mxu0 %v3800_v6  ;;  %v3809_v15 = vld [vmem:[%s5014_s1 + $0x98] sm:$0xff]   ;;  %v3813_v19 = vld [vmem:[%s5014_s1 + $0xa0] sm:$0xff]   ;;  %v3817_v23 = vld [vmem:[%s5014_s1 + $0xa8] sm:$0xff]  }
   0x9   :  { %3368 = vmatpush3.bf16.msra.mxu1 %v3801_v7  ;;  %3341 = vmatprep.subr.bf16.mxu0 %v3802_v8  ;;  %v3818_v24 = vld [vmem:[%s5014_s1 + $0x70] sm:$0xff]   ;;  %v3822_v28 = vld [vmem:[%s5014_s1 + $0x78] sm:$0xff]   ;;  %v28_v32 = vld [vmem:[%s5013_s0] sm:$0xff] }
   0xa   :  { %3369 = vmatprep.subr.bf16.mxu1 %v3803_v9  ;;  %v3819_v25 = vld [vmem:[%s5014_s1 + $0xf0] sm:$0xff]   ;;  %v3823_v29 = vld [vmem:[%s5014_s1 + $0xf8] sm:$0xff]   ;;  %v40_v33 = vld [vmem:[%s5013_s0 + $0x60] sm:$0xff] }
   0xb   :  { %v3820_v26 = vld [vmem:[%s5014_s1 + $0x30] sm:$0xff]   ;;  %v3824_v30 = vld [vmem:[%s5014_s1 + $0x38] sm:$0xff]   ;;  %v29_v34 = vld [vmem:[%s5013_s0 + $0x8] sm:$0xff]  ;;  %v3008_v35 = vcombine.low %v28_v32, %v40_v33  ;;  %v3009_v36 = vcombine.high %v28_v32, %v40_v33 }
   0xc   :  { %3342 = vmatpush3.bf16.msra.mxu0 %v3804_v10  ;;  %v3821_v27 = vld [vmem:[%s5014_s1 + $0xb0] sm:$0xff]   ;;  %v3825_v31 = vld [vmem:[%s5014_s1 + $0xb8] sm:$0xff]   ;;  %v41_v37 = vld [vmem:[%s5013_s0 + $0x68] sm:$0xff] }
   0xd   :  { %3370 = vmatpush3.bf16.msra.mxu1 %v3805_v11  ;;  %3343 = vmatprep.subr.bf16.mxu0 %v3806_v12  ;;  %v3010_v38 = vcombine.low %v29_v34, %v41_v37  ;;  %v3011_v39 = vcombine.high %v29_v34, %v41_v37  ;;  %v3826_v40 = vld [vmem:[%s5014_s1 + $0x140] sm:$0xff]   ;;  %v3830_v44 = vld [vmem:[%s5014_s1 + $0x148] sm:$0xff]   ;;  %v3834_v48 = vld [vmem:[%s5014_s1 + $0x150] sm:$0xff]  }
   0xe   :  { %3371 = vmatprep.subr.bf16.mxu1 %v3807_v13  ;;  %1857 = vmatprep.mubr.bf16.mxu0 %v3009_v36  ;;  %v3827_v41 = vld [vmem:[%s5014_s1 + $0x1c0] sm:$0xff]   ;;  %v3831_v45 = vld [vmem:[%s5014_s1 + $0x1c8] sm:$0xff]   ;;  %v3835_v49 = vld [vmem:[%s5014_s1 + $0x1d0] sm:$0xff]  }
   0xf   :  { %1906 = vmatprep.mubr.bf16.mxu1 %v3011_v39  ;;  %v3828_v42 = vld [vmem:[%s5014_s1 + $0x100] sm:$0xff]   ;;  %v3832_v46 = vld [vmem:[%s5014_s1 + $0x108] sm:$0xff]   ;;  %v3836_v50 = vld [vmem:[%s5014_s1 + $0x110] sm:$0xff]  }
  0x10   :  { %3344 = vmatpush3.bf16.msra.mxu0 %v3808_v14  ;;  %v3829_v43 = vld [vmem:[%s5014_s1 + $0x180] sm:$0xff]   ;;  %v3833_v47 = vld [vmem:[%s5014_s1 + $0x188] sm:$0xff]   ;;  %v3837_v51 = vld [vmem:[%s5014_s1 + $0x190] sm:$0xff]  }
  0x11   :  { %3372 = vmatpush3.bf16.msra.mxu1 %v3809_v15  ;;  %3345 = vmatprep.subr.bf16.mxu0 %v3810_v16  ;;  %v3838_v52 = vld [vmem:[%s5014_s1 + $0x158] sm:$0xff]   ;;  %v3842_v56 = vld [vmem:[%s5014_s1 + $0x160] sm:$0xff]   ;;  %v3846_v60 = vld [vmem:[%s5014_s1 + $0x168] sm:$0xff]  }
  0x12   :  { %3373 = vmatprep.subr.bf16.mxu1 %v3811_v17  ;;  %v3839_v53 = vld [vmem:[%s5014_s1 + $0x1d8] sm:$0xff]   ;;  %v3843_v57 = vld [vmem:[%s5014_s1 + $0x1e0] sm:$0xff]   ;;  %v3847_v61 = vld [vmem:[%s5014_s1 + $0x1e8] sm:$0xff]  }
  0x13   :  { %v3840_v54 = vld [vmem:[%s5014_s1 + $0x118] sm:$0xff]   ;;  %v3844_v58 = vld [vmem:[%s5014_s1 + $0x120] sm:$0xff]   ;;  %v53_v1 = vld [vmem:[%s5013_s0 + $0xc8] sm:$0xff] }
  0x14   :  { %3346 = vmatpush3.bf16.msra.mxu0 %v3812_v18  ;;  %v3841_v55 = vld [vmem:[%s5014_s1 + $0x198] sm:$0xff]   ;;  %v3845_v59 = vld [vmem:[%s5014_s1 + $0x1a0] sm:$0xff]   ;;  %v65_v2 = vld [vmem:[%s5013_s0 + $0x128] sm:$0xff] }
  0x15   :  { %3374 = vmatpush3.bf16.msra.mxu1 %v3813_v19  ;;  %3347 = vmatprep.subr.bf16.mxu0 %v3814_v20  ;;  %v52_v62 = vld [vmem:[%s5013_s0 + $0xc0] sm:$0xff]  ;;  %v3035_v4 = vcombine.high %v53_v1, %v65_v2  ;;  %v3848_v5 = vld [vmem:[%s5014_s1 + $0x128] sm:$0xff]   ;;  %v3034_v6 = vcombine.low %v53_v1, %v65_v2  ;;  %v3850_v8 = vld [vmem:[%s5014_s1 + $0x170] sm:$0xff]  }
  0x16   :  { %3375 = vmatprep.subr.bf16.mxu1 %v3815_v21  ;;  %v64_v63 = vld [vmem:[%s5013_s0 + $0x120] sm:$0xff]  ;;  %v3849_v7 = vld [vmem:[%s5014_s1 + $0x1a8] sm:$0xff]   ;;  %v3851_v9 = vld [vmem:[%s5014_s1 + $0x1f0] sm:$0xff]  }
  0x17   :  { %v3033_v0 = vcombine.high %v52_v62, %v64_v63  ;;  %v3032_v3 = vcombine.low %v52_v62, %v64_v63  ;;  %v3852_v10 = vld [vmem:[%s5014_s1 + $0x130] sm:$0xff]   ;;  %v3854_v12 = vld [vmem:[%s5014_s1 + $0x178] sm:$0xff]   ;;  %v44_v1 = vld [vmem:[%s5013_s0 + $0x80] sm:$0xff] }
  0x18   :  { %3348 = vmatpush3.bf16.msra.mxu0 %v3816_v22  ;;  %v3853_v11 = vld [vmem:[%s5014_s1 + $0x1b0] sm:$0xff]   ;;  %v3855_v13 = vld [vmem:[%s5014_s1 + $0x1f8] sm:$0xff]  }
  0x19   :  { %3376 = vmatpush3.bf16.msra.mxu1 %v3817_v23  ;;  %3349 = vmatprep.subr.bf16.mxu0 %v3818_v24  ;;  %v3856_v14 = vld [vmem:[%s5014_s1 + $0x138] sm:$0xff]   ;;  %v30_v16 = vld [vmem:[%s5013_s0 + $0x10] sm:$0xff]  ;;  %v3858_v24 = vld [vmem:[%s5014_s1 + $0x240] sm:$0xff]  }
  0x1a   :  { %3377 = vmatprep.subr.bf16.mxu1 %v3819_v25  ;;  %v3857_v15 = vld [vmem:[%s5014_s1 + $0x1b8] sm:$0xff]   ;;  %v42_v17 = vld [vmem:[%s5013_s0 + $0x70] sm:$0xff]  ;;  %v3859_v25 = vld [vmem:[%s5014_s1 + $0x2c0] sm:$0xff]  }
  0x1b   :  { %v31_v18 = vld [vmem:[%s5013_s0 + $0x18] sm:$0xff]  ;;  %v3012_v20 = vcombine.low %v30_v16, %v42_v17  ;;  %v3013_v21 = vcombine.high %v30_v16, %v42_v17  ;;  %v54_v32 = vld [vmem:[%s5013_s0 + $0xd0] sm:$0xff]  ;;  %v56_v16 = vld [vmem:[%s5013_s0 + $0xe0] sm:$0xff] }
  0x1c   :  { %3350 = vmatpush3.bf16.msra.mxu0 %v3820_v26  ;;  %v43_v19 = vld [vmem:[%s5013_s0 + $0x78] sm:$0xff]  ;;  %v3860_v26 = vld [vmem:[%s5014_s1 + $0x200] sm:$0xff]   ;;  %v66_v33 = vld [vmem:[%s5013_s0 + $0x130] sm:$0xff] }
  0x1d   :  { %3378 = vmatpush3.bf16.msra.mxu1 %v3821_v27  ;;  %3351 = vmatprep.subr.bf16.mxu0 %v3822_v28  ;;  %v3014_v22 = vcombine.low %v31_v18, %v43_v19  ;;  %v3015_v23 = vcombine.high %v31_v18, %v43_v19  ;;  %v3861_v27 = vld [vmem:[%s5014_s1 + $0x280] sm:$0xff]   ;;  %v3862_v28 = vld [vmem:[%s5014_s1 + $0x248] sm:$0xff]   ;;  %v3037_v34 = vcombine.high %v54_v32, %v66_v33  ;;  %v3866_v36 = vld [vmem:[%s5014_s1 + $0x250] sm:$0xff]  }
  0x1e   :  { %3379 = vmatprep.subr.bf16.mxu1 %v3823_v29  ;;  %v3863_v29 = vld [vmem:[%s5014_s1 + $0x2c8] sm:$0xff]   ;;  %v3867_v37 = vld [vmem:[%s5014_s1 + $0x2d0] sm:$0xff]   ;;  %v67_v39 = vld [vmem:[%s5013_s0 + $0x138] sm:$0xff] }
  0x1f   :  { %v3888_v62 = vld [vmem:[%s5014_s1 + $0x238] sm:$0xff]   ;;  %v68_v17 = vld [vmem:[%s5013_s0 + $0x140] sm:$0xff] }
  0x20   :  { %3352 = vmatpush3.bf16.msra.mxu0 %v3824_v30  ;;  %v3864_v30 = vld [vmem:[%s5014_s1 + $0x208] sm:$0xff]   ;;  %v3889_v63 = vld [vmem:[%s5014_s1 + $0x2b8] sm:$0xff]   ;;  %v3041_v18 = vcombine.high %v56_v16, %v68_v17  ;;  %v3040_v19 = vcombine.low %v56_v16, %v68_v17  ;;  %v3938_v16 = vld [vmem:[%s5014_s1 + $0x460] sm:$0xff]  }
  0x21   :  { %3380 = vmatpush3.bf16.msra.mxu1 %v3825_v31  ;;  %3393 = vmatprep.subr.bf16.mxu0 %v3826_v40  ;;  %v3865_v31 = vld [vmem:[%s5014_s1 + $0x288] sm:$0xff]   ;;  %v3939_v17 = vld [vmem:[%s5014_s1 + $0x4e0] sm:$0xff]  }
  0x22   :  { %3421 = vmatprep.subr.bf16.mxu1 %v3827_v41  ;;  %v3868_v41 = vld [vmem:[%s5014_s1 + $0x210] sm:$0xff]  }
  0x23   :  { %1858 = vmatmul.mubr.bf16.vlgmr.msra.gmra.mrb[0].mxu0 %v3008_v35  ;;  %v3036_v35 = vcombine.low %v54_v32, %v66_v33  ;;  %v3906_v32 = vld [vmem:[%s5014_s1 + $0x360] sm:$0xff]  }
  0x24   :  { %1907 = vmatmul.mubr.bf16.vlgmr.msra.gmra.mrb[0].mxu1 %v3010_v38  ;;  %3394 = vmatpush3.bf16.msra.mxu0 %v3828_v42  ;;  %v55_v38 = vld [vmem:[%s5013_s0 + $0xd8] sm:$0xff]  ;;  %v3907_v33 = vld [vmem:[%s5014_s1 + $0x3e0] sm:$0xff]  }
  0x25   :  { %3422 = vmatpush3.bf16.msra.mxu1 %v3829_v43  ;;  %3395 = vmatprep.subr.bf16.mxu0 %v3830_v44  ;;  %v3039_v40 = vcombine.high %v55_v38, %v67_v39  ;;  %v3038_v42 = vcombine.low %v55_v38, %v67_v39  ;;  %v3869_v43 = vld [vmem:[%s5014_s1 + $0x290] sm:$0xff]   ;;  %v3870_v44 = vld [vmem:[%s5014_s1 + $0x258] sm:$0xff]   ;;  %v3912_v38 = vld [vmem:[%s5014_s1 + $0x328] sm:$0xff]  }
  0x26   :  { %3423 = vmatprep.subr.bf16.mxu1 %v3831_v45  ;;  %1865 = vmatprep.mubr.bf16.mxu0 %v3033_v0  ;;  %v3871_v45 = vld [vmem:[%s5014_s1 + $0x2d8] sm:$0xff]   ;;  %v32_v0 = vld [vmem:[%s5013_s0 + $0x20] sm:$0xff]  ;;  %v3913_v39 = vld [vmem:[%s5014_s1 + $0x3a8] sm:$0xff]  }
  0x27   :  { %1914 = vmatprep.mubr.bf16.mxu1 %v3035_v4  ;;  %v3016_v2 = vcombine.low %v32_v0, %v44_v1  ;;  %v33_v4 = vld [vmem:[%s5013_s0 + $0x28] sm:$0xff] }
  0x28   :  { %3396 = vmatpush3.bf16.msra.mxu0 %v3832_v46  ;;  %v3872_v46 = vld [vmem:[%s5014_s1 + $0x218] sm:$0xff]  }
  0x29   :  { %3424 = vmatpush3.bf16.msra.mxu1 %v3833_v47  ;;  %3397 = vmatprep.subr.bf16.mxu0 %v3834_v48  ;;  %v3873_v47 = vld [vmem:[%s5014_s1 + $0x298] sm:$0xff]   ;;  %v3874_v48 = vld [vmem:[%s5014_s1 + $0x260] sm:$0xff]  }
  0x2a   :  { %3425 = vmatprep.subr.bf16.mxu1 %v3835_v49  ;;  %v3875_v49 = vld [vmem:[%s5014_s1 + $0x2e0] sm:$0xff]  }
  0x2b   :  { %1866 = vmatmul.mubr.bf16.gmra.mrb[4].mxu0 %v3032_v3  ;;  %v3017_v3 = vcombine.high %v32_v0, %v44_v1  ;;  %v58_v0 = vld [vmem:[%s5013_s0 + $0xf0] sm:$0xff] }
  0x2c   :  { %3398 = vmatpush3.bf16.msra.mxu0 %v3836_v50  ;;  %1915 = vmatmul.mubr.bf16.gmra.mrb[4].mxu1 %v3034_v6  ;;  %v3876_v50 = vld [vmem:[%s5014_s1 + $0x220] sm:$0xff]   ;;  %v70_v1 = vld [vmem:[%s5013_s0 + $0x150] sm:$0xff] }
  0x2d   :  { %3426 = vmatpush3.bf16.msra.mxu1 %v3837_v51  ;;  %3399 = vmatprep.subr.bf16.mxu0 %v3838_v52  ;;  %v3877_v51 = vld [vmem:[%s5014_s1 + $0x2a0] sm:$0xff]   ;;  %v3878_v52 = vld [vmem:[%s5014_s1 + $0x268] sm:$0xff]  }
  0x2e   :  { %3427 = vmatprep.subr.bf16.mxu1 %v3839_v53  ;;  %1955 = vmatprep.mubr.bf16.mxu0 %v3013_v21  ;;  %v3879_v53 = vld [vmem:[%s5014_s1 + $0x2e8] sm:$0xff]   ;;  %v3899_v21 = vld [vmem:[%s5014_s1 + $0x3d0] sm:$0xff]  }
  0x2f   :  { %2004 = vmatprep.mubr.bf16.mxu1 %v3015_v23  ;;  %v69_v23 = vld [vmem:[%s5013_s0 + $0x148] sm:$0xff] }
  0x30   :  { %3400 = vmatpush3.bf16.msra.mxu0 %v3840_v54  ;;  %v3880_v54 = vld [vmem:[%s5014_s1 + $0x228] sm:$0xff]  }
  0x31   :  { %3428 = vmatpush3.bf16.msra.mxu1 %v3841_v55  ;;  %3401 = vmatprep.subr.bf16.mxu0 %v3842_v56  ;;  %v3881_v55 = vld [vmem:[%s5014_s1 + $0x2a8] sm:$0xff]   ;;  %v3882_v56 = vld [vmem:[%s5014_s1 + $0x270] sm:$0xff]  }
  0x32   :  { %3429 = vmatprep.subr.bf16.mxu1 %v3843_v57  ;;  %v3883_v57 = vld [vmem:[%s5014_s1 + $0x2f0] sm:$0xff]  }
  0x34   :  { %3402 = vmatpush3.bf16.msra.mxu0 %v3844_v58  ;;  %v3884_v58 = vld [vmem:[%s5014_s1 + $0x230] sm:$0xff]  }
  0x35   :  { %3430 = vmatpush3.bf16.msra.mxu1 %v3845_v59  ;;  %3403 = vmatprep.subr.bf16.mxu0 %v3846_v60  ;;  %v3885_v59 = vld [vmem:[%s5014_s1 + $0x2b0] sm:$0xff]   ;;  %v3886_v60 = vld [vmem:[%s5014_s1 + $0x278] sm:$0xff]  }
  0x36   :  { %3431 = vmatprep.subr.bf16.mxu1 %v3847_v61  ;;  %v3887_v61 = vld [vmem:[%s5014_s1 + $0x2f8] sm:$0xff]  }
  0x38   :  { %3404 = vmatpush3.bf16.msra.mxu0 %v3848_v5  ;;  %v45_v5 = vld [vmem:[%s5013_s0 + $0x88] sm:$0xff] }
  0x39   :  { %3432 = vmatpush3.bf16.msra.mxu1 %v3849_v7  ;;  %3405 = vmatprep.subr.bf16.mxu0 %v3850_v8  ;;  %v3018_v6 = vcombine.low %v33_v4, %v45_v5  ;;  %v3019_v7 = vcombine.high %v33_v4, %v45_v5  ;;  %v3890_v8 = vld [vmem:[%s5014_s1 + $0x340] sm:$0xff]   ;;  %v3930_v4 = vld [vmem:[%s5014_s1 + $0x450] sm:$0xff]  }
  0x3a   :  { %3433 = vmatprep.subr.bf16.mxu1 %v3851_v9  ;;  %v3891_v9 = vld [vmem:[%s5014_s1 + $0x3c0] sm:$0xff]   ;;  %v3931_v5 = vld [vmem:[%s5014_s1 + $0x4d0] sm:$0xff]  }
  0x3c   :  { %3406 = vmatpush3.bf16.msra.mxu0 %v3852_v10  ;;  %v3892_v10 = vld [vmem:[%s5014_s1 + $0x300] sm:$0xff]  }
  0x3d   :  { %3434 = vmatpush3.bf16.msra.mxu1 %v3853_v11  ;;  %3407 = vmatprep.subr.bf16.mxu0 %v3854_v12  ;;  %v3893_v11 = vld [vmem:[%s5014_s1 + $0x380] sm:$0xff]   ;;  %v3894_v12 = vld [vmem:[%s5014_s1 + $0x348] sm:$0xff]  }
  0x3e   :  { %3435 = vmatprep.subr.bf16.mxu1 %v3855_v13  ;;  %v3895_v13 = vld [vmem:[%s5014_s1 + $0x3c8] sm:$0xff]  }
  0x40   :  { %3408 = vmatpush3.bf16.msra.mxu0 %v3856_v14  ;;  %v3896_v14 = vld [vmem:[%s5014_s1 + $0x308] sm:$0xff]  }
  0x41   :  { %3436 = vmatpush3.bf16.msra.mxu1 %v3857_v15  ;;  %3449 = vmatprep.subr.bf16.mxu0 %v3858_v24  ;;  %v3897_v15 = vld [vmem:[%s5014_s1 + $0x388] sm:$0xff]  }
  0x42   :  { %3477 = vmatprep.subr.bf16.mxu1 %v3859_v25  ;;  %v3900_v25 = vld [vmem:[%s5014_s1 + $0x310] sm:$0xff]  }
  0x43   :  { %1956 = vmatmul.mubr.bf16.vlgmr.msra.gmra.mrb[8].mxu0 %v3012_v20  ;;  %v3898_v20 = vld [vmem:[%s5014_s1 + $0x350] sm:$0xff]  }
  0x44   :  { %2005 = vmatmul.mubr.bf16.vlgmr.msra.gmra.mrb[8].mxu1 %v3014_v22  ;;  %3450 = vmatpush3.bf16.msra.mxu0 %v3860_v26  ;;  %v57_v22 = vld [vmem:[%s5013_s0 + $0xe8] sm:$0xff] }
  0x45   :  { %3478 = vmatpush3.bf16.msra.mxu1 %v3861_v27  ;;  %3451 = vmatprep.subr.bf16.mxu0 %v3862_v28  ;;  %v3043_v24 = vcombine.high %v57_v22, %v69_v23  ;;  %v3042_v26 = vcombine.low %v57_v22, %v69_v23  ;;  %v3901_v27 = vld [vmem:[%s5014_s1 + $0x390] sm:$0xff]   ;;  %v3902_v28 = vld [vmem:[%s5014_s1 + $0x358] sm:$0xff]   ;;  %v3944_v22 = vld [vmem:[%s5014_s1 + $0x428] sm:$0xff]  }
  0x46   :  { %3479 = vmatprep.subr.bf16.mxu1 %v3863_v29  ;;  %1963 = vmatprep.mubr.bf16.mxu0 %v3037_v34  ;;  %v3903_v29 = vld [vmem:[%s5014_s1 + $0x3d8] sm:$0xff]   ;;  %v3908_v34 = vld [vmem:[%s5014_s1 + $0x320] sm:$0xff]   ;;  %v3945_v23 = vld [vmem:[%s5014_s1 + $0x4a8] sm:$0xff]  }
  0x47   :  { %2012 = vmatprep.mubr.bf16.mxu1 %v3039_v40  ;;  %v3914_v40 = vld [vmem:[%s5014_s1 + $0x370] sm:$0xff]  }
  0x48   :  { %3452 = vmatpush3.bf16.msra.mxu0 %v3864_v30  ;;  %v3904_v30 = vld [vmem:[%s5014_s1 + $0x318] sm:$0xff]  }
  0x49   :  { %3480 = vmatpush3.bf16.msra.mxu1 %v3865_v31  ;;  %3453 = vmatprep.subr.bf16.mxu0 %v3866_v36  ;;  %v3905_v31 = vld [vmem:[%s5014_s1 + $0x398] sm:$0xff]   ;;  %v3910_v36 = vld [vmem:[%s5014_s1 + $0x368] sm:$0xff]  }
  0x4a   :  { %3481 = vmatprep.subr.bf16.mxu1 %v3867_v37  ;;  %v3911_v37 = vld [vmem:[%s5014_s1 + $0x3e8] sm:$0xff]  }
  0x4b   :  { %1964 = vmatmul.mubr.bf16.gmra.mrb[12].mxu0 %v3036_v35  ;;  %v3909_v35 = vld [vmem:[%s5014_s1 + $0x3a0] sm:$0xff]  }
  0x4c   :  { %3454 = vmatpush3.bf16.msra.mxu0 %v3868_v41  ;;  %2013 = vmatmul.mubr.bf16.gmra.mrb[12].mxu1 %v3038_v42  ;;  %v3915_v41 = vld [vmem:[%s5014_s1 + $0x3f0] sm:$0xff]  }
  0x4d   :  { %3482 = vmatpush3.bf16.msra.mxu1 %v3869_v43  ;;  %3455 = vmatprep.subr.bf16.mxu0 %v3870_v44  ;;  %v3916_v42 = vld [vmem:[%s5014_s1 + $0x330] sm:$0xff]   ;;  %v3918_v44 = vld [vmem:[%s5014_s1 + $0x378] sm:$0xff]  }
  0x4e   :  { %3483 = vmatprep.subr.bf16.mxu1 %v3871_v45  ;;  %2053 = vmatprep.mubr.bf16.mxu0 %v3017_v3  ;;  %v3917_v43 = vld [vmem:[%s5014_s1 + $0x3b0] sm:$0xff]   ;;  %v3919_v45 = vld [vmem:[%s5014_s1 + $0x3f8] sm:$0xff]   ;;  %v3044_v3 = vcombine.low %v58_v0, %v70_v1 }
  0x4f   :  { %2102 = vmatprep.mubr.bf16.mxu1 %v3019_v7  ;;  %v71_v7 = vld [vmem:[%s5013_s0 + $0x158] sm:$0xff] }
  0x50   :  { %3456 = vmatpush3.bf16.msra.mxu0 %v3872_v46  ;;  %v3920_v46 = vld [vmem:[%s5014_s1 + $0x338] sm:$0xff]  }
  0x51   :  { %3484 = vmatpush3.bf16.msra.mxu1 %v3873_v47  ;;  %3457 = vmatprep.subr.bf16.mxu0 %v3874_v48  ;;  %v3921_v47 = vld [vmem:[%s5014_s1 + $0x3b8] sm:$0xff]   ;;  %v34_v48 = vld [vmem:[%s5013_s0 + $0x30] sm:$0xff] }
  0x52   :  { %3485 = vmatprep.subr.bf16.mxu1 %v3875_v49  ;;  %v46_v49 = vld [vmem:[%s5013_s0 + $0x90] sm:$0xff] }
  0x54   :  { %3458 = vmatpush3.bf16.msra.mxu0 %v3876_v50  ;;  %v35_v50 = vld [vmem:[%s5013_s0 + $0x38] sm:$0xff] }
  0x55   :  { %3486 = vmatpush3.bf16.msra.mxu1 %v3877_v51  ;;  %3459 = vmatprep.subr.bf16.mxu0 %v3878_v52  ;;  %v3020_v51 = vcombine.low %v34_v48, %v46_v49  ;;  %v3021_v52 = vcombine.high %v34_v48, %v46_v49  ;;  %v72_v48 = vld [vmem:[%s5013_s0 + $0x160] sm:$0xff] }
  0x56   :  { %3487 = vmatprep.subr.bf16.mxu1 %v3879_v53  ;;  %v47_v53 = vld [vmem:[%s5013_s0 + $0x98] sm:$0xff] }
  0x58   :  { %3460 = vmatpush3.bf16.msra.mxu0 %v3880_v54  ;;  %v3022_v54 = vcombine.low %v35_v50, %v47_v53 }
  0x59   :  { %3488 = vmatpush3.bf16.msra.mxu1 %v3881_v55  ;;  %3461 = vmatprep.subr.bf16.mxu0 %v3882_v56  ;;  %v3023_v55 = vcombine.high %v35_v50, %v47_v53  ;;  %v3922_v56 = vld [vmem:[%s5014_s1 + $0x440] sm:$0xff]   ;;  %v73_v53 = vld [vmem:[%s5013_s0 + $0x168] sm:$0xff] }
  0x5a   :  { %3489 = vmatprep.subr.bf16.mxu1 %v3883_v57  ;;  %v3923_v57 = vld [vmem:[%s5014_s1 + $0x4c0] sm:$0xff]  }
  0x5c   :  { %3462 = vmatpush3.bf16.msra.mxu0 %v3884_v58  ;;  %v3924_v58 = vld [vmem:[%s5014_s1 + $0x400] sm:$0xff]  }
  0x5d   :  { %3490 = vmatpush3.bf16.msra.mxu1 %v3885_v59  ;;  %3463 = vmatprep.subr.bf16.mxu0 %v3886_v60  ;;  %v3925_v59 = vld [vmem:[%s5014_s1 + $0x480] sm:$0xff]   ;;  %v3926_v60 = vld [vmem:[%s5014_s1 + $0x448] sm:$0xff]  }
  0x5e   :  { %3491 = vmatprep.subr.bf16.mxu1 %v3887_v61  ;;  %v3927_v61 = vld [vmem:[%s5014_s1 + $0x4c8] sm:$0xff]  }
  0x60   :  { %3464 = vmatpush3.bf16.msra.mxu0 %v3888_v62  ;;  %v3928_v62 = vld [vmem:[%s5014_s1 + $0x408] sm:$0xff]  }
  0x61   :  { %3492 = vmatpush3.bf16.msra.mxu1 %v3889_v63  ;;  %3505 = vmatprep.subr.bf16.mxu0 %v3890_v8  ;;  %v3929_v63 = vld [vmem:[%s5014_s1 + $0x488] sm:$0xff]  }
  0x62   :  { %3533 = vmatprep.subr.bf16.mxu1 %v3891_v9  ;;  %v3932_v9 = vld [vmem:[%s5014_s1 + $0x410] sm:$0xff]  }
  0x63   :  { %2054 = vmatmul.mubr.bf16.vlgmr.msra.gmra.mrb[16].mxu0 %v3016_v2  ;;  %v3045_v2 = vcombine.high %v58_v0, %v70_v1  ;;  %v3969_v0 = vld [vmem:[%s5014_s1 + $0x568] sm:$0xff]  }
  0x64   :  { %2103 = vmatmul.mubr.bf16.vlgmr.msra.gmra.mrb[16].mxu1 %v3018_v6  ;;  %3506 = vmatpush3.bf16.msra.mxu0 %v3892_v10  ;;  %v59_v6 = vld [vmem:[%s5013_s0 + $0xf8] sm:$0xff]  ;;  %v3971_v1 = vld [vmem:[%s5014_s1 + $0x5a8] sm:$0xff]  }
  0x65   :  { %3534 = vmatpush3.bf16.msra.mxu1 %v3893_v11  ;;  %3507 = vmatprep.subr.bf16.mxu0 %v3894_v12  ;;  %v3047_v8 = vcombine.high %v59_v6, %v71_v7  ;;  %v3046_v10 = vcombine.low %v59_v6, %v71_v7  ;;  %v3933_v11 = vld [vmem:[%s5014_s1 + $0x490] sm:$0xff]   ;;  %v3934_v12 = vld [vmem:[%s5014_s1 + $0x458] sm:$0xff]  }
  0x66   :  { %3535 = vmatprep.subr.bf16.mxu1 %v3895_v13  ;;  %2061 = vmatprep.mubr.bf16.mxu0 %v3041_v18  ;;  %v3935_v13 = vld [vmem:[%s5014_s1 + $0x4d8] sm:$0xff]   ;;  %v3940_v18 = vld [vmem:[%s5014_s1 + $0x420] sm:$0xff]   ;;  %v38_v6 = vld [vmem:[%s5013_s0 + $0x50] sm:$0xff] }
  0x67   :  { %2110 = vmatprep.mubr.bf16.mxu1 %v3043_v24  ;;  %v3946_v24 = vld [vmem:[%s5014_s1 + $0x470] sm:$0xff]  }
  0x68   :  { %3508 = vmatpush3.bf16.msra.mxu0 %v3896_v14  ;;  %v3936_v14 = vld [vmem:[%s5014_s1 + $0x418] sm:$0xff]   ;;  %v50_v7 = vld [vmem:[%s5013_s0 + $0xb0] sm:$0xff] }
  0x69   :  { %3536 = vmatpush3.bf16.msra.mxu1 %v3897_v15  ;;  %3509 = vmatprep.subr.bf16.mxu0 %v3898_v20  ;;  %v3937_v15 = vld [vmem:[%s5014_s1 + $0x498] sm:$0xff]   ;;  %v3942_v20 = vld [vmem:[%s5014_s1 + $0x468] sm:$0xff]  }
  0x6a   :  { %3537 = vmatprep.subr.bf16.mxu1 %v3899_v21  ;;  %v3943_v21 = vld [vmem:[%s5014_s1 + $0x4e8] sm:$0xff]  }
  0x6b   :  { %2062 = vmatmul.mubr.bf16.gmra.mrb[20].mxu0 %v3040_v19  ;;  %v3941_v19 = vld [vmem:[%s5014_s1 + $0x4a0] sm:$0xff]  }
  0x6c   :  { %3510 = vmatpush3.bf16.msra.mxu0 %v3900_v25  ;;  %2111 = vmatmul.mubr.bf16.gmra.mrb[20].mxu1 %v3042_v26  ;;  %v3947_v25 = vld [vmem:[%s5014_s1 + $0x4f0] sm:$0xff]  }
  0x6d   :  { %3538 = vmatpush3.bf16.msra.mxu1 %v3901_v27  ;;  %3511 = vmatprep.subr.bf16.mxu0 %v3902_v28  ;;  %v3948_v26 = vld [vmem:[%s5014_s1 + $0x430] sm:$0xff]   ;;  %v3950_v28 = vld [vmem:[%s5014_s1 + $0x478] sm:$0xff]  }
  0x6e   :  { %3539 = vmatprep.subr.bf16.mxu1 %v3903_v29  ;;  %2151 = vmatprep.mubr.bf16.mxu0 %v3021_v52  ;;  %v3949_v27 = vld [vmem:[%s5014_s1 + $0x4b0] sm:$0xff]   ;;  %v3951_v29 = vld [vmem:[%s5014_s1 + $0x4f8] sm:$0xff]   ;;  %v61_v52 = vld [vmem:[%s5013_s0 + $0x108] sm:$0xff] }
  0x6f   :  { %2200 = vmatprep.mubr.bf16.mxu1 %v3023_v55  ;;  %v3961_v55 = vld [vmem:[%s5014_s1 + $0x510] sm:$0xff]  }
  0x70   :  { %3512 = vmatpush3.bf16.msra.mxu0 %v3904_v30  ;;  %v3952_v30 = vld [vmem:[%s5014_s1 + $0x438] sm:$0xff]  }
  0x71   :  { %3540 = vmatpush3.bf16.msra.mxu1 %v3905_v31  ;;  %3513 = vmatprep.subr.bf16.mxu0 %v3906_v32  ;;  %v3953_v31 = vld [vmem:[%s5014_s1 + $0x4b8] sm:$0xff]   ;;  %v36_v32 = vld [vmem:[%s5013_s0 + $0x40] sm:$0xff] }
  0x72   :  { %3541 = vmatprep.subr.bf16.mxu1 %v3907_v33  ;;  %v48_v33 = vld [vmem:[%s5013_s0 + $0xa0] sm:$0xff] }
  0x74   :  { %3514 = vmatpush3.bf16.msra.mxu0 %v3908_v34  ;;  %v37_v34 = vld [vmem:[%s5013_s0 + $0x48] sm:$0xff] }
  0x75   :  { %3542 = vmatpush3.bf16.msra.mxu1 %v3909_v35  ;;  %3515 = vmatprep.subr.bf16.mxu0 %v3910_v36  ;;  %v49_v35 = vld [vmem:[%s5013_s0 + $0xa8] sm:$0xff]  ;;  %v3024_v36 = vcombine.low %v36_v32, %v48_v33 }
  0x76   :  { %3543 = vmatprep.subr.bf16.mxu1 %v3911_v37  ;;  %v3025_v37 = vcombine.high %v36_v32, %v48_v33 }
  0x78   :  { %3516 = vmatpush3.bf16.msra.mxu0 %v3912_v38  ;;  %v3026_v38 = vcombine.low %v37_v34, %v49_v35 }
  0x79   :  { %3544 = vmatpush3.bf16.msra.mxu1 %v3913_v39  ;;  %3517 = vmatprep.subr.bf16.mxu0 %v3914_v40  ;;  %v3027_v39 = vcombine.high %v37_v34, %v49_v35  ;;  %v3954_v40 = vld [vmem:[%s5014_s1 + $0x540] sm:$0xff]  }
  0x7a   :  { %3545 = vmatprep.subr.bf16.mxu1 %v3915_v41  ;;  %v4050_v41 = vmov 0  }
  0x7c   :  { %3518 = vmatpush3.bf16.msra.mxu0 %v3916_v42  ;;  %v3955_v42 = vld [vmem:[%s5014_s1 + $0x500] sm:$0xff]  }
  0x7d   :  { %3546 = vmatpush3.bf16.msra.mxu1 %v3917_v43  ;;  %3519 = vmatprep.subr.bf16.mxu0 %v3918_v44  ;;  %v3956_v43 = vld [vmem:[%s5014_s1 + $0x580] sm:$0xff]   ;;  %v3957_v44 = vld [vmem:[%s5014_s1 + $0x548] sm:$0xff]  }
  0x7e   :  { %3547 = vmatprep.subr.bf16.mxu1 %v3919_v45  ;;  %v3958_v45 = vld [vmem:[%s5014_s1 + $0x508] sm:$0xff]  }
  0x80   :  { %3520 = vmatpush3.bf16.msra.mxu0 %v3920_v46  ;;  %v3959_v46 = vld [vmem:[%s5014_s1 + $0x588] sm:$0xff]  }
  0x81   :  { %3548 = vmatpush3.bf16.msra.mxu1 %v3921_v47  ;;  %3561 = vmatprep.subr.bf16.mxu0 %v3922_v56  ;;  %v60_v47 = vld [vmem:[%s5013_s0 + $0x100] sm:$0xff]  ;;  %v3050_v56 = vcombine.low %v61_v52, %v73_v53 }
  0x82   :  { %3589 = vmatprep.subr.bf16.mxu1 %v3923_v57  ;;  %v3049_v49 = vcombine.high %v60_v47, %v72_v48  ;;  %v3048_v50 = vcombine.low %v60_v47, %v72_v48  ;;  %v3962_v57 = vld [vmem:[%s5014_s1 + $0x590] sm:$0xff]  }
  0x83   :  { %2152 = vmatmul.mubr.bf16.vlgmr.msra.gmra.mrb[24].mxu0 %v3020_v51  ;;  %v3960_v51 = vld [vmem:[%s5014_s1 + $0x550] sm:$0xff]  }
  0x84   :  { %2201 = vmatmul.mubr.bf16.vlgmr.msra.gmra.mrb[24].mxu1 %v3022_v54  ;;  %3562 = vmatpush3.bf16.msra.mxu0 %v3924_v58  ;;  %v3051_v54 = vcombine.high %v61_v52, %v73_v53  ;;  %v3963_v58 = vld [vmem:[%s5014_s1 + $0x558] sm:$0xff]  }
  0x85   :  { %3590 = vmatpush3.bf16.msra.mxu1 %v3925_v59  ;;  %3563 = vmatprep.subr.bf16.mxu0 %v3926_v60  ;;  %v3964_v59 = vld [vmem:[%s5014_s1 + $0x518] sm:$0xff]  }
  0x86   :  { %3591 = vmatprep.subr.bf16.mxu1 %v3927_v61  ;;  %2159 = vmatprep.mubr.bf16.mxu0 %v3045_v2  ;;  %v3965_v60 = vld [vmem:[%s5014_s1 + $0x598] sm:$0xff]   ;;  %v3966_v61 = vld [vmem:[%s5014_s1 + $0x560] sm:$0xff]   ;;  %v3970_v2 = vld [vmem:[%s5014_s1 + $0x528] sm:$0xff]  }
  0x87   :  { %2208 = vmatprep.mubr.bf16.mxu1 %v3047_v8  ;;  %v3975_v8 = vld [vmem:[%s5014_s1 + $0x578] sm:$0xff]  }
  0x88   :  { %3564 = vmatpush3.bf16.msra.mxu0 %v3928_v62  ;;  %v3968_v62 = vld [vmem:[%s5014_s1 + $0x5a0] sm:$0xff]  }
  0x89   :  { %3592 = vmatpush3.bf16.msra.mxu1 %v3929_v63  ;;  %3565 = vmatprep.subr.bf16.mxu0 %v3930_v4  ;;  %v3967_v63 = vld [vmem:[%s5014_s1 + $0x520] sm:$0xff]   ;;  %v3974_v4 = vld [vmem:[%s5014_s1 + $0x5b0] sm:$0xff]  }
  0x8a   :  { %3593 = vmatprep.subr.bf16.mxu1 %v3931_v5  ;;  %v3973_v5 = vld [vmem:[%s5014_s1 + $0x530] sm:$0xff]  }
  0x8b   :  { %2160 = vmatmul.mubr.bf16.gmra.mrb[28].mxu0 %v3044_v3  ;;  %v3972_v3 = vld [vmem:[%s5014_s1 + $0x570] sm:$0xff]  }
  0x8c   :  { %3566 = vmatpush3.bf16.msra.mxu0 %v3932_v9  ;;  %2209 = vmatmul.mubr.bf16.gmra.mrb[28].mxu1 %v3046_v10  ;;  %v3029_v9 = vcombine.high %v38_v6, %v50_v7  ;;  %v3976_v10 = vld [vmem:[%s5014_s1 + $0x538] sm:$0xff]  }
  0x8d   :  { %3594 = vmatpush3.bf16.msra.mxu1 %v3933_v11  ;;  %3567 = vmatprep.subr.bf16.mxu0 %v3934_v12  ;;  %v3977_v11 = vld [vmem:[%s5014_s1 + $0x5b8] sm:$0xff]   ;;  %v62_v12 = vld [vmem:[%s5013_s0 + $0x110] sm:$0xff] }
  0x8e   :  { %3595 = vmatprep.subr.bf16.mxu1 %v3935_v13  ;;  %2249 = vmatprep.mubr.bf16.mxu0 %v3025_v37  ;;  %v74_v13 = vld [vmem:[%s5013_s0 + $0x170] sm:$0xff] }
  0x8f   :  { %2298 = vmatprep.mubr.bf16.mxu1 %v3027_v39 }
  0x90   :  { %3568 = vmatpush3.bf16.msra.mxu0 %v3936_v14  ;;  %v3981_v14 = vld [vmem:[%s5014_s1 + $0x5d8] ss:$0 sps:$4 sm:$0xff]  }
  0x91   :  { %3596 = vmatpush3.bf16.msra.mxu1 %v3937_v15  ;;  %3569 = vmatprep.subr.bf16.mxu0 %v3938_v16  ;;  %v39_v15 = vld [vmem:[%s5013_s0 + $0x58] sm:$0xff] }
  0x92   :  { %3597 = vmatprep.subr.bf16.mxu1 %v3939_v17  ;;  %v51_v16 = vld [vmem:[%s5013_s0 + $0xb8] sm:$0xff] }
  0x93   :  { %v3031_v17 = vcombine.high %v39_v15, %v51_v16 }
  0x94   :  { %3570 = vmatpush3.bf16.msra.mxu0 %v3940_v18  ;;  %v3028_v18 = vcombine.low %v38_v6, %v50_v7 }
  0x95   :  { %3598 = vmatpush3.bf16.msra.mxu1 %v3941_v19  ;;  %3571 = vmatprep.subr.bf16.mxu0 %v3942_v20  ;;  %v3978_v19 = vld [vmem:[%s5014_s1 + $0x5c0] sm:$0xff]   ;;  %v1823_v20 = vsel %vm1821_vm0, %v3981_v14, 0 }
  0x96   :  { %3599 = vmatprep.subr.bf16.mxu1 %v3943_v21  ;;  %v3053_v21 = vcombine.high %v62_v12, %v74_v13 }
  0x98   :  { %3572 = vmatpush3.bf16.msra.mxu0 %v3944_v22  ;;  %v3979_v22 = vld [vmem:[%s5014_s1 + $0x5c8] sm:$0xff]  }
  0x99   :  { %3600 = vmatpush3.bf16.msra.mxu1 %v3945_v23  ;;  %3573 = vmatprep.subr.bf16.mxu0 %v3946_v24  ;;  %v3980_v23 = vld [vmem:[%s5014_s1 + $0x5d0] sm:$0xff]   ;;  %v3052_v24 = vcombine.low %v62_v12, %v74_v13 }
  0x9a   :  { %3601 = vmatprep.subr.bf16.mxu1 %v3947_v25  ;;  %v63_v25 = vld [vmem:[%s5013_s0 + $0x118] sm:$0xff] }
  0x9c   :  { %3574 = vmatpush3.bf16.msra.mxu0 %v3948_v26  ;;  %v75_v26 = vld [vmem:[%s5013_s0 + $0x178] sm:$0xff] }
  0x9d   :  { %3602 = vmatpush3.bf16.msra.mxu1 %v3949_v27  ;;  %3575 = vmatprep.subr.bf16.mxu0 %v3950_v28  ;;  %v3030_v27 = vcombine.low %v39_v15, %v51_v16  ;;  %v3055_v28 = vcombine.high %v63_v25, %v75_v26 }
  0x9e   :  { %3603 = vmatprep.subr.bf16.mxu1 %v3951_v29  ;;  %v3054_v29 = vcombine.low %v63_v25, %v75_v26 }
  0xa0   :  { %3576 = vmatpush3.bf16.msra.mxu0 %v3952_v30 }
  0xa1   :  { %3604 = vmatpush3.bf16.msra.mxu1 %v3953_v31  ;;  %3617 = vmatprep.subr.bf16.mxu0 %v3954_v40 }
  0xa2   :  { %2364 = vmatprep.subr.bf16.mxu1 %v4050_v41 }
  0xa3   :  { %2250 = vmatmul.mubr.bf16.vlgmr.msra.gmra.mrb[32].mxu0 %v3024_v36 }
  0xa4   :  { %2299 = vmatmul.mubr.bf16.vlgmr.msra.gmra.mrb[32].mxu1 %v3026_v38  ;;  %3618 = vmatpush3.bf16.msra.mxu0 %v3955_v42 }
  0xa5   :  { %2365 = vmatpush1.bf16.msra.mxu1 %v3956_v43  ;;  %3619 = vmatprep.subr.bf16.mxu0 %v3957_v44 }
  0xa6   :  { %2366 = vmatprep.subr.bf16.mxu1 %v4050_v41  ;;  %2257 = vmatprep.mubr.bf16.mxu0 %v3049_v49 }
  0xa7   :  { %2306 = vmatprep.mubr.bf16.mxu1 %v3051_v54 }
  0xa8   :  { %3620 = vmatpush3.bf16.msra.mxu0 %v3958_v45 }
  0xa9   :  { %2367 = vmatpush1.bf16.msra.mxu1 %v3959_v46  ;;  %3621 = vmatprep.subr.bf16.mxu0 %v3960_v51 }
  0xaa   :  { %2368 = vmatprep.subr.bf16.mxu1 %v4050_v41 }
  0xab   :  { %2258 = vmatmul.mubr.bf16.gmra.mrb[36].mxu0 %v3048_v50 }
  0xac   :  { %3622 = vmatpush3.bf16.msra.mxu0 %v3961_v55  ;;  %2307 = vmatmul.mubr.bf16.gmra.mrb[36].mxu1 %v3050_v56 }
  0xad   :  { %2369 = vmatpush1.bf16.msra.mxu1 %v3962_v57  ;;  %3623 = vmatprep.subr.bf16.mxu0 %v3963_v58 }
  0xae   :  { %2370 = vmatprep.subr.bf16.mxu1 %v4050_v41  ;;  %2347 = vmatprep.mubr.bf16.mxu0 %v3029_v9 }
  0xaf   :  { %3244 = vmatprep.mubr.msk.bf16.mxu1 %vm1814_vm1, %v3031_v17 }
  0xb0   :  { %3624 = vmatpush3.bf16.msra.mxu0 %v3964_v59 }
  0xb1   :  { %2371 = vmatpush1.bf16.msra.mxu1 %v3965_v60  ;;  %3625 = vmatprep.subr.bf16.mxu0 %v3966_v61 }
  0xb2   :  { %2372 = vmatprep.subr.bf16.mxu1 %v4050_v41 }
  0xb4   :  { %3626 = vmatpush3.bf16.msra.mxu0 %v3967_v63 }
  0xb5   :  { %2373 = vmatpush1.bf16.msra.mxu1 %v3968_v62  ;;  %3627 = vmatprep.subr.bf16.mxu0 %v3969_v0 }
  0xb6   :  { %2374 = vmatprep.subr.bf16.mxu1 %v4050_v41 }
  0xb8   :  { %3628 = vmatpush3.bf16.msra.mxu0 %v3970_v2 }
  0xb9   :  { %2375 = vmatpush1.bf16.msra.mxu1 %v3971_v1  ;;  %3629 = vmatprep.subr.bf16.mxu0 %v3972_v3 }
  0xba   :  { %2376 = vmatprep.subr.bf16.mxu1 %v4050_v41 }
  0xbc   :  { %3630 = vmatpush3.bf16.msra.mxu0 %v3973_v5 }
  0xbd   :  { %2377 = vmatpush1.bf16.msra.mxu1 %v3974_v4  ;;  %3631 = vmatprep.subr.bf16.mxu0 %v3975_v8 }
  0xbe   :  { %2378 = vmatprep.subr.bf16.mxu1 %v4050_v41 }
  0xc0   :  { %3632 = vmatpush3.bf16.msra.mxu0 %v3976_v10 }
  0xc1   :  { %2379 = vmatpush1.bf16.msra.mxu1 %v3977_v11 }
  0xc2   :  { %2380 = vmatprep.subr.bf16.mxu1 %v4050_v41 }
  0xc3   :  { %2348 = vmatmul.mubr.bf16.vlgmr.msra.gmra.mrb[40].mxu0 %v3028_v18 }
  0xc4   :  { %2355 = vmatprep.mubr.bf16.mxu0 %v3053_v21 }
  0xc5   :  { %2381 = vmatpush1.bf16.msra.mxu1 %v3978_v19 }
  0xc6   :  { %2382 = vmatprep.subr.bf16.mxu1 %v4050_v41 }
  0xc9   :  { %2383 = vmatpush1.bf16.msra.mxu1 %v3979_v22 }
  0xca   :  { %2384 = vmatprep.subr.bf16.mxu1 %v4050_v41 }
  0xcb   :  { %2356 = vmatmul.mubr.bf16.gmra.mrb[44].mxu0 %v3052_v24 }
  0xcd   :  { %2385 = vmatpush1.bf16.msra.mxu1 %v3980_v23 }
  0xce   :  { %2386 = vmatprep.subr.bf16.mxu1 %v4050_v41 }
  0xd1   :  { %2387 = vmatpush1.bf16.msra.mxu1 %v1823_v20 }
  0xd4   :  { %2397 = vmatmul.mubr.bf16.vlgmr.msra.gmra.mrb[40].mxu1 %v3030_v27 }
  0xd5   :  { %3245 = vmatprep.mubr.msk.bf16.mxu1 %vm1814_vm1, %v3055_v28 }
  0xd6   :  { %12 = vsyncpa [#allocation4], 0  ;;  %v3982_v26 = vld [vmem:[%s5016_s3 + $0x40] sm:$0xff]   ;;  %v4051_v28 = vmov 0.0   ;;  %vm4052_vm2 = vmmov 0   ;;  %vm2977_vm3 = vcmask 1041408  }
  0xd7   :  { %v3983_v27 = vld [vmem:[%s5016_s3] sm:$0xff]   ;;  %3690 = vmatprep.subr.bf16.mxu0 %v4051_v28  ;;  %3710 = vmatprep.subr.bf16.mxu1 %v4051_v28 }
  0xd8   :  { %3691 = vmatpush3.bf16.msra.mxu0 %v3982_v26  ;;  %3711 = vmatpush3.bf16.msra.mxu1 %v3983_v27 }
  0xd9   :  { %3692 = vmatprep.subr.bf16.mxu0 %v4051_v28  ;;  %3712 = vmatprep.subr.bf16.mxu1 %v4051_v28 }
  0xda   :  { %3706 = vmatprep.mubr.msk.bf16.mxu0 %vm4052_vm2, %v4051_v28 }
  0xdc   :  { %2405 = vmatmul.mubr.bf16.gmra.mrb[44].mxu1 %v3054_v29  ;;  %v3984_v29 = vld [vmem:[%s5016_s3 + $0x48] sm:$0xff]  }
  0xdd   :  { %3693 = vmatpush3.bf16.msra.mxu0 %v3984_v29  ;;  %3726 = vmatprep.mubr.msk.bf16.mxu1 %vm4052_vm2, %v4051_v28 }
  0xde   :  { %3694 = vmatprep.subr.bf16.mxu0 %v4051_v28 }
  0xf6   :  { %v3353_v30 = vpop.f32.mrb[0].mxu0 }
  0xf7   :  { %v3381_v31 = vpop.f32.mrb[0].mxu1  ;;  %v3354_v32 = vpop.f32.mrb[1].mxu0 }
  0xf8   :  { %v3355_v33 = vadd.f32 %v3354_v32, %v3353_v30  ;;  %v3382_v34 = vpop.f32.mrb[1].mxu1  ;;  %v3356_v35 = vpop.f32.mrb[2].mxu0  ;;  %v3985_v30 = vld [vmem:[%s5016_s3 + $0x8] sm:$0xff]   ;;  %v3987_v32 = vld [vmem:[%s5016_s3 + $0x10] sm:$0xff]  }
  0xf9   :  { %v3383_v36 = vadd.f32 %v3382_v34, %v3381_v31  ;;  %v3384_v37 = vpop.f32.mrb[2].mxu1  ;;  %v3357_v38 = vpop.f32.mrb[3].mxu0  ;;  %3713 = vmatpush3.bf16.msra.mxu1 %v3985_v30  ;;  %v3986_v31 = vld [vmem:[%s5016_s3 + $0x50] sm:$0xff]   ;;  %v3988_v34 = vld [vmem:[%s5016_s3 + $0x58] sm:$0xff]  }
  0xfa   :  { %v3358_v39 = vadd.f32 %v3357_v38, %v3356_v35  ;;  %v3385_v40 = vpop.f32.mrb[3].mxu1  ;;  %3714 = vmatprep.subr.bf16.mxu1 %v4051_v28  ;;  %3695 = vmatpush3.bf16.msra.mxu0 %v3986_v31  ;;  %v3989_v35 = vld [vmem:[%s5016_s3 + $0x18] sm:$0xff]  }
  0xfb   :  { %v1909_v41 = vadd.f32 %v3383_v36, %v3355_v33  ;;  %v3386_v42 = vadd.f32 %v3385_v40, %v3384_v37  ;;  %3696 = vmatprep.subr.bf16.mxu0 %v4051_v28 }
  0xfd   :  { %v1912_v43 = vadd.f32 %v3386_v42, %v3358_v39  ;;  %3715 = vmatpush3.bf16.msra.mxu1 %v3987_v32 }
  0xfe   :  { %v3359_v44 = vpop.f32.mrb[4].mxu0  ;;  %3716 = vmatprep.subr.bf16.mxu1 %v4051_v28  ;;  %3697 = vmatpush3.bf16.msra.mxu0 %v3988_v34 }
  0xff   :  { %v3387_v45 = vpop.f32.mrb[4].mxu1  ;;  %v3360_v46 = vpop.f32.mrb[5].mxu0  ;;  %3698 = vmatprep.subr.bf16.mxu0 %v4051_v28 }
 0x100   :  { %v3361_v47 = vadd.f32 %v3360_v46, %v3359_v44  ;;  %v3388_v48 = vpop.f32.mrb[5].mxu1  ;;  %v3362_v49 = vpop.f32.mrb[6].mxu0 }
 0x101   :  { %v3389_v50 = vadd.f32 %v3388_v48, %v3387_v45  ;;  %v3390_v51 = vpop.f32.mrb[6].mxu1  ;;  %v3363_v52 = vpop.f32.mrb[7].mxu0  ;;  %3717 = vmatpush3.bf16.msra.mxu1 %v3989_v35  ;;  %v3991_v48 = vld [vmem:[%s5016_s3 + $0x20] sm:$0xff]  }
 0x102   :  { %v3364_v53 = vadd.f32 %v3363_v52, %v3362_v49  ;;  %v3391_v54 = vpop.f32.mrb[7].mxu1  ;;  %3718 = vmatprep.subr.bf16.mxu1 %v4051_v28 }
 0x103   :  { %v1917_v55 = vadd.f32 %v3389_v50, %v3361_v47  ;;  %v3392_v56 = vadd.f32 %v3391_v54, %v3390_v51  ;;  %v3990_v47 = vld [vmem:[%s5016_s3 + $0x60] sm:$0xff]   ;;  %v3993_v54 = vld [vmem:[%s5016_s3 + $0x28] sm:$0xff]  }
 0x104   :  { %3699 = vmatpush3.bf16.msra.mxu0 %v3990_v47 }
 0x105   :  { %v1920_v57 = vadd.f32 %v3392_v56, %v3364_v53  ;;  %3719 = vmatpush3.bf16.msra.mxu1 %v3991_v48  ;;  %3700 = vmatprep.subr.bf16.mxu0 %v4051_v28  ;;  %v3992_v53 = vld [vmem:[%s5016_s3 + $0x68] sm:$0xff]  }
 0x106   :  { %3720 = vmatprep.subr.bf16.mxu1 %v4051_v28 }
 0x108   :  { %3701 = vmatpush3.bf16.msra.mxu0 %v3992_v53 }
 0x109   :  { %3721 = vmatpush3.bf16.msra.mxu1 %v3993_v54  ;;  %3702 = vmatprep.subr.bf16.mxu0 %v4051_v28 }
 0x10a   :  { %3722 = vmatprep.subr.bf16.mxu1 %v4051_v28 }
 0x116   :  { %v3409_v58 = vpop.f32.mrb[8].mxu0 }
 0x117   :  { %v3437_v59 = vpop.f32.mrb[8].mxu1  ;;  %v3410_v60 = vpop.f32.mrb[9].mxu0 }
 0x118   :  { %v3438_v61 = vpop.f32.mrb[9].mxu1  ;;  %v3411_v62 = vadd.f32 %v3410_v60, %v3409_v58  ;;  %v3412_v0 = vpop.f32.mrb[10].mxu0  ;;  %v3995_v58 = vld [vmem:[%s5016_s3 + $0x30] sm:$0xff]  }
 0x119   :  { %v3439_v63 = vadd.f32 %v3438_v61, %v3437_v59  ;;  %v3440_v1 = vpop.f32.mrb[10].mxu1  ;;  %v3413_v2 = vpop.f32.mrb[11].mxu0  ;;  %3723 = vmatpush3.bf16.msra.mxu1 %v3995_v58 }
 0x11a   :  { %v3441_v3 = vpop.f32.mrb[11].mxu1  ;;  %v1958_v4 = vadd.f32 %v3411_v62, %v1909_v41  ;;  %v3414_v5 = vadd.f32 %v3413_v2, %v3412_v0  ;;  %v3996_v2 = vld [vmem:[%s5016_s3 + $0x78] sm:$0xff]   ;;  %3724 = vmatprep.subr.bf16.mxu1 %v4051_v28 }
 0x11b   :  { %v3442_v6 = vadd.f32 %v3441_v3, %v3440_v1  ;;  %v3997_v3 = vld [vmem:[%s5016_s3 + $0x38] sm:$0xff]  }
 0x11c   :  { %v2007_v7 = vadd.f32 %v3439_v63, %v1958_v4  ;;  %v1961_v8 = vadd.f32 %v3414_v5, %v1912_v43 }
 0x11d   :  { %3725 = vmatpush3.bf16.msra.mxu1 %v3997_v3 }
 0x11e   :  { %v2010_v9 = vadd.f32 %v3442_v6, %v1961_v8  ;;  %v3415_v10 = vpop.f32.mrb[12].mxu0  ;;  %3750 = vmatprep.subr.bf16.mxu1 %v4051_v28 }
 0x11f   :  { %v3416_v11 = vpop.f32.mrb[13].mxu0  ;;  %v3443_v16 = vpop.f32.mrb[12].mxu1 }
 0x120   :  { %v3417_v12 = vadd.f32 %v3416_v11, %v3415_v10  ;;  %v3418_v13 = vpop.f32.mrb[14].mxu0  ;;  %v3444_v18 = vpop.f32.mrb[13].mxu1 }
 0x121   :  { %v3419_v14 = vpop.f32.mrb[15].mxu0  ;;  %v3445_v20 = vadd.f32 %v3444_v18, %v3443_v16  ;;  %v3446_v21 = vpop.f32.mrb[14].mxu1 }
 0x122   :  { %v1966_v15 = vadd.f32 %v3417_v12, %v1917_v55  ;;  %v3420_v17 = vadd.f32 %v3419_v14, %v3418_v13  ;;  %v3447_v22 = vpop.f32.mrb[15].mxu1 }
 0x123   :  { %v3448_v24 = vadd.f32 %v3447_v22, %v3446_v21 }
 0x124   :  { %v1969_v19 = vadd.f32 %v3420_v17, %v1920_v57  ;;  %v4816_v23 = vadd.f32 %v3445_v20, %v1966_v15  ;;  %v3994_v57 = vld [vmem:[%s5016_s3 + $0x70] sm:$0xff]  }
 0x125   :  { %3703 = vmatpush3.bf16.msra.mxu0 %v3994_v57 }
 0x126   :  { %v4818_v25 = vadd.f32 %v3448_v24, %v1969_v19  ;;  %3704 = vmatprep.subr.bf16.mxu0 %v4051_v28 }
 0x129   :  { %3705 = vmatpush3.bf16.msra.mxu0 %v3996_v2 }
 0x12a   :  { %3730 = vmatprep.subr.bf16.mxu0 %v4051_v28 }
 0x136   :  { %v3465_v33 = vpop.f32.mrb[16].mxu0 }
 0x137   :  { %v3493_v36 = vpop.f32.mrb[16].mxu1  ;;  %v3466_v37 = vpop.f32.mrb[17].mxu0 }
 0x138   :  { %v3467_v38 = vadd.f32 %v3466_v37, %v3465_v33  ;;  %v3494_v39 = vpop.f32.mrb[17].mxu1  ;;  %v3468_v40 = vpop.f32.mrb[18].mxu0 }
 0x139   :  { %v3495_v41 = vadd.f32 %v3494_v39, %v3493_v36  ;;  %v3496_v42 = vpop.f32.mrb[18].mxu1  ;;  %v3469_v43 = vpop.f32.mrb[19].mxu0 }
 0x13a   :  { %v2056_v44 = vadd.f32 %v3467_v38, %v2007_v7  ;;  %v3470_v45 = vadd.f32 %v3469_v43, %v3468_v40  ;;  %v3497_v46 = vpop.f32.mrb[19].mxu1 }
 0x13b   :  { %v3498_v49 = vadd.f32 %v3497_v46, %v3496_v42 }
 0x13c   :  { %v2105_v50 = vadd.f32 %v3495_v41, %v2056_v44  ;;  %v2059_v51 = vadd.f32 %v3470_v45, %v2010_v9 }
 0x13e   :  { %v2108_v52 = vadd.f32 %v3498_v49, %v2059_v51  ;;  %v3471_v55 = vpop.f32.mrb[20].mxu0 }
 0x13f   :  { %v3472_v56 = vpop.f32.mrb[21].mxu0  ;;  %v3499_v61 = vpop.f32.mrb[20].mxu1 }
 0x140   :  { %v3473_v59 = vadd.f32 %v3472_v56, %v3471_v55  ;;  %v3474_v60 = vpop.f32.mrb[22].mxu0  ;;  %v3500_v1 = vpop.f32.mrb[21].mxu1 }
 0x141   :  { %v3475_v62 = vpop.f32.mrb[23].mxu0  ;;  %v3501_v4 = vadd.f32 %v3500_v1, %v3499_v61  ;;  %v3502_v5 = vpop.f32.mrb[22].mxu1 }
 0x142   :  { %v2064_v63 = vadd.f32 %v3473_v59, %v4816_v23  ;;  %v3476_v0 = vadd.f32 %v3475_v62, %v3474_v60  ;;  %v3503_v7 = vpop.f32.mrb[23].mxu1 }
 0x143   :  { %v3504_v9 = vadd.f32 %v3503_v7, %v3502_v5 }
 0x144   :  { %v2067_v6 = vadd.f32 %v3476_v0, %v4818_v25  ;;  %v2113_v8 = vadd.f32 %v3501_v4, %v2064_v63 }
 0x146   :  { %v2116_v10 = vadd.f32 %v3504_v9, %v2067_v6 }
 0x156   :  { %v3521_v11 = vpop.f32.mrb[24].mxu0 }
 0x157   :  { %v3549_v12 = vpop.f32.mrb[24].mxu1  ;;  %v3522_v13 = vpop.f32.mrb[25].mxu0 }
 0x158   :  { %v3523_v14 = vadd.f32 %v3522_v13, %v3521_v11  ;;  %v3550_v15 = vpop.f32.mrb[25].mxu1  ;;  %v3524_v16 = vpop.f32.mrb[26].mxu0 }
 0x159   :  { %v3551_v17 = vadd.f32 %v3550_v15, %v3549_v12  ;;  %v3552_v18 = vpop.f32.mrb[26].mxu1  ;;  %v3525_v19 = vpop.f32.mrb[27].mxu0 }
 0x15a   :  { %v2154_v20 = vadd.f32 %v3523_v14, %v2105_v50  ;;  %v3526_v21 = vadd.f32 %v3525_v19, %v3524_v16  ;;  %v3553_v22 = vpop.f32.mrb[27].mxu1 }
 0x15b   :  { %v3554_v23 = vadd.f32 %v3553_v22, %v3552_v18 }
 0x15c   :  { %v2203_v24 = vadd.f32 %v3551_v17, %v2154_v20  ;;  %v2157_v25 = vadd.f32 %v3526_v21, %v2108_v52 }
 0x15e   :  { %v2206_v26 = vadd.f32 %v3554_v23, %v2157_v25  ;;  %v3527_v27 = vpop.f32.mrb[28].mxu0 }
 0x15f   :  { %v3528_v29 = vpop.f32.mrb[29].mxu0  ;;  %v3555_v34 = vpop.f32.mrb[28].mxu1 }
 0x160   :  { %v3529_v30 = vadd.f32 %v3528_v29, %v3527_v27  ;;  %v3530_v31 = vpop.f32.mrb[30].mxu0  ;;  %v3556_v36 = vpop.f32.mrb[29].mxu1 }
 0x161   :  { %v3531_v32 = vpop.f32.mrb[31].mxu0  ;;  %v3557_v38 = vadd.f32 %v3556_v36, %v3555_v34  ;;  %v3558_v39 = vpop.f32.mrb[30].mxu1 }
 0x162   :  { %v2162_v33 = vadd.f32 %v3529_v30, %v2113_v8  ;;  %v3532_v35 = vadd.f32 %v3531_v32, %v3530_v31  ;;  %v3559_v40 = vpop.f32.mrb[31].mxu1 }
 0x163   :  { %v3560_v42 = vadd.f32 %v3559_v40, %v3558_v39 }
 0x164   :  { %v2165_v37 = vadd.f32 %v3532_v35, %v2116_v10  ;;  %v2211_v41 = vadd.f32 %v3557_v38, %v2162_v33 }
 0x166   :  { %v2214_v43 = vadd.f32 %v3560_v42, %v2165_v37 }
 0x176   :  { %v3577_v44 = vpop.f32.mrb[32].mxu0 }
 0x177   :  { %v3605_v45 = vpop.f32.mrb[32].mxu1  ;;  %v3578_v46 = vpop.f32.mrb[33].mxu0 }
 0x178   :  { %v3606_v47 = vpop.f32.mrb[33].mxu1  ;;  %v3579_v48 = vadd.f32 %v3578_v46, %v3577_v44  ;;  %v3580_v50 = vpop.f32.mrb[34].mxu0 }
 0x179   :  { %v3607_v49 = vadd.f32 %v3606_v47, %v3605_v45  ;;  %v3608_v51 = vpop.f32.mrb[34].mxu1  ;;  %v3581_v52 = vpop.f32.mrb[35].mxu0  ;;  %v3998_v47 = vld [vmem:[%s5016_s3 + $0x80] sm:$0xff]  }
 0x17a   :  { %v3609_v53 = vpop.f32.mrb[35].mxu1  ;;  %v2252_v54 = vadd.f32 %v3579_v48, %v2203_v24  ;;  %v3582_v55 = vadd.f32 %v3581_v52, %v3580_v50  ;;  %v3999_v50 = vld [vmem:[%s5016_s3 + $0xc0] sm:$0xff]  }
 0x17b   :  { %v3610_v56 = vadd.f32 %v3609_v53, %v3608_v51  ;;  %v4000_v53 = vld [vmem:[%s5016_s3 + $0x88] sm:$0xff]  }
 0x17c   :  { %v2301_v57 = vadd.f32 %v3607_v49, %v2252_v54  ;;  %v2255_v58 = vadd.f32 %v3582_v55, %v2206_v26  ;;  %v4001_v54 = vld [vmem:[%s5016_s3 + $0xc8] sm:$0xff]   ;;  %v4002_v55 = vld [vmem:[%s5016_s3 + $0x90] sm:$0xff]  }
 0x17e   :  { %v2304_v59 = vadd.f32 %v3610_v56, %v2255_v58  ;;  %v3583_v60 = vpop.f32.mrb[36].mxu0  ;;  %v4003_v56 = vld [vmem:[%s5016_s3 + $0xd0] sm:$0xff]   ;;  %v4005_v58 = vld [vmem:[%s5016_s3 + $0xd8] sm:$0xff]  }
 0x17f   :  { %v3584_v61 = vpop.f32.mrb[37].mxu0  ;;  %v3611_v0 = vpop.f32.mrb[36].mxu1 }
 0x180   :  { %v3585_v62 = vadd.f32 %v3584_v61, %v3583_v60  ;;  %v3586_v63 = vpop.f32.mrb[38].mxu0  ;;  %v3612_v2 = vpop.f32.mrb[37].mxu1  ;;  %v4007_v60 = vld [vmem:[%s5016_s3 + $0xe0] sm:$0xff]   ;;  %v4008_v61 = vld [vmem:[%s5016_s3 + $0xa8] sm:$0xff]  }
 0x181   :  { %v3587_v1 = vpop.f32.mrb[39].mxu0  ;;  %v3613_v5 = vadd.f32 %v3612_v2, %v3611_v0  ;;  %v3614_v6 = vpop.f32.mrb[38].mxu1  ;;  %v4011_v0 = vld [vmem:[%s5016_s3 + $0xf0] sm:$0xff]   ;;  %v4013_v2 = vld [vmem:[%s5016_s3 + $0xf8] sm:$0xff]  }
 0x182   :  { %v2260_v3 = vadd.f32 %v3585_v62, %v2211_v41  ;;  %v3588_v4 = vadd.f32 %v3587_v1, %v3586_v63  ;;  %v3615_v7 = vpop.f32.mrb[39].mxu1  ;;  %v4009_v62 = vld [vmem:[%s5016_s3 + $0xe8] sm:$0xff]   ;;  %v4010_v63 = vld [vmem:[%s5016_s3 + $0xb0] sm:$0xff]   ;;  %v4012_v1 = vld [vmem:[%s5016_s3 + $0xb8] sm:$0xff]  }
 0x183   :  { %v3616_v10 = vadd.f32 %v3615_v7, %v3614_v6  ;;  %v4014_v7 = vld [vmem:[%s5018_s5] sm:$0xff]  }
 0x184   :  { %v2263_v8 = vadd.f32 %v3588_v4, %v2214_v43  ;;  %v2309_v9 = vadd.f32 %v3613_v5, %v2260_v3  ;;  %v3246_v43 = vld [vmem:[%s5015_s2] ss:$0 sm:$0xff] }
 0x186   :  { %v2312_v11 = vadd.f32 %v3616_v10, %v2263_v8  ;;  %v4015_v8 = vld [vmem:[%s5018_s5 + $0x8] sm:$0xff]   ;;  %v4017_v10 = vld [vmem:[%s5018_s5 + $0x18] sm:$0xff]  }
 0x196   :  { %v3633_v12 = vpop.f32.mrb[40].mxu0 }
 0x197   :  { %v3634_v13 = vpop.f32.mrb[41].mxu0 }
 0x198   :  { %v3635_v14 = vadd.f32 %v3634_v13, %v3633_v12  ;;  %v3636_v15 = vpop.f32.mrb[42].mxu0  ;;  %v4019_v12 = vld [vmem:[%s5018_s5 + $0x28] sm:$0xff]   ;;  %v4020_v13 = vld [vmem:[%s5018_s5 + $0x30] sm:$0xff]  }
 0x199   :  { %v3637_v16 = vpop.f32.mrb[43].mxu0 }
 0x19a   :  { %v3638_v17 = vadd.f32 %v3637_v16, %v3636_v15  ;;  %v2350_v18 = vadd.f32 %v3635_v14, %v2301_v57  ;;  %v4004_v57 = vld [vmem:[%s5016_s3 + $0x98] sm:$0xff]  }
 0x19b   :  { %v4021_v14 = vld [vmem:[%s5018_s5 + $0x38] sm:$0xff]  }
 0x19c   :  { %v2353_v19 = vadd.f32 %v3638_v17, %v2304_v59  ;;  %v4006_v59 = vld [vmem:[%s5016_s3 + $0xa0] sm:$0xff]  }
 0x19e   :  { %v3639_v20 = vpop.f32.mrb[44].mxu0 }
 0x19f   :  { %v3640_v21 = vpop.f32.mrb[45].mxu0 }
 0x1a0   :  { %v3641_v22 = vadd.f32 %v3640_v21, %v3639_v20  ;;  %v3642_v23 = vpop.f32.mrb[46].mxu0 }
 0x1a1   :  { %v3643_v24 = vpop.f32.mrb[47].mxu0 }
 0x1a2   :  { %v3644_v25 = vadd.f32 %v3643_v24, %v3642_v23  ;;  %v2358_v26 = vadd.f32 %v3641_v22, %v2309_v9  ;;  %v4016_v9 = vld [vmem:[%s5018_s5 + $0x10] sm:$0xff]  }
 0x1a4   :  { %v2361_v27 = vadd.f32 %v3644_v25, %v2312_v11  ;;  %v4018_v11 = vld [vmem:[%s5018_s5 + $0x20] sm:$0xff]  }
 0x1a7   :  { %v2398_v29 = vpop.f32.mrb[40].mxu1 }
 0x1a8   :  { %v2399_v30 = vadd.f32 %v2398_v29, %v2350_v18  ;;  %v2400_v31 = vpop.f32.mrb[41].mxu1 }
 0x1a9   :  { %v2401_v32 = vpop.f32.mrb[42].mxu1 }
 0x1aa   :  { %v2402_v33 = vadd.f32 %v2401_v32, %v2353_v19  ;;  %v2403_v34 = vpop.f32.mrb[43].mxu1 }
 0x1ac   :  { %v2413_v35 = vmax.f32 %v2399_v30, %v2402_v33 }
 0x1af   :  { %v2406_v36 = vpop.f32.mrb[44].mxu1 }
 0x1b0   :  { %v2407_v37 = vadd.f32 %v2406_v36, %v2358_v26  ;;  %v2408_v38 = vpop.f32.mrb[45].mxu1 }
 0x1b1   :  { %v2409_v39 = vpop.f32.mrb[46].mxu1  ;;  %v3328_v38 = vld [vmem:[%s5019_s6] ss:$0 sm:$0xff] }
 0x1b2   :  { %v2410_v40 = vadd.f32 %v2409_v39, %v2361_v27  ;;  %v2411_v41 = vpop.f32.mrb[47].mxu1 }
 0x1b4   :  { %v2414_v42 = vmax.f32 %v2407_v37, %v2410_v40 }
 0x1b6   :  { %v2415_v44 = vmax.f32 %v2413_v35, %v2414_v42 }
 0x1b8   :  { %v2423_v45 = vadd.f32 %v3246_v43, %v2415_v44 }
 0x1ba   :  { %v2424_v46 = vmax.f32 %v2423_v45, 0.0 }
 0x1bc   :  { %2425 = vst [vmem:[#allocation2] sm:$0xff] %v2424_v46 }
 0x1c3   :  { %v2444_v48 = vld [vmem:[#allocation2 + $0x2] sm:$0x3]  ;;  %v2426_v49 = vld [vmem:[#allocation2] sm:$0x3]  ;;  %v2639_v3 = vld [vmem:[#allocation2 + $0x4] sm:$0x3] }
 0x1c4   :  { %v2445_v51 = vpack.c.bf16 %v2444_v48, %v2444_v48  ;;  %v2427_v52 = vpack.c.bf16 %v2426_v49, %v2426_v49  ;;  %v2747_v4 = vld [vmem:[#allocation2 + $0x6] sm:$0x3]  ;;  %v2640_v5 = vpack.c.bf16 %v2639_v3, %v2639_v3  ;;  %v2981_v49 = vlaneseq }
 0x1c5   :  { %v2748_v6 = vpack.c.bf16 %v2747_v4, %v2747_v4 }
 0x1c6   :  { %3707 = vmatmul.mubr.bf16.vlgmr.msra.gmra.mrb[48].mxu0 %v2445_v51  ;;  %3727 = vmatmul.mubr.bf16.vlgmr.msra.gmra.mrb[48].mxu1 %v2427_v52 }
 0x1c7   :  { %3731 = vmatpush3.bf16.msra.mxu0 %v3998_v47  ;;  %3751 = vmatpush3.bf16.msra.mxu1 %v3999_v50  ;;  %v2982_v50 = vand.u32 127, %v2981_v49 }
 0x1c8   :  { %3732 = vmatprep.subr.bf16.mxu0 %v4051_v28  ;;  %3752 = vmatprep.subr.bf16.mxu1 %v4051_v28 }
 0x1c9   :  { %3746 = vmatprep.mubr.msk.bf16.mxu0 %vm4052_vm2, %v4051_v28  ;;  %3766 = vmatprep.mubr.msk.bf16.mxu1 %vm4052_vm2, %v4051_v28  ;;  %vm2983_vm4 = vcmp.lt.s32.totalorder %v2982_v50, 3 }
 0x1cb   :  { %3733 = vmatpush3.bf16.msra.mxu0 %v4000_v53  ;;  %3753 = vmatpush3.bf16.msra.mxu1 %v4001_v54 }
 0x1cc   :  { %3734 = vmatprep.subr.bf16.mxu0 %v4051_v28  ;;  %3754 = vmatprep.subr.bf16.mxu1 %v4051_v28 }
 0x1cf   :  { %3735 = vmatpush3.bf16.msra.mxu0 %v4002_v55  ;;  %3755 = vmatpush3.bf16.msra.mxu1 %v4003_v56 }
 0x1d0   :  { %3736 = vmatprep.subr.bf16.mxu0 %v4051_v28  ;;  %3756 = vmatprep.subr.bf16.mxu1 %v4051_v28 }
 0x1d3   :  { %3737 = vmatpush3.bf16.msra.mxu0 %v4004_v57  ;;  %3757 = vmatpush3.bf16.msra.mxu1 %v4005_v58 }
 0x1d4   :  { %3738 = vmatprep.subr.bf16.mxu0 %v4051_v28  ;;  %3758 = vmatprep.subr.bf16.mxu1 %v4051_v28 }
 0x1d7   :  { %3739 = vmatpush3.bf16.msra.mxu0 %v4006_v59  ;;  %3759 = vmatpush3.bf16.msra.mxu1 %v4007_v60 }
 0x1d8   :  { %3740 = vmatprep.subr.bf16.mxu0 %v4051_v28  ;;  %3760 = vmatprep.subr.bf16.mxu1 %v4051_v28 }
 0x1db   :  { %3741 = vmatpush3.bf16.msra.mxu0 %v4008_v61  ;;  %3761 = vmatpush3.bf16.msra.mxu1 %v4009_v62 }
 0x1dc   :  { %3742 = vmatprep.subr.bf16.mxu0 %v4051_v28  ;;  %3762 = vmatprep.subr.bf16.mxu1 %v4051_v28 }
 0x1df   :  { %3743 = vmatpush3.bf16.msra.mxu0 %v4010_v63  ;;  %3763 = vmatpush3.bf16.msra.mxu1 %v4011_v0 }
 0x1e0   :  { %3744 = vmatprep.subr.bf16.mxu0 %v4051_v28  ;;  %3764 = vmatprep.subr.bf16.mxu1 %v4051_v28 }
 0x1e3   :  { %3745 = vmatpush3.bf16.msra.mxu0 %v4012_v1  ;;  %3765 = vmatpush3.bf16.msra.mxu1 %v4013_v2 }
 0x1e4   :  { %3770 = vmatprep.subr.bf16.mxu0 %v4051_v28 }
 0x1e6   :  { %3747 = vmatmul.mubr.bf16.vlgmr.msra.gmra.mrb[52].mxu0 %v2640_v5  ;;  %3767 = vmatmul.mubr.bf16.vlgmr.msra.gmra.mrb[52].mxu1 %v2748_v6 }
 0x1e7   :  { %3786 = vmatprep.mubr.msk.bf16.mxu0 %vm4052_vm2, %v4051_v28  ;;  %3771 = vmatpush3.bf16.msra.mxu0 %v4014_v7 }
 0x1e8   :  { %3772 = vmatprep.subr.bf16.mxu0 %v4051_v28 }
 0x1eb   :  { %3773 = vmatpush3.bf16.msra.mxu0 %v4015_v8 }
 0x1ec   :  { %3774 = vmatprep.subr.bf16.mxu0 %v4051_v28 }
 0x1ef   :  { %3775 = vmatpush3.bf16.msra.mxu0 %v4016_v9 }
 0x1f0   :  { %3776 = vmatprep.subr.bf16.mxu0 %v4051_v28 }
 0x1f3   :  { %3777 = vmatpush3.bf16.msra.mxu0 %v4017_v10 }
 0x1f4   :  { %3778 = vmatprep.subr.bf16.mxu0 %v4051_v28 }
 0x1f7   :  { %3779 = vmatpush3.bf16.msra.mxu0 %v4018_v11 }
 0x1f8   :  { %3780 = vmatprep.subr.bf16.mxu0 %v4051_v28 }
 0x1fb   :  { %3781 = vmatpush3.bf16.msra.mxu0 %v4019_v12 }
 0x1fc   :  { %3782 = vmatprep.subr.bf16.mxu0 %v4051_v28 }
 0x1ff   :  { %3783 = vmatpush3.bf16.msra.mxu0 %v4020_v13 }
 0x200   :  { %3784 = vmatprep.subr.bf16.mxu0 %v4051_v28  ;;  %v3327_v28 = vld [vmem:[%s5017_s4] ss:$0 sm:$0xff]  ;;  %s4053_s4 = smov [#allocation3]  }
 0x201   :  { %s3000_s6 = sshll.u32 %s4053_s4, 4  ;;  %s3001_s6 = int_to_ptr.vmem [resolvable:$true] %s3000_s6 }
 0x202   :  { %s4026_s18 = scalar_lea.vmem %s3001_s6, 32  ;;  %p4031_p1 = scmp.lt.s32.totalorder %s3001_s6, %s3001_s6 }
 0x203   :  { %3785 = vmatpush3.bf16.msra.mxu0 %v4021_v14  ;;  %p4027_p0 = scmp.ne.s32.totalorder %s3001_s6, %s4026_s18  ;;  %p4032_p2 = scmp.lt.s32.totalorder %s4026_s18, %s4026_s18 }
 0x205   :  { %p4033_p3 = por %p4032_p2, %p4031_p1 }
 0x207   :  { %p4034_p4 = pnand %p4033_p3, %p4027_p0 }
 0x299   :  { %v2545_v15 = vpop.f32.mrb[48].mxu0  ;;  %v2633_v16 = vpop.f32.mrb[48].mxu1 }
 0x29a   :  { %v2634_v17 = vadd.f32 %v2633_v16, %v2545_v15  ;;  %v3708_v18 = vpop.f32.mrb[49].mxu0  ;;  %v3728_v19 = vpop.f32.mrb[49].mxu1 }
 0x29b   :  { %v2548_v20 = vpop.f32.mrb[50].mxu0  ;;  %v2636_v21 = vpop.f32.mrb[50].mxu1 }
 0x29c   :  { %v3709_v22 = vpop.f32.mrb[51].mxu0  ;;  %v3729_v23 = vpop.f32.mrb[51].mxu1 }
 0x2b9   :  { %v2740_v24 = vpop.f32.mrb[52].mxu0  ;;  %v2848_v25 = vpop.f32.mrb[52].mxu1 }
 0x2ba   :  { %v2746_v26 = vadd.f32 %v2740_v24, %v2634_v17  ;;  %v3748_v27 = vpop.f32.mrb[53].mxu0  ;;  %v3768_v29 = vpop.f32.mrb[53].mxu1 }
 0x2bb   :  { %v2743_v30 = vpop.f32.mrb[54].mxu0  ;;  %v2851_v31 = vpop.f32.mrb[54].mxu1 }
 0x2bc   :  { %v2854_v32 = vadd.f32 %v2848_v25, %v2746_v26  ;;  %v3749_v33 = vpop.f32.mrb[55].mxu0  ;;  %v3769_v34 = vpop.f32.mrb[55].mxu1 }
 0x2be   :  { %v2862_v35 = vadd.f32 %v3327_v28, %v2854_v32 }
 0x2c0   :  { %v2863_v36 = vmax.f32 %v2862_v35, 0.0 }
 0x2c2   :  { %v2864_v37 = vpack.c.bf16 %v2863_v36, %v2863_v36 }
 0x2c4   :  { %3787 = vmatmul.mubr.bf16.vlgmr.msra.gmra.mrb[56].mxu0 %v2864_v37 }
 0x397   :  { %v2970_v39 = vpop.f32.mrb[56].mxu0 }
 0x398   :  { %v2971_v40 = vadd.f32 %v3328_v38, %v2970_v39  ;;  %v3788_v41 = vpop.f32.mrb[57].mxu0 }
 0x399   :  { %v2973_v42 = vpop.f32.mrb[58].mxu0 }
 0x39a   :  { %v2976_v43 = vmax.f32 %v2971_v40, 0.0  ;;  %v3789_v44 = vpop.f32.mrb[59].mxu0 }
 0x39c   :  { %v2978_v45 = vsel %vm2977_vm3, %v2976_v43, -inf }
 0x39d   :  { %2979 = vmax.xlane.f32.xlu0 %v2978_v45 }
 0x42a   :  { %v2980_v46 = vpop.xlane.xlu0 %2979 }
 0x42b   :  { %v2984_v47 = vsub.f32 %v2976_v43, %v2980_v46 }
 0x42d   :  { %v2985_v48 = vmul.f32 1.442695, %v2984_v47 }
 0x42f   :  { %4022 = vpow2.f32 %v2985_v48 }
 0x439   :  { %v4023_v51 = vpop.eup %4022 }
 0x43a   :  { %v2987_v52 = vsel %vm2983_vm4, %v4023_v51, 0.0 }
 0x43b   :  { %v2988_v53 = vsel %vm2977_vm3, %v2987_v52, 0.0 }
 0x43c   :  { %2989 = vadd.xlane.f32.xlu0 %v2988_v53 }
 0x4c9   :  { %v2990_v54 = vpop.xlane.xlu0 %2989 }
 0x4ca   :  { %4024 = vrcp.f32 %v2990_v54 }
 0x4d4   :  { %v4025_v55 = vpop.eup %4024 }
 0x4d5   :  { %v2992_v56 = vmul.f32 %v4025_v55, %v2987_v52 }
 0x4d7   :  { %2993 = vst [vmem:[#allocation3] sm:$0x3] %v2992_v56 }
 0x4d8   :  { %4037 = shalt.err (!%p4034_p4)
}
 0x4d9   :  { %s4038_s21 = scalar_lea.hbm %s5020_s7, 32 }
 0x4da   :  { %p4039_p5 = scmp.ne.s32.totalorder %s5020_s7, %s4038_s21  ;;  %p4042_p6 = scmp.lt.u32.totalorder %s4038_s21, %s5020_s7 }
 0x4dc   :  { %p4044_p7 = pnand %p4042_p6, %p4039_p5 }
 0x4de   :  { %4047 = shalt.err (!%p4044_p7)
}
 0x4df   :  { %3003 = dma.vmem_to_hbm [thread:$0]  %s3001_s6, 32, %s5020_s7, [#allocation4]  }
 0x4e0   :  { %4048 = dma.done.wait [#allocation4], 32  }
 0x4e1   :  { %4049 = vsyncadd [#allocation4], 4294967264 }
 0x4e2   :  { %3007 = vsyncpa [#allocation4], 1 }

// kernel: radu_g_forward.2
= control target key start
LH: loop header
LB: loop body
LE: loop exit
PB: predicated region body
PF: predicated region fallthrough
CT: control target
= control target key end

     0   :  { %s20700_s18 = smov 0   ;;  %s20702_s19 = smov 0   ;;  %s25961_s0 = inlined_call_operand.vmem [shape: bf16[4,1280,25], index: 0, kind: input, shape index: {}]   ;;  %s25962_s1 = inlined_call_operand.vmem [shape: bf16[25,128], index: 1, kind: input, shape index: {}]   ;;  %s25963_s2 = inlined_call_operand.vmem [shape: f32[1,128], index: 2, kind: input, shape index: {}]   ;;  %s25964_s3 = inlined_call_operand.vmem [shape: bf16[25,128,128], index: 3, kind: input, shape index: {}]   ;;  %s25965_s4 = inlined_call_operand.vmem [shape: f32[1,128], index: 4, kind: input, shape index: {}]   ;;  %s25966_s5 = inlined_call_operand.vmem [shape: bf16[128,128], index: 5, kind: output, shape index: {}]  }
   0x1   :  { %s20704_s20 = smov 0  }
   0x2 LB: > { %s14421_s21 = sadd.s32 4294967295, %s20667_s20   ;;  %s20717_s22 = sadd.s32 1, %s20667_s20   ;;  %s20667_s20 = sphi %s20704_s20, %s26627_s20   ;;  %s20663_s19 = sphi %s20702_s19, %s26626_s19   ;;  %s20659_s18 = sphi %s20700_s18, %s26625_s18  }
   0x3   : > { %s19_s23 = ssub.s32 %s20667_s20, %s20717_s22  ;;  %s22_s24 = sadd.s32 1, %s20663_s19 }
   0x4   : > { %p20_p0 = scmp.eq.s32.totalorder %s19_s23, 0  ;;  %p29_p1 = scmp.ne.s32.totalorder %s20663_s19, %s20659_s18 }
   0x5   : > { %p30_p2 = scmp.eq.s32.totalorder %s20667_s20, 0  ;;  %p14424_p4 = scmp.ge.s32.totalorder %s20667_s20, 2 }
   0x6   : > { %s20726_s25 = scalar_select %p20_p0, %s20663_s19, %s22_s24  }
   0x7   : > { %p31_p3 = por %p30_p2, %p29_p1  ;;  %177 = sbr.rel (%p14424_p4) target bundleno = 99 (0x63), region = 32 }
   0xe   : > { %180 = sbr.rel (!%p31_p3) target bundleno = 99 (0x63), region = 36  ;;  %s182_s26 = sand.u32 (%p31_p3), 1, %s20663_s19  }
   0xf   : > { %s15347_s27 = smul.u32 (%p31_p3), 320, %s20667_s20 }
  0x10   : > { %s20233_s28 = smul.u32 (%p31_p3), 1280, %s182_s26 }
  0x11   : > { %s20734_s6 = scalar_lea.vmem (%p31_p3), %s25961_s0, %s15347_s27 }
  0x12   : > { %v203_v0 = vld [vmem:[%s20734_s6] sm:$0xff] (%p31_p3)   ;;  %v207_v1 = vld [vmem:[%s20734_s6 + $0x8] sm:$0xff] (%p31_p3)   ;;  %v211_v2 = vld [vmem:[%s20734_s6 + $0x10] sm:$0xff] (%p31_p3)   ;;  %s20739_s7 = scalar_lea.vmem (%p31_p3), [#allocation3], %s20233_s28 }
  0x13   : > { %204 = vst [vmem:[%s20739_s7] sm:$0xff] (%p31_p3), %v203_v0   ;;  %208 = vst [vmem:[%s20739_s7 + $0x8] sm:$0xff] (%p31_p3), %v207_v1   ;;  %v215_v3 = vld [vmem:[%s20734_s6 + $0x18] sm:$0xff] (%p31_p3)   ;;  %v219_v4 = vld [vmem:[%s20734_s6 + $0x20] sm:$0xff] (%p31_p3)  }
  0x14   : > { %212 = vst [vmem:[%s20739_s7 + $0x10] sm:$0xff] (%p31_p3), %v211_v2   ;;  %v223_v5 = vld [vmem:[%s20734_s6 + $0x28] sm:$0xff] (%p31_p3)   ;;  %216 = vst [vmem:[%s20739_s7 + $0x18] sm:$0xff] (%p31_p3), %v215_v3   ;;  %v227_v6 = vld [vmem:[%s20734_s6 + $0x30] sm:$0xff] (%p31_p3)  }
  0x15   : > { %220 = vst [vmem:[%s20739_s7 + $0x20] sm:$0xff] %v219_v4   ;;  %224 = vst [vmem:[%s20739_s7 + $0x28] sm:$0xff] %v223_v5   ;;  %v231_v7 = vld [vmem:[%s20734_s6 + $0x38] sm:$0xff]   ;;  %v235_v8 = vld [vmem:[%s20734_s6 + $0x40] sm:$0xff]  }
  0x16   : > { %228 = vst [vmem:[%s20739_s7 + $0x30] sm:$0xff] %v227_v6   ;;  %232 = vst [vmem:[%s20739_s7 + $0x38] sm:$0xff] %v231_v7   ;;  %v239_v9 = vld [vmem:[%s20734_s6 + $0x48] sm:$0xff]   ;;  %v243_v10 = vld [vmem:[%s20734_s6 + $0x50] sm:$0xff]  }
  0x17   : > { %236 = vst [vmem:[%s20739_s7 + $0x40] sm:$0xff] %v235_v8   ;;  %v247_v11 = vld [vmem:[%s20734_s6 + $0x58] sm:$0xff]   ;;  %240 = vst [vmem:[%s20739_s7 + $0x48] sm:$0xff] %v239_v9   ;;  %v251_v12 = vld [vmem:[%s20734_s6 + $0x60] sm:$0xff]  }
  0x18   : > { %244 = vst [vmem:[%s20739_s7 + $0x50] sm:$0xff] %v243_v10   ;;  %248 = vst [vmem:[%s20739_s7 + $0x58] sm:$0xff] %v247_v11   ;;  %v255_v13 = vld [vmem:[%s20734_s6 + $0x68] sm:$0xff]   ;;  %v259_v14 = vld [vmem:[%s20734_s6 + $0x70] sm:$0xff]  }
  0x19   : > { %252 = vst [vmem:[%s20739_s7 + $0x60] sm:$0xff] %v251_v12   ;;  %256 = vst [vmem:[%s20739_s7 + $0x68] sm:$0xff] %v255_v13   ;;  %v263_v15 = vld [vmem:[%s20734_s6 + $0x78] sm:$0xff]   ;;  %v267_v16 = vld [vmem:[%s20734_s6 + $0x80] sm:$0xff]  }
  0x1a   : > { %260 = vst [vmem:[%s20739_s7 + $0x70] sm:$0xff] %v259_v14   ;;  %v271_v17 = vld [vmem:[%s20734_s6 + $0x88] sm:$0xff]   ;;  %264 = vst [vmem:[%s20739_s7 + $0x78] sm:$0xff] %v263_v15   ;;  %v275_v18 = vld [vmem:[%s20734_s6 + $0x90] sm:$0xff]  }
  0x1b   : > { %268 = vst [vmem:[%s20739_s7 + $0x80] sm:$0xff] %v267_v16   ;;  %272 = vst [vmem:[%s20739_s7 + $0x88] sm:$0xff] %v271_v17   ;;  %v279_v19 = vld [vmem:[%s20734_s6 + $0x98] sm:$0xff]   ;;  %v283_v20 = vld [vmem:[%s20734_s6 + $0xa0] sm:$0xff]  }
  0x1c   : > { %276 = vst [vmem:[%s20739_s7 + $0x90] sm:$0xff] %v275_v18   ;;  %280 = vst [vmem:[%s20739_s7 + $0x98] sm:$0xff] %v279_v19   ;;  %v287_v21 = vld [vmem:[%s20734_s6 + $0xa8] sm:$0xff]   ;;  %v291_v22 = vld [vmem:[%s20734_s6 + $0xb0] sm:$0xff]  }
  0x1d   : > { %284 = vst [vmem:[%s20739_s7 + $0xa0] sm:$0xff] %v283_v20   ;;  %v295_v23 = vld [vmem:[%s20734_s6 + $0xb8] sm:$0xff]   ;;  %288 = vst [vmem:[%s20739_s7 + $0xa8] sm:$0xff] %v287_v21   ;;  %v299_v24 = vld [vmem:[%s20734_s6 + $0xc0] sm:$0xff]  }
  0x1e   : > { %292 = vst [vmem:[%s20739_s7 + $0xb0] sm:$0xff] %v291_v22   ;;  %296 = vst [vmem:[%s20739_s7 + $0xb8] sm:$0xff] %v295_v23   ;;  %v303_v25 = vld [vmem:[%s20734_s6 + $0xc8] sm:$0xff]   ;;  %v307_v26 = vld [vmem:[%s20734_s6 + $0xd0] sm:$0xff]  }
  0x1f   : > { %300 = vst [vmem:[%s20739_s7 + $0xc0] sm:$0xff] %v299_v24   ;;  %304 = vst [vmem:[%s20739_s7 + $0xc8] sm:$0xff] %v303_v25   ;;  %v311_v27 = vld [vmem:[%s20734_s6 + $0xd8] sm:$0xff]   ;;  %v315_v28 = vld [vmem:[%s20734_s6 + $0xe0] sm:$0xff]  }
  0x20   : > { %308 = vst [vmem:[%s20739_s7 + $0xd0] sm:$0xff] %v307_v26   ;;  %v319_v29 = vld [vmem:[%s20734_s6 + $0xe8] sm:$0xff]   ;;  %312 = vst [vmem:[%s20739_s7 + $0xd8] sm:$0xff] %v311_v27   ;;  %v323_v30 = vld [vmem:[%s20734_s6 + $0xf0] sm:$0xff]  }
  0x21   : > { %316 = vst [vmem:[%s20739_s7 + $0xe0] sm:$0xff] %v315_v28   ;;  %320 = vst [vmem:[%s20739_s7 + $0xe8] sm:$0xff] %v319_v29   ;;  %v327_v31 = vld [vmem:[%s20734_s6 + $0xf8] sm:$0xff]   ;;  %v331_v32 = vld [vmem:[%s20734_s6 + $0x100] sm:$0xff]  }
  0x22   : > { %324 = vst [vmem:[%s20739_s7 + $0xf0] sm:$0xff] %v323_v30   ;;  %328 = vst [vmem:[%s20739_s7 + $0xf8] sm:$0xff] %v327_v31   ;;  %v335_v33 = vld [vmem:[%s20734_s6 + $0x108] sm:$0xff]   ;;  %v339_v34 = vld [vmem:[%s20734_s6 + $0x110] sm:$0xff]  }
  0x23   : > { %332 = vst [vmem:[%s20739_s7 + $0x100] sm:$0xff] %v331_v32   ;;  %v343_v35 = vld [vmem:[%s20734_s6 + $0x118] sm:$0xff]   ;;  %336 = vst [vmem:[%s20739_s7 + $0x108] sm:$0xff] %v335_v33   ;;  %v347_v36 = vld [vmem:[%s20734_s6 + $0x120] sm:$0xff]  }
  0x24   : > { %340 = vst [vmem:[%s20739_s7 + $0x110] sm:$0xff] %v339_v34   ;;  %344 = vst [vmem:[%s20739_s7 + $0x118] sm:$0xff] %v343_v35   ;;  %v351_v37 = vld [vmem:[%s20734_s6 + $0x128] sm:$0xff]   ;;  %v355_v38 = vld [vmem:[%s20734_s6 + $0x130] sm:$0xff]  }
  0x25   : > { %348 = vst [vmem:[%s20739_s7 + $0x120] sm:$0xff] %v347_v36   ;;  %352 = vst [vmem:[%s20739_s7 + $0x128] sm:$0xff] %v351_v37   ;;  %v359_v39 = vld [vmem:[%s20734_s6 + $0x138] sm:$0xff]   ;;  %v363_v40 = vld [vmem:[%s20734_s6 + $0x280] sm:$0xff]  }
  0x26   : > { %356 = vst [vmem:[%s20739_s7 + $0x130] sm:$0xff] %v355_v38   ;;  %v367_v41 = vld [vmem:[%s20734_s6 + $0x288] sm:$0xff]   ;;  %360 = vst [vmem:[%s20739_s7 + $0x138] sm:$0xff] %v359_v39   ;;  %v371_v42 = vld [vmem:[%s20734_s6 + $0x290] sm:$0xff]  }
  0x27   : > { %364 = vst [vmem:[%s20739_s7 + $0x140] sm:$0xff] %v363_v40   ;;  %368 = vst [vmem:[%s20739_s7 + $0x148] sm:$0xff] %v367_v41   ;;  %v375_v43 = vld [vmem:[%s20734_s6 + $0x298] sm:$0xff]   ;;  %v379_v44 = vld [vmem:[%s20734_s6 + $0x2a0] sm:$0xff]  }
  0x28   : > { %372 = vst [vmem:[%s20739_s7 + $0x150] sm:$0xff] %v371_v42   ;;  %376 = vst [vmem:[%s20739_s7 + $0x158] sm:$0xff] %v375_v43   ;;  %v383_v45 = vld [vmem:[%s20734_s6 + $0x2a8] sm:$0xff]   ;;  %v387_v46 = vld [vmem:[%s20734_s6 + $0x2b0] sm:$0xff]  }
  0x29   : > { %380 = vst [vmem:[%s20739_s7 + $0x160] sm:$0xff] %v379_v44   ;;  %v391_v47 = vld [vmem:[%s20734_s6 + $0x2b8] sm:$0xff]   ;;  %384 = vst [vmem:[%s20739_s7 + $0x168] sm:$0xff] %v383_v45   ;;  %v395_v48 = vld [vmem:[%s20734_s6 + $0x2c0] sm:$0xff]  }
  0x2a   : > { %388 = vst [vmem:[%s20739_s7 + $0x170] sm:$0xff] %v387_v46   ;;  %392 = vst [vmem:[%s20739_s7 + $0x178] sm:$0xff] %v391_v47   ;;  %v399_v49 = vld [vmem:[%s20734_s6 + $0x2c8] sm:$0xff]   ;;  %v403_v50 = vld [vmem:[%s20734_s6 + $0x2d0] sm:$0xff]  }
  0x2b   : > { %396 = vst [vmem:[%s20739_s7 + $0x180] sm:$0xff] %v395_v48   ;;  %400 = vst [vmem:[%s20739_s7 + $0x188] sm:$0xff] %v399_v49   ;;  %v407_v51 = vld [vmem:[%s20734_s6 + $0x2d8] sm:$0xff]   ;;  %v411_v52 = vld [vmem:[%s20734_s6 + $0x2e0] sm:$0xff]  }
  0x2c   : > { %404 = vst [vmem:[%s20739_s7 + $0x190] sm:$0xff] %v403_v50   ;;  %v415_v53 = vld [vmem:[%s20734_s6 + $0x2e8] sm:$0xff]   ;;  %408 = vst [vmem:[%s20739_s7 + $0x198] sm:$0xff] %v407_v51   ;;  %v419_v54 = vld [vmem:[%s20734_s6 + $0x2f0] sm:$0xff]  }
  0x2d   : > { %412 = vst [vmem:[%s20739_s7 + $0x1a0] sm:$0xff] %v411_v52   ;;  %416 = vst [vmem:[%s20739_s7 + $0x1a8] sm:$0xff] %v415_v53   ;;  %v423_v55 = vld [vmem:[%s20734_s6 + $0x2f8] sm:$0xff]   ;;  %v427_v56 = vld [vmem:[%s20734_s6 + $0x300] sm:$0xff]  }
  0x2e   : > { %420 = vst [vmem:[%s20739_s7 + $0x1b0] sm:$0xff] %v419_v54   ;;  %424 = vst [vmem:[%s20739_s7 + $0x1b8] sm:$0xff] %v423_v55   ;;  %v431_v57 = vld [vmem:[%s20734_s6 + $0x308] sm:$0xff]   ;;  %v435_v58 = vld [vmem:[%s20734_s6 + $0x310] sm:$0xff]  }
  0x2f   : > { %428 = vst [vmem:[%s20739_s7 + $0x1c0] sm:$0xff] %v427_v56   ;;  %v439_v59 = vld [vmem:[%s20734_s6 + $0x318] sm:$0xff]   ;;  %432 = vst [vmem:[%s20739_s7 + $0x1c8] sm:$0xff] %v431_v57   ;;  %v443_v60 = vld [vmem:[%s20734_s6 + $0x320] sm:$0xff]  }
  0x30   : > { %436 = vst [vmem:[%s20739_s7 + $0x1d0] sm:$0xff] %v435_v58   ;;  %440 = vst [vmem:[%s20739_s7 + $0x1d8] sm:$0xff] %v439_v59   ;;  %v447_v61 = vld [vmem:[%s20734_s6 + $0x328] sm:$0xff]   ;;  %v451_v62 = vld [vmem:[%s20734_s6 + $0x330] sm:$0xff]  }
  0x31   : > { %444 = vst [vmem:[%s20739_s7 + $0x1e0] sm:$0xff] %v443_v60   ;;  %448 = vst [vmem:[%s20739_s7 + $0x1e8] sm:$0xff] %v447_v61   ;;  %v455_v63 = vld [vmem:[%s20734_s6 + $0x338] sm:$0xff]   ;;  %v459_v0 = vld [vmem:[%s20734_s6 + $0x340] sm:$0xff]  }
  0x32   : > { %452 = vst [vmem:[%s20739_s7 + $0x1f0] sm:$0xff] %v451_v62   ;;  %v463_v1 = vld [vmem:[%s20734_s6 + $0x348] sm:$0xff]   ;;  %456 = vst [vmem:[%s20739_s7 + $0x1f8] sm:$0xff] %v455_v63   ;;  %v467_v2 = vld [vmem:[%s20734_s6 + $0x350] sm:$0xff]  }
  0x33   : > { %460 = vst [vmem:[%s20739_s7 + $0x200] sm:$0xff] %v459_v0   ;;  %464 = vst [vmem:[%s20739_s7 + $0x208] sm:$0xff] %v463_v1   ;;  %v471_v3 = vld [vmem:[%s20734_s6 + $0x358] sm:$0xff]   ;;  %v475_v4 = vld [vmem:[%s20734_s6 + $0x360] sm:$0xff]  }
  0x34   : > { %468 = vst [vmem:[%s20739_s7 + $0x210] sm:$0xff] %v467_v2   ;;  %472 = vst [vmem:[%s20739_s7 + $0x218] sm:$0xff] %v471_v3   ;;  %v479_v5 = vld [vmem:[%s20734_s6 + $0x368] sm:$0xff]   ;;  %v483_v6 = vld [vmem:[%s20734_s6 + $0x370] sm:$0xff]  }
  0x35   : > { %476 = vst [vmem:[%s20739_s7 + $0x220] sm:$0xff] %v475_v4   ;;  %v487_v7 = vld [vmem:[%s20734_s6 + $0x378] sm:$0xff]   ;;  %480 = vst [vmem:[%s20739_s7 + $0x228] sm:$0xff] %v479_v5   ;;  %v491_v8 = vld [vmem:[%s20734_s6 + $0x380] sm:$0xff]  }
  0x36   : > { %484 = vst [vmem:[%s20739_s7 + $0x230] sm:$0xff] %v483_v6   ;;  %488 = vst [vmem:[%s20739_s7 + $0x238] sm:$0xff] %v487_v7   ;;  %v495_v9 = vld [vmem:[%s20734_s6 + $0x388] sm:$0xff]   ;;  %v499_v10 = vld [vmem:[%s20734_s6 + $0x390] sm:$0xff]  }
  0x37   : > { %492 = vst [vmem:[%s20739_s7 + $0x240] sm:$0xff] %v491_v8   ;;  %496 = vst [vmem:[%s20739_s7 + $0x248] sm:$0xff] %v495_v9   ;;  %v503_v11 = vld [vmem:[%s20734_s6 + $0x398] sm:$0xff]   ;;  %v507_v12 = vld [vmem:[%s20734_s6 + $0x3a0] sm:$0xff]  }
  0x38   : > { %500 = vst [vmem:[%s20739_s7 + $0x250] sm:$0xff] %v499_v10   ;;  %v511_v13 = vld [vmem:[%s20734_s6 + $0x3a8] sm:$0xff]   ;;  %504 = vst [vmem:[%s20739_s7 + $0x258] sm:$0xff] %v503_v11   ;;  %v515_v14 = vld [vmem:[%s20734_s6 + $0x3b0] sm:$0xff]  }
  0x39   : > { %508 = vst [vmem:[%s20739_s7 + $0x260] sm:$0xff] %v507_v12   ;;  %512 = vst [vmem:[%s20739_s7 + $0x268] sm:$0xff] %v511_v13   ;;  %v519_v15 = vld [vmem:[%s20734_s6 + $0x3b8] sm:$0xff]   ;;  %v523_v16 = vld [vmem:[%s20734_s6 + $0x500] sm:$0xff]  }
  0x3a   : > { %516 = vst [vmem:[%s20739_s7 + $0x270] sm:$0xff] %v515_v14   ;;  %520 = vst [vmem:[%s20739_s7 + $0x278] sm:$0xff] %v519_v15   ;;  %v527_v17 = vld [vmem:[%s20734_s6 + $0x508] sm:$0xff]   ;;  %v531_v18 = vld [vmem:[%s20734_s6 + $0x510] sm:$0xff]  }
  0x3b   : > { %524 = vst [vmem:[%s20739_s7 + $0x280] sm:$0xff] %v523_v16   ;;  %v535_v19 = vld [vmem:[%s20734_s6 + $0x518] sm:$0xff]   ;;  %528 = vst [vmem:[%s20739_s7 + $0x288] sm:$0xff] %v527_v17   ;;  %v539_v20 = vld [vmem:[%s20734_s6 + $0x520] sm:$0xff]  }
  0x3c   : > { %532 = vst [vmem:[%s20739_s7 + $0x290] sm:$0xff] %v531_v18   ;;  %536 = vst [vmem:[%s20739_s7 + $0x298] sm:$0xff] %v535_v19   ;;  %v543_v21 = vld [vmem:[%s20734_s6 + $0x528] sm:$0xff]   ;;  %v547_v22 = vld [vmem:[%s20734_s6 + $0x530] sm:$0xff]  }
  0x3d   : > { %540 = vst [vmem:[%s20739_s7 + $0x2a0] sm:$0xff] %v539_v20   ;;  %544 = vst [vmem:[%s20739_s7 + $0x2a8] sm:$0xff] %v543_v21   ;;  %v551_v23 = vld [vmem:[%s20734_s6 + $0x538] sm:$0xff]   ;;  %v555_v24 = vld [vmem:[%s20734_s6 + $0x540] sm:$0xff]  }
  0x3e   : > { %548 = vst [vmem:[%s20739_s7 + $0x2b0] sm:$0xff] %v547_v22   ;;  %v559_v25 = vld [vmem:[%s20734_s6 + $0x548] sm:$0xff]   ;;  %552 = vst [vmem:[%s20739_s7 + $0x2b8] sm:$0xff] %v551_v23   ;;  %v563_v26 = vld [vmem:[%s20734_s6 + $0x550] sm:$0xff]  }
  0x3f   : > { %556 = vst [vmem:[%s20739_s7 + $0x2c0] sm:$0xff] %v555_v24   ;;  %560 = vst [vmem:[%s20739_s7 + $0x2c8] sm:$0xff] %v559_v25   ;;  %v567_v27 = vld [vmem:[%s20734_s6 + $0x558] sm:$0xff]   ;;  %v571_v28 = vld [vmem:[%s20734_s6 + $0x560] sm:$0xff]  }
  0x40   : > { %564 = vst [vmem:[%s20739_s7 + $0x2d0] sm:$0xff] %v563_v26   ;;  %568 = vst [vmem:[%s20739_s7 + $0x2d8] sm:$0xff] %v567_v27   ;;  %v575_v29 = vld [vmem:[%s20734_s6 + $0x568] sm:$0xff]   ;;  %v579_v30 = vld [vmem:[%s20734_s6 + $0x570] sm:$0xff]  }
  0x41   : > { %572 = vst [vmem:[%s20739_s7 + $0x2e0] sm:$0xff] %v571_v28   ;;  %v583_v31 = vld [vmem:[%s20734_s6 + $0x578] sm:$0xff]   ;;  %576 = vst [vmem:[%s20739_s7 + $0x2e8] sm:$0xff] %v575_v29   ;;  %v587_v32 = vld [vmem:[%s20734_s6 + $0x580] sm:$0xff]  }
  0x42   : > { %580 = vst [vmem:[%s20739_s7 + $0x2f0] sm:$0xff] %v579_v30   ;;  %584 = vst [vmem:[%s20739_s7 + $0x2f8] sm:$0xff] %v583_v31   ;;  %v591_v33 = vld [vmem:[%s20734_s6 + $0x588] sm:$0xff]   ;;  %v595_v34 = vld [vmem:[%s20734_s6 + $0x590] sm:$0xff]  }
  0x43   : > { %588 = vst [vmem:[%s20739_s7 + $0x300] sm:$0xff] %v587_v32   ;;  %592 = vst [vmem:[%s20739_s7 + $0x308] sm:$0xff] %v591_v33   ;;  %v599_v35 = vld [vmem:[%s20734_s6 + $0x598] sm:$0xff]   ;;  %v603_v36 = vld [vmem:[%s20734_s6 + $0x5a0] sm:$0xff]  }
  0x44   : > { %596 = vst [vmem:[%s20739_s7 + $0x310] sm:$0xff] %v595_v34   ;;  %v607_v37 = vld [vmem:[%s20734_s6 + $0x5a8] sm:$0xff]   ;;  %600 = vst [vmem:[%s20739_s7 + $0x318] sm:$0xff] %v599_v35   ;;  %v611_v38 = vld [vmem:[%s20734_s6 + $0x5b0] sm:$0xff]  }
  0x45   : > { %604 = vst [vmem:[%s20739_s7 + $0x320] sm:$0xff] %v603_v36   ;;  %608 = vst [vmem:[%s20739_s7 + $0x328] sm:$0xff] %v607_v37   ;;  %v615_v39 = vld [vmem:[%s20734_s6 + $0x5b8] sm:$0xff]   ;;  %v619_v40 = vld [vmem:[%s20734_s6 + $0x5c0] sm:$0xff]  }
  0x46   : > { %612 = vst [vmem:[%s20739_s7 + $0x330] sm:$0xff] %v611_v38   ;;  %616 = vst [vmem:[%s20739_s7 + $0x338] sm:$0xff] %v615_v39   ;;  %v623_v41 = vld [vmem:[%s20734_s6 + $0x5c8] sm:$0xff]   ;;  %v627_v42 = vld [vmem:[%s20734_s6 + $0x5d0] sm:$0xff]  }
  0x47   : > { %620 = vst [vmem:[%s20739_s7 + $0x340] sm:$0xff] %v619_v40   ;;  %v631_v43 = vld [vmem:[%s20734_s6 + $0x5d8] sm:$0xff]   ;;  %624 = vst [vmem:[%s20739_s7 + $0x348] sm:$0xff] %v623_v41   ;;  %v635_v44 = vld [vmem:[%s20734_s6 + $0x5e0] sm:$0xff]  }
  0x48   : > { %628 = vst [vmem:[%s20739_s7 + $0x350] sm:$0xff] %v627_v42   ;;  %632 = vst [vmem:[%s20739_s7 + $0x358] sm:$0xff] %v631_v43   ;;  %v639_v45 = vld [vmem:[%s20734_s6 + $0x5e8] sm:$0xff]   ;;  %v643_v46 = vld [vmem:[%s20734_s6 + $0x5f0] sm:$0xff]  }
  0x49   : > { %636 = vst [vmem:[%s20739_s7 + $0x360] sm:$0xff] %v635_v44   ;;  %640 = vst [vmem:[%s20739_s7 + $0x368] sm:$0xff] %v639_v45   ;;  %v647_v47 = vld [vmem:[%s20734_s6 + $0x5f8] sm:$0xff]   ;;  %v651_v48 = vld [vmem:[%s20734_s6 + $0x600] sm:$0xff]  }
  0x4a   : > { %644 = vst [vmem:[%s20739_s7 + $0x370] sm:$0xff] %v643_v46   ;;  %v655_v49 = vld [vmem:[%s20734_s6 + $0x608] sm:$0xff]   ;;  %648 = vst [vmem:[%s20739_s7 + $0x378] sm:$0xff] %v647_v47   ;;  %v659_v50 = vld [vmem:[%s20734_s6 + $0x610] sm:$0xff]  }
  0x4b   : > { %652 = vst [vmem:[%s20739_s7 + $0x380] sm:$0xff] %v651_v48   ;;  %656 = vst [vmem:[%s20739_s7 + $0x388] sm:$0xff] %v655_v49   ;;  %v663_v51 = vld [vmem:[%s20734_s6 + $0x618] sm:$0xff]   ;;  %v667_v52 = vld [vmem:[%s20734_s6 + $0x620] sm:$0xff]  }
  0x4c   : > { %660 = vst [vmem:[%s20739_s7 + $0x390] sm:$0xff] %v659_v50   ;;  %664 = vst [vmem:[%s20739_s7 + $0x398] sm:$0xff] %v663_v51   ;;  %v671_v53 = vld [vmem:[%s20734_s6 + $0x628] sm:$0xff]   ;;  %v675_v54 = vld [vmem:[%s20734_s6 + $0x630] sm:$0xff]  }
  0x4d   : > { %668 = vst [vmem:[%s20739_s7 + $0x3a0] sm:$0xff] %v667_v52   ;;  %v679_v55 = vld [vmem:[%s20734_s6 + $0x638] sm:$0xff]   ;;  %672 = vst [vmem:[%s20739_s7 + $0x3a8] sm:$0xff] %v671_v53   ;;  %v683_v56 = vld [vmem:[%s20734_s6 + $0x780] sm:$0xff]  }
  0x4e   : > { %676 = vst [vmem:[%s20739_s7 + $0x3b0] sm:$0xff] %v675_v54   ;;  %680 = vst [vmem:[%s20739_s7 + $0x3b8] sm:$0xff] %v679_v55   ;;  %v687_v57 = vld [vmem:[%s20734_s6 + $0x788] sm:$0xff]   ;;  %v691_v58 = vld [vmem:[%s20734_s6 + $0x790] sm:$0xff]  }
  0x4f   : > { %684 = vst [vmem:[%s20739_s7 + $0x3c0] sm:$0xff] %v683_v56   ;;  %688 = vst [vmem:[%s20739_s7 + $0x3c8] sm:$0xff] %v687_v57   ;;  %v695_v59 = vld [vmem:[%s20734_s6 + $0x798] sm:$0xff]   ;;  %v699_v60 = vld [vmem:[%s20734_s6 + $0x7a0] sm:$0xff]  }
  0x50   : > { %692 = vst [vmem:[%s20739_s7 + $0x3d0] sm:$0xff] %v691_v58   ;;  %v703_v61 = vld [vmem:[%s20734_s6 + $0x7a8] sm:$0xff]   ;;  %696 = vst [vmem:[%s20739_s7 + $0x3d8] sm:$0xff] %v695_v59   ;;  %v707_v62 = vld [vmem:[%s20734_s6 + $0x7b0] sm:$0xff]  }
  0x51   : > { %700 = vst [vmem:[%s20739_s7 + $0x3e0] sm:$0xff] %v699_v60   ;;  %704 = vst [vmem:[%s20739_s7 + $0x3e8] sm:$0xff] %v703_v61   ;;  %v711_v63 = vld [vmem:[%s20734_s6 + $0x7b8] sm:$0xff]   ;;  %v715_v0 = vld [vmem:[%s20734_s6 + $0x7c0] sm:$0xff]  }
  0x52   : > { %708 = vst [vmem:[%s20739_s7 + $0x3f0] sm:$0xff] %v707_v62   ;;  %712 = vst [vmem:[%s20739_s7 + $0x3f8] sm:$0xff] %v711_v63   ;;  %v719_v1 = vld [vmem:[%s20734_s6 + $0x7c8] sm:$0xff]   ;;  %v723_v2 = vld [vmem:[%s20734_s6 + $0x7d0] sm:$0xff]  }
  0x53   : > { %716 = vst [vmem:[%s20739_s7 + $0x400] sm:$0xff] %v715_v0   ;;  %v727_v3 = vld [vmem:[%s20734_s6 + $0x7d8] sm:$0xff]   ;;  %720 = vst [vmem:[%s20739_s7 + $0x408] sm:$0xff] %v719_v1   ;;  %v731_v4 = vld [vmem:[%s20734_s6 + $0x7e0] sm:$0xff]  }
  0x54   : > { %724 = vst [vmem:[%s20739_s7 + $0x410] sm:$0xff] %v723_v2   ;;  %728 = vst [vmem:[%s20739_s7 + $0x418] sm:$0xff] %v727_v3   ;;  %v735_v5 = vld [vmem:[%s20734_s6 + $0x7e8] sm:$0xff]   ;;  %v739_v6 = vld [vmem:[%s20734_s6 + $0x7f0] sm:$0xff]  }
  0x55   : > { %732 = vst [vmem:[%s20739_s7 + $0x420] sm:$0xff] %v731_v4   ;;  %736 = vst [vmem:[%s20739_s7 + $0x428] sm:$0xff] %v735_v5   ;;  %v743_v7 = vld [vmem:[%s20734_s6 + $0x7f8] sm:$0xff]   ;;  %v747_v8 = vld [vmem:[%s20734_s6 + $0x800] sm:$0xff]  }
  0x56   : > { %740 = vst [vmem:[%s20739_s7 + $0x430] sm:$0xff] %v739_v6   ;;  %v751_v9 = vld [vmem:[%s20734_s6 + $0x808] sm:$0xff]   ;;  %744 = vst [vmem:[%s20739_s7 + $0x438] sm:$0xff] %v743_v7   ;;  %v755_v10 = vld [vmem:[%s20734_s6 + $0x810] sm:$0xff]  }
  0x57   : > { %748 = vst [vmem:[%s20739_s7 + $0x440] sm:$0xff] %v747_v8   ;;  %752 = vst [vmem:[%s20739_s7 + $0x448] sm:$0xff] %v751_v9   ;;  %v759_v11 = vld [vmem:[%s20734_s6 + $0x818] sm:$0xff]   ;;  %v763_v12 = vld [vmem:[%s20734_s6 + $0x820] sm:$0xff]  }
  0x58   : > { %756 = vst [vmem:[%s20739_s7 + $0x450] sm:$0xff] %v755_v10   ;;  %760 = vst [vmem:[%s20739_s7 + $0x458] sm:$0xff] %v759_v11   ;;  %v767_v13 = vld [vmem:[%s20734_s6 + $0x828] sm:$0xff]   ;;  %v771_v14 = vld [vmem:[%s20734_s6 + $0x830] sm:$0xff]  }
  0x59   : > { %764 = vst [vmem:[%s20739_s7 + $0x460] sm:$0xff] %v763_v12   ;;  %v775_v15 = vld [vmem:[%s20734_s6 + $0x838] sm:$0xff]   ;;  %768 = vst [vmem:[%s20739_s7 + $0x468] sm:$0xff] %v767_v13   ;;  %v779_v16 = vld [vmem:[%s20734_s6 + $0x840] sm:$0xff]  }
  0x5a   : > { %772 = vst [vmem:[%s20739_s7 + $0x470] sm:$0xff] %v771_v14   ;;  %776 = vst [vmem:[%s20739_s7 + $0x478] sm:$0xff] %v775_v15   ;;  %v783_v17 = vld [vmem:[%s20734_s6 + $0x848] sm:$0xff]   ;;  %v787_v18 = vld [vmem:[%s20734_s6 + $0x850] sm:$0xff]  }
  0x5b   : > { %780 = vst [vmem:[%s20739_s7 + $0x480] sm:$0xff] %v779_v16   ;;  %784 = vst [vmem:[%s20739_s7 + $0x488] sm:$0xff] %v783_v17   ;;  %v791_v19 = vld [vmem:[%s20734_s6 + $0x858] sm:$0xff]   ;;  %v795_v20 = vld [vmem:[%s20734_s6 + $0x860] sm:$0xff]  }
  0x5c   : > { %788 = vst [vmem:[%s20739_s7 + $0x490] sm:$0xff] %v787_v18   ;;  %v799_v21 = vld [vmem:[%s20734_s6 + $0x868] sm:$0xff]   ;;  %792 = vst [vmem:[%s20739_s7 + $0x498] sm:$0xff] %v791_v19   ;;  %v803_v22 = vld [vmem:[%s20734_s6 + $0x870] sm:$0xff]  }
  0x5d   : > { %796 = vst [vmem:[%s20739_s7 + $0x4a0] sm:$0xff] %v795_v20   ;;  %800 = vst [vmem:[%s20739_s7 + $0x4a8] sm:$0xff] %v799_v21   ;;  %v807_v23 = vld [vmem:[%s20734_s6 + $0x878] sm:$0xff]   ;;  %v811_v24 = vld [vmem:[%s20734_s6 + $0x880] sm:$0xff]  }
  0x5e   : > { %804 = vst [vmem:[%s20739_s7 + $0x4b0] sm:$0xff] %v803_v22   ;;  %808 = vst [vmem:[%s20739_s7 + $0x4b8] sm:$0xff] %v807_v23   ;;  %v815_v25 = vld [vmem:[%s20734_s6 + $0x888] sm:$0xff]   ;;  %v819_v26 = vld [vmem:[%s20734_s6 + $0x890] sm:$0xff]  }
  0x5f   : > { %812 = vst [vmem:[%s20739_s7 + $0x4c0] sm:$0xff] %v811_v24   ;;  %v823_v27 = vld [vmem:[%s20734_s6 + $0x898] sm:$0xff]   ;;  %816 = vst [vmem:[%s20739_s7 + $0x4c8] sm:$0xff] %v815_v25   ;;  %v827_v28 = vld [vmem:[%s20734_s6 + $0x8a0] sm:$0xff]  }
  0x60   : > { %820 = vst [vmem:[%s20739_s7 + $0x4d0] sm:$0xff] %v819_v26   ;;  %824 = vst [vmem:[%s20739_s7 + $0x4d8] sm:$0xff] %v823_v27   ;;  %v831_v29 = vld [vmem:[%s20734_s6 + $0x8a8] sm:$0xff]   ;;  %v835_v30 = vld [vmem:[%s20734_s6 + $0x8b0] sm:$0xff]  }
  0x61   : > { %828 = vst [vmem:[%s20739_s7 + $0x4e0] sm:$0xff] %v827_v28   ;;  %832 = vst [vmem:[%s20739_s7 + $0x4e8] sm:$0xff] %v831_v29   ;;  %v839_v31 = vld [vmem:[%s20734_s6 + $0x8b8] sm:$0xff]  }
  0x62   : > { %836 = vst [vmem:[%s20739_s7 + $0x4f0] sm:$0xff] %v835_v30   ;;  %840 = vst [vmem:[%s20739_s7 + $0x4f8] sm:$0xff] %v839_v31  }
  0x63 PF: > { %p14426_p5 = scmp.ge.s32.totalorder %s20667_s20, 1  ;;  %p1504_p6 = scmp.lt.s32.totalorder %s20667_s20, 3 }
  0x65   : > { %p1505_p7 = pnand %p14426_p5, %p1504_p6 }
  0x67   : > { %1508 = sbr.rel (%p1505_p7) target bundleno = 3004 (0xbbc), region = 77 }
  0x6e   : > { %v20260_v32 = vld [vmem:[%s25962_s1] sm:$0xff]   ;;  %vm3162_vm0 = vcmask 1043456   ;;  %v20261_v33 = vld [vmem:[%s25962_s1 + $0x8] sm:$0x1f]   ;;  %vm3163_vm1 = vcmask 1044480   ;;  %s1511_s12 = sand.u32 1, %s20659_s18  }
  0x6f   : > { %16741 = vmatprep.subr.bf16.mxu0 %v20260_v32  ;;  %v20669_v34 = vmov 65535   ;;  %s20234_s13 = smul.u32 1280, %s1511_s12  ;;  %vm2681_vm2 = vcmask 203776   ;;  %s14427_s29 = sshll.u32 %s14421_s21, 3 }
  0x70   : > { %16742 = vmatpush3.bf16.msra.mxu0 %v20260_v32  ;;  %v3164_v35 = vsel %vm3162_vm0, 4294967295, %v20669_v34  ;;  %p1540_p8 = scmp.lt.s32.totalorder %s14427_s29, 15 }
  0x71   : > { %v3165_v36 = vsel %vm3163_vm1, %v3164_v35, 0  ;;  %s21067_s14 = scalar_lea.vmem [#allocation3], %s20234_s13 }
  0x72   : > { %v3167_v37 = vand.u32 %v20261_v33, %v3165_v36  ;;  %v20262_v38 = vld [vmem:[%s21067_s14] sm:$0xff]   ;;  %v20263_v39 = vld [vmem:[%s21067_s14 + $0x8] sm:$0xff]   ;;  %v20264_v40 = vld [vmem:[%s21067_s14 + $0x10] sm:$0xff]   ;;  %s26629_s29 = smov (!%p1540_p8, %s14427_s29), 15 }
  0x73   : > { %16745 = vmatprep.mubr.msk.bf16.mxu0 %vm2681_vm2, %v20262_v38  ;;  %v20265_v41 = vld [vmem:[%s21067_s14 + $0x18] sm:$0xff]   ;;  %v20266_v42 = vld [vmem:[%s21067_s14 + $0x20] sm:$0xff]   ;;  %v20267_v43 = vld [vmem:[%s21067_s14 + $0x28] sm:$0xff]   ;;  %s14428_s20 = sshll.u32 %s26629_s29, 2 }
  0x74   : > { %16743 = vmatprep.subr.bf16.mxu0 %v3167_v37  ;;  %v20268_v44 = vld [vmem:[%s21067_s14 + $0x30] sm:$0xff]   ;;  %v20269_v45 = vld [vmem:[%s21067_s14 + $0x38] sm:$0xff]   ;;  %v20270_v46 = vld [vmem:[%s21067_s14 + $0x40] sm:$0xff]   ;;  %s1543_s8 = scalar_lea.vmem %s25966_s5, %s14428_s20 }
  0x75   : > { %16744 = vmatpush3.bf16.msra.mxu0 %v3167_v37  ;;  %v20271_v47 = vld [vmem:[%s21067_s14 + $0x48] sm:$0xff]   ;;  %v20272_v48 = vld [vmem:[%s21067_s14 + $0x50] sm:$0xff]   ;;  %v20273_v49 = vld [vmem:[%s21067_s14 + $0x58] sm:$0xff]  }
  0x76   : > { %v20274_v50 = vld [vmem:[%s21067_s14 + $0x60] sm:$0xff]   ;;  %v20275_v51 = vld [vmem:[%s21067_s14 + $0x68] sm:$0xff]   ;;  %v20276_v52 = vld [vmem:[%s21067_s14 + $0x70] sm:$0xff]  }
  0x77   : > { %v20277_v53 = vld [vmem:[%s21067_s14 + $0x78] sm:$0xff]   ;;  %v20278_v54 = vld [vmem:[%s21067_s14 + $0x80] sm:$0xff]   ;;  %v20279_v55 = vld [vmem:[%s21067_s14 + $0x88] sm:$0xff]  }
  0x78   : > { %16746 = vmatmul.mubr.msk.bf16.vlgmr.msra.gmra.mrb[0].mxu0 %vm2681_vm2, %v20263_v39  ;;  %v20280_v56 = vld [vmem:[%s21067_s14 + $0x90] sm:$0xff]   ;;  %v20281_v57 = vld [vmem:[%s21067_s14 + $0x98] sm:$0xff]   ;;  %v20282_v58 = vld [vmem:[%s21067_s14 + $0xa0] sm:$0xff]  }
  0x79   : > { %16749 = vmatprep.mubr.msk.bf16.mxu0 %vm2681_vm2, %v20264_v40  ;;  %v20283_v59 = vld [vmem:[%s21067_s14 + $0xa8] sm:$0xff]   ;;  %v20284_v60 = vld [vmem:[%s21067_s14 + $0xb0] sm:$0xff]   ;;  %v20285_v61 = vld [vmem:[%s21067_s14 + $0xb8] sm:$0xff]  }
  0x7a   : > { %v20286_v62 = vld [vmem:[%s21067_s14 + $0xc0] sm:$0xff]   ;;  %v20287_v63 = vld [vmem:[%s21067_s14 + $0xc8] sm:$0xff]   ;;  %v20288_v0 = vld [vmem:[%s21067_s14 + $0xd0] sm:$0xff]  }
  0x7b   : > { %v20289_v1 = vld [vmem:[%s21067_s14 + $0xd8] sm:$0xff]   ;;  %v20290_v2 = vld [vmem:[%s21067_s14 + $0xe0] sm:$0xff]   ;;  %v20291_v3 = vld [vmem:[%s21067_s14 + $0xe8] sm:$0xff]  }
  0x7c   : > { %v20292_v4 = vld [vmem:[%s21067_s14 + $0xf0] sm:$0xff]   ;;  %v20293_v5 = vld [vmem:[%s21067_s14 + $0xf8] sm:$0xff]   ;;  %v20294_v6 = vld [vmem:[%s21067_s14 + $0x100] sm:$0xff]  }
  0x7d   : > { %v20295_v7 = vld [vmem:[%s21067_s14 + $0x108] sm:$0xff]   ;;  %v20296_v8 = vld [vmem:[%s21067_s14 + $0x110] sm:$0xff]   ;;  %v20297_v9 = vld [vmem:[%s21067_s14 + $0x118] sm:$0xff]  }
  0x7e   : > { %v20298_v10 = vld [vmem:[%s21067_s14 + $0x120] sm:$0xff]   ;;  %v20299_v11 = vld [vmem:[%s21067_s14 + $0x128] sm:$0xff]   ;;  %v20300_v12 = vld [vmem:[%s21067_s14 + $0x130] sm:$0xff]  }
  0x7f   : > { %v20301_v13 = vld [vmem:[%s21067_s14 + $0x138] sm:$0xff]   ;;  %v20302_v14 = vld [vmem:[%s21067_s14 + $0x140] sm:$0xff]   ;;  %v20303_v15 = vld [vmem:[%s21067_s14 + $0x148] sm:$0xff]  }
  0x80   : > { %16750 = vmatmul.mubr.msk.bf16.gmra.mrb[4].mxu0 %vm2681_vm2, %v20265_v41  ;;  %v20304_v16 = vld [vmem:[%s21067_s14 + $0x150] sm:$0xff]   ;;  %v20305_v17 = vld [vmem:[%s21067_s14 + $0x158] sm:$0xff]   ;;  %v20306_v18 = vld [vmem:[%s21067_s14 + $0x160] sm:$0xff]  }
  0x81   : > { %16753 = vmatprep.mubr.msk.bf16.mxu0 %vm2681_vm2, %v20266_v42  ;;  %v20307_v19 = vld [vmem:[%s21067_s14 + $0x168] sm:$0xff]   ;;  %v20308_v20 = vld [vmem:[%s21067_s14 + $0x170] sm:$0xff]   ;;  %v20309_v21 = vld [vmem:[%s21067_s14 + $0x178] sm:$0xff]  }
  0x82   : > { %v20310_v22 = vld [vmem:[%s21067_s14 + $0x180] sm:$0xff]   ;;  %v20311_v23 = vld [vmem:[%s21067_s14 + $0x188] sm:$0xff]   ;;  %v20312_v24 = vld [vmem:[%s21067_s14 + $0x190] sm:$0xff]  }
  0x83   : > { %v20313_v25 = vld [vmem:[%s21067_s14 + $0x198] sm:$0xff]   ;;  %v20314_v26 = vld [vmem:[%s21067_s14 + $0x1a0] sm:$0xff]   ;;  %v20315_v27 = vld [vmem:[%s21067_s14 + $0x1a8] sm:$0xff]  }
  0x84   : > { %v20316_v28 = vld [vmem:[%s21067_s14 + $0x1b0] sm:$0xff]   ;;  %v20317_v31 = vld [vmem:[%s21067_s14 + $0x1b8] sm:$0xff]   ;;  %v20318_v33 = vld [vmem:[%s21067_s14 + $0x1c0] sm:$0xff]  }
  0x85   : > { %v20319_v37 = vld [vmem:[%s21067_s14 + $0x1c8] sm:$0xff]   ;;  %v20320_v39 = vld [vmem:[%s21067_s14 + $0x1d0] sm:$0xff]  }
  0x88   : > { %16754 = vmatmul.mubr.msk.bf16.gmra.mrb[8].mxu0 %vm2681_vm2, %v20267_v43  ;;  %v20321_v43 = vld [vmem:[%s21067_s14 + $0x1d8] sm:$0xff]  }
  0x89   : > { %16757 = vmatprep.mubr.msk.bf16.mxu0 %vm2681_vm2, %v20268_v44 }
  0x90   : > { %16758 = vmatmul.mubr.msk.bf16.gmra.mrb[12].mxu0 %vm2681_vm2, %v20269_v45  ;;  %v20322_v45 = vld [vmem:[%s21067_s14 + $0x1e0] sm:$0xff]  }
  0x91   : > { %16761 = vmatprep.mubr.msk.bf16.mxu0 %vm2681_vm2, %v20270_v46 }
  0x98   : > { %16762 = vmatmul.mubr.msk.bf16.gmra.mrb[16].mxu0 %vm2681_vm2, %v20271_v47 }
  0x99   : > { %16765 = vmatprep.mubr.msk.bf16.mxu0 %vm2681_vm2, %v20272_v48 }
  0xa0   : > { %16766 = vmatmul.mubr.msk.bf16.gmra.mrb[20].mxu0 %vm2681_vm2, %v20273_v49  ;;  %v20323_v49 = vld [vmem:[%s21067_s14 + $0x1e8] sm:$0xff]  }
  0xa1   : > { %16769 = vmatprep.mubr.msk.bf16.mxu0 %vm2681_vm2, %v20274_v50 }
  0xa8   : > { %16770 = vmatmul.mubr.msk.bf16.gmra.mrb[24].mxu0 %vm2681_vm2, %v20275_v51  ;;  %v20324_v51 = vld [vmem:[%s21067_s14 + $0x1f0] sm:$0xff]  }
  0xa9   : > { %16773 = vmatprep.mubr.msk.bf16.mxu0 %vm2681_vm2, %v20276_v52 }
  0xb0   : > { %16774 = vmatmul.mubr.msk.bf16.gmra.mrb[28].mxu0 %vm2681_vm2, %v20277_v53 }
  0xb1   : > { %16777 = vmatprep.mubr.msk.bf16.mxu0 %vm2681_vm2, %v20278_v54 }
  0xb8   : > { %16778 = vmatmul.mubr.msk.bf16.gmra.mrb[32].mxu0 %vm2681_vm2, %v20279_v55  ;;  %v20325_v55 = vld [vmem:[%s21067_s14 + $0x1f8] sm:$0xff]  }
  0xb9   : > { %16781 = vmatprep.mubr.msk.bf16.mxu0 %vm2681_vm2, %v20280_v56 }
  0xc0   : > { %16782 = vmatmul.mubr.msk.bf16.gmra.mrb[36].mxu0 %vm2681_vm2, %v20281_v57  ;;  %v20326_v57 = vld [vmem:[%s21067_s14 + $0x200] sm:$0xff]  }
  0xc1   : > { %16785 = vmatprep.mubr.msk.bf16.mxu0 %vm2681_vm2, %v20282_v58 }
  0xc8   : > { %16786 = vmatmul.mubr.msk.bf16.gmra.mrb[40].mxu0 %vm2681_vm2, %v20283_v59 }
  0xc9   : > { %16789 = vmatprep.mubr.msk.bf16.mxu0 %vm2681_vm2, %v20284_v60 }
  0xd0   : > { %16790 = vmatmul.mubr.msk.bf16.gmra.mrb[44].mxu0 %vm2681_vm2, %v20285_v61  ;;  %v20327_v61 = vld [vmem:[%s21067_s14 + $0x208] sm:$0xff]  }
  0xd1   : > { %16793 = vmatprep.mubr.msk.bf16.mxu0 %vm2681_vm2, %v20286_v62 }
  0xd8   : > { %16794 = vmatmul.mubr.msk.bf16.gmra.mrb[48].mxu0 %vm2681_vm2, %v20287_v63  ;;  %v20328_v63 = vld [vmem:[%s21067_s14 + $0x210] sm:$0xff]  }
  0xd9   : > { %16797 = vmatprep.mubr.msk.bf16.mxu0 %vm2681_vm2, %v20288_v0 }
  0xe0   : > { %16798 = vmatmul.mubr.msk.bf16.gmra.mrb[52].mxu0 %vm2681_vm2, %v20289_v1 }
  0xe1   : > { %16801 = vmatprep.mubr.msk.bf16.mxu0 %vm2681_vm2, %v20290_v2 }
  0xe8   : > { %16802 = vmatmul.mubr.msk.bf16.gmra.mrb[56].mxu0 %vm2681_vm2, %v20291_v3  ;;  %v20329_v3 = vld [vmem:[%s21067_s14 + $0x218] sm:$0xff]  }
  0xe9   : > { %16805 = vmatprep.mubr.msk.bf16.mxu0 %vm2681_vm2, %v20292_v4 }
  0xf0   : > { %16806 = vmatmul.mubr.msk.bf16.gmra.mrb[60].mxu0 %vm2681_vm2, %v20293_v5  ;;  %v20330_v5 = vld [vmem:[%s21067_s14 + $0x220] sm:$0xff]  }
  0xf1   : > { %16809 = vmatprep.mubr.msk.bf16.mxu0 %vm2681_vm2, %v20294_v6 }
  0xf8   : > { %16810 = vmatmul.mubr.msk.bf16.gmra.mrb[64].mxu0 %vm2681_vm2, %v20295_v7 }
  0xf9   : > { %16813 = vmatprep.mubr.msk.bf16.mxu0 %vm2681_vm2, %v20296_v8 }
 0x100   : > { %16814 = vmatmul.mubr.msk.bf16.gmra.mrb[68].mxu0 %vm2681_vm2, %v20297_v9  ;;  %v20331_v9 = vld [vmem:[%s21067_s14 + $0x228] sm:$0xff]  }
 0x101   : > { %16817 = vmatprep.mubr.msk.bf16.mxu0 %vm2681_vm2, %v20298_v10 }
 0x108   : > { %16818 = vmatmul.mubr.msk.bf16.gmra.mrb[72].mxu0 %vm2681_vm2, %v20299_v11  ;;  %v20332_v11 = vld [vmem:[%s21067_s14 + $0x230] sm:$0xff]  }
 0x109   : > { %16821 = vmatprep.mubr.msk.bf16.mxu0 %vm2681_vm2, %v20300_v12 }
 0x110   : > { %16822 = vmatmul.mubr.msk.bf16.gmra.mrb[76].mxu0 %vm2681_vm2, %v20301_v13 }
 0x111   : > { %16825 = vmatprep.mubr.msk.bf16.mxu0 %vm2681_vm2, %v20302_v14 }
 0x118   : > { %16826 = vmatmul.mubr.msk.bf16.gmra.mrb[80].mxu0 %vm2681_vm2, %v20303_v15  ;;  %v20333_v15 = vld [vmem:[%s21067_s14 + $0x238] sm:$0xff]  }
 0x119   : > { %16829 = vmatprep.mubr.msk.bf16.mxu0 %vm2681_vm2, %v20304_v16 }
 0x120   : > { %16830 = vmatmul.mubr.msk.bf16.gmra.mrb[84].mxu0 %vm2681_vm2, %v20305_v17  ;;  %v20334_v17 = vld [vmem:[%s21067_s14 + $0x240] sm:$0xff]  }
 0x121   : > { %16833 = vmatprep.mubr.msk.bf16.mxu0 %vm2681_vm2, %v20306_v18 }
 0x128   : > { %16834 = vmatmul.mubr.msk.bf16.gmra.mrb[88].mxu0 %vm2681_vm2, %v20307_v19 }
 0x129   : > { %16837 = vmatprep.mubr.msk.bf16.mxu0 %vm2681_vm2, %v20308_v20 }
 0x130   : > { %16838 = vmatmul.mubr.msk.bf16.gmra.mrb[92].mxu0 %vm2681_vm2, %v20309_v21  ;;  %v20335_v21 = vld [vmem:[%s21067_s14 + $0x248] sm:$0xff]  }
 0x131   : > { %16841 = vmatprep.mubr.msk.bf16.mxu0 %vm2681_vm2, %v20310_v22 }
 0x138   : > { %16842 = vmatmul.mubr.msk.bf16.gmra.mrb[96].mxu0 %vm2681_vm2, %v20311_v23  ;;  %v20336_v23 = vld [vmem:[%s21067_s14 + $0x250] sm:$0xff]  }
 0x139   : > { %16845 = vmatprep.mubr.msk.bf16.mxu0 %vm2681_vm2, %v20312_v24 }
 0x140   : > { %16846 = vmatmul.mubr.msk.bf16.gmra.mrb[100].mxu0 %vm2681_vm2, %v20313_v25 }
 0x141   : > { %16849 = vmatprep.mubr.msk.bf16.mxu0 %vm2681_vm2, %v20314_v26 }
 0x148   : > { %16850 = vmatmul.mubr.msk.bf16.gmra.mrb[104].mxu0 %vm2681_vm2, %v20315_v27  ;;  %v20337_v27 = vld [vmem:[%s21067_s14 + $0x258] sm:$0xff]  }
 0x149   : > { %16853 = vmatprep.mubr.msk.bf16.mxu0 %vm2681_vm2, %v20316_v28 }
 0x14b   : > { %v21179_v29 = vpop.f32.mrb[0].mxu0 }
 0x14c   : > { %26149 = vst [vmem:[#allocation4_spill] sm:$0xff] %v21179_v29  ;;  %v21181_v30 = vpop.f32.mrb[1].mxu0  ;;  %v20359_v29 = vld [vmem:[%s21067_s14 + $0x308] sm:$0xff]  }
 0x14d   : > { %v21184_v32 = vpop.f32.mrb[2].mxu0 }
 0x14e   : > { %v21187_v34 = vpop.f32.mrb[3].mxu0 }
 0x150   : > { %16854 = vmatmul.mubr.msk.bf16.gmra.mrb[108].mxu0 %vm2681_vm2, %v20317_v31  ;;  %v20338_v31 = vld [vmem:[%s21067_s14 + $0x260] sm:$0xff]  }
 0x151   : > { %16857 = vmatprep.mubr.msk.bf16.mxu0 %vm2681_vm2, %v20318_v33 }
 0x153   : > { %v21191_v35 = vpop.f32.mrb[4].mxu0 }
 0x154   : > { %26150 = vst [vmem:[#allocation5_spill] sm:$0xff] %v21191_v35  ;;  %v21193_v36 = vpop.f32.mrb[5].mxu0  ;;  %v20361_v35 = vld [vmem:[%s21067_s14 + $0x318] sm:$0xff]  }
 0x155   : > { %v21196_v38 = vpop.f32.mrb[6].mxu0 }
 0x156   : > { %v21199_v40 = vpop.f32.mrb[7].mxu0 }
 0x158   : > { %16858 = vmatmul.mubr.msk.bf16.gmra.mrb[112].mxu0 %vm2681_vm2, %v20319_v37 }
 0x159   : > { %16861 = vmatprep.mubr.msk.bf16.mxu0 %vm2681_vm2, %v20320_v39 }
 0x15b   : > { %v21203_v41 = vpop.f32.mrb[8].mxu0 }
 0x15c   : > { %26151 = vst [vmem:[#allocation6_spill] sm:$0xff] %v21203_v41  ;;  %v21205_v42 = vpop.f32.mrb[9].mxu0  ;;  %v20363_v41 = vld [vmem:[%s21067_s14 + $0x328] sm:$0xff]  }
 0x15d   : > { %v21208_v44 = vpop.f32.mrb[10].mxu0 }
 0x15e   : > { %v21211_v46 = vpop.f32.mrb[11].mxu0 }
 0x160   : > { %16862 = vmatmul.mubr.msk.bf16.gmra.mrb[116].mxu0 %vm2681_vm2, %v20321_v43  ;;  %v20339_v43 = vld [vmem:[%s21067_s14 + $0x268] sm:$0xff]  }
 0x161   : > { %16865 = vmatprep.mubr.msk.bf16.mxu0 %vm2681_vm2, %v20322_v45 }
 0x163   : > { %v21215_v47 = vpop.f32.mrb[12].mxu0 }
 0x164   : > { %26152 = vst [vmem:[#allocation7_spill] sm:$0xff] %v21215_v47  ;;  %v21217_v48 = vpop.f32.mrb[13].mxu0 }
 0x165   : > { %v21220_v50 = vpop.f32.mrb[14].mxu0 }
 0x166   : > { %v21223_v52 = vpop.f32.mrb[15].mxu0 }
 0x168   : > { %16866 = vmatmul.mubr.msk.bf16.gmra.mrb[120].mxu0 %vm2681_vm2, %v20323_v49  ;;  %v20340_v49 = vld [vmem:[%s21067_s14 + $0x270] sm:$0xff]  }
 0x169   : > { %16869 = vmatprep.mubr.msk.bf16.mxu0 %vm2681_vm2, %v20324_v51 }
 0x16b   : > { %v21227_v53 = vpop.f32.mrb[16].mxu0 }
 0x16c   : > { %v21229_v54 = vpop.f32.mrb[17].mxu0 }
 0x16d   : > { %26153 = vst [vmem:[#allocation8_spill] sm:$0xff] %v21229_v54  ;;  %v21232_v56 = vpop.f32.mrb[18].mxu0  ;;  %v20367_v54 = vld [vmem:[%s21067_s14 + $0x348] sm:$0xff]  }
 0x16e   : > { %v21235_v58 = vpop.f32.mrb[19].mxu0 }
 0x170   : > { %16870 = vmatmul.mubr.msk.bf16.gmra.mrb[124].mxu0 %vm2681_vm2, %v20325_v55 }
 0x171   : > { %16873 = vmatprep.mubr.msk.bf16.mxu0 %vm2681_vm2, %v20326_v57 }
 0x173   : > { %v21239_v59 = vpop.f32.mrb[20].mxu0 }
 0x174   : > { %v21241_v60 = vpop.f32.mrb[21].mxu0 }
 0x175   : > { %26154 = vst [vmem:[#allocation9_spill] sm:$0xff] %v21241_v60  ;;  %v21244_v62 = vpop.f32.mrb[22].mxu0  ;;  %v20369_v60 = vld [vmem:[%s21067_s14 + $0x358] sm:$0xff]  }
 0x176   : > { %v21247_v0 = vpop.f32.mrb[23].mxu0 }
 0x178   : > { %16874 = vmatmul.mubr.msk.bf16.gmra.mrb[128].mxu0 %vm2681_vm2, %v20327_v61  ;;  %v20341_v61 = vld [vmem:[%s21067_s14 + $0x278] sm:$0xff]  }
 0x179   : > { %16877 = vmatprep.mubr.msk.bf16.mxu0 %vm2681_vm2, %v20328_v63 }
 0x17b   : > { %v21251_v1 = vpop.f32.mrb[24].mxu0 }
 0x17c   : > { %v21253_v2 = vpop.f32.mrb[25].mxu0 }
 0x17d   : > { %26155 = vst [vmem:[#allocation10_spill] sm:$0xff] %v21253_v2  ;;  %v21256_v4 = vpop.f32.mrb[26].mxu0  ;;  %v20371_v2 = vld [vmem:[%s21067_s14 + $0x368] sm:$0xff]  }
 0x17e   : > { %v21259_v6 = vpop.f32.mrb[27].mxu0 }
 0x180   : > { %16878 = vmatmul.mubr.msk.bf16.gmra.mrb[132].mxu0 %vm2681_vm2, %v20329_v3  ;;  %v20342_v3 = vld [vmem:[%s21067_s14 + $0x280] sm:$0xff]  }
 0x181   : > { %16881 = vmatprep.mubr.msk.bf16.mxu0 %vm2681_vm2, %v20330_v5 }
 0x183   : > { %v21263_v7 = vpop.f32.mrb[28].mxu0 }
 0x184   : > { %v21265_v8 = vpop.f32.mrb[29].mxu0 }
 0x185   : > { %26156 = vst [vmem:[#allocation11_spill] sm:$0xff] %v21265_v8  ;;  %v21268_v10 = vpop.f32.mrb[30].mxu0  ;;  %v20373_v8 = vld [vmem:[%s21067_s14 + $0x378] sm:$0xff]  }
 0x186   : > { %v21271_v12 = vpop.f32.mrb[31].mxu0 }
 0x188   : > { %16882 = vmatmul.mubr.msk.bf16.gmra.mrb[136].mxu0 %vm2681_vm2, %v20331_v9 }
 0x189   : > { %16885 = vmatprep.mubr.msk.bf16.mxu0 %vm2681_vm2, %v20332_v11 }
 0x18b   : > { %v21275_v13 = vpop.f32.mrb[32].mxu0 }
 0x18c   : > { %v21277_v14 = vpop.f32.mrb[33].mxu0 }
 0x18d   : > { %26157 = vst [vmem:[#allocation12_spill] sm:$0xff] %v21277_v14  ;;  %v21280_v16 = vpop.f32.mrb[34].mxu0  ;;  %v20375_v14 = vld [vmem:[%s21067_s14 + $0x388] sm:$0xff]  }
 0x18e   : > { %v21283_v18 = vpop.f32.mrb[35].mxu0 }
 0x190   : > { %16886 = vmatmul.mubr.msk.bf16.gmra.mrb[140].mxu0 %vm2681_vm2, %v20333_v15  ;;  %v20343_v15 = vld [vmem:[%s21067_s14 + $0x288] sm:$0xff]  }
 0x191   : > { %16889 = vmatprep.mubr.msk.bf16.mxu0 %vm2681_vm2, %v20334_v17 }
 0x193   : > { %v21287_v19 = vpop.f32.mrb[36].mxu0 }
 0x194   : > { %v21289_v20 = vpop.f32.mrb[37].mxu0 }
 0x195   : > { %26158 = vst [vmem:[#allocation13_spill] sm:$0xff] %v21289_v20  ;;  %v21292_v22 = vpop.f32.mrb[38].mxu0  ;;  %v20377_v20 = vld [vmem:[%s21067_s14 + $0x398] sm:$0xff]  }
 0x196   : > { %v21295_v24 = vpop.f32.mrb[39].mxu0 }
 0x198   : > { %16890 = vmatmul.mubr.msk.bf16.gmra.mrb[144].mxu0 %vm2681_vm2, %v20335_v21  ;;  %v20344_v21 = vld [vmem:[%s21067_s14 + $0x290] sm:$0xff]  }
 0x199   : > { %16893 = vmatprep.mubr.msk.bf16.mxu0 %vm2681_vm2, %v20336_v23 }
 0x19b   : > { %v21299_v25 = vpop.f32.mrb[40].mxu0 }
 0x19c   : > { %v21301_v26 = vpop.f32.mrb[41].mxu0 }
 0x19d   : > { %26159 = vst [vmem:[#allocation14_spill] sm:$0xff] %v21301_v26  ;;  %v21304_v28 = vpop.f32.mrb[42].mxu0  ;;  %v20379_v26 = vld [vmem:[%s21067_s14 + $0x3a8] sm:$0xff]  }
 0x19e   : > { %v21307_v33 = vpop.f32.mrb[43].mxu0 }
 0x1a0   : > { %16894 = vmatmul.mubr.msk.bf16.gmra.mrb[148].mxu0 %vm2681_vm2, %v20337_v27 }
 0x1a1   : > { %16897 = vmatprep.mubr.msk.bf16.mxu0 %vm2681_vm2, %v20338_v31 }
 0x1a3   : > { %v21311_v37 = vpop.f32.mrb[44].mxu0 }
 0x1a4   : > { %v21313_v39 = vpop.f32.mrb[45].mxu0 }
 0x1a5   : > { %26160 = vst [vmem:[#allocation15_spill] sm:$0xff] %v21313_v39  ;;  %v21316_v45 = vpop.f32.mrb[46].mxu0  ;;  %v20381_v39 = vld [vmem:[%s21067_s14 + $0x3b8] sm:$0xff]  }
 0x1a6   : > { %v21319_v51 = vpop.f32.mrb[47].mxu0 }
 0x1a8   : > { %16898 = vmatmul.mubr.msk.bf16.gmra.mrb[152].mxu0 %vm2681_vm2, %v20339_v43  ;;  %v20345_v43 = vld [vmem:[%s21067_s14 + $0x298] sm:$0xff]  }
 0x1a9   : > { %16901 = vmatprep.mubr.msk.bf16.mxu0 %vm2681_vm2, %v20340_v49 }
 0x1ab   : > { %v21323_v55 = vpop.f32.mrb[48].mxu0 }
 0x1ac   : > { %v21325_v57 = vpop.f32.mrb[49].mxu0 }
 0x1ad   : > { %26161 = vst [vmem:[#allocation16_spill] sm:$0xff] %v21325_v57  ;;  %v21328_v63 = vpop.f32.mrb[50].mxu0  ;;  %v20383_v57 = vld [vmem:[%s21067_s14 + $0x3c8] sm:$0xff]  }
 0x1ae   : > { %26162 = vst [vmem:[#allocation17_spill] sm:$0xff] %v21328_v63  ;;  %v21331_v5 = vpop.f32.mrb[51].mxu0  ;;  %v20386_v63 = vld [vmem:[%s21067_s14 + $0x3e0] sm:$0xff]  }
 0x1af   : > { %26163 = vst [vmem:[#allocation18_spill] sm:$0xff] %v21331_v5 }
 0x1b0   : > { %16902 = vmatmul.mubr.msk.bf16.gmra.mrb[156].mxu0 %vm2681_vm2, %v20341_v61  ;;  %v20346_v61 = vld [vmem:[%s21067_s14 + $0x2a0] sm:$0xff]  }
 0x1b1   : > { %16905 = vmatprep.mubr.msk.bf16.mxu0 %vm2681_vm2, %v20342_v3 }
 0x1b3   : > { %v21335_v9 = vpop.f32.mrb[52].mxu0 }
 0x1b4   : > { %26164 = vst [vmem:[#allocation19_spill] sm:$0xff] %v21335_v9  ;;  %v21337_v11 = vpop.f32.mrb[53].mxu0  ;;  %v20388_v9 = vld [vmem:[%s21067_s14 + $0x3f0] sm:$0xff]  }
 0x1b5   : > { %26165 = vst [vmem:[#allocation20_spill] sm:$0xff] %v21337_v11  ;;  %v21340_v17 = vpop.f32.mrb[54].mxu0 }
 0x1b6   : > { %26166 = vst [vmem:[#allocation21_spill] sm:$0xff] %v21340_v17  ;;  %v21343_v23 = vpop.f32.mrb[55].mxu0 }
 0x1b7   : > { %26167 = vst [vmem:[#allocation22_spill] sm:$0xff] %v21343_v23 }
 0x1b8   : > { %16906 = vmatmul.mubr.msk.bf16.gmra.mrb[160].mxu0 %vm2681_vm2, %v20343_v15 }
 0x1b9   : > { %16909 = vmatprep.mubr.msk.bf16.mxu0 %vm2681_vm2, %v20344_v21  ;;  %v20347_v21 = vld [vmem:[%s21067_s14 + $0x2a8] sm:$0xff]  }
 0x1bb   : > { %v21347_v27 = vpop.f32.mrb[56].mxu0 }
 0x1bc   : > { %26168 = vst [vmem:[#allocation23_spill] sm:$0xff] %v21347_v27  ;;  %v21349_v31 = vpop.f32.mrb[57].mxu0 }
 0x1bd   : > { %26169 = vst [vmem:[#allocation24_spill] sm:$0xff] %v21349_v31  ;;  %v21352_v49 = vpop.f32.mrb[58].mxu0  ;;  %v20348_v31 = vld [vmem:[%s21067_s14 + $0x2b0] sm:$0xff]  }
 0x1be   : > { %26170 = vst [vmem:[#allocation25_spill] sm:$0xff] %v21352_v49  ;;  %v21355_v3 = vpop.f32.mrb[59].mxu0 }
 0x1bf   : > { %26171 = vst [vmem:[#allocation26_spill] sm:$0xff] %v21355_v3 }
 0x1c0   : > { %16910 = vmatmul.mubr.msk.bf16.gmra.mrb[164].mxu0 %vm2681_vm2, %v20345_v43 }
 0x1c1   : > { %16913 = vmatprep.mubr.msk.bf16.mxu0 %vm2681_vm2, %v20346_v61  ;;  %v20349_v61 = vld [vmem:[%s21067_s14 + $0x2b8] sm:$0xff]  }
 0x1c3   : > { %v21359_v23 = vpop.f32.mrb[60].mxu0 }
 0x1c4   : > { %26172 = vst [vmem:[#allocation27_spill] sm:$0xff] %v21359_v23  ;;  %v21361_v15 = vpop.f32.mrb[61].mxu0 }
 0x1c5   : > { %26173 = vst [vmem:[#allocation28_spill] sm:$0xff] %v21361_v15  ;;  %v21364_v27 = vpop.f32.mrb[62].mxu0  ;;  %v20350_v15 = vld [vmem:[%s21067_s14 + $0x2c0] sm:$0xff]  }
 0x1c6   : > { %26174 = vst [vmem:[#allocation29_spill] sm:$0xff] %v21364_v27  ;;  %v21367_v17 = vpop.f32.mrb[63].mxu0 }
 0x1c7   : > { %26175 = vst [vmem:[#allocation30_spill] sm:$0xff] %v21367_v17 }
 0x1c8   : > { %16914 = vmatmul.mubr.msk.bf16.gmra.mrb[168].mxu0 %vm2681_vm2, %v20347_v21 }
 0x1c9   : > { %16917 = vmatprep.mubr.msk.bf16.mxu0 %vm2681_vm2, %v20348_v31  ;;  %v20351_v31 = vld [vmem:[%s21067_s14 + $0x2c8] sm:$0xff]  }
 0x1cb   : > { %v21371_v3 = vpop.f32.mrb[64].mxu0 }
 0x1cc   : > { %26176 = vst [vmem:[#allocation31_spill] sm:$0xff] %v21371_v3  ;;  %v21373_v43 = vpop.f32.mrb[65].mxu0 }
 0x1cd   : > { %26177 = vst [vmem:[#allocation32_spill] sm:$0xff] %v21373_v43  ;;  %v21376_v23 = vpop.f32.mrb[66].mxu0  ;;  %v20352_v43 = vld [vmem:[%s21067_s14 + $0x2d0] sm:$0xff]  }
 0x1ce   : > { %26178 = vst [vmem:[#allocation33_spill] sm:$0xff] %v21376_v23  ;;  %v21379_v49 = vpop.f32.mrb[67].mxu0 }
 0x1cf   : > { %26179 = vst [vmem:[#allocation34_spill] sm:$0xff] %v21379_v49 }
 0x1d0   : > { %16918 = vmatmul.mubr.msk.bf16.gmra.mrb[172].mxu0 %vm2681_vm2, %v20349_v61 }
 0x1d1   : > { %16921 = vmatprep.mubr.msk.bf16.mxu0 %vm2681_vm2, %v20350_v15  ;;  %v20353_v15 = vld [vmem:[%s21067_s14 + $0x2d8] sm:$0xff]  }
 0x1d3   : > { %v21383_v17 = vpop.f32.mrb[68].mxu0 }
 0x1d4   : > { %26180 = vst [vmem:[#allocation35_spill] sm:$0xff] %v21383_v17  ;;  %v21385_v21 = vpop.f32.mrb[69].mxu0 }
 0x1d5   : > { %26181 = vst [vmem:[#allocation36_spill] sm:$0xff] %v21385_v21  ;;  %v21388_v3 = vpop.f32.mrb[70].mxu0  ;;  %v20354_v21 = vld [vmem:[%s21067_s14 + $0x2e0] sm:$0xff]  }
 0x1d6   : > { %26182 = vst [vmem:[#allocation37_spill] sm:$0xff] %v21388_v3  ;;  %v21391_v27 = vpop.f32.mrb[71].mxu0 }
 0x1d7   : > { %26183 = vst [vmem:[#allocation38_spill] sm:$0xff] %v21391_v27 }
 0x1d8   : > { %16922 = vmatmul.mubr.msk.bf16.gmra.mrb[176].mxu0 %vm2681_vm2, %v20351_v31 }
 0x1d9   : > { %16925 = vmatprep.mubr.msk.bf16.mxu0 %vm2681_vm2, %v20352_v43  ;;  %v20355_v43 = vld [vmem:[%s21067_s14 + $0x2e8] sm:$0xff]  }
 0x1db   : > { %v21395_v49 = vpop.f32.mrb[72].mxu0 }
 0x1dc   : > { %26184 = vst [vmem:[#allocation39_spill] sm:$0xff] %v21395_v49  ;;  %v21397_v61 = vpop.f32.mrb[73].mxu0 }
 0x1dd   : > { %26185 = vst [vmem:[#allocation40_spill] sm:$0xff] %v21397_v61  ;;  %v21400_v17 = vpop.f32.mrb[74].mxu0  ;;  %v20356_v61 = vld [vmem:[%s21067_s14 + $0x2f0] sm:$0xff]  }
 0x1de   : > { %26186 = vst [vmem:[#allocation41_spill] sm:$0xff] %v21400_v17  ;;  %v21403_v23 = vpop.f32.mrb[75].mxu0 }
 0x1df   : > { %26187 = vst [vmem:[#allocation42_spill] sm:$0xff] %v21403_v23 }
 0x1e0   : > { %16926 = vmatmul.mubr.msk.bf16.gmra.mrb[180].mxu0 %vm2681_vm2, %v20353_v15 }
 0x1e1   : > { %16929 = vmatprep.mubr.msk.bf16.mxu0 %vm2681_vm2, %v20354_v21  ;;  %v20357_v21 = vld [vmem:[%s21067_s14 + $0x2f8] sm:$0xff]  }
 0x1e3   : > { %v21407_v27 = vpop.f32.mrb[76].mxu0 }
 0x1e4   : > { %26188 = vst [vmem:[#allocation43_spill] sm:$0xff] %v21407_v27  ;;  %v21409_v31 = vpop.f32.mrb[77].mxu0 }
 0x1e5   : > { %26189 = vst [vmem:[#allocation44_spill] sm:$0xff] %v21409_v31  ;;  %v21412_v49 = vpop.f32.mrb[78].mxu0 }
 0x1e6   : > { %26190 = vst [vmem:[#allocation45_spill] sm:$0xff] %v21412_v49  ;;  %v21415_v3 = vpop.f32.mrb[79].mxu0  ;;  %v20358_v49 = vld [vmem:[%s21067_s14 + $0x300] sm:$0xff]  }
 0x1e7   : > { %26191 = vst [vmem:[#allocation46_spill] sm:$0xff] %v21415_v3 }
 0x1e8   : > { %16930 = vmatmul.mubr.msk.bf16.gmra.mrb[184].mxu0 %vm2681_vm2, %v20355_v43 }
 0x1e9   : > { %16933 = vmatprep.mubr.msk.bf16.mxu0 %vm2681_vm2, %v20356_v61  ;;  %v20360_v61 = vld [vmem:[%s21067_s14 + $0x310] sm:$0xff]  }
 0x1eb   : > { %v21419_v23 = vpop.f32.mrb[80].mxu0 }
 0x1ec   : > { %26192 = vst [vmem:[#allocation47_spill] sm:$0xff] %v21419_v23  ;;  %v21421_v15 = vpop.f32.mrb[81].mxu0 }
 0x1ed   : > { %26193 = vst [vmem:[#allocation48_spill] sm:$0xff] %v21421_v15  ;;  %v21426_v27 = vpop.f32.mrb[82].mxu0 }
 0x1ee   : > { %v21431_v17 = vpop.f32.mrb[83].mxu0 }
 0x1ef   : > { %26194 = vst [vmem:[#allocation49_spill] sm:$0xff] %v21431_v17 }
 0x1f0   : > { %16934 = vmatmul.mubr.msk.bf16.gmra.mrb[188].mxu0 %vm2681_vm2, %v20357_v21 }
 0x1f1   : > { %16937 = vmatprep.mubr.msk.bf16.mxu0 %vm2681_vm2, %v20358_v49  ;;  %v20362_v49 = vld [vmem:[%s21067_s14 + $0x320] sm:$0xff]  }
 0x1f3   : > { %v21439_v31 = vpop.f32.mrb[84].mxu0 }
 0x1f4   : > { %26195 = vst [vmem:[#allocation50_spill] sm:$0xff] %v21439_v31  ;;  %v21441_v23 = vpop.f32.mrb[85].mxu0 }
 0x1f5   : > { %26196 = vst [vmem:[#allocation51_spill] sm:$0xff] %v21441_v23  ;;  %v21446_v15 = vpop.f32.mrb[86].mxu0 }
 0x1f6   : > { %v21451_v17 = vpop.f32.mrb[87].mxu0 }
 0x1f7   : > { %26197 = vst [vmem:[#allocation52_spill] sm:$0xff] %v21451_v17 }
 0x1f8   : > { %16938 = vmatmul.mubr.msk.bf16.gmra.mrb[192].mxu0 %vm2681_vm2, %v20359_v29  ;;  %v20364_v29 = vld [vmem:[%s21067_s14 + $0x330] sm:$0xff]  }
 0x1f9   : > { %16941 = vmatprep.mubr.msk.bf16.mxu0 %vm2681_vm2, %v20360_v61  ;;  %v20365_v61 = vld [vmem:[%s21067_s14 + $0x338] sm:$0xff]  }
 0x1fb   : > { %v21459_v3 = vpop.f32.mrb[88].mxu0 }
 0x1fc   : > { %26198 = vst [vmem:[#allocation53_spill] sm:$0xff] %v21459_v3  ;;  %v21461_v31 = vpop.f32.mrb[89].mxu0 }
 0x1fd   : > { %26199 = vst [vmem:[#allocation54_spill] sm:$0xff] %v21461_v31  ;;  %v21466_v23 = vpop.f32.mrb[90].mxu0 }
 0x1fe   : > { %v21471_v17 = vpop.f32.mrb[91].mxu0 }
 0x1ff   : > { %26200 = vst [vmem:[#allocation55_spill] sm:$0xff] %v21471_v17 }
 0x200   : > { %16942 = vmatmul.mubr.msk.bf16.gmra.mrb[196].mxu0 %vm2681_vm2, %v20361_v35 }
 0x201   : > { %16945 = vmatprep.mubr.msk.bf16.mxu0 %vm2681_vm2, %v20362_v49  ;;  %v20366_v49 = vld [vmem:[%s21067_s14 + $0x340] sm:$0xff]  }
 0x203   : > { %v21479_v43 = vpop.f32.mrb[92].mxu0 }
 0x204   : > { %26201 = vst [vmem:[#allocation56_spill] sm:$0xff] %v21479_v43  ;;  %v21481_v3 = vpop.f32.mrb[93].mxu0 }
 0x205   : > { %v21486_v31 = vpop.f32.mrb[94].mxu0 }
 0x206   : > { %26202 = vst [vmem:[#allocation57_spill] sm:$0xff] %v21486_v31  ;;  %v21491_v17 = vpop.f32.mrb[95].mxu0 }
 0x207   : > { %26203 = vst [vmem:[#allocation58_spill] sm:$0xff] %v21491_v17  ;;  %v20368_v17 = vld [vmem:[%s21067_s14 + $0x350] sm:$0xff]  }
 0x208   : > { %16946 = vmatmul.mubr.msk.bf16.gmra.mrb[200].mxu0 %vm2681_vm2, %v20363_v41 }
 0x209   : > { %16949 = vmatprep.mubr.msk.bf16.mxu0 %vm2681_vm2, %v20364_v29 }
 0x20b   : > { %v21499_v21 = vpop.f32.mrb[96].mxu0 }
 0x20c   : > { %v21503_v47 = vpop.f32.mrb[97].mxu0 }
 0x20d   : > { %26204 = vst [vmem:[#allocation59_spill] sm:$0xff] %v21503_v47  ;;  %v21508_v31 = vpop.f32.mrb[98].mxu0 }
 0x20e   : > { %26205 = vst [vmem:[#allocation60_spill] sm:$0xff] %v21508_v31  ;;  %v21513_v29 = vpop.f32.mrb[99].mxu0 }
 0x20f   : > { %26206 = vst [vmem:[#allocation61_spill] sm:$0xff] %v21513_v29  ;;  %v20370_v29 = vld [vmem:[%s21067_s14 + $0x360] sm:$0xff]  }
 0x210   : > { %16950 = vmatmul.mubr.msk.bf16.gmra.mrb[204].mxu0 %vm2681_vm2, %v20365_v61 }
 0x211   : > { %16953 = vmatprep.mubr.msk.bf16.mxu0 %vm2681_vm2, %v20366_v49 }
 0x213   : > { %v21519_v43 = vpop.f32.mrb[100].mxu0 }
 0x214   : > { %v21523_v47 = vpop.f32.mrb[101].mxu0 }
 0x215   : > { %26207 = vst [vmem:[#allocation62_spill] sm:$0xff] %v21523_v47  ;;  %v21528_v31 = vpop.f32.mrb[102].mxu0 }
 0x216   : > { %26208 = vst [vmem:[#allocation63_spill] sm:$0xff] %v21528_v31  ;;  %v21533_v49 = vpop.f32.mrb[103].mxu0 }
 0x217   : > { %26209 = vst [vmem:[#allocation64_spill] sm:$0xff] %v21533_v49  ;;  %v20372_v49 = vld [vmem:[%s21067_s14 + $0x370] sm:$0xff]  }
 0x218   : > { %16954 = vmatmul.mubr.msk.bf16.gmra.mrb[208].mxu0 %vm2681_vm2, %v20367_v54 }
 0x219   : > { %16957 = vmatprep.mubr.msk.bf16.mxu0 %vm2681_vm2, %v20368_v17 }
 0x21b   : > { %v21539_v35 = vpop.f32.mrb[104].mxu0 }
 0x21c   : > { %v21543_v47 = vpop.f32.mrb[105].mxu0 }
 0x21d   : > { %26210 = vst [vmem:[#allocation65_spill] sm:$0xff] %v21543_v47  ;;  %v21548_v31 = vpop.f32.mrb[106].mxu0 }
 0x21e   : > { %26211 = vst [vmem:[#allocation66_spill] sm:$0xff] %v21548_v31  ;;  %v21553_v17 = vpop.f32.mrb[107].mxu0 }
 0x21f   : > { %26212 = vst [vmem:[#allocation67_spill] sm:$0xff] %v21553_v17  ;;  %v20374_v17 = vld [vmem:[%s21067_s14 + $0x380] sm:$0xff]  }
 0x220   : > { %16958 = vmatmul.mubr.msk.bf16.gmra.mrb[212].mxu0 %vm2681_vm2, %v20369_v60 }
 0x221   : > { %16961 = vmatprep.mubr.msk.bf16.mxu0 %vm2681_vm2, %v20370_v29 }
 0x223   : > { %v21559_v41 = vpop.f32.mrb[108].mxu0 }
 0x224   : > { %v21563_v47 = vpop.f32.mrb[109].mxu0 }
 0x225   : > { %26213 = vst [vmem:[#allocation68_spill] sm:$0xff] %v21563_v47  ;;  %v21568_v31 = vpop.f32.mrb[110].mxu0 }
 0x226   : > { %26214 = vst [vmem:[#allocation69_spill] sm:$0xff] %v21568_v31  ;;  %v21573_v29 = vpop.f32.mrb[111].mxu0 }
 0x227   : > { %26215 = vst [vmem:[#allocation70_spill] sm:$0xff] %v21573_v29  ;;  %v20376_v29 = vld [vmem:[%s21067_s14 + $0x390] sm:$0xff]  }
 0x228   : > { %16962 = vmatmul.mubr.msk.bf16.gmra.mrb[216].mxu0 %vm2681_vm2, %v20371_v2 }
 0x229   : > { %16965 = vmatprep.mubr.msk.bf16.mxu0 %vm2681_vm2, %v20372_v49 }
 0x22b   : > { %v21579_v61 = vpop.f32.mrb[112].mxu0 }
 0x22c   : > { %v21583_v47 = vpop.f32.mrb[113].mxu0 }
 0x22d   : > { %26216 = vst [vmem:[#allocation71_spill] sm:$0xff] %v21583_v47  ;;  %v21588_v31 = vpop.f32.mrb[114].mxu0 }
 0x22e   : > { %26217 = vst [vmem:[#allocation72_spill] sm:$0xff] %v21588_v31  ;;  %v21593_v49 = vpop.f32.mrb[115].mxu0 }
 0x22f   : > { %26218 = vst [vmem:[#allocation73_spill] sm:$0xff] %v21593_v49  ;;  %v20378_v49 = vld [vmem:[%s21067_s14 + $0x3a0] sm:$0xff]  }
 0x230   : > { %16966 = vmatmul.mubr.msk.bf16.gmra.mrb[220].mxu0 %vm2681_vm2, %v20373_v8 }
 0x231   : > { %16969 = vmatprep.mubr.msk.bf16.mxu0 %vm2681_vm2, %v20374_v17 }
 0x233   : > { %v21599_v54 = vpop.f32.mrb[116].mxu0 }
 0x234   : > { %v21603_v47 = vpop.f32.mrb[117].mxu0 }
 0x235   : > { %26219 = vst [vmem:[#allocation74_spill] sm:$0xff] %v21603_v47  ;;  %v21608_v31 = vpop.f32.mrb[118].mxu0 }
 0x236   : > { %26220 = vst [vmem:[#allocation75_spill] sm:$0xff] %v21608_v31  ;;  %v21613_v17 = vpop.f32.mrb[119].mxu0 }
 0x237   : > { %26221 = vst [vmem:[#allocation76_spill] sm:$0xff] %v21613_v17  ;;  %v20380_v17 = vld [vmem:[%s21067_s14 + $0x3b0] sm:$0xff]  }
 0x238   : > { %16970 = vmatmul.mubr.msk.bf16.gmra.mrb[224].mxu0 %vm2681_vm2, %v20375_v14 }
 0x239   : > { %16973 = vmatprep.mubr.msk.bf16.mxu0 %vm2681_vm2, %v20376_v29 }
 0x23b   : > { %v21619_v60 = vpop.f32.mrb[120].mxu0 }
 0x23c   : > { %v21623_v47 = vpop.f32.mrb[121].mxu0 }
 0x23d   : > { %26222 = vst [vmem:[#allocation77_spill] sm:$0xff] %v21623_v47  ;;  %v21628_v31 = vpop.f32.mrb[122].mxu0 }
 0x23e   : > { %26223 = vst [vmem:[#allocation78_spill] sm:$0xff] %v21628_v31  ;;  %v21633_v29 = vpop.f32.mrb[123].mxu0 }
 0x23f   : > { %26224 = vst [vmem:[#allocation79_spill] sm:$0xff] %v21633_v29  ;;  %v20382_v29 = vld [vmem:[%s21067_s14 + $0x3c0] sm:$0xff]  }
 0x240   : > { %16974 = vmatmul.mubr.msk.bf16.gmra.mrb[228].mxu0 %vm2681_vm2, %v20377_v20 }
 0x241   : > { %16977 = vmatprep.mubr.msk.bf16.mxu0 %vm2681_vm2, %v20378_v49 }
 0x243   : > { %v21639_v2 = vpop.f32.mrb[124].mxu0 }
 0x244   : > { %v21643_v47 = vpop.f32.mrb[125].mxu0 }
 0x245   : > { %26225 = vst [vmem:[#allocation80_spill] sm:$0xff] %v21643_v47  ;;  %v21648_v31 = vpop.f32.mrb[126].mxu0 }
 0x246   : > { %26226 = vst [vmem:[#allocation81_spill] sm:$0xff] %v21648_v31  ;;  %v21653_v49 = vpop.f32.mrb[127].mxu0 }
 0x247   : > { %26227 = vst [vmem:[#allocation82_spill] sm:$0xff] %v21653_v49  ;;  %v20384_v49 = vld [vmem:[%s21067_s14 + $0x3d0] sm:$0xff]  }
 0x248   : > { %16978 = vmatmul.mubr.msk.bf16.gmra.mrb[232].mxu0 %vm2681_vm2, %v20379_v26  ;;  %v20390_v26 = vld [vmem:[%s21067_s14 + $0x400] sm:$0xff]  }
 0x249   : > { %16981 = vmatprep.mubr.msk.bf16.mxu0 %vm2681_vm2, %v20380_v17 }
 0x24b   : > { %v21659_v8 = vpop.f32.mrb[128].mxu0 }
 0x24c   : > { %26228 = vst [vmem:[#allocation83_spill] sm:$0xff] %v21659_v8  ;;  %v21663_v47 = vpop.f32.mrb[129].mxu0  ;;  %v20397_v8 = vld [vmem:[%s21067_s14 + $0x438] sm:$0xff]  }
 0x24d   : > { %26229 = vst [vmem:[#allocation84_spill] sm:$0xff] %v21663_v47  ;;  %v21668_v31 = vpop.f32.mrb[130].mxu0 }
 0x24e   : > { %26230 = vst [vmem:[#allocation85_spill] sm:$0xff] %v21668_v31  ;;  %v21673_v17 = vpop.f32.mrb[131].mxu0 }
 0x24f   : > { %26231 = vst [vmem:[#allocation86_spill] sm:$0xff] %v21673_v17 }
 0x250   : > { %16982 = vmatmul.mubr.msk.bf16.gmra.mrb[236].mxu0 %vm2681_vm2, %v20381_v39 }
 0x251   : > { %16985 = vmatprep.mubr.msk.bf16.mxu0 %vm2681_vm2, %v20382_v29 }
 0x253   : > { %v21679_v14 = vpop.f32.mrb[132].mxu0 }
 0x254   : > { %26232 = vst [vmem:[#allocation87_spill] sm:$0xff] %v21679_v14  ;;  %v21683_v47 = vpop.f32.mrb[133].mxu0  ;;  %v20385_v14 = vld [vmem:[%s21067_s14 + $0x3d8] sm:$0xff]  }
 0x255   : > { %26233 = vst [vmem:[#allocation88_spill] sm:$0xff] %v21683_v47  ;;  %v21688_v31 = vpop.f32.mrb[134].mxu0 }
 0x256   : > { %26234 = vst [vmem:[#allocation89_spill] sm:$0xff] %v21688_v31  ;;  %v21693_v29 = vpop.f32.mrb[135].mxu0  ;;  %v20392_v31 = vld [vmem:[%s21067_s14 + $0x410] sm:$0xff]  }
 0x257   : > { %26236 = vst [vmem:[#allocation90_spill] sm:$0xff] %v21693_v29 }
 0x258   : > { %16986 = vmatmul.mubr.msk.bf16.gmra.mrb[240].mxu0 %vm2681_vm2, %v20383_v57 }
 0x259   : > { %16989 = vmatprep.mubr.msk.bf16.mxu0 %vm2681_vm2, %v20384_v49 }
 0x25b   : > { %v21699_v20 = vpop.f32.mrb[136].mxu0 }
 0x25c   : > { %26238 = vst [vmem:[#allocation91_spill] sm:$0xff] %v21699_v20  ;;  %v21703_v11 = vpop.f32.mrb[137].mxu0  ;;  %v20387_v20 = vld [vmem:[%s21067_s14 + $0x3e8] sm:$0xff]  }
 0x25d   : > { %26240 = vst [vmem:[#allocation92_spill] sm:$0xff] %v21703_v11  ;;  %v21708_v39 = vpop.f32.mrb[138].mxu0 }
 0x25e   : > { %26242 = vst [vmem:[#allocation93_spill] sm:$0xff] %v21708_v39  ;;  %v21713_v49 = vpop.f32.mrb[139].mxu0  ;;  %v20394_v39 = vld [vmem:[%s21067_s14 + $0x420] sm:$0xff]  }
 0x25f   : > { %26244 = vst [vmem:[#allocation94_spill] sm:$0xff] %v21713_v49 }
 0x260   : > { %16990 = vmatmul.mubr.msk.bf16.gmra.mrb[244].mxu0 %vm2681_vm2, %v20385_v14 }
 0x261   : > { %16993 = vmatprep.mubr.msk.bf16.mxu0 %vm2681_vm2, %v20386_v63 }
 0x263   : > { %v21719_v47 = vpop.f32.mrb[140].mxu0 }
 0x264   : > { %26246 = vst [vmem:[#allocation95_spill] sm:$0xff] %v21719_v47  ;;  %v21723_v17 = vpop.f32.mrb[141].mxu0  ;;  %v20389_v47 = vld [vmem:[%s21067_s14 + $0x3f8] sm:$0xff]  }
 0x265   : > { %26248 = vst [vmem:[#allocation96_spill] sm:$0xff] %v21723_v17  ;;  %v21728_v57 = vpop.f32.mrb[142].mxu0 }
 0x266   : > { %26250 = vst [vmem:[#allocation97_spill] sm:$0xff] %v21728_v57  ;;  %v21733_v63 = vpop.f32.mrb[143].mxu0  ;;  %v20396_v57 = vld [vmem:[%s21067_s14 + $0x430] sm:$0xff]  }
 0x267   : > { %26252 = vst [vmem:[#allocation98_spill] sm:$0xff] %v21733_v63 }
 0x268   : > { %16994 = vmatmul.mubr.msk.bf16.gmra.mrb[248].mxu0 %vm2681_vm2, %v20387_v20 }
 0x269   : > { %16997 = vmatprep.mubr.msk.bf16.mxu0 %vm2681_vm2, %v20388_v9 }
 0x26b   : > { %v21739_v11 = vpop.f32.mrb[144].mxu0 }
 0x26c   : > { %26254 = vst [vmem:[#allocation99_spill] sm:$0xff] %v21739_v11  ;;  %v21743_v29 = vpop.f32.mrb[145].mxu0  ;;  %v20391_v11 = vld [vmem:[%s21067_s14 + $0x408] sm:$0xff]  }
 0x26d   : > { %26256 = vst [vmem:[#allocation100_spill] sm:$0xff] %v21743_v29  ;;  %v21748_v14 = vpop.f32.mrb[146].mxu0 }
 0x26e   : > { %26258 = vst [vmem:[#allocation101_spill] sm:$0xff] %v21748_v14  ;;  %v21753_v9 = vpop.f32.mrb[147].mxu0 }
 0x26f   : > { %26260 = vst [vmem:[#allocation102_spill] sm:$0xff] %v21753_v9 }
 0x270   : > { %16998 = vmatmul.mubr.msk.bf16.gmra.mrb[252].mxu0 %vm2681_vm2, %v20389_v47 }
 0x271   : > { %17001 = vmatprep.mubr.msk.bf16.mxu0 %vm2681_vm2, %v20390_v26 }
 0x273   : > { %v21759_v17 = vpop.f32.mrb[148].mxu0 }
 0x274   : > { %26262 = vst [vmem:[#allocation103_spill] sm:$0xff] %v21759_v17  ;;  %v21763_v49 = vpop.f32.mrb[149].mxu0  ;;  %v20393_v17 = vld [vmem:[%s21067_s14 + $0x418] sm:$0xff]  }
 0x275   : > { %26264 = vst [vmem:[#allocation104_spill] sm:$0xff] %v21763_v49  ;;  %v21768_v20 = vpop.f32.mrb[150].mxu0 }
 0x276   : > { %26266 = vst [vmem:[#allocation105_spill] sm:$0xff] %v21768_v20  ;;  %v21773_v26 = vpop.f32.mrb[151].mxu0  ;;  %v26287_v20 = vld [vmem:[#allocation47_spill] sm:$0xff] }
 0x277   : > { %26268 = vst [vmem:[#allocation106_spill] sm:$0xff] %v21773_v26 }
 0x278   : > { %17002 = vmatmul.mubr.msk.bf16.gmra.mrb[0].mxu0 %vm2681_vm2, %v20391_v11 }
 0x279   : > { %17005 = vmatprep.mubr.msk.bf16.mxu0 %vm2681_vm2, %v20392_v31 }
 0x27b   : > { %v21779_v29 = vpop.f32.mrb[152].mxu0 }
 0x27c   : > { %26270 = vst [vmem:[#allocation107_spill] sm:$0xff] %v21779_v29  ;;  %v21783_v63 = vpop.f32.mrb[153].mxu0  ;;  %v20395_v29 = vld [vmem:[%s21067_s14 + $0x428] sm:$0xff]  }
 0x27d   : > { %26272 = vst [vmem:[#allocation108_spill] sm:$0xff] %v21783_v63  ;;  %v21788_v47 = vpop.f32.mrb[154].mxu0 }
 0x27e   : > { %26274 = vst [vmem:[#allocation109_spill] sm:$0xff] %v21788_v47  ;;  %v21793_v31 = vpop.f32.mrb[155].mxu0 }
 0x27f   : > { %26276 = vst [vmem:[#allocation110_spill] sm:$0xff] %v21793_v31  ;;  %v26289_v31 = vld [vmem:[#allocation48_spill] sm:$0xff] }
 0x280   : > { %17006 = vmatmul.mubr.msk.bf16.gmra.mrb[4].mxu0 %vm2681_vm2, %v20393_v17 }
 0x281   : > { %17009 = vmatprep.mubr.msk.bf16.mxu0 %vm2681_vm2, %v20394_v39 }
 0x283   : > { %v21799_v49 = vpop.f32.mrb[156].mxu0 }
 0x284   : > { %26278 = vst [vmem:[#allocation111_spill] sm:$0xff] %v21799_v49  ;;  %v21803_v9 = vpop.f32.mrb[157].mxu0  ;;  %v26286_v49 = vld [vmem:[#allocation4_spill] sm:$0xff] }
 0x285   : > { %26280 = vst [vmem:[#allocation112_spill] sm:$0xff] %v21803_v9  ;;  %v21808_v11 = vpop.f32.mrb[158].mxu0  ;;  %v26288_v47 = vmax.f32 %v26286_v49, %v26287_v20  ;;  %v26292_v49 = vld [vmem:[#allocation49_spill] sm:$0xff] }
 0x286   : > { %26282 = vst [vmem:[#allocation113_spill] sm:$0xff] %v21808_v11  ;;  %v21813_v39 = vpop.f32.mrb[159].mxu0  ;;  %v26290_v11 = vmax.f32 %v21181_v30, %v26289_v31 }
 0x287   : > { %26284 = vst [vmem:[#allocation114_spill] sm:$0xff] %v21813_v39  ;;  %v20398_v39 = vld [vmem:[%s21067_s14 + $0x440] sm:$0xff]  }
 0x288   : > { %17010 = vmatmul.mubr.msk.bf16.gmra.mrb[8].mxu0 %vm2681_vm2, %v20395_v29  ;;  %v26291_v29 = vmax.f32 %v21184_v32, %v21426_v27  ;;  %v20399_v27 = vld [vmem:[%s21067_s14 + $0x448] sm:$0xff]  }
 0x289   : > { %17013 = vmatprep.mubr.msk.bf16.mxu0 %vm2681_vm2, %v20396_v57 }
 0x28b   : > { %v16907_v63 = vpop.f32.mrb[160].mxu0 }
 0x28c   : > { %v21822_v9 = vmax.f32 %v26288_v47, %v16907_v63  ;;  %v3843_v26 = vpop.f32.mrb[161].mxu0  ;;  %v26293_v63 = vmax.f32 %v21187_v34, %v26292_v49  ;;  %v26294_v47 = vld [vmem:[#allocation5_spill] sm:$0xff]  ;;  %v20400_v49 = vld [vmem:[%s21067_s14 + $0x450] sm:$0xff]  }
 0x28d   : > { %v21828_v17 = vmax.f32 %v26290_v11, %v3843_v26  ;;  %v16908_v14 = vpop.f32.mrb[162].mxu0  ;;  %v26295_v26 = vld [vmem:[#allocation50_spill] sm:$0xff] }
 0x28e   : > { %v21834_v57 = vmax.f32 %v26291_v29, %v16908_v14  ;;  %v3846_v5 = vpop.f32.mrb[163].mxu0  ;;  %v26296_v11 = vmax.f32 %v26294_v47, %v26295_v26  ;;  %v26297_v14 = vld [vmem:[#allocation51_spill] sm:$0xff]  ;;  %v26300_v47 = vld [vmem:[#allocation52_spill] sm:$0xff] }
 0x28f   : > { %v21839_v20 = vmax.f32 %v26293_v63, %v3846_v5  ;;  %v26298_v29 = vmax.f32 %v21193_v36, %v26297_v14 }
 0x290   : > { %17014 = vmatmul.mubr.msk.bf16.gmra.mrb[12].mxu0 %vm2681_vm2, %v20397_v8  ;;  %v26299_v8 = vmax.f32 %v21196_v38, %v21446_v15  ;;  %v20401_v15 = vld [vmem:[%s21067_s14 + $0x458] sm:$0xff]  }
 0x291   : > { %17017 = vmatprep.mubr.msk.bf16.mxu0 %vm2681_vm2, %v20398_v39 }
 0x293   : > { %v16911_v30 = vpop.f32.mrb[164].mxu0 }
 0x294   : > { %v21846_v31 = vmax.f32 %v26296_v11, %v16911_v30  ;;  %v3859_v32 = vpop.f32.mrb[165].mxu0  ;;  %v26301_v30 = vmax.f32 %v21199_v40, %v26300_v47  ;;  %v26302_v11 = vld [vmem:[#allocation6_spill] sm:$0xff]  ;;  %v20402_v47 = vld [vmem:[%s21067_s14 + $0x460] sm:$0xff]  }
 0x295   : > { %v21852_v34 = vmax.f32 %v26298_v29, %v3859_v32  ;;  %v16912_v5 = vpop.f32.mrb[166].mxu0  ;;  %v26303_v32 = vld [vmem:[#allocation53_spill] sm:$0xff] }
 0x296   : > { %v21858_v39 = vmax.f32 %v26299_v8, %v16912_v5  ;;  %v3862_v63 = vpop.f32.mrb[167].mxu0  ;;  %v26304_v14 = vmax.f32 %v26302_v11, %v26303_v32  ;;  %v26305_v5 = vld [vmem:[#allocation54_spill] sm:$0xff]  ;;  %v26308_v11 = vld [vmem:[#allocation55_spill] sm:$0xff] }
 0x297   : > { %v21863_v26 = vmax.f32 %v26301_v30, %v3862_v63  ;;  %v26306_v8 = vmax.f32 %v21205_v42, %v26305_v5 }
 0x298   : > { %17018 = vmatmul.mubr.msk.bf16.gmra.mrb[16].mxu0 %vm2681_vm2, %v20399_v27  ;;  %v26307_v27 = vmax.f32 %v21208_v44, %v21466_v23  ;;  %v26311_v44 = vld [vmem:[#allocation56_spill] sm:$0xff] }
 0x299   : > { %17021 = vmatprep.mubr.msk.bf16.mxu0 %vm2681_vm2, %v20400_v49 }
 0x29b   : > { %v16915_v36 = vpop.f32.mrb[168].mxu0 }
 0x29c   : > { %v21870_v29 = vmax.f32 %v26304_v14, %v16915_v36  ;;  %v3875_v38 = vpop.f32.mrb[169].mxu0  ;;  %v26309_v36 = vmax.f32 %v21211_v46, %v26308_v11  ;;  %v21894_v14 = vld [vmem:[%s25964_s3 + $0x280] sm:$0xff]   ;;  %v26313_v46 = vmax.f32 %v21217_v48, %v21481_v3  ;;  %v21923_v3 = vld [vmem:[%s25964_s3 + $0x288] sm:$0xff]  }
 0x29d   : > { %v21876_v40 = vmax.f32 %v26306_v8, %v3875_v38  ;;  %v16916_v63 = vpop.f32.mrb[170].mxu0  ;;  %v26310_v38 = vld [vmem:[#allocation7_spill] sm:$0xff]  ;;  %18025 = vmatprep.subr.bf16.mxu1 %v21894_v14  ;;  %26319 = vst [vmem:[#allocation47_spill] sm:$0xff] %v21923_v3 }
 0x29e   : > { %v21882_v49 = vmax.f32 %v26307_v27, %v16916_v63  ;;  %v3878_v30 = vpop.f32.mrb[171].mxu0  ;;  %v26312_v23 = vmax.f32 %v26310_v38, %v26311_v44  ;;  %v20403_v63 = vld [vmem:[%s21067_s14 + $0x468] sm:$0xff]   ;;  %18026 = vmatpush3.bf16.msra.mxu1 %v21894_v14  ;;  %v26316_v38 = vld [vmem:[#allocation58_spill] sm:$0xff] }
 0x29f   : > { %v21887_v32 = vmax.f32 %v26309_v36, %v3878_v30  ;;  %v26314_v30 = vld [vmem:[#allocation57_spill] sm:$0xff]  ;;  %v26317_v44 = vmax.f32 %v21223_v52, %v26316_v38  ;;  %18027 = vmatprep.subr.bf16.mxu1 %v21923_v3  ;;  %v21932_v52 = vld [vmem:[%s25964_s3 + $0x290] sm:$0xff]   ;;  %v20406_v38 = vld [vmem:[%s21067_s14 + $0x480] sm:$0xff]  }
 0x2a0   : > { %17022 = vmatmul.mubr.msk.bf16.gmra.mrb[20].mxu0 %vm2681_vm2, %v20401_v15  ;;  %v26315_v11 = vmax.f32 %v21220_v50, %v26314_v30  ;;  %v26322_v30 = vld [vmem:[#allocation59_spill] sm:$0xff] }
 0x2a1   : > { %17025 = vmatprep.mubr.msk.bf16.mxu0 %vm2681_vm2, %v20402_v47  ;;  %v20404_v47 = vld [vmem:[%s21067_s14 + $0x470] sm:$0xff]  }
 0x2a2   : > { %18028 = vmatpush3.bf16.msra.mxu1 %v21923_v3 }
 0x2a3   : > { %v16919_v42 = vpop.f32.mrb[172].mxu0  ;;  %18029 = vmatprep.subr.bf16.mxu1 %v21932_v52 }
 0x2a4   : > { %v21899_v5 = vmax.f32 %v26312_v23, %v16919_v42  ;;  %v3891_v8 = vpop.f32.mrb[173].mxu0  ;;  %v26320_v23 = vmax.f32 %v21227_v53, %v21499_v21  ;;  %v26326_v21 = vld [vmem:[#allocation61_spill] sm:$0xff] }
 0x2a5   : > { %v21905_v27 = vmax.f32 %v26313_v46, %v3891_v8  ;;  %v16920_v15 = vpop.f32.mrb[174].mxu0 }
 0x2a6   : > { %v21912_v36 = vmax.f32 %v26315_v11, %v16920_v15  ;;  %v3894_v42 = vpop.f32.mrb[175].mxu0  ;;  %v20405_v15 = vld [vmem:[%s21067_s14 + $0x478] sm:$0xff]   ;;  %18030 = vmatpush3.bf16.msra.mxu1 %v21932_v52 }
 0x2a7   : > { %v21918_v48 = vmax.f32 %v26317_v44, %v3894_v42  ;;  %v26324_v44 = vld [vmem:[#allocation60_spill] sm:$0xff] }
 0x2a8   : > { %17026 = vmatmul.mubr.msk.bf16.gmra.mrb[24].mxu0 %vm2681_vm2, %v20403_v63  ;;  %v26321_v63 = vld [vmem:[#allocation8_spill] sm:$0xff]  ;;  %v26325_v3 = vmax.f32 %v21232_v56, %v26324_v44 }
 0x2a9   : > { %26318 = vst [vmem:[#allocation4_spill] sm:$0xff] %v21918_v48  ;;  %17029 = vmatprep.mubr.msk.bf16.mxu0 %vm2681_vm2, %v20404_v47  ;;  %v26323_v47 = vmax.f32 %v26321_v63, %v26322_v30 }
 0x2ab   : > { %v16923_v50 = vpop.f32.mrb[176].mxu0 }
 0x2ac   : > { %v21937_v8 = vmax.f32 %v26320_v23, %v16923_v50  ;;  %v3907_v46 = vpop.f32.mrb[177].mxu0  ;;  %v26327_v50 = vmax.f32 %v21235_v58, %v26326_v21  ;;  %v21970_v58 = vld [vmem:[%s25964_s3 + $0x2a0] sm:$0xff]   ;;  %v20408_v21 = vld [vmem:[%s21067_s14 + $0x490] sm:$0xff]  }
 0x2ad   : > { %v21943_v11 = vmax.f32 %v26323_v47, %v3907_v46  ;;  %v16924_v42 = vpop.f32.mrb[178].mxu0  ;;  %v21961_v46 = vld [vmem:[%s25964_s3 + $0x298] sm:$0xff]   ;;  %v20407_v47 = vld [vmem:[%s21067_s14 + $0x488] sm:$0xff]  }
 0x2ae   : > { %v21950_v48 = vmax.f32 %v26325_v3, %v16924_v42  ;;  %v3910_v53 = vpop.f32.mrb[179].mxu0  ;;  %26329 = vst [vmem:[#allocation49_spill] sm:$0xff] %v21961_v46  ;;  %18031 = vmatprep.subr.bf16.mxu1 %v21961_v46  ;;  %v26330_v3 = vmax.f32 %v21239_v59, %v21519_v43  ;;  %v26332_v42 = vld [vmem:[#allocation62_spill] sm:$0xff]  ;;  %v26336_v43 = vld [vmem:[#allocation64_spill] sm:$0xff] }
 0x2af   : > { %v21956_v23 = vmax.f32 %v26327_v50, %v3910_v53  ;;  %18032 = vmatpush3.bf16.msra.mxu1 %v21961_v46  ;;  %v26334_v50 = vld [vmem:[#allocation63_spill] sm:$0xff] }
 0x2b0   : > { %17030 = vmatmul.mubr.msk.bf16.gmra.mrb[28].mxu0 %vm2681_vm2, %v20405_v15  ;;  %v26331_v15 = vld [vmem:[#allocation9_spill] sm:$0xff]  ;;  %18033 = vmatprep.subr.bf16.mxu1 %v21970_v58  ;;  %v26335_v46 = vmax.f32 %v21244_v62, %v26334_v50 }
 0x2b1   : > { %26328 = vst [vmem:[#allocation48_spill] sm:$0xff] %v21956_v23  ;;  %17033 = vmatprep.mubr.msk.bf16.mxu0 %vm2681_vm2, %v20406_v38  ;;  %v26333_v38 = vmax.f32 %v26331_v15, %v26332_v42 }
 0x2b3   : > { %v16927_v56 = vpop.f32.mrb[180].mxu0  ;;  %18034 = vmatpush3.bf16.msra.mxu1 %v21970_v58 }
 0x2b4   : > { %v21975_v63 = vmax.f32 %v26330_v3, %v16927_v56  ;;  %v3923_v30 = vpop.f32.mrb[181].mxu0  ;;  %v26337_v56 = vmax.f32 %v21247_v0, %v26336_v43  ;;  %v22008_v0 = vld [vmem:[%s25964_s3 + $0x2b0] sm:$0xff]   ;;  %v20410_v43 = vld [vmem:[%s21067_s14 + $0x4a0] sm:$0xff]  }
 0x2b5   : > { %v21981_v44 = vmax.f32 %v26333_v38, %v3923_v30  ;;  %v16928_v53 = vpop.f32.mrb[182].mxu0  ;;  %v21999_v30 = vld [vmem:[%s25964_s3 + $0x2a8] sm:$0xff]   ;;  %v20409_v38 = vld [vmem:[%s21067_s14 + $0x498] sm:$0xff]  }
 0x2b6   : > { %v21988_v23 = vmax.f32 %v26335_v46, %v16928_v53  ;;  %v3926_v59 = vpop.f32.mrb[183].mxu0  ;;  %26339 = vst [vmem:[#allocation50_spill] sm:$0xff] %v21999_v30  ;;  %18035 = vmatprep.subr.bf16.mxu1 %v21999_v30  ;;  %v26340_v46 = vmax.f32 %v21251_v1, %v21539_v35  ;;  %v26342_v53 = vld [vmem:[#allocation65_spill] sm:$0xff]  ;;  %v26346_v35 = vld [vmem:[#allocation67_spill] sm:$0xff] }
 0x2b7   : > { %v21994_v3 = vmax.f32 %v26337_v56, %v3926_v59  ;;  %18036 = vmatpush3.bf16.msra.mxu1 %v21999_v30  ;;  %v26344_v56 = vld [vmem:[#allocation66_spill] sm:$0xff] }
 0x2b8   : > { %17034 = vmatmul.mubr.msk.bf16.gmra.mrb[32].mxu0 %vm2681_vm2, %v20407_v47  ;;  %v26341_v47 = vld [vmem:[#allocation10_spill] sm:$0xff]  ;;  %18037 = vmatprep.subr.bf16.mxu1 %v22008_v0  ;;  %v26345_v30 = vmax.f32 %v21256_v4, %v26344_v56  ;;  %v22046_v4 = vld [vmem:[%s25964_s3 + $0x40] sm:$0xff]  }
 0x2b9   : > { %26338 = vst [vmem:[#allocation5_spill] sm:$0xff] %v21994_v3  ;;  %17037 = vmatprep.mubr.msk.bf16.mxu0 %vm2681_vm2, %v20408_v21  ;;  %v26343_v21 = vmax.f32 %v26341_v47, %v26342_v53  ;;  %26349 = vst [vmem:[#allocation52_spill] sm:$0xff] %v22046_v4  ;;  %v20411_v53 = vld [vmem:[%s21067_s14 + $0x4a8] sm:$0xff]   ;;  %17065 = vmatprep.subr.bf16.mxu0 %v22046_v4 }
 0x2ba   : > { %17066 = vmatpush3.bf16.msra.mxu0 %v22046_v4 }
 0x2bb   : > { %v16931_v62 = vpop.f32.mrb[184].mxu0  ;;  %18038 = vmatpush3.bf16.msra.mxu1 %v22008_v0 }
 0x2bc   : > { %v22013_v15 = vmax.f32 %v26340_v46, %v16931_v62  ;;  %v3939_v42 = vpop.f32.mrb[185].mxu0  ;;  %v26347_v62 = vmax.f32 %v21259_v6, %v26346_v35  ;;  %v20412_v35 = vld [vmem:[%s21067_s14 + $0x4b0] sm:$0xff]  }
 0x2bd   : > { %v22019_v50 = vmax.f32 %v26343_v21, %v3939_v42  ;;  %v16932_v59 = vpop.f32.mrb[186].mxu0  ;;  %v22037_v42 = vld [vmem:[%s25964_s3 + $0x2b8] sm:$0xff]  }
 0x2be   : > { %v22026_v3 = vmax.f32 %v26345_v30, %v16932_v59  ;;  %v3942_v1 = vpop.f32.mrb[187].mxu0  ;;  %26348 = vst [vmem:[#allocation51_spill] sm:$0xff] %v22037_v42  ;;  %18039 = vmatprep.subr.bf16.mxu1 %v22037_v42  ;;  %v26350_v30 = vmax.f32 %v21263_v7, %v21559_v41  ;;  %v26351_v21 = vld [vmem:[#allocation11_spill] sm:$0xff]  ;;  %v26352_v59 = vld [vmem:[#allocation68_spill] sm:$0xff] }
 0x2bf   : > { %v22032_v46 = vmax.f32 %v26347_v62, %v3942_v1  ;;  %18040 = vmatpush3.bf16.msra.mxu1 %v22037_v42  ;;  %v26354_v62 = vld [vmem:[#allocation69_spill] sm:$0xff] }
 0x2c0   : > { %17038 = vmatmul.mubr.msk.bf16.gmra.mrb[36].mxu0 %vm2681_vm2, %v20409_v38  ;;  %18049 = vmatprep.subr.bf16.mxu1 %v21894_v14  ;;  %v26355_v42 = vmax.f32 %v21268_v10, %v26354_v62  ;;  %v22085_v10 = vld [vmem:[%s25964_s3 + $0x50] sm:$0xff]   ;;  %v26362_v62 = vld [vmem:[#allocation71_spill] sm:$0xff] }
 0x2c1   : > { %17041 = vmatprep.mubr.msk.bf16.mxu0 %vm2681_vm2, %v20410_v43  ;;  %v26353_v43 = vmax.f32 %v26351_v21, %v26352_v59  ;;  %26359 = vst [vmem:[#allocation53_spill] sm:$0xff] %v22085_v10  ;;  %v26360_v59 = vmax.f32 %v21275_v13, %v21579_v61 }
 0x2c3   : > { %v16935_v6 = vpop.f32.mrb[188].mxu0 }
 0x2c4   : > { %v22052_v47 = vmax.f32 %v26350_v30, %v16935_v6  ;;  %v3955_v38 = vpop.f32.mrb[189].mxu0  ;;  %v22071_v6 = vld [vmem:[%s25964_s3 + $0x48] sm:$0xff]   ;;  %v26357_v30 = vld [vmem:[#allocation70_spill] sm:$0xff] }
 0x2c5   : > { %v22059_v56 = vmax.f32 %v26353_v43, %v3955_v38  ;;  %v16936_v1 = vpop.f32.mrb[190].mxu0  ;;  %26356 = vst [vmem:[#allocation6_spill] sm:$0xff] %v22071_v6  ;;  %v26358_v38 = vmax.f32 %v21271_v12, %v26357_v30  ;;  %17067 = vmatprep.subr.bf16.mxu0 %v22071_v6 }
 0x2c6   : > { %v22066_v7 = vmax.f32 %v26355_v42, %v16936_v1  ;;  %v3958_v41 = vpop.f32.mrb[191].mxu0  ;;  %17068 = vmatpush3.bf16.msra.mxu0 %v22071_v6  ;;  %v20413_v1 = vld [vmem:[%s21067_s14 + $0x4b8] sm:$0xff]   ;;  %v26364_v6 = vld [vmem:[#allocation72_spill] sm:$0xff] }
 0x2c7   : > { %v22076_v21 = vmax.f32 %v26358_v38, %v3958_v41  ;;  %17069 = vmatprep.subr.bf16.mxu0 %v22085_v10  ;;  %v20414_v38 = vld [vmem:[%s21067_s14 + $0x4c0] sm:$0xff]   ;;  %v26365_v4 = vmax.f32 %v21280_v16, %v26364_v6  ;;  %v26370_v6 = vmax.f32 %v21287_v19, %v21599_v54 }
 0x2c8   : > { %17042 = vmatmul.mubr.msk.bf16.gmra.mrb[40].mxu0 %vm2681_vm2, %v20411_v53  ;;  %v26361_v53 = vld [vmem:[#allocation12_spill] sm:$0xff] }
 0x2c9   : > { %17045 = vmatprep.mubr.msk.bf16.mxu0 %vm2681_vm2, %v20412_v35  ;;  %v26363_v35 = vmax.f32 %v26361_v53, %v26362_v62  ;;  %v22123_v16 = vld [vmem:[%s25964_s3 + $0x60] sm:$0xff]  }
 0x2ca   : > { %17070 = vmatpush3.bf16.msra.mxu0 %v22085_v10  ;;  %26369 = vst [vmem:[#allocation55_spill] sm:$0xff] %v22123_v16 }
 0x2cb   : > { %v16939_v42 = vpop.f32.mrb[192].mxu0 }
 0x2cc   : > { %v22090_v12 = vmax.f32 %v26360_v59, %v16939_v42  ;;  %v3971_v43 = vpop.f32.mrb[193].mxu0  ;;  %v22109_v42 = vld [vmem:[%s25964_s3 + $0x58] sm:$0xff]   ;;  %v26367_v59 = vld [vmem:[#allocation73_spill] sm:$0xff] }
 0x2cd   : > { %v22097_v41 = vmax.f32 %v26363_v35, %v3971_v43  ;;  %v16940_v30 = vpop.f32.mrb[194].mxu0  ;;  %26366 = vst [vmem:[#allocation54_spill] sm:$0xff] %v22109_v42  ;;  %v26368_v43 = vmax.f32 %v21283_v18, %v26367_v59  ;;  %17071 = vmatprep.subr.bf16.mxu0 %v22109_v42  ;;  %v20415_v35 = vld [vmem:[%s21067_s14 + $0x4c8] sm:$0xff]  }
 0x2ce   : > { %v22104_v13 = vmax.f32 %v26365_v4, %v16940_v30  ;;  %v3974_v61 = vpop.f32.mrb[195].mxu0  ;;  %17072 = vmatpush3.bf16.msra.mxu0 %v22109_v42  ;;  %v26372_v30 = vld [vmem:[#allocation74_spill] sm:$0xff]  ;;  %v26374_v42 = vld [vmem:[#allocation75_spill] sm:$0xff] }
 0x2cf   : > { %v22114_v53 = vmax.f32 %v26368_v43, %v3974_v61  ;;  %17073 = vmatprep.subr.bf16.mxu0 %v22123_v16  ;;  %v20416_v43 = vld [vmem:[%s21067_s14 + $0x4d0] sm:$0xff]   ;;  %v26375_v10 = vmax.f32 %v21292_v22, %v26374_v42  ;;  %v26380_v42 = vmax.f32 %v21299_v25, %v21619_v60 }
 0x2d0   : > { %17046 = vmatmul.mubr.msk.bf16.gmra.mrb[44].mxu0 %vm2681_vm2, %v20413_v1  ;;  %v26371_v1 = vld [vmem:[#allocation13_spill] sm:$0xff]  ;;  %v22161_v22 = vld [vmem:[%s25964_s3 + $0x70] sm:$0xff]  }
 0x2d1   : > { %17049 = vmatprep.mubr.msk.bf16.mxu0 %vm2681_vm2, %v20414_v38  ;;  %v26373_v38 = vmax.f32 %v26371_v1, %v26372_v30  ;;  %26379 = vst [vmem:[#allocation56_spill] sm:$0xff] %v22161_v22 }
 0x2d2   : > { %17074 = vmatpush3.bf16.msra.mxu0 %v22123_v16 }
 0x2d3   : > { %v16943_v4 = vpop.f32.mrb[196].mxu0 }
 0x2d4   : > { %v22128_v18 = vmax.f32 %v26370_v6, %v16943_v4  ;;  %v3987_v62 = vpop.f32.mrb[197].mxu0  ;;  %v22147_v4 = vld [vmem:[%s25964_s3 + $0x68] sm:$0xff]   ;;  %v26377_v6 = vld [vmem:[#allocation76_spill] sm:$0xff] }
 0x2d5   : > { %v22135_v61 = vmax.f32 %v26373_v38, %v3987_v62  ;;  %v16944_v59 = vpop.f32.mrb[198].mxu0  ;;  %26376 = vst [vmem:[#allocation7_spill] sm:$0xff] %v22147_v4  ;;  %v26378_v62 = vmax.f32 %v21295_v24, %v26377_v6  ;;  %17075 = vmatprep.subr.bf16.mxu0 %v22147_v4  ;;  %v20417_v38 = vld [vmem:[%s21067_s14 + $0x4d8] sm:$0xff]  }
 0x2d6   : > { %v22142_v19 = vmax.f32 %v26375_v10, %v16944_v59  ;;  %v3990_v54 = vpop.f32.mrb[199].mxu0  ;;  %17076 = vmatpush3.bf16.msra.mxu0 %v22147_v4  ;;  %v26382_v59 = vld [vmem:[#allocation77_spill] sm:$0xff]  ;;  %v26384_v4 = vld [vmem:[#allocation78_spill] sm:$0xff] }
 0x2d7   : > { %v22152_v1 = vmax.f32 %v26378_v62, %v3990_v54  ;;  %17077 = vmatprep.subr.bf16.mxu0 %v22161_v22  ;;  %v20418_v62 = vld [vmem:[%s21067_s14 + $0x4e0] sm:$0xff]   ;;  %v26385_v16 = vmax.f32 %v21304_v28, %v26384_v4  ;;  %v26391_v4 = vmax.f32 %v21311_v37, %v21639_v2  ;;  %v26400_v2 = vld [vmem:[#allocation82_spill] sm:$0xff] }
 0x2d8   : > { %17050 = vmatmul.mubr.msk.bf16.gmra.mrb[48].mxu0 %vm2681_vm2, %v20415_v35  ;;  %v26381_v35 = vld [vmem:[#allocation14_spill] sm:$0xff]  ;;  %v22199_v28 = vld [vmem:[%s25964_s3] sm:$0xff]  }
 0x2d9   : > { %17053 = vmatprep.mubr.msk.bf16.mxu0 %vm2681_vm2, %v20416_v43  ;;  %v26383_v43 = vmax.f32 %v26381_v35, %v26382_v59 }
 0x2da   : > { %17078 = vmatpush3.bf16.msra.mxu0 %v22161_v22 }
 0x2db   : > { %v16947_v10 = vpop.f32.mrb[200].mxu0 }
 0x2dc   : > { %v22166_v24 = vmax.f32 %v26380_v42, %v16947_v10  ;;  %v4003_v30 = vpop.f32.mrb[201].mxu0  ;;  %v22185_v10 = vld [vmem:[%s25964_s3 + $0x78] sm:$0xff]  }
 0x2dd   : > { %v22173_v54 = vmax.f32 %v26383_v43, %v4003_v30  ;;  %v16948_v6 = vpop.f32.mrb[202].mxu0  ;;  %26387 = vst [vmem:[#allocation58_spill] sm:$0xff] %v22185_v10  ;;  %v26388_v42 = vld [vmem:[#allocation79_spill] sm:$0xff]  ;;  %17079 = vmatprep.subr.bf16.mxu0 %v22185_v10 }
 0x2de   : > { %v22180_v25 = vmax.f32 %v26385_v16, %v16948_v6  ;;  %v4006_v60 = vpop.f32.mrb[203].mxu0  ;;  %v26389_v30 = vmax.f32 %v21307_v33, %v26388_v42  ;;  %17080 = vmatpush3.bf16.msra.mxu0 %v22185_v10  ;;  %v26393_v43 = vld [vmem:[#allocation15_spill] sm:$0xff]  ;;  %v26394_v6 = vld [vmem:[#allocation80_spill] sm:$0xff]  ;;  %v26397_v10 = vld [vmem:[#allocation81_spill] sm:$0xff] }
 0x2df   : > { %17089 = vmatprep.subr.bf16.mxu0 %v22199_v28  ;;  %v26398_v22 = vmax.f32 %v21316_v45, %v26397_v10  ;;  %v20421_v45 = vld [vmem:[%s21067_s14 + $0x4f8] sm:$0xff]   ;;  %v26407_v10 = vld [vmem:[#allocation84_spill] sm:$0xff] }
 0x2e0   : > { %26386 = vst [vmem:[#allocation57_spill] sm:$0xff] %v22180_v25  ;;  %v22190_v35 = vmax.f32 %v26389_v30, %v4006_v60  ;;  %17054 = vmatmul.mubr.msk.bf16.gmra.mrb[52].mxu0 %vm2681_vm2, %v20417_v38  ;;  %v20419_v38 = vld [vmem:[%s21067_s14 + $0x4e8] sm:$0xff]   ;;  %v20420_v30 = vld [vmem:[%s21067_s14 + $0x4f0] sm:$0xff]  }
 0x2e1   : > { %17057 = vmatprep.mubr.msk.bf16.mxu0 %vm2681_vm2, %v20418_v62  ;;  %v26395_v62 = vmax.f32 %v26393_v43, %v26394_v6 }
 0x2e2   : > { %26390 = vst [vmem:[#allocation8_spill] sm:$0xff] %v22190_v35 }
 0x2e3   : > { %v16951_v16 = vpop.f32.mrb[204].mxu0 }
 0x2e4   : > { %v22204_v33 = vmax.f32 %v26391_v4, %v16951_v16  ;;  %v4019_v59 = vpop.f32.mrb[205].mxu0  ;;  %v26401_v16 = vmax.f32 %v21319_v51, %v26400_v2  ;;  %v26411_v2 = vld [vmem:[#allocation85_spill] sm:$0xff] }
 0x2e5   : > { %v22211_v60 = vmax.f32 %v26395_v62, %v4019_v59  ;;  %v16952_v42 = vpop.f32.mrb[206].mxu0  ;;  %v26403_v59 = vld [vmem:[#allocation83_spill] sm:$0xff] }
 0x2e6   : > { %26392 = vst [vmem:[#allocation59_spill] sm:$0xff] %v22204_v33  ;;  %v22217_v35 = vmax.f32 %v26398_v22, %v16952_v42  ;;  %v4022_v37 = vpop.f32.mrb[207].mxu0  ;;  %v26404_v6 = vmax.f32 %v21323_v55, %v26403_v59  ;;  %v26406_v22 = vld [vmem:[#allocation16_spill] sm:$0xff]  ;;  %v26415_v33 = vld [vmem:[#allocation86_spill] sm:$0xff]  ;;  %v26418_v59 = vld [vmem:[#allocation19_spill] sm:$0xff] }
 0x2e7   : > { %26396 = vst [vmem:[#allocation60_spill] sm:$0xff] %v22211_v60  ;;  %v22222_v4 = vmax.f32 %v26401_v16, %v4022_v37  ;;  %v26408_v42 = vmax.f32 %v26406_v22, %v26407_v10  ;;  %v26410_v37 = vld [vmem:[#allocation17_spill] sm:$0xff] }
 0x2e8   : > { %26399 = vst [vmem:[#allocation61_spill] sm:$0xff] %v22217_v35  ;;  %17058 = vmatmul.mubr.msk.bf16.gmra.mrb[56].mxu0 %vm2681_vm2, %v20419_v38  ;;  %v26412_v16 = vmax.f32 %v26410_v37, %v26411_v2 }
 0x2e9   : > { %26402 = vst [vmem:[#allocation9_spill] sm:$0xff] %v22222_v4  ;;  %17061 = vmatprep.mubr.msk.bf16.mxu0 %vm2681_vm2, %v20420_v30  ;;  %v26414_v4 = vld [vmem:[#allocation18_spill] sm:$0xff] }
 0x2ea   : > { %v26416_v25 = vmax.f32 %v26414_v4, %v26415_v33 }
 0x2eb   : > { %v16955_v43 = vpop.f32.mrb[208].mxu0 }
 0x2ec   : > { %v22229_v62 = vmax.f32 %v26404_v6, %v16955_v43  ;;  %v4035_v60 = vpop.f32.mrb[209].mxu0  ;;  %v26419_v6 = vld [vmem:[#allocation87_spill] sm:$0xff] }
 0x2ed   : > { %v22235_v35 = vmax.f32 %v26408_v42, %v4035_v60  ;;  %v16956_v51 = vpop.f32.mrb[210].mxu0  ;;  %v26420_v22 = vmax.f32 %v26418_v59, %v26419_v6  ;;  %v26422_v42 = vld [vmem:[#allocation20_spill] sm:$0xff]  ;;  %v26434_v59 = vld [vmem:[#allocation23_spill] sm:$0xff] }
 0x2ee   : > { %26405 = vst [vmem:[#allocation62_spill] sm:$0xff] %v22229_v62  ;;  %v22240_v38 = vmax.f32 %v26412_v16, %v16956_v51  ;;  %v4038_v30 = vpop.f32.mrb[211].mxu0  ;;  %v26426_v16 = vld [vmem:[#allocation21_spill] sm:$0xff]  ;;  %v26435_v6 = vld [vmem:[#allocation91_spill] sm:$0xff] }
 0x2ef   : > { %26409 = vst [vmem:[#allocation63_spill] sm:$0xff] %v22235_v35  ;;  %v22245_v55 = vmax.f32 %v26416_v25, %v4038_v30  ;;  %v26423_v35 = vld [vmem:[#allocation88_spill] sm:$0xff]  ;;  %v26431_v30 = vld [vmem:[#allocation90_spill] sm:$0xff] }
 0x2f0   : > { %26413 = vst [vmem:[#allocation64_spill] sm:$0xff] %v22240_v38  ;;  %17062 = vmatmul.mubr.msk.bf16.gmra.mrb[60].mxu0 %vm2681_vm2, %v20421_v45  ;;  %v26424_v37 = vmax.f32 %v26422_v42, %v26423_v35  ;;  %v26427_v38 = vld [vmem:[#allocation89_spill] sm:$0xff]  ;;  %v26430_v45 = vld [vmem:[#allocation22_spill] sm:$0xff]  ;;  %v26439_v42 = vld [vmem:[#allocation92_spill] sm:$0xff] }
 0x2f1   : > { %26417 = vst [vmem:[#allocation10_spill] sm:$0xff] %v22245_v55  ;;  %v26428_v33 = vmax.f32 %v26426_v16, %v26427_v38  ;;  %v26432_v55 = vmax.f32 %v26430_v45, %v26431_v30  ;;  %v26443_v16 = vld [vmem:[#allocation93_spill] sm:$0xff]  ;;  %v26447_v45 = vld [vmem:[#allocation94_spill] sm:$0xff] }
 0x2f3   : > { %v16959_v43 = vpop.f32.mrb[212].mxu0 }
 0x2f4   : > { %v22251_v60 = vmax.f32 %v26420_v22, %v16959_v43  ;;  %v4051_v10 = vpop.f32.mrb[213].mxu0  ;;  %v26436_v22 = vmax.f32 %v26434_v59, %v26435_v6  ;;  %v26450_v59 = vld [vmem:[#allocation27_spill] sm:$0xff] }
 0x2f5   : > { %v22256_v51 = vmax.f32 %v26424_v37, %v4051_v10  ;;  %v16960_v2 = vpop.f32.mrb[214].mxu0  ;;  %v26438_v10 = vld [vmem:[#allocation24_spill] sm:$0xff]  ;;  %v26451_v6 = vld [vmem:[#allocation95_spill] sm:$0xff] }
 0x2f6   : > { %26421 = vst [vmem:[#allocation65_spill] sm:$0xff] %v22251_v60  ;;  %v22261_v25 = vmax.f32 %v26428_v33, %v16960_v2  ;;  %v4054_v4 = vpop.f32.mrb[215].mxu0  ;;  %v26440_v37 = vmax.f32 %v26438_v10, %v26439_v42  ;;  %v26442_v2 = vld [vmem:[#allocation25_spill] sm:$0xff]  ;;  %v26454_v10 = vld [vmem:[#allocation28_spill] sm:$0xff] }
 0x2f7   : > { %26425 = vst [vmem:[#allocation66_spill] sm:$0xff] %v22256_v51  ;;  %v22266_v62 = vmax.f32 %v26432_v55, %v4054_v4  ;;  %v26444_v33 = vmax.f32 %v26442_v2, %v26443_v16  ;;  %v26446_v4 = vld [vmem:[#allocation26_spill] sm:$0xff]  ;;  %v26455_v42 = vld [vmem:[#allocation96_spill] sm:$0xff]  ;;  %v26458_v2 = vld [vmem:[#allocation29_spill] sm:$0xff] }
 0x2f8   : > { %26429 = vst [vmem:[#allocation67_spill] sm:$0xff] %v22261_v25  ;;  %v26448_v30 = vmax.f32 %v26446_v4, %v26447_v45  ;;  %v26459_v16 = vld [vmem:[#allocation97_spill] sm:$0xff]  ;;  %v26462_v4 = vld [vmem:[#allocation30_spill] sm:$0xff] }
 0x2f9   : > { %26433 = vst [vmem:[#allocation11_spill] sm:$0xff] %v22266_v62  ;;  %v26463_v45 = vld [vmem:[#allocation98_spill] sm:$0xff] }
 0x2fb   : > { %v16963_v43 = vpop.f32.mrb[216].mxu0 }
 0x2fc   : > { %v22271_v60 = vmax.f32 %v26436_v22, %v16963_v43  ;;  %v4067_v35 = vpop.f32.mrb[217].mxu0  ;;  %v26452_v22 = vmax.f32 %v26450_v59, %v26451_v6  ;;  %v26466_v59 = vld [vmem:[#allocation31_spill] sm:$0xff] }
 0x2fd   : > { %v22276_v51 = vmax.f32 %v26440_v37, %v4067_v35  ;;  %v16964_v38 = vpop.f32.mrb[218].mxu0  ;;  %v26456_v37 = vmax.f32 %v26454_v10, %v26455_v42  ;;  %v26467_v6 = vld [vmem:[#allocation99_spill] sm:$0xff]  ;;  %v26470_v10 = vld [vmem:[#allocation32_spill] sm:$0xff] }
 0x2fe   : > { %26437 = vst [vmem:[#allocation68_spill] sm:$0xff] %v22271_v60  ;;  %v22281_v25 = vmax.f32 %v26444_v33, %v16964_v38  ;;  %v4070_v55 = vpop.f32.mrb[219].mxu0  ;;  %v26460_v33 = vmax.f32 %v26458_v2, %v26459_v16  ;;  %v26471_v42 = vld [vmem:[#allocation100_spill] sm:$0xff]  ;;  %v26474_v2 = vld [vmem:[#allocation33_spill] sm:$0xff] }
 0x2ff   : > { %26441 = vst [vmem:[#allocation69_spill] sm:$0xff] %v22276_v51  ;;  %v22286_v62 = vmax.f32 %v26448_v30, %v4070_v55  ;;  %v26464_v30 = vmax.f32 %v26462_v4, %v26463_v45  ;;  %v26475_v16 = vld [vmem:[#allocation101_spill] sm:$0xff]  ;;  %v26478_v4 = vld [vmem:[#allocation34_spill] sm:$0xff] }
 0x300   : > { %26445 = vst [vmem:[#allocation70_spill] sm:$0xff] %v22281_v25  ;;  %v26479_v45 = vld [vmem:[#allocation102_spill] sm:$0xff] }
 0x301   : > { %26449 = vst [vmem:[#allocation12_spill] sm:$0xff] %v22286_v62 }
 0x303   : > { %v16967_v43 = vpop.f32.mrb[220].mxu0 }
 0x304   : > { %v22291_v60 = vmax.f32 %v26452_v22, %v16967_v43  ;;  %v4083_v35 = vpop.f32.mrb[221].mxu0  ;;  %v26468_v22 = vmax.f32 %v26466_v59, %v26467_v6  ;;  %v26482_v59 = vld [vmem:[#allocation35_spill] sm:$0xff] }
 0x305   : > { %v22296_v51 = vmax.f32 %v26456_v37, %v4083_v35  ;;  %v16968_v38 = vpop.f32.mrb[222].mxu0  ;;  %v26472_v37 = vmax.f32 %v26470_v10, %v26471_v42  ;;  %v26483_v6 = vld [vmem:[#allocation103_spill] sm:$0xff]  ;;  %v26486_v10 = vld [vmem:[#allocation36_spill] sm:$0xff] }
 0x306   : > { %26453 = vst [vmem:[#allocation71_spill] sm:$0xff] %v22291_v60  ;;  %v22301_v25 = vmax.f32 %v26460_v33, %v16968_v38  ;;  %v4086_v55 = vpop.f32.mrb[223].mxu0  ;;  %v26476_v33 = vmax.f32 %v26474_v2, %v26475_v16  ;;  %v26487_v42 = vld [vmem:[#allocation104_spill] sm:$0xff]  ;;  %v26490_v2 = vld [vmem:[#allocation37_spill] sm:$0xff] }
 0x307   : > { %26457 = vst [vmem:[#allocation72_spill] sm:$0xff] %v22296_v51  ;;  %v22306_v62 = vmax.f32 %v26464_v30, %v4086_v55  ;;  %v26480_v30 = vmax.f32 %v26478_v4, %v26479_v45  ;;  %v26491_v16 = vld [vmem:[#allocation105_spill] sm:$0xff]  ;;  %v26494_v4 = vld [vmem:[#allocation38_spill] sm:$0xff] }
 0x308   : > { %26461 = vst [vmem:[#allocation73_spill] sm:$0xff] %v22301_v25  ;;  %v26495_v45 = vld [vmem:[#allocation106_spill] sm:$0xff] }
 0x309   : > { %26465 = vst [vmem:[#allocation13_spill] sm:$0xff] %v22306_v62 }
 0x30b   : > { %v16971_v43 = vpop.f32.mrb[224].mxu0 }
 0x30c   : > { %v22311_v60 = vmax.f32 %v26468_v22, %v16971_v43  ;;  %v4099_v35 = vpop.f32.mrb[225].mxu0  ;;  %v26484_v22 = vmax.f32 %v26482_v59, %v26483_v6  ;;  %v26498_v59 = vld [vmem:[#allocation39_spill] sm:$0xff] }
 0x30d   : > { %v22316_v51 = vmax.f32 %v26472_v37, %v4099_v35  ;;  %v16972_v38 = vpop.f32.mrb[226].mxu0  ;;  %v26488_v37 = vmax.f32 %v26486_v10, %v26487_v42  ;;  %v26499_v6 = vld [vmem:[#allocation107_spill] sm:$0xff]  ;;  %v26502_v10 = vld [vmem:[#allocation40_spill] sm:$0xff] }
 0x30e   : > { %26469 = vst [vmem:[#allocation74_spill] sm:$0xff] %v22311_v60  ;;  %v22321_v25 = vmax.f32 %v26476_v33, %v16972_v38  ;;  %v4102_v55 = vpop.f32.mrb[227].mxu0  ;;  %v26492_v33 = vmax.f32 %v26490_v2, %v26491_v16  ;;  %v26503_v42 = vld [vmem:[#allocation108_spill] sm:$0xff]  ;;  %v26506_v2 = vld [vmem:[#allocation41_spill] sm:$0xff] }
 0x30f   : > { %26473 = vst [vmem:[#allocation75_spill] sm:$0xff] %v22316_v51  ;;  %v22326_v62 = vmax.f32 %v26480_v30, %v4102_v55  ;;  %v26496_v30 = vmax.f32 %v26494_v4, %v26495_v45  ;;  %v26507_v16 = vld [vmem:[#allocation109_spill] sm:$0xff]  ;;  %v26510_v4 = vld [vmem:[#allocation42_spill] sm:$0xff] }
 0x310   : > { %26477 = vst [vmem:[#allocation76_spill] sm:$0xff] %v22321_v25  ;;  %v26511_v45 = vld [vmem:[#allocation110_spill] sm:$0xff] }
 0x311   : > { %26481 = vst [vmem:[#allocation14_spill] sm:$0xff] %v22326_v62 }
 0x313   : > { %v16975_v43 = vpop.f32.mrb[228].mxu0 }
 0x314   : > { %v22331_v60 = vmax.f32 %v26484_v22, %v16975_v43  ;;  %v4115_v35 = vpop.f32.mrb[229].mxu0  ;;  %v26500_v22 = vmax.f32 %v26498_v59, %v26499_v6  ;;  %v26514_v59 = vld [vmem:[#allocation43_spill] sm:$0xff] }
 0x315   : > { %v22336_v51 = vmax.f32 %v26488_v37, %v4115_v35  ;;  %v16976_v38 = vpop.f32.mrb[230].mxu0  ;;  %v26504_v37 = vmax.f32 %v26502_v10, %v26503_v42  ;;  %v26515_v6 = vld [vmem:[#allocation111_spill] sm:$0xff]  ;;  %v26517_v10 = vld [vmem:[#allocation44_spill] sm:$0xff] }
 0x316   : > { %26485 = vst [vmem:[#allocation77_spill] sm:$0xff] %v22331_v60  ;;  %v22341_v25 = vmax.f32 %v26492_v33, %v16976_v38  ;;  %v4118_v55 = vpop.f32.mrb[231].mxu0  ;;  %v26508_v33 = vmax.f32 %v26506_v2, %v26507_v16  ;;  %v26518_v42 = vld [vmem:[#allocation112_spill] sm:$0xff]  ;;  %v26520_v2 = vld [vmem:[#allocation45_spill] sm:$0xff] }
 0x317   : > { %26489 = vst [vmem:[#allocation78_spill] sm:$0xff] %v22336_v51  ;;  %v22346_v62 = vmax.f32 %v26496_v30, %v4118_v55  ;;  %v26512_v30 = vmax.f32 %v26510_v4, %v26511_v45  ;;  %v26521_v16 = vld [vmem:[#allocation113_spill] sm:$0xff]  ;;  %v26523_v4 = vld [vmem:[#allocation46_spill] sm:$0xff] }
 0x318   : > { %26493 = vst [vmem:[#allocation79_spill] sm:$0xff] %v22341_v25  ;;  %v26524_v45 = vld [vmem:[#allocation114_spill] sm:$0xff] }
 0x319   : > { %26497 = vst [vmem:[#allocation15_spill] sm:$0xff] %v22346_v62 }
 0x31b   : > { %v16979_v43 = vpop.f32.mrb[232].mxu0 }
 0x31c   : > { %v22351_v60 = vmax.f32 %v26500_v22, %v16979_v43  ;;  %v4131_v35 = vpop.f32.mrb[233].mxu0  ;;  %v26516_v22 = vmax.f32 %v26514_v59, %v26515_v6  ;;  %v22391_v59 = vld [vmem:[%s25963_s2] ss:$0 sm:$0xff] }
 0x31d   : > { %v22356_v51 = vmax.f32 %v26504_v37, %v4131_v35  ;;  %v16980_v38 = vpop.f32.mrb[234].mxu0  ;;  %v26519_v37 = vmax.f32 %v26517_v10, %v26518_v42 }
 0x31e   : > { %26501 = vst [vmem:[#allocation80_spill] sm:$0xff] %v22351_v60  ;;  %v22361_v25 = vmax.f32 %v26508_v33, %v16980_v38  ;;  %v4134_v55 = vpop.f32.mrb[235].mxu0  ;;  %v26522_v33 = vmax.f32 %v26520_v2, %v26521_v16 }
 0x31f   : > { %26505 = vst [vmem:[#allocation81_spill] sm:$0xff] %v22356_v51  ;;  %v22366_v62 = vmax.f32 %v26512_v30, %v4134_v55  ;;  %v26525_v30 = vmax.f32 %v26523_v4, %v26524_v45 }
 0x320   : > { %26509 = vst [vmem:[#allocation82_spill] sm:$0xff] %v22361_v25 }
 0x321   : > { %26513 = vst [vmem:[#allocation83_spill] sm:$0xff] %v22366_v62 }
 0x323   : > { %v16983_v43 = vpop.f32.mrb[236].mxu0 }
 0x324   : > { %v22371_v60 = vmax.f32 %v26516_v22, %v16983_v43  ;;  %v4147_v35 = vpop.f32.mrb[237].mxu0 }
 0x325   : > { %v22376_v51 = vmax.f32 %v26519_v37, %v4147_v35  ;;  %v16984_v38 = vpop.f32.mrb[238].mxu0 }
 0x326   : > { %v22381_v25 = vmax.f32 %v26522_v33, %v16984_v38  ;;  %v4150_v55 = vpop.f32.mrb[239].mxu0 }
 0x327   : > { %v22386_v62 = vmax.f32 %v26525_v30, %v4150_v55 }
 0x32b   : > { %v16987_v43 = vpop.f32.mrb[240].mxu0 }
 0x32c   : > { %v4490_v6 = vmax.f32 %v21822_v9, %v16987_v43  ;;  %v4163_v22 = vpop.f32.mrb[241].mxu0 }
 0x32d   : > { %v4484_v35 = vmax.f32 %v21828_v17, %v4163_v22  ;;  %v16988_v10 = vpop.f32.mrb[242].mxu0 }
 0x32e   : > { %v4731_v42 = vadd.f32 %v22391_v59, %v4490_v6  ;;  %v4493_v37 = vmax.f32 %v21834_v57, %v16988_v10  ;;  %v4166_v38 = vpop.f32.mrb[243].mxu0 }
 0x32f   : > { %v4729_v2 = vadd.f32 %v22391_v59, %v4484_v35  ;;  %v4487_v16 = vmax.f32 %v21839_v20, %v4166_v38 }
 0x330   : > { %v4811_v33 = vmax.f32 %v4731_v42, 0.0  ;;  %v4732_v55 = vadd.f32 %v22391_v59, %v4493_v37 }
 0x331   : > { %v4809_v4 = vmax.f32 %v4729_v2, 0.0  ;;  %v4730_v45 = vadd.f32 %v22391_v59, %v4487_v16 }
 0x332   : > { %4891 = vst [vmem:[#allocation2 + $0x10] sm:$0xff] %v4811_v33  ;;  %v4812_v9 = vmax.f32 %v4732_v55, 0.0 }
 0x333   : > { %4889 = vst [vmem:[#allocation2] sm:$0xff] %v4809_v4  ;;  %v4810_v17 = vmax.f32 %v4730_v45, 0.0  ;;  %v16991_v30 = vpop.f32.mrb[244].mxu0  ;;  %v22401_v43 = vpack.c.bf16 %v4811_v33, %v4809_v4 }
 0x334   : > { %4892 = vst [vmem:[#allocation2 + $0x18] sm:$0xff] %v4812_v9  ;;  %v4502_v57 = vmax.f32 %v21846_v31, %v16991_v30  ;;  %v4179_v6 = vpop.f32.mrb[245].mxu0 }
 0x335   : > { %4890 = vst [vmem:[#allocation2 + $0x8] sm:$0xff] %v4810_v17  ;;  %v4496_v20 = vmax.f32 %v21852_v34, %v4179_v6  ;;  %v16992_v22 = vpop.f32.mrb[246].mxu0 }
 0x336   : > { %v4735_v35 = vadd.f32 %v22391_v59, %v4502_v57  ;;  %v4505_v10 = vmax.f32 %v21858_v39, %v16992_v22  ;;  %v4182_v42 = vpop.f32.mrb[247].mxu0 }
 0x337   : > { %v4733_v37 = vadd.f32 %v22391_v59, %v4496_v20  ;;  %v4499_v38 = vmax.f32 %v21863_v26, %v4182_v42 }
 0x338   : > { %v22409_v2 = vmax.f32 %v4735_v35, 0.0  ;;  %v4736_v16 = vadd.f32 %v22391_v59, %v4505_v10 }
 0x339   : > { %v22412_v55 = vmax.f32 %v4733_v37, 0.0  ;;  %v4734_v31 = vadd.f32 %v22391_v59, %v4499_v38 }
 0x33a   : > { %4895 = vst [vmem:[#allocation2 + $0x30] sm:$0xff] %v22409_v2  ;;  %v4816_v34 = vmax.f32 %v4736_v16, 0.0 }
 0x33b   : > { %4893 = vst [vmem:[#allocation2 + $0x20] sm:$0xff] %v22412_v55  ;;  %v4994_v39 = vpack.c.bf16 %v22409_v2, %v22412_v55  ;;  %v4814_v4 = vmax.f32 %v4734_v31, 0.0  ;;  %v16995_v45 = vpop.f32.mrb[248].mxu0  ;;  %v22420_v26 = vpack.c.bf16 %v22412_v55, %v4811_v33 }
 0x33c   : > { %4896 = vst [vmem:[#allocation2 + $0x38] sm:$0xff] %v4816_v34  ;;  %v4514_v9 = vmax.f32 %v21870_v29, %v16995_v45  ;;  %v4195_v17 = vpop.f32.mrb[249].mxu0 }
 0x33d   : > { %4894 = vst [vmem:[#allocation2 + $0x28] sm:$0xff] %v4814_v4  ;;  %v4508_v30 = vmax.f32 %v21876_v40, %v4195_v17  ;;  %v16996_v57 = vpop.f32.mrb[250].mxu0  ;;  %18041 = vmatprep.mubr.bf16.mxu1 %v22420_v26 }
 0x33e   : > { %v4739_v6 = vadd.f32 %v22391_v59, %v4514_v9  ;;  %v4517_v20 = vmax.f32 %v21882_v49, %v16996_v57  ;;  %v4198_v22 = vpop.f32.mrb[251].mxu0 }
 0x33f   : > { %v4737_v35 = vadd.f32 %v22391_v59, %v4508_v30  ;;  %v4511_v33 = vmax.f32 %v21887_v32, %v4198_v22  ;;  %v26527_v22 = vld [vmem:[#allocation47_spill] sm:$0xff] }
 0x340   : > { %v22429_v10 = vmax.f32 %v4739_v6, 0.0  ;;  %v4740_v29 = vadd.f32 %v22391_v59, %v4517_v20  ;;  %v26526_v6 = vld [vmem:[#allocation4_spill] sm:$0xff] }
 0x341   : > { %v22432_v42 = vmax.f32 %v4737_v35, 0.0  ;;  %v4738_v40 = vadd.f32 %v22391_v59, %v4511_v33 }
 0x342   : > { %4899 = vst [vmem:[#allocation2 + $0x50] sm:$0xff] %v22429_v10  ;;  %v4820_v37 = vmax.f32 %v4740_v29, 0.0 }
 0x343   : > { %4897 = vst [vmem:[#allocation2 + $0x40] sm:$0xff] %v22432_v42  ;;  %v4818_v38 = vmax.f32 %v4738_v40, 0.0  ;;  %v16999_v49 = vpop.f32.mrb[252].mxu0  ;;  %v22439_v16 = vpack.c.bf16 %v22432_v42, %v22409_v2  ;;  %v4995_v32 = vpack.c.bf16 %v22429_v10, %v22432_v42  ;;  %v22657_v42 = vld [vmem:[#allocation2 + $0x11] sm:$0xff] }
 0x344   : > { %4900 = vst [vmem:[#allocation2 + $0x58] sm:$0xff] %v4820_v37  ;;  %v4526_v31 = vmax.f32 %v21899_v5, %v16999_v49  ;;  %v4211_v34 = vpop.f32.mrb[253].mxu0 }
 0x345   : > { %4898 = vst [vmem:[#allocation2 + $0x48] sm:$0xff] %v4818_v38  ;;  %v4520_v4 = vmax.f32 %v21905_v27, %v4211_v34  ;;  %v17000_v45 = vpop.f32.mrb[254].mxu0  ;;  %18042 = vmatmul.mubr.bf16.vlgmr.msra.gmra.mrb[0].mxu1 %v22439_v16 }
 0x346   : > { %v4743_v9 = vadd.f32 %v22391_v59, %v4526_v31  ;;  %v4529_v17 = vmax.f32 %v21912_v36, %v17000_v45  ;;  %v4214_v30 = vpop.f32.mrb[255].mxu0  ;;  %18050 = vmatpush3.bf16.msra.mxu1 %v21894_v14 }
 0x347   : > { %v4741_v57 = vadd.f32 %v22391_v59, %v4520_v4  ;;  %v4523_v20 = vmax.f32 %v26526_v6, %v4214_v30  ;;  %18051 = vmatprep.subr.bf16.mxu1 %v26527_v22 }
 0x348   : > { %v22452_v5 = vmax.f32 %v4743_v9, 0.0  ;;  %v4744_v27 = vadd.f32 %v22391_v59, %v4529_v17 }
 0x349   : > { %v22455_v35 = vmax.f32 %v4741_v57, 0.0  ;;  %v4742_v33 = vadd.f32 %v22391_v59, %v4523_v20  ;;  %v26528_v57 = vld [vmem:[#allocation48_spill] sm:$0xff]  ;;  %v26529_v20 = vld [vmem:[#allocation49_spill] sm:$0xff] }
 0x34a   : > { %4903 = vst [vmem:[#allocation2 + $0x70] sm:$0xff] %v22452_v5  ;;  %v4824_v36 = vmax.f32 %v4744_v27, 0.0  ;;  %18052 = vmatpush3.bf16.msra.mxu1 %v26527_v22 }
 0x34b   : > { %4901 = vst [vmem:[#allocation2 + $0x60] sm:$0xff] %v22455_v35  ;;  %v4822_v29 = vmax.f32 %v4742_v33, 0.0  ;;  %v17003_v40 = vpop.f32.mrb[0].mxu0  ;;  %v22463_v37 = vpack.c.bf16 %v22455_v35, %v22429_v10  ;;  %18053 = vmatprep.subr.bf16.mxu1 %v21932_v52  ;;  %v4996_v38 = vpack.c.bf16 %v22452_v5, %v22455_v35  ;;  %v5279_v10 = vld [vmem:[#allocation2 + $0x1] sm:$0xff] }
 0x34c   : > { %4904 = vst [vmem:[#allocation2 + $0x78] sm:$0xff] %v4824_v36  ;;  %v4538_v49 = vmax.f32 %v21937_v8, %v17003_v40  ;;  %v4227_v31 = vpop.f32.mrb[1].mxu0 }
 0x34d   : > { %4902 = vst [vmem:[#allocation2 + $0x68] sm:$0xff] %v4822_v29  ;;  %v4532_v34 = vmax.f32 %v21943_v11, %v4227_v31  ;;  %v17004_v4 = vpop.f32.mrb[2].mxu0  ;;  %18045 = vmatprep.mubr.bf16.mxu1 %v22463_v37 }
 0x34e   : > { %v4747_v45 = vadd.f32 %v22391_v59, %v4538_v49  ;;  %v4541_v9 = vmax.f32 %v21950_v48, %v17004_v4  ;;  %v4230_v17 = vpop.f32.mrb[3].mxu0  ;;  %18054 = vmatpush3.bf16.msra.mxu1 %v21932_v52 }
 0x34f   : > { %v4745_v30 = vadd.f32 %v22391_v59, %v4532_v34  ;;  %v4535_v6 = vmax.f32 %v26528_v57, %v4230_v17  ;;  %18055 = vmatprep.subr.bf16.mxu1 %v26529_v20  ;;  %v22485_v34 = vld [vmem:[#allocation2 + $0x51] sm:$0xff] }
 0x350   : > { %v4827_v8 = vmax.f32 %v4747_v45, 0.0  ;;  %v4748_v27 = vadd.f32 %v22391_v59, %v4541_v9 }
 0x351   : > { %v4825_v11 = vmax.f32 %v4745_v30, 0.0  ;;  %v4746_v33 = vadd.f32 %v22391_v59, %v4535_v6 }
 0x352   : > { %4907 = vst [vmem:[#allocation2 + $0x90] sm:$0xff] %v4827_v8  ;;  %v4828_v36 = vmax.f32 %v4748_v27, 0.0  ;;  %18056 = vmatpush3.bf16.msra.mxu1 %v26529_v20  ;;  %v26531_v8 = vld [vmem:[#allocation5_spill] sm:$0xff] }
 0x353   : > { %4905 = vst [vmem:[#allocation2 + $0x80] sm:$0xff] %v4825_v11  ;;  %v4826_v48 = vmax.f32 %v4746_v33, 0.0  ;;  %v17007_v29 = vpop.f32.mrb[4].mxu0  ;;  %v22481_v40 = vpack.c.bf16 %v4825_v11, %v22452_v5  ;;  %18057 = vmatprep.subr.bf16.mxu1 %v21970_v58  ;;  %v26532_v11 = vld [vmem:[#allocation50_spill] sm:$0xff] }
 0x354   : > { %4908 = vst [vmem:[#allocation2 + $0x98] sm:$0xff] %v4828_v36  ;;  %v4550_v49 = vmax.f32 %v21975_v63, %v17007_v29  ;;  %v4243_v31 = vpop.f32.mrb[5].mxu0  ;;  %v22487_v4 = vld [vmem:[#allocation2 + $0x61] sm:$0xff] }
 0x355   : > { %4906 = vst [vmem:[#allocation2 + $0x88] sm:$0xff] %v4826_v48  ;;  %v4544_v45 = vmax.f32 %v21981_v44, %v4243_v31  ;;  %v17008_v9 = vpop.f32.mrb[6].mxu0  ;;  %18046 = vmatmul.mubr.bf16.gmra.mrb[4].mxu1 %v22481_v40  ;;  %v22493_v17 = vpack.c.bf16 %v22487_v4, %v22485_v34 }
 0x356   : > { %v4751_v30 = vadd.f32 %v22391_v59, %v4550_v49  ;;  %v4553_v57 = vmax.f32 %v21988_v23, %v17008_v9  ;;  %v4246_v63 = vpop.f32.mrb[7].mxu0  ;;  %18058 = vmatpush3.bf16.msra.mxu1 %v21970_v58 }
 0x357   : > { %26530 = vst [vmem:[#allocation16_spill] sm:$0xff] %v22493_v17  ;;  %v4749_v6 = vadd.f32 %v22391_v59, %v4544_v45  ;;  %v4547_v27 = vmax.f32 %v26531_v8, %v4246_v63  ;;  %18059 = vmatprep.subr.bf16.mxu1 %v26532_v11 }
 0x358   : > { %v4831_v44 = vmax.f32 %v4751_v30, 0.0  ;;  %v4752_v33 = vadd.f32 %v22391_v59, %v4553_v57 }
 0x359   : > { %v4829_v36 = vmax.f32 %v4749_v6, 0.0  ;;  %v4750_v48 = vadd.f32 %v22391_v59, %v4547_v27 }
 0x35a   : > { %4911 = vst [vmem:[#allocation2 + $0xb0] sm:$0xff] %v4831_v44  ;;  %v4832_v29 = vmax.f32 %v4752_v33, 0.0  ;;  %18060 = vmatpush3.bf16.msra.mxu1 %v26532_v11 }
 0x35b   : > { %4909 = vst [vmem:[#allocation2 + $0xa0] sm:$0xff] %v4829_v36  ;;  %v4830_v23 = vmax.f32 %v4750_v48, 0.0  ;;  %v17011_v49 = vpop.f32.mrb[8].mxu0  ;;  %v22504_v31 = vpack.c.bf16 %v4831_v44, %v4829_v36  ;;  %18061 = vmatprep.subr.bf16.mxu1 %v22008_v0  ;;  %v26533_v36 = vld [vmem:[#allocation51_spill] sm:$0xff] }
 0x35c   : > { %4912 = vst [vmem:[#allocation2 + $0xb8] sm:$0xff] %v4832_v29  ;;  %v4562_v45 = vmax.f32 %v22013_v15, %v17011_v49  ;;  %v4259_v9 = vpop.f32.mrb[9].mxu0 }
 0x35d   : > { %4910 = vst [vmem:[#allocation2 + $0xa8] sm:$0xff] %v4830_v23  ;;  %v4556_v30 = vmax.f32 %v22019_v50, %v4259_v9  ;;  %v17012_v57 = vpop.f32.mrb[10].mxu0  ;;  %17081 = vmatprep.mubr.bf16.mxu0 %v22504_v31 }
 0x35e   : > { %v4755_v63 = vadd.f32 %v22391_v59, %v4562_v45  ;;  %v4565_v6 = vmax.f32 %v22026_v3, %v17012_v57  ;;  %v4262_v8 = vpop.f32.mrb[11].mxu0  ;;  %18062 = vmatpush3.bf16.msra.mxu1 %v22008_v0 }
 0x35f   : > { %v4753_v27 = vadd.f32 %v22391_v59, %v4556_v30  ;;  %v4559_v33 = vmax.f32 %v22032_v46, %v4262_v8  ;;  %18063 = vmatprep.subr.bf16.mxu1 %v26533_v36  ;;  %v22526_v46 = vld [vmem:[%s25964_s3 + $0x8] sm:$0xff]  }
 0x360   : > { %v4835_v15 = vmax.f32 %v4755_v63, 0.0  ;;  %v4756_v48 = vadd.f32 %v22391_v59, %v4565_v6 }
 0x361   : > { %v4833_v50 = vmax.f32 %v4753_v27, 0.0  ;;  %v4754_v29 = vadd.f32 %v22391_v59, %v4559_v33 }
 0x362   : > { %4915 = vst [vmem:[#allocation2 + $0xd0] sm:$0xff] %v4835_v15  ;;  %v4836_v23 = vmax.f32 %v4756_v48, 0.0  ;;  %18064 = vmatpush3.bf16.msra.mxu1 %v26533_v36 }
 0x363   : > { %4913 = vst [vmem:[#allocation2 + $0xc0] sm:$0xff] %v4833_v50  ;;  %v22519_v3 = vpack.c.bf16 %v4835_v15, %v4833_v50  ;;  %v4834_v49 = vmax.f32 %v4754_v29, 0.0  ;;  %v17015_v45 = vpop.f32.mrb[12].mxu0  ;;  %v22521_v9 = vpack.c.bf16 %v4833_v50, %v4831_v44  ;;  %18073 = vmatprep.subr.bf16.mxu1 %v21894_v14 }
 0x364   : > { %4916 = vst [vmem:[#allocation2 + $0xd8] sm:$0xff] %v4836_v23  ;;  %v4574_v30 = vmax.f32 %v22052_v47, %v17015_v45  ;;  %v4275_v57 = vpop.f32.mrb[13].mxu0 }
 0x365   : > { %4914 = vst [vmem:[#allocation2 + $0xc8] sm:$0xff] %v4834_v49  ;;  %v4568_v63 = vmax.f32 %v22059_v56, %v4275_v57  ;;  %v17016_v6 = vpop.f32.mrb[14].mxu0  ;;  %17082 = vmatmul.mubr.bf16.vlgmr.msra.gmra.mrb[64].mxu0 %v22519_v3  ;;  %18065 = vmatprep.mubr.bf16.mxu1 %v22521_v9  ;;  %v22542_v56 = vld [vmem:[%s25964_s3 + $0x10] sm:$0xff]   ;;  %v22555_v57 = vld [vmem:[%s25964_s3 + $0x18] sm:$0xff]  }
 0x366   : > { %v4759_v44 = vadd.f32 %v22391_v59, %v4574_v30  ;;  %v4577_v8 = vmax.f32 %v22066_v7, %v17016_v6  ;;  %v4278_v27 = vpop.f32.mrb[15].mxu0  ;;  %17090 = vmatpush3.bf16.msra.mxu0 %v22199_v28 }
 0x367   : > { %v4757_v33 = vadd.f32 %v22391_v59, %v4568_v63  ;;  %v4571_v47 = vmax.f32 %v22076_v21, %v4278_v27  ;;  %17091 = vmatprep.subr.bf16.mxu0 %v22526_v46 }
 0x368   : > { %v4839_v48 = vmax.f32 %v4759_v44, 0.0  ;;  %v4760_v50 = vadd.f32 %v22391_v59, %v4577_v8 }
 0x369   : > { %v4837_v29 = vmax.f32 %v4757_v33, 0.0  ;;  %v4758_v7 = vadd.f32 %v22391_v59, %v4571_v47 }
 0x36a   : > { %4919 = vst [vmem:[#allocation2 + $0xf0] sm:$0xff] %v4839_v48  ;;  %v4840_v23 = vmax.f32 %v4760_v50, 0.0  ;;  %17092 = vmatpush3.bf16.msra.mxu0 %v22526_v46 }
 0x36b   : > { %4917 = vst [vmem:[#allocation2 + $0xe0] sm:$0xff] %v4837_v29  ;;  %v4838_v49 = vmax.f32 %v4758_v7, 0.0  ;;  %v17019_v21 = vpop.f32.mrb[16].mxu0  ;;  %17093 = vmatprep.subr.bf16.mxu0 %v22542_v56  ;;  %v22548_v45 = vpack.c.bf16 %v4839_v48, %v4837_v29  ;;  %v22550_v30 = vpack.c.bf16 %v4837_v29, %v4835_v15 }
 0x36c   : > { %4920 = vst [vmem:[#allocation2 + $0xf8] sm:$0xff] %v4840_v23  ;;  %v4586_v63 = vmax.f32 %v22090_v12, %v17019_v21  ;;  %v4291_v6 = vpop.f32.mrb[17].mxu0 }
 0x36d   : > { %4918 = vst [vmem:[#allocation2 + $0xe8] sm:$0xff] %v4838_v49  ;;  %v4580_v44 = vmax.f32 %v22097_v41, %v4291_v6  ;;  %v17020_v8 = vpop.f32.mrb[18].mxu0  ;;  %17085 = vmatprep.mubr.bf16.mxu0 %v22548_v45  ;;  %18066 = vmatmul.mubr.bf16.vlgmr.msra.gmra.mrb[8].mxu1 %v22550_v30  ;;  %v22571_v41 = vld [vmem:[%s25964_s3 + $0x20] sm:$0xff]  }
 0x36e   : > { %v4763_v15 = vadd.f32 %v22391_v59, %v4586_v63  ;;  %v4589_v27 = vmax.f32 %v22104_v13, %v17020_v8  ;;  %v4294_v33 = vpop.f32.mrb[19].mxu0  ;;  %17094 = vmatpush3.bf16.msra.mxu0 %v22542_v56  ;;  %18074 = vmatpush3.bf16.msra.mxu1 %v21894_v14  ;;  %v22586_v63 = vld [vmem:[%s25964_s3 + $0x28] sm:$0xff]  }
 0x36f   : > { %v4761_v12 = vadd.f32 %v22391_v59, %v4580_v44  ;;  %v4583_v47 = vmax.f32 %v22114_v53, %v4294_v33  ;;  %17095 = vmatprep.subr.bf16.mxu0 %v22555_v57  ;;  %18075 = vmatprep.subr.bf16.mxu1 %v26527_v22 }
 0x370   : > { %v4843_v50 = vmax.f32 %v4763_v15, 0.0  ;;  %v4764_v13 = vadd.f32 %v22391_v59, %v4589_v27 }
 0x371   : > { %v4841_v29 = vmax.f32 %v4761_v12, 0.0  ;;  %v4762_v7 = vadd.f32 %v22391_v59, %v4583_v47 }
 0x372   : > { %4923 = vst [vmem:[#allocation2 + $0x110] sm:$0xff] %v4843_v50  ;;  %v4844_v14 = vmax.f32 %v4764_v13, 0.0  ;;  %17096 = vmatpush3.bf16.msra.mxu0 %v22555_v57  ;;  %18076 = vmatpush3.bf16.msra.mxu1 %v26527_v22 }
 0x373   : > { %4921 = vst [vmem:[#allocation2 + $0x100] sm:$0xff] %v4841_v29  ;;  %v4842_v53 = vmax.f32 %v4762_v7, 0.0  ;;  %v17023_v23 = vpop.f32.mrb[20].mxu0  ;;  %17097 = vmatprep.subr.bf16.mxu0 %v22571_v41  ;;  %v22579_v49 = vpack.c.bf16 %v4843_v50, %v4841_v29  ;;  %v22581_v21 = vpack.c.bf16 %v4841_v29, %v4839_v48  ;;  %18077 = vmatprep.subr.bf16.mxu1 %v21932_v52 }
 0x374   : > { %4924 = vst [vmem:[#allocation2 + $0x118] sm:$0xff] %v4844_v14  ;;  %v4598_v6 = vmax.f32 %v22128_v18, %v17023_v23  ;;  %v4307_v22 = vpop.f32.mrb[21].mxu0 }
 0x375   : > { %4922 = vst [vmem:[#allocation2 + $0x108] sm:$0xff] %v4842_v53  ;;  %v4592_v44 = vmax.f32 %v22135_v61, %v4307_v22  ;;  %v17024_v8 = vpop.f32.mrb[22].mxu0  ;;  %17086 = vmatmul.mubr.bf16.gmra.mrb[68].mxu0 %v22579_v49  ;;  %18069 = vmatprep.mubr.bf16.mxu1 %v22581_v21  ;;  %v22603_v61 = vld [vmem:[%s25964_s3 + $0x30] sm:$0xff]   ;;  %v26534_v22 = vld [vmem:[#allocation57_spill] sm:$0xff] }
 0x376   : > { %v4767_v48 = vadd.f32 %v22391_v59, %v4598_v6  ;;  %v4601_v15 = vmax.f32 %v22142_v19, %v17024_v8  ;;  %v4310_v27 = vpop.f32.mrb[23].mxu0  ;;  %17098 = vmatpush3.bf16.msra.mxu0 %v22571_v41  ;;  %17105 = vmatprep.mubr.bf16.mxu0 %v22401_v43 }
 0x377   : > { %v4765_v18 = vadd.f32 %v22391_v59, %v4592_v44  ;;  %v4595_v33 = vmax.f32 %v22152_v1, %v4310_v27  ;;  %17099 = vmatprep.subr.bf16.mxu0 %v22586_v63  ;;  %18078 = vmatpush3.bf16.msra.mxu1 %v21932_v52  ;;  %v22616_v52 = vld [vmem:[%s25964_s3 + $0x38] sm:$0xff]  }
 0x378   : > { %v4847_v12 = vmax.f32 %v4767_v48, 0.0  ;;  %v4768_v19 = vadd.f32 %v22391_v59, %v4601_v15  ;;  %18079 = vmatprep.subr.bf16.mxu1 %v26529_v20  ;;  %v26535_v48 = vld [vmem:[#allocation8_spill] sm:$0xff] }
 0x379   : > { %v4845_v47 = vmax.f32 %v4765_v18, 0.0  ;;  %v4766_v43 = vadd.f32 %v22391_v59, %v4595_v33 }
 0x37a   : > { %4927 = vst [vmem:[#allocation2 + $0x130] sm:$0xff] %v4847_v12  ;;  %v4848_v13 = vmax.f32 %v4768_v19, 0.0  ;;  %17100 = vmatpush3.bf16.msra.mxu0 %v22586_v63 }
 0x37b   : > { %4925 = vst [vmem:[#allocation2 + $0x120] sm:$0xff] %v4845_v47  ;;  %v4846_v1 = vmax.f32 %v4766_v43, 0.0  ;;  %v17027_v29 = vpop.f32.mrb[24].mxu0  ;;  %17101 = vmatprep.subr.bf16.mxu0 %v22603_v61  ;;  %v22611_v7 = vpack.c.bf16 %v4845_v47, %v4843_v50  ;;  %18080 = vmatpush3.bf16.msra.mxu1 %v26529_v20  ;;  %v26536_v47 = vld [vmem:[#allocation52_spill] sm:$0xff]  ;;  %v26537_v43 = vld [vmem:[#allocation59_spill] sm:$0xff] }
 0x37c   : > { %4928 = vst [vmem:[#allocation2 + $0x138] sm:$0xff] %v4848_v13  ;;  %v4610_v14 = vmax.f32 %v22166_v24, %v17027_v29  ;;  %v4323_v53 = vpop.f32.mrb[25].mxu0  ;;  %18081 = vmatprep.subr.bf16.mxu1 %v21970_v58  ;;  %v26538_v29 = vld [vmem:[#allocation60_spill] sm:$0xff] }
 0x37d   : > { %4926 = vst [vmem:[#allocation2 + $0x128] sm:$0xff] %v4846_v1  ;;  %v4604_v23 = vmax.f32 %v22173_v54, %v4323_v53  ;;  %v17028_v6 = vpop.f32.mrb[26].mxu0  ;;  %18070 = vmatmul.mubr.bf16.gmra.mrb[12].mxu1 %v22611_v7 }
 0x37e   : > { %v4771_v50 = vadd.f32 %v22391_v59, %v4610_v14  ;;  %v4613_v44 = vmax.f32 %v26534_v22, %v17028_v6  ;;  %v4326_v8 = vpop.f32.mrb[27].mxu0  ;;  %17102 = vmatpush3.bf16.msra.mxu0 %v22603_v61  ;;  %v26539_v6 = vld [vmem:[#allocation61_spill] sm:$0xff] }
 0x37f   : > { %v4769_v20 = vadd.f32 %v22391_v59, %v4604_v23  ;;  %v4607_v24 = vmax.f32 %v26535_v48, %v4326_v8  ;;  %17103 = vmatprep.subr.bf16.mxu0 %v22616_v52  ;;  %18082 = vmatpush3.bf16.msra.mxu1 %v21970_v58 }
 0x380   : > { %v4851_v15 = vmax.f32 %v4771_v50, 0.0  ;;  %v4772_v54 = vadd.f32 %v22391_v59, %v4613_v44  ;;  %18083 = vmatprep.subr.bf16.mxu1 %v26532_v11  ;;  %v26540_v44 = vld [vmem:[#allocation9_spill] sm:$0xff] }
 0x381   : > { %v4849_v27 = vmax.f32 %v4769_v20, 0.0  ;;  %v4770_v18 = vadd.f32 %v22391_v59, %v4607_v24  ;;  %v26541_v20 = vld [vmem:[#allocation6_spill] sm:$0xff] }
 0x382   : > { %4931 = vst [vmem:[#allocation2 + $0x150] sm:$0xff] %v4851_v15  ;;  %v4852_v33 = vmax.f32 %v4772_v54, 0.0  ;;  %17104 = vmatpush3.bf16.msra.mxu0 %v22616_v52 }
 0x383   : > { %4929 = vst [vmem:[#allocation2 + $0x140] sm:$0xff] %v4849_v27  ;;  %v4850_v12 = vmax.f32 %v4770_v18, 0.0  ;;  %v17031_v19 = vpop.f32.mrb[28].mxu0  ;;  %17113 = vmatprep.subr.bf16.mxu0 %v26536_v47  ;;  %18084 = vmatpush3.bf16.msra.mxu1 %v26532_v11  ;;  %v22636_v58 = vpack.c.bf16 %v4851_v15, %v4849_v27  ;;  %v26542_v27 = vld [vmem:[#allocation53_spill] sm:$0xff] }
 0x384   : > { %4932 = vst [vmem:[#allocation2 + $0x158] sm:$0xff] %v4852_v33  ;;  %v4622_v13 = vmax.f32 %v26537_v43, %v17031_v19  ;;  %v4339_v1 = vpop.f32.mrb[29].mxu0  ;;  %18085 = vmatprep.subr.bf16.mxu1 %v22008_v0  ;;  %v26543_v33 = vld [vmem:[#allocation62_spill] sm:$0xff]  ;;  %v20622_v43 = vld [vmem:[%s25964_s3 + $0x280] sm:$0xff]  }
 0x385   : > { %4930 = vst [vmem:[#allocation2 + $0x148] sm:$0xff] %v4850_v12  ;;  %v4616_v14 = vmax.f32 %v26538_v29, %v4339_v1  ;;  %v17032_v53 = vpop.f32.mrb[30].mxu0  ;;  %17106 = vmatmul.mubr.bf16.vlgmr.msra.gmra.mrb[64].mxu0 %v4994_v39 }
 0x386   : > { %v4775_v23 = vadd.f32 %v22391_v59, %v4622_v13  ;;  %v4625_v11 = vmax.f32 %v26539_v6, %v17032_v53  ;;  %v4342_v50 = vpop.f32.mrb[31].mxu0  ;;  %17109 = vmatprep.mubr.bf16.mxu0 %v4995_v32  ;;  %17114 = vmatpush3.bf16.msra.mxu0 %v26536_v47  ;;  %v22668_v47 = vpack.c.bf16 %v22657_v42, %v5279_v10  ;;  %v26544_v13 = vld [vmem:[#allocation63_spill] sm:$0xff]  ;;  %v26546_v6 = vld [vmem:[#allocation10_spill] sm:$0xff]  ;;  %v26549_v10 = vld [vmem:[#allocation65_spill] sm:$0xff] }
 0x387   : > { %v4773_v22 = vadd.f32 %v22391_v59, %v4616_v14  ;;  %v4619_v8 = vmax.f32 %v26540_v44, %v4342_v50  ;;  %17115 = vmatprep.subr.bf16.mxu0 %v26541_v20  ;;  %18086 = vmatpush3.bf16.msra.mxu1 %v22008_v0  ;;  %v26547_v50 = vld [vmem:[#allocation54_spill] sm:$0xff] }
 0x388   : > { %v4855_v2 = vmax.f32 %v4775_v23, 0.0  ;;  %v4776_v55 = vadd.f32 %v22391_v59, %v4625_v11  ;;  %18087 = vmatprep.subr.bf16.mxu1 %v26533_v36 }
 0x389   : > { %v4853_v39 = vmax.f32 %v4773_v22, 0.0  ;;  %v4774_v48 = vadd.f32 %v22391_v59, %v4619_v8 }
 0x38a   : > { %4935 = vst [vmem:[#allocation2 + $0x170] sm:$0xff] %v4855_v2  ;;  %v4856_v32 = vmax.f32 %v4776_v55, 0.0  ;;  %17116 = vmatpush3.bf16.msra.mxu0 %v26541_v20  ;;  %v26548_v55 = vld [vmem:[#allocation55_spill] sm:$0xff] }
 0x38b   : > { %4933 = vst [vmem:[#allocation2 + $0x160] sm:$0xff] %v4853_v39  ;;  %v22660_v24 = vpack.c.bf16 %v4855_v2, %v4853_v39  ;;  %v4854_v54 = vmax.f32 %v4774_v48, 0.0  ;;  %v17035_v0 = vpop.f32.mrb[32].mxu0  ;;  %17117 = vmatprep.subr.bf16.mxu0 %v26542_v27  ;;  %v22663_v18 = vpack.c.bf16 %v4853_v39, %v4851_v15  ;;  %18088 = vmatpush3.bf16.msra.mxu1 %v26533_v36  ;;  %v26545_v15 = vld [vmem:[#allocation64_spill] sm:$0xff] }
 0x38c   : > { %4936 = vst [vmem:[#allocation2 + $0x178] sm:$0xff] %v4856_v32  ;;  %v4634_v12 = vmax.f32 %v26543_v33, %v17035_v0  ;;  %v4355_v19 = vpop.f32.mrb[33].mxu0  ;;  %18097 = vmatprep.subr.bf16.mxu1 %v20622_v43  ;;  %v26550_v0 = vld [vmem:[#allocation66_spill] sm:$0xff] }
 0x38d   : > { %4934 = vst [vmem:[#allocation2 + $0x168] sm:$0xff] %v4854_v54  ;;  %v4628_v1 = vmax.f32 %v26544_v13, %v4355_v19  ;;  %v17036_v29 = vpop.f32.mrb[34].mxu0  ;;  %17110 = vmatmul.mubr.bf16.gmra.mrb[68].mxu0 %v4996_v38  ;;  %18089 = vmatprep.mubr.bf16.mxu1 %v22663_v18  ;;  %v26551_v19 = vld [vmem:[#allocation67_spill] sm:$0xff] }
 0x38e   : > { %v4779_v36 = vadd.f32 %v22391_v59, %v4634_v12  ;;  %v4637_v14 = vmax.f32 %v26545_v15, %v17036_v29  ;;  %v4358_v53 = vpop.f32.mrb[35].mxu0  ;;  %17118 = vmatpush3.bf16.msra.mxu0 %v26542_v27  ;;  %17129 = vmatprep.mubr.bf16.mxu0 %v22668_v47  ;;  %v26552_v29 = vld [vmem:[#allocation11_spill] sm:$0xff] }
 0x38f   : > { %v4777_v23 = vadd.f32 %v22391_v59, %v4628_v1  ;;  %v4631_v11 = vmax.f32 %v26546_v6, %v4358_v53  ;;  %17119 = vmatprep.subr.bf16.mxu0 %v26547_v50  ;;  %v26553_v15 = vld [vmem:[#allocation7_spill] sm:$0xff] }
 0x390   : > { %v4859_v22 = vmax.f32 %v4779_v36, 0.0  ;;  %v4780_v5 = vadd.f32 %v22391_v59, %v4637_v14  ;;  %v20623_v14 = vld [vmem:[%s25964_s3 + $0x288] sm:$0xff]  }
 0x391   : > { %v4857_v35 = vmax.f32 %v4777_v23, 0.0  ;;  %v4778_v38 = vadd.f32 %v22391_v59, %v4631_v11 }
 0x392   : > { %4939 = vst [vmem:[#allocation2 + $0x190] sm:$0xff] %v4859_v22  ;;  %v4860_v44 = vmax.f32 %v4780_v5, 0.0  ;;  %17120 = vmatpush3.bf16.msra.mxu0 %v26547_v50 }
 0x393   : > { %4937 = vst [vmem:[#allocation2 + $0x180] sm:$0xff] %v4857_v35  ;;  %v4858_v8 = vmax.f32 %v4778_v38, 0.0  ;;  %v17039_v20 = vpop.f32.mrb[36].mxu0  ;;  %17121 = vmatprep.subr.bf16.mxu0 %v26548_v55  ;;  %v22689_v39 = vpack.c.bf16 %v4857_v35, %v4855_v2  ;;  %v22691_v48 = vpack.c.bf16 %v4859_v22, %v4857_v35  ;;  %v26554_v35 = vld [vmem:[#allocation56_spill] sm:$0xff] }
 0x394   : > { %4940 = vst [vmem:[#allocation2 + $0x198] sm:$0xff] %v4860_v44  ;;  %v4646_v32 = vmax.f32 %v26549_v10, %v17039_v20  ;;  %v4371_v54 = vpop.f32.mrb[37].mxu0  ;;  %v20624_v44 = vld [vmem:[%s25964_s3 + $0x290] sm:$0xff]   ;;  %v26555_v20 = vld [vmem:[#allocation68_spill] sm:$0xff] }
 0x395   : > { %4938 = vst [vmem:[#allocation2 + $0x188] sm:$0xff] %v4858_v8  ;;  %v4640_v27 = vmax.f32 %v26550_v0, %v4371_v54  ;;  %v17040_v33 = vpop.f32.mrb[38].mxu0  ;;  %18090 = vmatmul.mubr.bf16.vlgmr.msra.gmra.mrb[16].mxu1 %v22689_v39 }
 0x396   : > { %v4783_v12 = vadd.f32 %v22391_v59, %v4646_v32  ;;  %v4649_v13 = vmax.f32 %v26551_v19, %v17040_v33  ;;  %v4374_v1 = vpop.f32.mrb[39].mxu0  ;;  %17122 = vmatpush3.bf16.msra.mxu0 %v26548_v55  ;;  %18098 = vmatpush3.bf16.msra.mxu1 %v20622_v43  ;;  %v26556_v32 = vld [vmem:[#allocation69_spill] sm:$0xff] }
 0x397   : > { %v4781_v2 = vadd.f32 %v22391_v59, %v4640_v27  ;;  %v4643_v36 = vmax.f32 %v26552_v29, %v4374_v1  ;;  %17123 = vmatprep.subr.bf16.mxu0 %v26553_v15  ;;  %18099 = vmatprep.subr.bf16.mxu1 %v20623_v14  ;;  %v26557_v27 = vld [vmem:[#allocation70_spill] sm:$0xff]  ;;  %v20625_v29 = vld [vmem:[%s25964_s3 + $0x298] sm:$0xff]  }
 0x398   : > { %v4863_v53 = vmax.f32 %v4783_v12, 0.0  ;;  %v4784_v23 = vadd.f32 %v22391_v59, %v4649_v13  ;;  %v26558_v13 = vld [vmem:[#allocation12_spill] sm:$0xff] }
 0x399   : > { %v4861_v6 = vmax.f32 %v4781_v2, 0.0  ;;  %v4782_v11 = vadd.f32 %v22391_v59, %v4643_v36  ;;  %v26559_v2 = vld [vmem:[#allocation58_spill] sm:$0xff] }
 0x39a   : > { %4943 = vst [vmem:[#allocation2 + $0x1b0] sm:$0xff] %v4863_v53  ;;  %v4864_v50 = vmax.f32 %v4784_v23, 0.0  ;;  %17124 = vmatpush3.bf16.msra.mxu0 %v26553_v15  ;;  %18100 = vmatpush3.bf16.msra.mxu1 %v20623_v14  ;;  %v5282_v36 = vld [vmem:[#allocation2 + $0x31] sm:$0xff]  ;;  %v5281_v15 = vld [vmem:[#allocation2 + $0x21] sm:$0xff] }
 0x39b   : > { %4941 = vst [vmem:[#allocation2 + $0x1a0] sm:$0xff] %v4861_v6  ;;  %v4862_v43 = vmax.f32 %v4782_v11, 0.0  ;;  %v17043_v5 = vpop.f32.mrb[40].mxu0  ;;  %17125 = vmatprep.subr.bf16.mxu0 %v26554_v35  ;;  %v22709_v38 = vpack.c.bf16 %v4861_v6, %v4859_v22  ;;  %18101 = vmatprep.subr.bf16.mxu1 %v20624_v44  ;;  %v22714_v8 = vpack.c.bf16 %v4863_v53, %v4861_v6 }
 0x39c   : > { %4944 = vst [vmem:[#allocation2 + $0x1b8] sm:$0xff] %v4864_v50  ;;  %v4658_v55 = vmax.f32 %v26555_v20, %v17043_v5  ;;  %v4387_v10 = vpop.f32.mrb[41].mxu0  ;;  %v22730_v50 = vld [vmem:[#allocation2 + $0x41] sm:$0xff]  ;;  %v22733_v5 = vpack.c.bf16 %v5282_v36, %v5281_v15  ;;  %v22762_v15 = vld [vmem:[#allocation2 + $0x71] sm:$0xff] }
 0x39d   : > { %4942 = vst [vmem:[#allocation2 + $0x1a8] sm:$0xff] %v4862_v43  ;;  %v4652_v54 = vmax.f32 %v26556_v32, %v4387_v10  ;;  %v17044_v0 = vpop.f32.mrb[42].mxu0  ;;  %18093 = vmatprep.mubr.bf16.mxu1 %v22709_v38  ;;  %v26560_v10 = vld [vmem:[#allocation71_spill] sm:$0xff] }
 0x39e   : > { %v4787_v22 = vadd.f32 %v22391_v59, %v4658_v55  ;;  %v4661_v33 = vmax.f32 %v26557_v27, %v17044_v0  ;;  %v4390_v12 = vpop.f32.mrb[43].mxu0  ;;  %17126 = vmatpush3.bf16.msra.mxu0 %v26554_v35  ;;  %18102 = vmatpush3.bf16.msra.mxu1 %v20624_v44  ;;  %v20626_v55 = vld [vmem:[%s25964_s3 + $0x2a0] sm:$0xff]   ;;  %v22744_v0 = vpack.c.bf16 %v22485_v34, %v22730_v50 }
 0x39f   : > { %v4785_v19 = vadd.f32 %v22391_v59, %v4652_v54  ;;  %v4655_v1 = vmax.f32 %v26558_v13, %v4390_v12  ;;  %17127 = vmatprep.subr.bf16.mxu0 %v26559_v2  ;;  %18103 = vmatprep.subr.bf16.mxu1 %v20625_v29  ;;  %v22755_v34 = vld [vmem:[%s25964_s3] sm:$0xff]  }
 0x3a0   : > { %v4867_v14 = vmax.f32 %v4787_v22, 0.0  ;;  %v4788_v23 = vadd.f32 %v22391_v59, %v4661_v33  ;;  %v26561_v22 = vld [vmem:[#allocation72_spill] sm:$0xff] }
 0x3a1   : > { %v4865_v6 = vmax.f32 %v4785_v19, 0.0  ;;  %v4786_v11 = vadd.f32 %v22391_v59, %v4655_v1  ;;  %v26563_v1 = vld [vmem:[#allocation13_spill] sm:$0xff] }
 0x3a2   : > { %4947 = vst [vmem:[#allocation2 + $0x1d0] sm:$0xff] %v4867_v14  ;;  %v4868_v43 = vmax.f32 %v4788_v23, 0.0  ;;  %17128 = vmatpush3.bf16.msra.mxu0 %v26559_v2  ;;  %18104 = vmatpush3.bf16.msra.mxu1 %v20625_v29  ;;  %v20628_v14 = vld [vmem:[%s25964_s3 + $0x2a8] sm:$0xff]  }
 0x3a3   : > { %4945 = vst [vmem:[#allocation2 + $0x1c0] sm:$0xff] %v4865_v6  ;;  %v4866_v35 = vmax.f32 %v4786_v11, 0.0  ;;  %v17047_v44 = vpop.f32.mrb[44].mxu0  ;;  %17137 = vmatprep.subr.bf16.mxu0 %v22199_v28  ;;  %v22736_v20 = vpack.c.bf16 %v4865_v6, %v4863_v53  ;;  %18105 = vmatprep.subr.bf16.mxu1 %v20626_v55  ;;  %v26562_v53 = vld [vmem:[#allocation73_spill] sm:$0xff] }
 0x3a4   : > { %4948 = vst [vmem:[#allocation2 + $0x1d8] sm:$0xff] %v4868_v43  ;;  %v4670_v32 = vmax.f32 %v26560_v10, %v17047_v44  ;;  %v4403_v54 = vpop.f32.mrb[45].mxu0  ;;  %v22771_v44 = vpack.c.bf16 %v22762_v15, %v22487_v4  ;;  %v26564_v10 = vld [vmem:[#allocation74_spill] sm:$0xff] }
 0x3a5   : > { %4946 = vst [vmem:[#allocation2 + $0x1c8] sm:$0xff] %v4866_v35  ;;  %v4664_v27 = vmax.f32 %v26561_v22, %v4403_v54  ;;  %v17048_v33 = vpop.f32.mrb[46].mxu0  ;;  %17130 = vmatmul.mubr.bf16.vlgmr.msra.gmra.mrb[72].mxu0 %v22733_v5  ;;  %18094 = vmatmul.mubr.bf16.gmra.mrb[20].mxu1 %v22736_v20  ;;  %v20629_v22 = vld [vmem:[%s25964_s3 + $0x2b0] sm:$0xff]  }
 0x3a6   : > { %v4791_v28 = vadd.f32 %v22391_v59, %v4670_v32  ;;  %v4673_v12 = vmax.f32 %v26562_v53, %v17048_v33  ;;  %v4406_v19 = vpop.f32.mrb[47].mxu0  ;;  %17133 = vmatprep.mubr.bf16.mxu0 %v22744_v0  ;;  %17138 = vmatpush3.bf16.msra.mxu0 %v22755_v34  ;;  %v26566_v53 = vld [vmem:[#allocation76_spill] sm:$0xff] }
 0x3a7   : > { %v4789_v13 = vadd.f32 %v22391_v59, %v4664_v27  ;;  %v4667_v2 = vmax.f32 %v26563_v1, %v4406_v19  ;;  %17139 = vmatprep.subr.bf16.mxu0 %v22526_v46  ;;  %18106 = vmatpush3.bf16.msra.mxu1 %v20626_v55  ;;  %v26565_v27 = vld [vmem:[#allocation75_spill] sm:$0xff]  ;;  %v26567_v1 = vld [vmem:[#allocation14_spill] sm:$0xff] }
 0x3a8   : > { %v4871_v29 = vmax.f32 %v4791_v28, 0.0  ;;  %v4792_v36 = vadd.f32 %v22391_v59, %v4673_v12  ;;  %18107 = vmatprep.subr.bf16.mxu1 %v20628_v14 }
 0x3a9   : > { %v4869_v23 = vmax.f32 %v4789_v13, 0.0  ;;  %v4790_v6 = vadd.f32 %v22391_v59, %v4667_v2 }
 0x3aa   : > { %4951 = vst [vmem:[#allocation2 + $0x1f0] sm:$0xff] %v4871_v29  ;;  %v4872_v11 = vmax.f32 %v4792_v36, 0.0  ;;  %17140 = vmatpush3.bf16.msra.mxu0 %v22526_v46 }
 0x3ab   : > { %4949 = vst [vmem:[#allocation2 + $0x1e0] sm:$0xff] %v4869_v23  ;;  %v4870_v43 = vmax.f32 %v4790_v6, 0.0  ;;  %v17051_v35 = vpop.f32.mrb[48].mxu0  ;;  %17141 = vmatprep.subr.bf16.mxu0 %v22542_v56  ;;  %18108 = vmatpush3.bf16.msra.mxu1 %v20628_v14  ;;  %v22774_v55 = vpack.c.bf16 %v4871_v29, %v4869_v23  ;;  %v20630_v23 = vld [vmem:[%s25964_s3 + $0x2b8] sm:$0xff]   ;;  %v22796_v6 = vld [vmem:[%s25964_s3 + $0x2c0] sm:$0xff]  }
 0x3ac   : > { %4952 = vst [vmem:[#allocation2 + $0x1f8] sm:$0xff] %v4872_v11  ;;  %v4682_v32 = vmax.f32 %v26564_v10, %v17051_v35  ;;  %v4419_v54 = vpop.f32.mrb[49].mxu0  ;;  %18109 = vmatprep.subr.bf16.mxu1 %v20629_v22 }
 0x3ad   : > { %4950 = vst [vmem:[#allocation2 + $0x1e8] sm:$0xff] %v4870_v43  ;;  %v4676_v33 = vmax.f32 %v26565_v27, %v4419_v54  ;;  %v17052_v28 = vpop.f32.mrb[50].mxu0  ;;  %17134 = vmatmul.mubr.bf16.gmra.mrb[76].mxu0 %v22771_v44 }
 0x3ae   : > { %v4795_v4 = vadd.f32 %v22391_v59, %v4682_v32  ;;  %v4685_v12 = vmax.f32 %v26566_v53, %v17052_v28  ;;  %v4422_v19 = vpop.f32.mrb[51].mxu0  ;;  %17142 = vmatpush3.bf16.msra.mxu0 %v22542_v56  ;;  %17153 = vmatprep.mubr.bf16.mxu0 %v22504_v31  ;;  %v26569_v28 = vld [vmem:[#allocation78_spill] sm:$0xff] }
 0x3af   : > { %v4793_v13 = vadd.f32 %v22391_v59, %v4676_v33  ;;  %v4679_v2 = vmax.f32 %v26567_v1, %v4422_v19  ;;  %17143 = vmatprep.subr.bf16.mxu0 %v22555_v57  ;;  %18110 = vmatpush3.bf16.msra.mxu1 %v20629_v22  ;;  %v26568_v22 = vld [vmem:[#allocation77_spill] sm:$0xff]  ;;  %v26570_v19 = vld [vmem:[#allocation79_spill] sm:$0xff] }
 0x3b0   : > { %v4875_v36 = vmax.f32 %v4795_v4, 0.0  ;;  %v4796_v14 = vadd.f32 %v22391_v59, %v4685_v12  ;;  %18111 = vmatprep.subr.bf16.mxu1 %v20630_v23 }
 0x3b1   : > { %v4873_v31 = vmax.f32 %v4793_v13, 0.0  ;;  %v4794_v11 = vadd.f32 %v22391_v59, %v4679_v2  ;;  %v26571_v2 = vld [vmem:[#allocation15_spill] sm:$0xff] }
 0x3b2   : > { %4955 = vst [vmem:[#allocation2 + $0x210] sm:$0xff] %v4875_v36  ;;  %v4876_v43 = vmax.f32 %v4796_v14, 0.0  ;;  %17144 = vmatpush3.bf16.msra.mxu0 %v22555_v57 }
 0x3b3   : > { %4953 = vst [vmem:[#allocation2 + $0x200] sm:$0xff] %v4873_v31  ;;  %v22800_v35 = vpack.c.bf16 %v4875_v36, %v4873_v31  ;;  %v4874_v10 = vmax.f32 %v4794_v11, 0.0  ;;  %v17055_v32 = vpop.f32.mrb[52].mxu0  ;;  %17145 = vmatprep.subr.bf16.mxu0 %v22571_v41  ;;  %v22803_v54 = vpack.c.bf16 %v4873_v31, %v4871_v29  ;;  %18112 = vmatpush3.bf16.msra.mxu1 %v20630_v23  ;;  %v22818_v31 = vld [vmem:[%s25963_s2] ss:$0 sm:$0xff] }
 0x3b4   : > { %4956 = vst [vmem:[#allocation2 + $0x218] sm:$0xff] %v4876_v43  ;;  %v4694_v27 = vmax.f32 %v26568_v22, %v17055_v32  ;;  %v4435_v33 = vpop.f32.mrb[53].mxu0  ;;  %18121 = vmatprep.subr.bf16.mxu1 %v22796_v6 }
 0x3b5   : > { %4954 = vst [vmem:[#allocation2 + $0x208] sm:$0xff] %v4874_v10  ;;  %v4688_v4 = vmax.f32 %v26569_v28, %v4435_v33  ;;  %v17056_v53 = vpop.f32.mrb[54].mxu0  ;;  %18113 = vmatprep.mubr.bf16.mxu1 %v22803_v54  ;;  %v22829_v33 = vld [vmem:[%s25964_s3 + $0x2c8] sm:$0xff]  }
 0x3b6   : > { %v4799_v12 = vadd.f32 %v22391_v59, %v4694_v27  ;;  %v4697_v13 = vmax.f32 %v26570_v19, %v17056_v53  ;;  %v4438_v1 = vpop.f32.mrb[55].mxu0  ;;  %17146 = vmatpush3.bf16.msra.mxu0 %v22571_v41  ;;  %v26573_v19 = vld [vmem:[#allocation81_spill] sm:$0xff] }
 0x3b7   : > { %v4797_v29 = vadd.f32 %v22391_v59, %v4688_v4  ;;  %v4691_v14 = vmax.f32 %v26571_v2, %v4438_v1  ;;  %17147 = vmatprep.subr.bf16.mxu0 %v22586_v63  ;;  %v26572_v4 = vld [vmem:[#allocation80_spill] sm:$0xff] }
 0x3b8   : > { %v4879_v23 = vmax.f32 %v4799_v12, 0.0  ;;  %v4800_v11 = vadd.f32 %v22818_v31, %v4697_v13 }
 0x3b9   : > { %v4877_v43 = vmax.f32 %v4797_v29, 0.0  ;;  %v4798_v10 = vadd.f32 %v22818_v31, %v4691_v14  ;;  %v26574_v29 = vld [vmem:[#allocation82_spill] sm:$0xff] }
 0x3ba   : > { %4959 = vst [vmem:[#allocation2 + $0x230] sm:$0xff] %v4879_v23  ;;  %v4880_v32 = vmax.f32 %v4800_v11, 0.0  ;;  %17148 = vmatpush3.bf16.msra.mxu0 %v22586_v63 }
 0x3bb   : > { %4957 = vst [vmem:[#allocation2 + $0x220] sm:$0xff] %v4877_v43  ;;  %v4878_v59 = vmax.f32 %v4798_v10, 0.0  ;;  %v17059_v22 = vpop.f32.mrb[56].mxu0  ;;  %17149 = vmatprep.subr.bf16.mxu0 %v22603_v61  ;;  %v22824_v27 = vpack.c.bf16 %v4877_v43, %v4875_v36  ;;  %v22831_v28 = vpack.c.bf16 %v4879_v23, %v4877_v43  ;;  %v26575_v43 = vld [vmem:[#allocation83_spill] sm:$0xff] }
 0x3bc   : > { %4960 = vst [vmem:[#allocation2 + $0x238] sm:$0xff] %v4880_v32  ;;  %v4706_v53 = vmax.f32 %v26572_v4, %v17059_v22  ;;  %v4451_v12 = vpop.f32.mrb[57].mxu0  ;;  %v22847_v32 = vld [vmem:[%s25964_s3 + $0x2d0] sm:$0xff]  }
 0x3bd   : > { %4958 = vst [vmem:[#allocation2 + $0x228] sm:$0xff] %v4878_v59  ;;  %v4700_v13 = vmax.f32 %v26573_v19, %v4451_v12  ;;  %v17060_v1 = vpop.f32.mrb[58].mxu0  ;;  %18114 = vmatmul.mubr.bf16.vlgmr.msra.gmra.mrb[24].mxu1 %v22824_v27 }
 0x3be   : > { %v4803_v36 = vadd.f32 %v22818_v31, %v4706_v53  ;;  %v4709_v2 = vmax.f32 %v26574_v29, %v17060_v1  ;;  %v4454_v14 = vpop.f32.mrb[59].mxu0  ;;  %17150 = vmatpush3.bf16.msra.mxu0 %v22603_v61  ;;  %18122 = vmatpush3.bf16.msra.mxu1 %v22796_v6  ;;  %v22856_v1 = vld [vmem:[%s25964_s3 + $0x40] sm:$0xff]  }
 0x3bf   : > { %v4801_v11 = vadd.f32 %v22818_v31, %v4700_v13  ;;  %v4703_v10 = vmax.f32 %v26575_v43, %v4454_v14  ;;  %17151 = vmatprep.subr.bf16.mxu0 %v22616_v52  ;;  %18123 = vmatprep.subr.bf16.mxu1 %v22829_v33 }
 0x3c0   : > { %v4883_v59 = vmax.f32 %v4803_v36, 0.0  ;;  %v4804_v22 = vadd.f32 %v22818_v31, %v4709_v2 }
 0x3c1   : > { %v4881_v4 = vmax.f32 %v4801_v11, 0.0  ;;  %v4802_v53 = vadd.f32 %v22818_v31, %v4703_v10  ;;  %v22868_v11 = vld [vmem:[%s25964_s3 + $0x2d8] sm:$0xff]  }
 0x3c2   : > { %4963 = vst [vmem:[#allocation2 + $0x250] sm:$0xff] %v4883_v59  ;;  %v4884_v12 = vmax.f32 %v4804_v22, 0.0  ;;  %17152 = vmatpush3.bf16.msra.mxu0 %v22616_v52  ;;  %18124 = vmatpush3.bf16.msra.mxu1 %v22829_v33 }
 0x3c3   : > { %4961 = vst [vmem:[#allocation2 + $0x240] sm:$0xff] %v4881_v4  ;;  %v4882_v19 = vmax.f32 %v4802_v53, 0.0  ;;  %v17063_v13 = vpop.f32.mrb[60].mxu0  ;;  %17161 = vmatprep.subr.bf16.mxu0 %v22856_v1  ;;  %18125 = vmatprep.subr.bf16.mxu1 %v22847_v32  ;;  %v22860_v36 = vpack.c.bf16 %v4881_v4, %v4879_v23  ;;  %v22862_v29 = vpack.c.bf16 %v4883_v59, %v4881_v4 }
 0x3c4   : > { %4964 = vst [vmem:[#allocation2 + $0x258] sm:$0xff] %v4884_v12  ;;  %v4718_v2 = vmax.f32 %v22371_v60, %v17063_v13  ;;  %v4467_v14 = vpop.f32.mrb[61].mxu0 }
 0x3c5   : > { %4962 = vst [vmem:[#allocation2 + $0x248] sm:$0xff] %v4882_v19  ;;  %v4712_v43 = vmax.f32 %v22376_v51, %v4467_v14  ;;  %v17064_v10 = vpop.f32.mrb[62].mxu0  ;;  %17154 = vmatmul.mubr.bf16.vlgmr.msra.gmra.mrb[72].mxu0 %v22519_v3  ;;  %18117 = vmatprep.mubr.bf16.mxu1 %v22860_v36  ;;  %v22883_v51 = vld [vmem:[%s25964_s3 + $0x48] sm:$0xff]  }
 0x3c6   : > { %v4807_v23 = vadd.f32 %v22818_v31, %v4718_v2  ;;  %v4721_v22 = vmax.f32 %v22381_v25, %v17064_v10  ;;  %v4470_v4 = vpop.f32.mrb[63].mxu0  ;;  %17157 = vmatprep.mubr.bf16.mxu0 %v22548_v45  ;;  %17162 = vmatpush3.bf16.msra.mxu0 %v22856_v1  ;;  %v22891_v45 = vld [vmem:[%s25964_s3 + $0x2e0] sm:$0xff]   ;;  %v22899_v2 = vld [vmem:[%s25964_s3 + $0x50] sm:$0xff]   ;;  %v22940_v10 = vld [vmem:[%s25964_s3 + $0x2f8] sm:$0xff]  }
 0x3c7   : > { %v4805_v60 = vadd.f32 %v22818_v31, %v4712_v43  ;;  %v4715_v53 = vmax.f32 %v22386_v62, %v4470_v4  ;;  %18126 = vmatpush3.bf16.msra.mxu1 %v22847_v32  ;;  %17163 = vmatprep.subr.bf16.mxu0 %v22883_v51  ;;  %v22933_v43 = vld [vmem:[%s25964_s3 + $0x60] sm:$0xff]   ;;  %v22967_v4 = vld [vmem:[%s25964_s3 + $0x78] sm:$0xff]  }
 0x3c8   : > { %v4887_v3 = vmax.f32 %v4807_v23, 0.0  ;;  %v4808_v25 = vadd.f32 %v22818_v31, %v4721_v22  ;;  %18127 = vmatprep.subr.bf16.mxu1 %v22868_v11  ;;  %v22947_v23 = vld [vmem:[%s25964_s3 + $0x68] sm:$0xff]   ;;  %v22956_v22 = vld [vmem:[%s25964_s3 + $0x70] sm:$0xff]  }
 0x3c9   : > { %v4885_v62 = vmax.f32 %v4805_v60, 0.0  ;;  %v4806_v12 = vadd.f32 %v22818_v31, %v4715_v53  ;;  %v22908_v31 = vld [vmem:[%s25964_s3 + $0x2e8] sm:$0xff]  }
 0x3ca   : > { %4967 = vst [vmem:[#allocation2 + $0x270] sm:$0xff] %v4887_v3  ;;  %v4888_v19 = vmax.f32 %v4808_v25, 0.0  ;;  %17164 = vmatpush3.bf16.msra.mxu0 %v22883_v51  ;;  %v7504_v60 = vld [vmem:[#allocation2 + $0x21] sm:$0xff]  ;;  %v5556_v3 = vld [vmem:[#allocation2 + $0x191] sm:$0xff] }
 0x3cb   : > { %4965 = vst [vmem:[#allocation2 + $0x260] sm:$0xff] %v4885_v62  ;;  %v4886_v13 = vmax.f32 %v4806_v12, 0.0  ;;  %18128 = vmatpush3.bf16.msra.mxu1 %v22868_v11  ;;  %17165 = vmatprep.subr.bf16.mxu0 %v22899_v2  ;;  %v22902_v14 = vpack.c.bf16 %v4885_v62, %v4883_v59  ;;  %v22919_v59 = vld [vmem:[%s25964_s3 + $0x58] sm:$0xff]   ;;  %v22979_v53 = vpack.c.bf16 %v7504_v60, %v22657_v42  ;;  %v5557_v12 = vld [vmem:[#allocation2 + $0x1a1] sm:$0xff] }
 0x3cc   : > { %4968 = vst [vmem:[#allocation2 + $0x278] sm:$0xff] %v4888_v19  ;;  %18129 = vmatprep.subr.bf16.mxu1 %v22891_v45  ;;  %v5552_v42 = vld [vmem:[#allocation2 + $0x151] sm:$0xff] }
 0x3cd   : > { %4966 = vst [vmem:[#allocation2 + $0x268] sm:$0xff] %v4886_v13  ;;  %17158 = vmatmul.mubr.bf16.gmra.mrb[76].mxu0 %v22579_v49  ;;  %18118 = vmatmul.mubr.bf16.gmra.mrb[28].mxu1 %v22902_v14  ;;  %v22926_v49 = vld [vmem:[%s25964_s3 + $0x2f0] sm:$0xff]   ;;  %26576 = vst [vmem:[#allocation84_spill] sm:$0xff] %v22979_v53  ;;  %v23153_v60 = vld [vmem:[%s25964_s3 + $0x318] sm:$0xff]  }
 0x3ce   : > { %17166 = vmatpush3.bf16.msra.mxu0 %v22899_v2  ;;  %17177 = vmatprep.mubr.bf16.mxu0 %v22774_v55  ;;  %v5558_v19 = vld [vmem:[#allocation2 + $0x1b1] sm:$0xff] }
 0x3cf   : > { %18130 = vmatpush3.bf16.msra.mxu1 %v22891_v45  ;;  %18137 = vmatprep.mubr.bf16.mxu1 %v22521_v9  ;;  %v23083_v13 = vpack.c.bf16 %v5558_v19, %v5557_v12 }
 0x3d0   : > { %17167 = vmatprep.subr.bf16.mxu0 %v22919_v59  ;;  %18131 = vmatprep.subr.bf16.mxu1 %v22908_v31 }
 0x3d1   : > { %26581 = vst [vmem:[#allocation19_spill] sm:$0xff] %v23083_v13 }
 0x3d2   : > { %17168 = vmatpush3.bf16.msra.mxu0 %v22919_v59 }
 0x3d3   : > { %18132 = vmatpush3.bf16.msra.mxu1 %v22908_v31  ;;  %17169 = vmatprep.subr.bf16.mxu0 %v22933_v43 }
 0x3d4   : > { %18133 = vmatprep.subr.bf16.mxu1 %v22926_v49 }
 0x3d6   : > { %17170 = vmatpush3.bf16.msra.mxu0 %v22933_v43 }
 0x3d7   : > { %18134 = vmatpush3.bf16.msra.mxu1 %v22926_v49  ;;  %17171 = vmatprep.subr.bf16.mxu0 %v22947_v23 }
 0x3d8   : > { %18135 = vmatprep.subr.bf16.mxu1 %v22940_v10 }
 0x3da   : > { %17172 = vmatpush3.bf16.msra.mxu0 %v22947_v23 }
 0x3db   : > { %18136 = vmatpush3.bf16.msra.mxu1 %v22940_v10  ;;  %17173 = vmatprep.subr.bf16.mxu0 %v22956_v22 }
 0x3dc   : > { %18145 = vmatprep.subr.bf16.mxu1 %v22796_v6 }
 0x3de   : > { %18138 = vmatmul.mubr.bf16.vlgmr.msra.gmra.mrb[0].mxu1 %v22550_v30  ;;  %17174 = vmatpush3.bf16.msra.mxu0 %v22956_v22 }
 0x3df   : > { %18141 = vmatprep.mubr.bf16.mxu1 %v22581_v21  ;;  %18146 = vmatpush3.bf16.msra.mxu1 %v22796_v6 }
 0x3e0   : > { %17175 = vmatprep.subr.bf16.mxu0 %v22967_v4  ;;  %18147 = vmatprep.subr.bf16.mxu1 %v22829_v33 }
 0x3e2   : > { %17176 = vmatpush3.bf16.msra.mxu0 %v22967_v4 }
 0x3e3   : > { %18148 = vmatpush3.bf16.msra.mxu1 %v22829_v33  ;;  %17185 = vmatprep.subr.bf16.mxu0 %v22755_v34 }
 0x3e4   : > { %18149 = vmatprep.subr.bf16.mxu1 %v22847_v32 }
 0x3e5   : > { %17178 = vmatmul.mubr.bf16.vlgmr.msra.gmra.mrb[80].mxu0 %v22800_v35 }
 0x3e6   : > { %18142 = vmatmul.mubr.bf16.gmra.mrb[4].mxu1 %v22611_v7  ;;  %17181 = vmatprep.mubr.bf16.mxu0 %v22831_v28 }
 0x3e7   : > { %17186 = vmatpush3.bf16.msra.mxu0 %v22755_v34  ;;  %18150 = vmatpush3.bf16.msra.mxu1 %v22847_v32 }
 0x3e8   : > { %18161 = vmatprep.mubr.bf16.mxu1 %v22979_v53  ;;  %17187 = vmatprep.subr.bf16.mxu0 %v22526_v46 }
 0x3e9   : > { %18151 = vmatprep.subr.bf16.mxu1 %v22868_v11 }
 0x3eb   : > { %17188 = vmatpush3.bf16.msra.mxu0 %v22526_v46  ;;  %18152 = vmatpush3.bf16.msra.mxu1 %v22868_v11  ;;  %v7505_v46 = vld [vmem:[#allocation2 + $0x31] sm:$0xff] }
 0x3ec   : > { %17189 = vmatprep.subr.bf16.mxu0 %v22542_v56  ;;  %18153 = vmatprep.subr.bf16.mxu1 %v22891_v45 }
 0x3ed   : > { %17182 = vmatmul.mubr.bf16.gmra.mrb[84].mxu0 %v22862_v29 }
 0x3ee   : > { %17201 = vmatprep.mubr.bf16.mxu0 %v22636_v58 }
 0x3ef   : > { %17190 = vmatpush3.bf16.msra.mxu0 %v22542_v56  ;;  %18154 = vmatpush3.bf16.msra.mxu1 %v22891_v45  ;;  %v23008_v56 = vpack.c.bf16 %v22730_v50, %v7505_v46  ;;  %v23171_v46 = vld [vmem:[%s25964_s3 + $0x320] sm:$0xff]  }
 0x3f0   : > { %17191 = vmatprep.subr.bf16.mxu0 %v22555_v57  ;;  %18155 = vmatprep.subr.bf16.mxu1 %v22908_v31 }
 0x3f1   : > { %26577 = vst [vmem:[#allocation17_spill] sm:$0xff] %v23008_v56 }
 0x3f3   : > { %17192 = vmatpush3.bf16.msra.mxu0 %v22555_v57  ;;  %18156 = vmatpush3.bf16.msra.mxu1 %v22908_v31  ;;  %v7510_v57 = vld [vmem:[#allocation2 + $0x81] sm:$0xff] }
 0x3f4   : > { %17193 = vmatprep.subr.bf16.mxu0 %v22571_v41  ;;  %18157 = vmatprep.subr.bf16.mxu1 %v22926_v49 }
 0x3f7   : > { %17194 = vmatpush3.bf16.msra.mxu0 %v22571_v41  ;;  %18158 = vmatpush3.bf16.msra.mxu1 %v22926_v49  ;;  %v23021_v41 = vpack.c.bf16 %v7510_v57, %v22762_v15  ;;  %v5554_v15 = vld [vmem:[#allocation2 + $0x171] sm:$0xff] }
 0x3f8   : > { %17195 = vmatprep.subr.bf16.mxu0 %v22586_v63  ;;  %18159 = vmatprep.subr.bf16.mxu1 %v22940_v10  ;;  %v23179_v57 = vld [vmem:[%s25964_s3 + $0x98] sm:$0xff]  }
 0x3f9   : > { %26578 = vst [vmem:[#allocation85_spill] sm:$0xff] %v23021_v41 }
 0x3fb   : > { %17196 = vmatpush3.bf16.msra.mxu0 %v22586_v63  ;;  %18160 = vmatpush3.bf16.msra.mxu1 %v22940_v10  ;;  %v5551_v63 = vld [vmem:[#allocation2 + $0x141] sm:$0xff] }
 0x3fc   : > { %17197 = vmatprep.subr.bf16.mxu0 %v22603_v61  ;;  %18169 = vmatprep.subr.bf16.mxu1 %v22796_v6  ;;  %v23036_v50 = vpack.c.bf16 %v5552_v42, %v5551_v63  ;;  %v23185_v63 = vld [vmem:[%s25964_s3 + $0x328] sm:$0xff]  }
 0x3fe   : > { %18162 = vmatmul.mubr.bf16.vlgmr.msra.gmra.mrb[8].mxu1 %v23008_v56 }
 0x3ff   : > { %17198 = vmatpush3.bf16.msra.mxu0 %v22603_v61  ;;  %18165 = vmatprep.mubr.bf16.mxu1 %v22493_v17 }
 0x400   : > { %18170 = vmatpush3.bf16.msra.mxu1 %v22796_v6  ;;  %17199 = vmatprep.subr.bf16.mxu0 %v22616_v52 }
 0x401   : > { %18171 = vmatprep.subr.bf16.mxu1 %v22829_v33 }
 0x403   : > { %17200 = vmatpush3.bf16.msra.mxu0 %v22616_v52 }
 0x404   : > { %18172 = vmatpush3.bf16.msra.mxu1 %v22829_v33  ;;  %17209 = vmatprep.subr.bf16.mxu0 %v22856_v1 }
 0x405   : > { %18173 = vmatprep.subr.bf16.mxu1 %v22847_v32 }
 0x406   : > { %17202 = vmatmul.mubr.bf16.vlgmr.msra.gmra.mrb[80].mxu0 %v22660_v24  ;;  %18166 = vmatmul.mubr.bf16.gmra.mrb[12].mxu1 %v23021_v41 }
 0x407   : > { %17205 = vmatprep.mubr.bf16.mxu0 %v22691_v48  ;;  %17210 = vmatpush3.bf16.msra.mxu0 %v22856_v1  ;;  %v5553_v1 = vld [vmem:[#allocation2 + $0x161] sm:$0xff] }
 0x408   : > { %18174 = vmatpush3.bf16.msra.mxu1 %v22847_v32  ;;  %18185 = vmatprep.mubr.bf16.mxu1 %v22803_v54  ;;  %v23063_v25 = vpack.c.bf16 %v5554_v15, %v5553_v1  ;;  %v23201_v15 = vld [vmem:[%s25964_s3 + $0x330] sm:$0xff]  }
 0x409   : > { %17211 = vmatprep.subr.bf16.mxu0 %v22883_v51  ;;  %18175 = vmatprep.subr.bf16.mxu1 %v22868_v11 }
 0x40a   : > { %26579 = vst [vmem:[#allocation18_spill] sm:$0xff] %v23063_v25 }
 0x40b   : > { %17212 = vmatpush3.bf16.msra.mxu0 %v22883_v51  ;;  %v5555_v51 = vld [vmem:[#allocation2 + $0x181] sm:$0xff] }
 0x40c   : > { %18176 = vmatpush3.bf16.msra.mxu1 %v22868_v11  ;;  %17213 = vmatprep.subr.bf16.mxu0 %v22899_v2  ;;  %v23068_v62 = vpack.c.bf16 %v5556_v3, %v5555_v51 }
 0x40d   : > { %18177 = vmatprep.subr.bf16.mxu1 %v22891_v45 }
 0x40e   : > { %17206 = vmatmul.mubr.bf16.gmra.mrb[84].mxu0 %v22714_v8  ;;  %26580 = vst [vmem:[#allocation86_spill] sm:$0xff] %v23068_v62 }
 0x40f   : > { %17214 = vmatpush3.bf16.msra.mxu0 %v22899_v2  ;;  %17225 = vmatprep.mubr.bf16.mxu0 %v23036_v50  ;;  %v23109_v2 = vld [vmem:[%s25964_s3 + $0x300] sm:$0xff]  }
 0x410   : > { %18178 = vmatpush3.bf16.msra.mxu1 %v22891_v45  ;;  %17215 = vmatprep.subr.bf16.mxu0 %v22919_v59 }
 0x411   : > { %18179 = vmatprep.subr.bf16.mxu1 %v22908_v31 }
 0x413   : > { %17216 = vmatpush3.bf16.msra.mxu0 %v22919_v59 }
 0x414   : > { %18180 = vmatpush3.bf16.msra.mxu1 %v22908_v31  ;;  %17217 = vmatprep.subr.bf16.mxu0 %v22933_v43 }
 0x415   : > { %18181 = vmatprep.subr.bf16.mxu1 %v22926_v49 }
 0x417   : > { %17218 = vmatpush3.bf16.msra.mxu0 %v22933_v43  ;;  %v23121_v43 = vld [vmem:[%s25964_s3 + $0x308] sm:$0xff]  }
 0x418   : > { %18182 = vmatpush3.bf16.msra.mxu1 %v22926_v49  ;;  %17219 = vmatprep.subr.bf16.mxu0 %v22947_v23 }
 0x419   : > { %18183 = vmatprep.subr.bf16.mxu1 %v22940_v10 }
 0x41b   : > { %17220 = vmatpush3.bf16.msra.mxu0 %v22947_v23  ;;  %v9369_v23 = vld [vmem:[#allocation2 + $0x1c1] sm:$0xff] }
 0x41c   : > { %18184 = vmatpush3.bf16.msra.mxu1 %v22940_v10  ;;  %17221 = vmatprep.subr.bf16.mxu0 %v22956_v22 }
 0x41d   : > { %18193 = vmatprep.subr.bf16.mxu1 %v22796_v6 }
 0x41f   : > { %18186 = vmatmul.mubr.bf16.vlgmr.msra.gmra.mrb[16].mxu1 %v22824_v27  ;;  %17222 = vmatpush3.bf16.msra.mxu0 %v22956_v22  ;;  %v23137_v22 = vld [vmem:[%s25964_s3 + $0x310] sm:$0xff]  }
 0x420   : > { %18189 = vmatprep.mubr.bf16.mxu1 %v22860_v36  ;;  %18194 = vmatpush3.bf16.msra.mxu1 %v22796_v6  ;;  %v23073_v6 = vpack.c.bf16 %v5553_v1, %v5552_v42  ;;  %v23195_v42 = vld [vmem:[%s25964_s3 + $0xa0] sm:$0xff]   ;;  %v23215_v1 = vld [vmem:[%s25964_s3 + $0x338] sm:$0xff]  }
 0x421   : > { %17223 = vmatprep.subr.bf16.mxu0 %v22967_v4  ;;  %18195 = vmatprep.subr.bf16.mxu1 %v22829_v33 }
 0x423   : > { %17224 = vmatpush3.bf16.msra.mxu0 %v22967_v4  ;;  %v23148_v4 = vld [vmem:[%s25964_s3 + $0x88] sm:$0xff]  }
 0x424   : > { %18196 = vmatpush3.bf16.msra.mxu1 %v22829_v33  ;;  %17233 = vmatprep.subr.bf16.mxu0 %v22755_v34  ;;  %v20640_v33 = vld [vmem:[%s25964_s3 + $0x8] sm:$0xff]  }
 0x425   : > { %18197 = vmatprep.subr.bf16.mxu1 %v22847_v32 }
 0x426   : > { %17226 = vmatmul.mubr.bf16.vlgmr.msra.gmra.mrb[88].mxu0 %v23063_v25 }
 0x427   : > { %18190 = vmatmul.mubr.bf16.gmra.mrb[20].mxu1 %v22902_v14  ;;  %17229 = vmatprep.mubr.bf16.mxu0 %v23068_v62 }
 0x428   : > { %17234 = vmatpush3.bf16.msra.mxu0 %v22755_v34  ;;  %18198 = vmatpush3.bf16.msra.mxu1 %v22847_v32  ;;  %v20641_v34 = vld [vmem:[%s25964_s3 + $0x10] sm:$0xff]   ;;  %v20642_v32 = vld [vmem:[%s25964_s3 + $0x18] sm:$0xff]  }
 0x429   : > { %18209 = vmatprep.mubr.bf16.mxu1 %v23073_v6  ;;  %17235 = vmatprep.subr.bf16.mxu0 %v20640_v33 }
 0x42a   : > { %18199 = vmatprep.subr.bf16.mxu1 %v22868_v11 }
 0x42c   : > { %17236 = vmatpush3.bf16.msra.mxu0 %v20640_v33  ;;  %18200 = vmatpush3.bf16.msra.mxu1 %v22868_v11  ;;  %v20643_v11 = vld [vmem:[%s25964_s3 + $0x20] sm:$0xff]  }
 0x42d   : > { %17237 = vmatprep.subr.bf16.mxu0 %v20641_v34  ;;  %18201 = vmatprep.subr.bf16.mxu1 %v22891_v45  ;;  %v7873_v33 = vld [vmem:[#allocation2 + $0xc1] sm:$0xff] }
 0x42e   : > { %17230 = vmatmul.mubr.bf16.gmra.mrb[92].mxu0 %v23083_v13 }
 0x42f   : > { %17249 = vmatprep.mubr.bf16.mxu0 %v22774_v55 }
 0x430   : > { %17238 = vmatpush3.bf16.msra.mxu0 %v20641_v34  ;;  %18202 = vmatpush3.bf16.msra.mxu1 %v22891_v45  ;;  %v20644_v45 = vld [vmem:[%s25964_s3 + $0x28] sm:$0xff]  }
 0x431   : > { %17239 = vmatprep.subr.bf16.mxu0 %v20642_v32  ;;  %18203 = vmatprep.subr.bf16.mxu1 %v22908_v31  ;;  %v5831_v34 = vld [vmem:[#allocation2 + $0xa1] sm:$0xff] }
 0x434   : > { %17240 = vmatpush3.bf16.msra.mxu0 %v20642_v32  ;;  %18204 = vmatpush3.bf16.msra.mxu1 %v22908_v31  ;;  %v9364_v31 = vld [vmem:[#allocation2 + $0x171] sm:$0xff] }
 0x435   : > { %17241 = vmatprep.subr.bf16.mxu0 %v20643_v11  ;;  %18205 = vmatprep.subr.bf16.mxu1 %v22926_v49  ;;  %v23113_v59 = vpack.c.bf16 %v5555_v51, %v9364_v31  ;;  %v23223_v51 = vld [vmem:[%s25964_s3 + $0xb0] sm:$0xff]  }
 0x436   : > { %v7874_v32 = vld [vmem:[#allocation2 + $0xd1] sm:$0xff] }
 0x437   : > { %26582 = vst [vmem:[#allocation87_spill] sm:$0xff] %v23113_v59 }
 0x438   : > { %17242 = vmatpush3.bf16.msra.mxu0 %v20643_v11  ;;  %18206 = vmatpush3.bf16.msra.mxu1 %v22926_v49  ;;  %v23116_v49 = vpack.c.bf16 %v5557_v12, %v5556_v3  ;;  %v23233_v3 = vld [vmem:[%s25964_s3 + $0xb8] sm:$0xff]  }
 0x439   : > { %17243 = vmatprep.subr.bf16.mxu0 %v20644_v45  ;;  %18207 = vmatprep.subr.bf16.mxu1 %v22940_v10  ;;  %v7872_v12 = vld [vmem:[#allocation2 + $0xb1] sm:$0xff] }
 0x43a   : > { %26583 = vst [vmem:[#allocation20_spill] sm:$0xff] %v23116_v49 }
 0x43c   : > { %17244 = vmatpush3.bf16.msra.mxu0 %v20644_v45  ;;  %18208 = vmatpush3.bf16.msra.mxu1 %v22940_v10  ;;  %v23131_v10 = vld [vmem:[%s25964_s3 + $0x80] sm:$0xff]   ;;  %v7876_v45 = vld [vmem:[#allocation2 + $0xf1] sm:$0xff] }
 0x43d   : > { %17245 = vmatprep.subr.bf16.mxu0 %v22603_v61  ;;  %18217 = vmatprep.subr.bf16.mxu1 %v23109_v2 }
 0x43f   : > { %18210 = vmatmul.mubr.bf16.vlgmr.msra.gmra.mrb[24].mxu1 %v23113_v59 }
 0x440   : > { %17246 = vmatpush3.bf16.msra.mxu0 %v22603_v61  ;;  %18213 = vmatprep.mubr.bf16.mxu1 %v23116_v49  ;;  %v23142_v61 = vpack.c.bf16 %v9369_v23, %v5558_v19  ;;  %v23248_v19 = vpack.c.bf16 %v7873_v33, %v7872_v12  ;;  %v5834_v23 = vld [vmem:[#allocation2 + $0xd1] sm:$0xff]  ;;  %v5833_v33 = vld [vmem:[#allocation2 + $0xc1] sm:$0xff] }
 0x441   : > { %18218 = vmatpush3.bf16.msra.mxu1 %v23109_v2  ;;  %17247 = vmatprep.subr.bf16.mxu0 %v22616_v52 }
 0x442   : > { %18219 = vmatprep.subr.bf16.mxu1 %v23121_v43  ;;  %26584 = vst [vmem:[#allocation88_spill] sm:$0xff] %v23142_v61  ;;  %26585 = vst [vmem:[#allocation21_spill] sm:$0xff] %v23248_v19 }
 0x444   : > { %17248 = vmatpush3.bf16.msra.mxu0 %v22616_v52  ;;  %v23164_v52 = vld [vmem:[%s25964_s3 + $0x90] sm:$0xff]  }
 0x445   : > { %18220 = vmatpush3.bf16.msra.mxu1 %v23121_v43  ;;  %17257 = vmatprep.subr.bf16.mxu0 %v23131_v10 }
 0x446   : > { %18221 = vmatprep.subr.bf16.mxu1 %v23137_v22 }
 0x447   : > { %17250 = vmatmul.mubr.bf16.vlgmr.msra.gmra.mrb[88].mxu0 %v22800_v35  ;;  %18214 = vmatmul.mubr.bf16.gmra.mrb[28].mxu1 %v23142_v61 }
 0x448   : > { %17253 = vmatprep.mubr.bf16.mxu0 %v22831_v28  ;;  %17258 = vmatpush3.bf16.msra.mxu0 %v23131_v10 }
 0x449   : > { %18222 = vmatpush3.bf16.msra.mxu1 %v23137_v22  ;;  %18233 = vmatprep.mubr.bf16.mxu1 %v22979_v53  ;;  %v6212_v53 = vld [vmem:[#allocation2 + $0x2] sm:$0xff] }
 0x44a   : > { %17259 = vmatprep.subr.bf16.mxu0 %v23148_v4  ;;  %18223 = vmatprep.subr.bf16.mxu1 %v23153_v60 }
 0x44c   : > { %17260 = vmatpush3.bf16.msra.mxu0 %v23148_v4 }
 0x44d   : > { %18224 = vmatpush3.bf16.msra.mxu1 %v23153_v60  ;;  %17261 = vmatprep.subr.bf16.mxu0 %v23164_v52 }
 0x44e   : > { %18225 = vmatprep.subr.bf16.mxu1 %v23171_v46 }
 0x44f   : > { %17254 = vmatmul.mubr.bf16.gmra.mrb[92].mxu0 %v22862_v29 }
 0x450   : > { %17262 = vmatpush3.bf16.msra.mxu0 %v23164_v52  ;;  %17273 = vmatprep.mubr.bf16.mxu0 %v22668_v47  ;;  %v23209_v47 = vld [vmem:[%s25964_s3 + $0xa8] sm:$0xff]  }
 0x451   : > { %18226 = vmatpush3.bf16.msra.mxu1 %v23171_v46  ;;  %17263 = vmatprep.subr.bf16.mxu0 %v23179_v57 }
 0x452   : > { %18227 = vmatprep.subr.bf16.mxu1 %v23185_v63 }
 0x454   : > { %17264 = vmatpush3.bf16.msra.mxu0 %v23179_v57 }
 0x455   : > { %18228 = vmatpush3.bf16.msra.mxu1 %v23185_v63  ;;  %17265 = vmatprep.subr.bf16.mxu0 %v23195_v42 }
 0x456   : > { %18229 = vmatprep.subr.bf16.mxu1 %v23201_v15 }
 0x458   : > { %17266 = vmatpush3.bf16.msra.mxu0 %v23195_v42 }
 0x459   : > { %18230 = vmatpush3.bf16.msra.mxu1 %v23201_v15  ;;  %17267 = vmatprep.subr.bf16.mxu0 %v23209_v47 }
 0x45a   : > { %18231 = vmatprep.subr.bf16.mxu1 %v23215_v1 }
 0x45c   : > { %17268 = vmatpush3.bf16.msra.mxu0 %v23209_v47 }
 0x45d   : > { %18232 = vmatpush3.bf16.msra.mxu1 %v23215_v1  ;;  %17269 = vmatprep.subr.bf16.mxu0 %v23223_v51 }
 0x45e   : > { %18241 = vmatprep.subr.bf16.mxu1 %v23109_v2 }
 0x460   : > { %18234 = vmatmul.mubr.bf16.vlgmr.msra.gmra.mrb[0].mxu1 %v23008_v56  ;;  %17270 = vmatpush3.bf16.msra.mxu0 %v23223_v51  ;;  %v8242_v56 = vld [vmem:[#allocation2 + $0x22] sm:$0xff] }
 0x461   : > { %18237 = vmatprep.mubr.bf16.mxu1 %v22493_v17  ;;  %18242 = vmatpush3.bf16.msra.mxu1 %v23109_v2 }
 0x462   : > { %17271 = vmatprep.subr.bf16.mxu0 %v23233_v3  ;;  %18243 = vmatprep.subr.bf16.mxu1 %v23121_v43 }
 0x464   : > { %17272 = vmatpush3.bf16.msra.mxu0 %v23233_v3 }
 0x465   : > { %18244 = vmatpush3.bf16.msra.mxu1 %v23121_v43  ;;  %17281 = vmatprep.subr.bf16.mxu0 %v23131_v10 }
 0x466   : > { %18245 = vmatprep.subr.bf16.mxu1 %v23137_v22 }
 0x467   : > { %17274 = vmatmul.mubr.bf16.vlgmr.msra.gmra.mrb[64].mxu0 %v22733_v5  ;;  %v23259_v5 = vpack.c.bf16 %v7872_v12, %v5831_v34  ;;  %v7879_v12 = vld [vmem:[#allocation2 + $0x121] sm:$0xff]  ;;  %v7878_v34 = vld [vmem:[#allocation2 + $0x111] sm:$0xff] }
 0x468   : > { %18238 = vmatmul.mubr.bf16.gmra.mrb[4].mxu1 %v23021_v41  ;;  %17277 = vmatprep.mubr.bf16.mxu0 %v22744_v0  ;;  %v7875_v0 = vld [vmem:[#allocation2 + $0xe1] sm:$0xff]  ;;  %v23294_v41 = vpack.c.bf16 %v7879_v12, %v7878_v34 }
 0x469   : > { %17282 = vmatpush3.bf16.msra.mxu0 %v23131_v10  ;;  %18246 = vmatpush3.bf16.msra.mxu1 %v23137_v22  ;;  %v23278_v11 = vpack.c.bf16 %v7875_v0, %v7874_v32  ;;  %v23290_v32 = vpack.c.bf16 %v5834_v23, %v5833_v33  ;;  %v23297_v17 = vpack.c.bf16 %v7876_v45, %v7875_v0  ;;  %v9737_v33 = vld [vmem:[#allocation2 + $0x251] sm:$0xff] }
 0x46a   : > { %18257 = vmatprep.mubr.bf16.mxu1 %v23248_v19  ;;  %17283 = vmatprep.subr.bf16.mxu0 %v23148_v4  ;;  %26588 = vst [vmem:[#allocation90_spill] sm:$0xff] %v23294_v41 }
 0x46b   : > { %18247 = vmatprep.subr.bf16.mxu1 %v23153_v60  ;;  %26586 = vst [vmem:[#allocation89_spill] sm:$0xff] %v23278_v11 }
 0x46d   : > { %17284 = vmatpush3.bf16.msra.mxu0 %v23148_v4  ;;  %18248 = vmatpush3.bf16.msra.mxu1 %v23153_v60 }
 0x46e   : > { %17285 = vmatprep.subr.bf16.mxu0 %v23164_v52  ;;  %18249 = vmatprep.subr.bf16.mxu1 %v23171_v46 }
 0x46f   : > { %17278 = vmatmul.mubr.bf16.gmra.mrb[68].mxu0 %v22771_v44  ;;  %v7877_v44 = vld [vmem:[#allocation2 + $0x101] sm:$0xff] }
 0x470   : > { %17297 = vmatprep.mubr.bf16.mxu0 %v23259_v5  ;;  %v23281_v31 = vpack.c.bf16 %v7877_v44, %v7876_v45  ;;  %v23309_v0 = vpack.c.bf16 %v7878_v34, %v7877_v44  ;;  %v9732_v44 = vld [vmem:[#allocation2 + $0x201] sm:$0xff]  ;;  %v9731_v45 = vld [vmem:[#allocation2 + $0x1f1] sm:$0xff] }
 0x471   : > { %17286 = vmatpush3.bf16.msra.mxu0 %v23164_v52  ;;  %18250 = vmatpush3.bf16.msra.mxu1 %v23171_v46 }
 0x472   : > { %17287 = vmatprep.subr.bf16.mxu0 %v23179_v57  ;;  %18251 = vmatprep.subr.bf16.mxu1 %v23185_v63  ;;  %26587 = vst [vmem:[#allocation22_spill] sm:$0xff] %v23281_v31 }
 0x475   : > { %17288 = vmatpush3.bf16.msra.mxu0 %v23179_v57  ;;  %18252 = vmatpush3.bf16.msra.mxu1 %v23185_v63 }
 0x476   : > { %17289 = vmatprep.subr.bf16.mxu0 %v23195_v42  ;;  %18253 = vmatprep.subr.bf16.mxu1 %v23201_v15 }
 0x479   : > { %17290 = vmatpush3.bf16.msra.mxu0 %v23195_v42  ;;  %18254 = vmatpush3.bf16.msra.mxu1 %v23201_v15 }
 0x47a   : > { %17291 = vmatprep.subr.bf16.mxu0 %v23209_v47  ;;  %18255 = vmatprep.subr.bf16.mxu1 %v23215_v1 }
 0x47d   : > { %17292 = vmatpush3.bf16.msra.mxu0 %v23209_v47  ;;  %18256 = vmatpush3.bf16.msra.mxu1 %v23215_v1 }
 0x47e   : > { %17293 = vmatprep.subr.bf16.mxu0 %v23223_v51  ;;  %18265 = vmatprep.subr.bf16.mxu1 %v23109_v2 }
 0x480   : > { %18258 = vmatmul.mubr.bf16.vlgmr.msra.gmra.mrb[8].mxu1 %v23278_v11 }
 0x481   : > { %17294 = vmatpush3.bf16.msra.mxu0 %v23223_v51  ;;  %18261 = vmatprep.mubr.bf16.mxu1 %v23281_v31 }
 0x482   : > { %18266 = vmatpush3.bf16.msra.mxu1 %v23109_v2  ;;  %17295 = vmatprep.subr.bf16.mxu0 %v23233_v3 }
 0x483   : > { %18267 = vmatprep.subr.bf16.mxu1 %v23121_v43 }
 0x485   : > { %17296 = vmatpush3.bf16.msra.mxu0 %v23233_v3 }
 0x486   : > { %18268 = vmatpush3.bf16.msra.mxu1 %v23121_v43  ;;  %17305 = vmatprep.subr.bf16.mxu0 %v23131_v10 }
 0x487   : > { %18269 = vmatprep.subr.bf16.mxu1 %v23137_v22 }
 0x488   : > { %17298 = vmatmul.mubr.bf16.vlgmr.msra.gmra.mrb[72].mxu0 %v23290_v32  ;;  %18262 = vmatmul.mubr.bf16.gmra.mrb[12].mxu1 %v23294_v41 }
 0x489   : > { %17301 = vmatprep.mubr.bf16.mxu0 %v23297_v17  ;;  %17306 = vmatpush3.bf16.msra.mxu0 %v23131_v10 }
 0x48a   : > { %18270 = vmatpush3.bf16.msra.mxu1 %v23137_v22  ;;  %18281 = vmatprep.mubr.bf16.mxu1 %v23073_v6 }
 0x48b   : > { %17307 = vmatprep.subr.bf16.mxu0 %v23148_v4  ;;  %18271 = vmatprep.subr.bf16.mxu1 %v23153_v60 }
 0x48d   : > { %17308 = vmatpush3.bf16.msra.mxu0 %v23148_v4 }
 0x48e   : > { %18272 = vmatpush3.bf16.msra.mxu1 %v23153_v60  ;;  %17309 = vmatprep.subr.bf16.mxu0 %v23164_v52 }
 0x48f   : > { %18273 = vmatprep.subr.bf16.mxu1 %v23171_v46 }
 0x490   : > { %17302 = vmatmul.mubr.bf16.gmra.mrb[76].mxu0 %v23309_v0 }
 0x491   : > { %17310 = vmatpush3.bf16.msra.mxu0 %v23164_v52  ;;  %17321 = vmatprep.mubr.bf16.mxu0 %v23036_v50 }
 0x492   : > { %18274 = vmatpush3.bf16.msra.mxu1 %v23171_v46  ;;  %17311 = vmatprep.subr.bf16.mxu0 %v23179_v57 }
 0x493   : > { %18275 = vmatprep.subr.bf16.mxu1 %v23185_v63 }
 0x495   : > { %17312 = vmatpush3.bf16.msra.mxu0 %v23179_v57 }
 0x496   : > { %18276 = vmatpush3.bf16.msra.mxu1 %v23185_v63  ;;  %17313 = vmatprep.subr.bf16.mxu0 %v23195_v42 }
 0x497   : > { %18277 = vmatprep.subr.bf16.mxu1 %v23201_v15 }
 0x499   : > { %17314 = vmatpush3.bf16.msra.mxu0 %v23195_v42 }
 0x49a   : > { %18278 = vmatpush3.bf16.msra.mxu1 %v23201_v15  ;;  %17315 = vmatprep.subr.bf16.mxu0 %v23209_v47 }
 0x49b   : > { %18279 = vmatprep.subr.bf16.mxu1 %v23215_v1 }
 0x49d   : > { %17316 = vmatpush3.bf16.msra.mxu0 %v23209_v47 }
 0x49e   : > { %18280 = vmatpush3.bf16.msra.mxu1 %v23215_v1  ;;  %17317 = vmatprep.subr.bf16.mxu0 %v23223_v51 }
 0x49f   : > { %18289 = vmatprep.subr.bf16.mxu1 %v23109_v2 }
 0x4a1   : > { %18282 = vmatmul.mubr.bf16.vlgmr.msra.gmra.mrb[16].mxu1 %v23113_v59  ;;  %17318 = vmatpush3.bf16.msra.mxu0 %v23223_v51 }
 0x4a2   : > { %18285 = vmatprep.mubr.bf16.mxu1 %v23116_v49  ;;  %18290 = vmatpush3.bf16.msra.mxu1 %v23109_v2  ;;  %v23344_v2 = vpack.c.bf16 %v9732_v44, %v9731_v45 }
 0x4a3   : > { %17319 = vmatprep.subr.bf16.mxu0 %v23233_v3  ;;  %18291 = vmatprep.subr.bf16.mxu1 %v23121_v43 }
 0x4a5   : > { %17320 = vmatpush3.bf16.msra.mxu0 %v23233_v3 }
 0x4a6   : > { %18292 = vmatpush3.bf16.msra.mxu1 %v23121_v43  ;;  %17329 = vmatprep.subr.bf16.mxu0 %v23131_v10  ;;  %v5989_v43 = vld [vmem:[#allocation2 + $0x1e1] sm:$0xff] }
 0x4a7   : > { %18293 = vmatprep.subr.bf16.mxu1 %v23137_v22  ;;  %v23355_v23 = vpack.c.bf16 %v9731_v45, %v5989_v43  ;;  %v23418_v45 = vld [vmem:[%s25964_s3 + $0xc8] sm:$0xff]   ;;  %v23434_v43 = vld [vmem:[%s25964_s3 + $0xd0] sm:$0xff]  }
 0x4a8   : > { %17322 = vmatmul.mubr.bf16.vlgmr.msra.gmra.mrb[80].mxu0 %v23063_v25 }
 0x4a9   : > { %18286 = vmatmul.mubr.bf16.gmra.mrb[20].mxu1 %v23142_v61  ;;  %17325 = vmatprep.mubr.bf16.mxu0 %v23068_v62  ;;  %v6214_v62 = vld [vmem:[#allocation2 + $0x22] sm:$0xff]  ;;  %v8247_v61 = vld [vmem:[#allocation2 + $0x72] sm:$0xff] }
 0x4aa   : > { %17330 = vmatpush3.bf16.msra.mxu0 %v23131_v10  ;;  %18294 = vmatpush3.bf16.msra.mxu1 %v23137_v22  ;;  %v23374_v10 = vld [vmem:[%s25964_s3 + $0x340] sm:$0xff]  }
 0x4ab   : > { %18305 = vmatprep.mubr.bf16.mxu1 %v23344_v2  ;;  %17331 = vmatprep.subr.bf16.mxu0 %v23148_v4  ;;  %v9734_v22 = vld [vmem:[#allocation2 + $0x221] sm:$0xff] }
 0x4ac   : > { %18295 = vmatprep.subr.bf16.mxu1 %v23153_v60 }
 0x4ae   : > { %17332 = vmatpush3.bf16.msra.mxu0 %v23148_v4  ;;  %18296 = vmatpush3.bf16.msra.mxu1 %v23153_v60  ;;  %v9736_v4 = vld [vmem:[#allocation2 + $0x241] sm:$0xff]  ;;  %v9733_v60 = vld [vmem:[#allocation2 + $0x211] sm:$0xff] }
 0x4af   : > { %17333 = vmatprep.subr.bf16.mxu0 %v23164_v52  ;;  %18297 = vmatprep.subr.bf16.mxu1 %v23171_v46 }
 0x4b0   : > { %17326 = vmatmul.mubr.bf16.gmra.mrb[84].mxu0 %v23083_v13  ;;  %v6215_v13 = vld [vmem:[#allocation2 + $0x32] sm:$0xff] }
 0x4b1   : > { %17345 = vmatprep.mubr.bf16.mxu0 %v23355_v23  ;;  %v23562_v25 = vpack.c.bf16 %v6215_v13, %v6214_v62  ;;  %v10101_v13 = vld [vmem:[#allocation2 + $0x162] sm:$0xff] }
 0x4b2   : > { %17334 = vmatpush3.bf16.msra.mxu0 %v23164_v52  ;;  %18298 = vmatpush3.bf16.msra.mxu1 %v23171_v46  ;;  %v23379_v52 = vpack.c.bf16 %v9734_v22, %v9733_v60  ;;  %v9735_v46 = vld [vmem:[#allocation2 + $0x231] sm:$0xff]  ;;  %v23445_v60 = vpack.c.bf16 %v9737_v33, %v9736_v4 }
 0x4b3   : > { %17335 = vmatprep.subr.bf16.mxu0 %v23179_v57  ;;  %18299 = vmatprep.subr.bf16.mxu1 %v23185_v63  ;;  %v23413_v44 = vpack.c.bf16 %v9735_v46, %v9734_v22  ;;  %v23441_v22 = vld [vmem:[%s25964_s3 + $0x360] sm:$0xff]  }
 0x4b4   : > { %26592 = vst [vmem:[#allocation92_spill] sm:$0xff] %v23445_v60 }
 0x4b5   : > { %26591 = vst [vmem:[#allocation24_spill] sm:$0xff] %v23413_v44 }
 0x4b6   : > { %17336 = vmatpush3.bf16.msra.mxu0 %v23179_v57  ;;  %18300 = vmatpush3.bf16.msra.mxu1 %v23185_v63  ;;  %v23382_v57 = vpack.c.bf16 %v9736_v4, %v9735_v46  ;;  %v23387_v63 = vld [vmem:[%s25964_s3 + $0x348] sm:$0xff]   ;;  %v23451_v46 = vld [vmem:[%s25964_s3 + $0xd8] sm:$0xff]   ;;  %v23467_v4 = vld [vmem:[%s25964_s3 + $0xe0] sm:$0xff]  }
 0x4b7   : > { %17337 = vmatprep.subr.bf16.mxu0 %v23195_v42  ;;  %18301 = vmatprep.subr.bf16.mxu1 %v23201_v15 }
 0x4ba   : > { %17338 = vmatpush3.bf16.msra.mxu0 %v23195_v42  ;;  %18302 = vmatpush3.bf16.msra.mxu1 %v23201_v15  ;;  %v5992_v42 = vld [vmem:[#allocation2 + $0x211] sm:$0xff]  ;;  %v23397_v15 = vld [vmem:[%s25964_s3 + $0xc0] sm:$0xff]  }
 0x4bb   : > { %17339 = vmatprep.subr.bf16.mxu0 %v23209_v47  ;;  %18303 = vmatprep.subr.bf16.mxu1 %v23215_v1 }
 0x4be   : > { %17340 = vmatpush3.bf16.msra.mxu0 %v23209_v47  ;;  %18304 = vmatpush3.bf16.msra.mxu1 %v23215_v1  ;;  %v5991_v47 = vld [vmem:[#allocation2 + $0x201] sm:$0xff] }
 0x4bf   : > { %17341 = vmatprep.subr.bf16.mxu0 %v23223_v51  ;;  %18313 = vmatprep.subr.bf16.mxu1 %v23374_v10  ;;  %v9738_v1 = vld [vmem:[#allocation2 + $0x261] sm:$0xff]  ;;  %v23406_v12 = vpack.c.bf16 %v5992_v42, %v5991_v47  ;;  %v23473_v47 = vld [vmem:[%s25964_s3 + $0x370] sm:$0xff]  }
 0x4c0   : > { %v23410_v34 = vpack.c.bf16 %v9738_v1, %v9737_v33  ;;  %v23457_v42 = vld [vmem:[%s25964_s3 + $0x368] sm:$0xff]   ;;  %v23487_v1 = vld [vmem:[%s25964_s3 + $0x378] sm:$0xff]   ;;  %v23495_v33 = vld [vmem:[%s25964_s3 + $0xf0] sm:$0xff]  }
 0x4c1   : > { %18306 = vmatmul.mubr.bf16.vlgmr.msra.gmra.mrb[24].mxu1 %v23379_v52  ;;  %26589 = vst [vmem:[#allocation23_spill] sm:$0xff] %v23406_v12 }
 0x4c2   : > { %17342 = vmatpush3.bf16.msra.mxu0 %v23223_v51  ;;  %18309 = vmatprep.mubr.bf16.mxu1 %v23382_v57  ;;  %v23403_v51 = vld [vmem:[%s25964_s3 + $0x350] sm:$0xff]   ;;  %26590 = vst [vmem:[#allocation91_spill] sm:$0xff] %v23410_v34 }
 0x4c3   : > { %18314 = vmatpush3.bf16.msra.mxu1 %v23374_v10  ;;  %17343 = vmatprep.subr.bf16.mxu0 %v23233_v3 }
 0x4c4   : > { %18315 = vmatprep.subr.bf16.mxu1 %v23387_v63 }
 0x4c6   : > { %17344 = vmatpush3.bf16.msra.mxu0 %v23233_v3  ;;  %v23423_v3 = vld [vmem:[%s25964_s3 + $0x358] sm:$0xff]  }
 0x4c7   : > { %18316 = vmatpush3.bf16.msra.mxu1 %v23387_v63  ;;  %17353 = vmatprep.subr.bf16.mxu0 %v23397_v15 }
 0x4c8   : > { %18317 = vmatprep.subr.bf16.mxu1 %v23403_v51 }
 0x4c9   : > { %17346 = vmatmul.mubr.bf16.vlgmr.msra.gmra.mrb[88].mxu0 %v23406_v12  ;;  %18310 = vmatmul.mubr.bf16.gmra.mrb[28].mxu1 %v23410_v34 }
 0x4ca   : > { %17349 = vmatprep.mubr.bf16.mxu0 %v23413_v44  ;;  %17354 = vmatpush3.bf16.msra.mxu0 %v23397_v15 }
 0x4cb   : > { %18318 = vmatpush3.bf16.msra.mxu1 %v23403_v51  ;;  %18329 = vmatprep.mubr.bf16.mxu1 %v23248_v19  ;;  %v23505_v19 = vld [vmem:[%s25964_s3 + $0xf8] sm:$0xff]  }
 0x4cc   : > { %17355 = vmatprep.subr.bf16.mxu0 %v23418_v45  ;;  %18319 = vmatprep.subr.bf16.mxu1 %v23423_v3 }
 0x4ce   : > { %17356 = vmatpush3.bf16.msra.mxu0 %v23418_v45 }
 0x4cf   : > { %18320 = vmatpush3.bf16.msra.mxu1 %v23423_v3  ;;  %17357 = vmatprep.subr.bf16.mxu0 %v23434_v43 }
 0x4d0   : > { %18321 = vmatprep.subr.bf16.mxu1 %v23441_v22 }
 0x4d1   : > { %17350 = vmatmul.mubr.bf16.gmra.mrb[92].mxu0 %v23445_v60 }
 0x4d2   : > { %17358 = vmatpush3.bf16.msra.mxu0 %v23434_v43  ;;  %17369 = vmatprep.mubr.bf16.mxu0 %v23259_v5  ;;  %v23481_v5 = vld [vmem:[%s25964_s3 + $0xe8] sm:$0xff]  }
 0x4d3   : > { %18322 = vmatpush3.bf16.msra.mxu1 %v23441_v22  ;;  %17359 = vmatprep.subr.bf16.mxu0 %v23451_v46 }
 0x4d4   : > { %18323 = vmatprep.subr.bf16.mxu1 %v23457_v42 }
 0x4d6   : > { %17360 = vmatpush3.bf16.msra.mxu0 %v23451_v46 }
 0x4d7   : > { %18324 = vmatpush3.bf16.msra.mxu1 %v23457_v42  ;;  %17361 = vmatprep.subr.bf16.mxu0 %v23467_v4 }
 0x4d8   : > { %18325 = vmatprep.subr.bf16.mxu1 %v23473_v47 }
 0x4da   : > { %17362 = vmatpush3.bf16.msra.mxu0 %v23467_v4 }
 0x4db   : > { %18326 = vmatpush3.bf16.msra.mxu1 %v23473_v47  ;;  %17363 = vmatprep.subr.bf16.mxu0 %v23481_v5 }
 0x4dc   : > { %18327 = vmatprep.subr.bf16.mxu1 %v23487_v1 }
 0x4de   : > { %17364 = vmatpush3.bf16.msra.mxu0 %v23481_v5 }
 0x4df   : > { %18328 = vmatpush3.bf16.msra.mxu1 %v23487_v1  ;;  %17365 = vmatprep.subr.bf16.mxu0 %v23495_v33 }
 0x4e0   : > { %18337 = vmatprep.subr.bf16.mxu1 %v23374_v10 }
 0x4e2   : > { %18330 = vmatmul.mubr.bf16.vlgmr.msra.gmra.mrb[0].mxu1 %v23278_v11  ;;  %17366 = vmatpush3.bf16.msra.mxu0 %v23495_v33  ;;  %v8241_v11 = vld [vmem:[#allocation2 + $0x12] sm:$0xff] }
 0x4e3   : > { %18333 = vmatprep.mubr.bf16.mxu1 %v23281_v31  ;;  %18338 = vmatpush3.bf16.msra.mxu1 %v23374_v10  ;;  %v23520_v31 = vpack.c.bf16 %v8242_v56, %v8241_v11  ;;  %v8246_v56 = vld [vmem:[#allocation2 + $0x62] sm:$0xff] }
 0x4e4   : > { %17367 = vmatprep.subr.bf16.mxu0 %v23505_v19  ;;  %18339 = vmatprep.subr.bf16.mxu1 %v23387_v63  ;;  %v23581_v62 = vpack.c.bf16 %v8247_v61, %v8246_v56 }
 0x4e5   : > { %26593 = vst [vmem:[#allocation25_spill] sm:$0xff] %v23520_v31 }
 0x4e6   : > { %17368 = vmatpush3.bf16.msra.mxu0 %v23505_v19 }
 0x4e7   : > { %18340 = vmatpush3.bf16.msra.mxu1 %v23387_v63  ;;  %17377 = vmatprep.subr.bf16.mxu0 %v23397_v15 }
 0x4e8   : > { %18341 = vmatprep.subr.bf16.mxu1 %v23403_v51 }
 0x4e9   : > { %17370 = vmatmul.mubr.bf16.vlgmr.msra.gmra.mrb[64].mxu0 %v23290_v32 }
 0x4ea   : > { %18334 = vmatmul.mubr.bf16.gmra.mrb[4].mxu1 %v23294_v41  ;;  %17373 = vmatprep.mubr.bf16.mxu0 %v23297_v17  ;;  %v23531_v17 = vpack.c.bf16 %v8241_v11, %v6212_v53  ;;  %v8244_v53 = vld [vmem:[#allocation2 + $0x42] sm:$0xff]  ;;  %v8243_v11 = vld [vmem:[#allocation2 + $0x32] sm:$0xff] }
 0x4eb   : > { %17378 = vmatpush3.bf16.msra.mxu0 %v23397_v15  ;;  %18342 = vmatpush3.bf16.msra.mxu1 %v23403_v51  ;;  %v23550_v32 = vpack.c.bf16 %v8244_v53, %v8243_v11  ;;  %v8248_v11 = vld [vmem:[#allocation2 + $0x82] sm:$0xff] }
 0x4ec   : > { %18353 = vmatprep.mubr.bf16.mxu1 %v23520_v31  ;;  %17379 = vmatprep.subr.bf16.mxu0 %v23418_v45  ;;  %v23566_v49 = vpack.c.bf16 %v8248_v11, %v8247_v61  ;;  %v10100_v61 = vld [vmem:[#allocation2 + $0x152] sm:$0xff] }
 0x4ed   : > { %18343 = vmatprep.subr.bf16.mxu1 %v23423_v3  ;;  %26594 = vst [vmem:[#allocation93_spill] sm:$0xff] %v23550_v32 }
 0x4ee   : > { %26596 = vst [vmem:[#allocation94_spill] sm:$0xff] %v23566_v49 }
 0x4ef   : > { %17380 = vmatpush3.bf16.msra.mxu0 %v23418_v45  ;;  %18344 = vmatpush3.bf16.msra.mxu1 %v23423_v3 }
 0x4f0   : > { %17381 = vmatprep.subr.bf16.mxu0 %v23434_v43  ;;  %18345 = vmatprep.subr.bf16.mxu1 %v23441_v22 }
 0x4f1   : > { %17374 = vmatmul.mubr.bf16.gmra.mrb[68].mxu0 %v23309_v0  ;;  %v8245_v0 = vld [vmem:[#allocation2 + $0x52] sm:$0xff] }
 0x4f2   : > { %17393 = vmatprep.mubr.bf16.mxu0 %v23531_v17  ;;  %v23553_v41 = vpack.c.bf16 %v8246_v56, %v8245_v0  ;;  %v23569_v59 = vpack.c.bf16 %v8245_v0, %v8244_v53  ;;  %v10106_v56 = vld [vmem:[#allocation2 + $0x1b2] sm:$0xff] }
 0x4f3   : > { %17382 = vmatpush3.bf16.msra.mxu0 %v23434_v43  ;;  %18346 = vmatpush3.bf16.msra.mxu1 %v23441_v22 }
 0x4f4   : > { %17383 = vmatprep.subr.bf16.mxu0 %v23451_v46  ;;  %18347 = vmatprep.subr.bf16.mxu1 %v23457_v42  ;;  %26595 = vst [vmem:[#allocation26_spill] sm:$0xff] %v23553_v41 }
 0x4f7   : > { %17384 = vmatpush3.bf16.msra.mxu0 %v23451_v46  ;;  %18348 = vmatpush3.bf16.msra.mxu1 %v23457_v42 }
 0x4f8   : > { %17385 = vmatprep.subr.bf16.mxu0 %v23467_v4  ;;  %18349 = vmatprep.subr.bf16.mxu1 %v23473_v47 }
 0x4fb   : > { %17386 = vmatpush3.bf16.msra.mxu0 %v23467_v4  ;;  %18350 = vmatpush3.bf16.msra.mxu1 %v23473_v47 }
 0x4fc   : > { %17387 = vmatprep.subr.bf16.mxu0 %v23481_v5  ;;  %18351 = vmatprep.subr.bf16.mxu1 %v23487_v1 }
 0x4ff   : > { %17388 = vmatpush3.bf16.msra.mxu0 %v23481_v5  ;;  %18352 = vmatpush3.bf16.msra.mxu1 %v23487_v1 }
 0x500   : > { %17389 = vmatprep.subr.bf16.mxu0 %v23495_v33  ;;  %18361 = vmatprep.subr.bf16.mxu1 %v23374_v10 }
 0x502   : > { %18354 = vmatmul.mubr.bf16.vlgmr.msra.gmra.mrb[8].mxu1 %v23550_v32 }
 0x503   : > { %17390 = vmatpush3.bf16.msra.mxu0 %v23495_v33  ;;  %18357 = vmatprep.mubr.bf16.mxu1 %v23553_v41 }
 0x504   : > { %18362 = vmatpush3.bf16.msra.mxu1 %v23374_v10  ;;  %17391 = vmatprep.subr.bf16.mxu0 %v23505_v19 }
 0x505   : > { %18363 = vmatprep.subr.bf16.mxu1 %v23387_v63 }
 0x507   : > { %17392 = vmatpush3.bf16.msra.mxu0 %v23505_v19 }
 0x508   : > { %18364 = vmatpush3.bf16.msra.mxu1 %v23387_v63  ;;  %17401 = vmatprep.subr.bf16.mxu0 %v23397_v15 }
 0x509   : > { %18365 = vmatprep.subr.bf16.mxu1 %v23403_v51 }
 0x50a   : > { %17394 = vmatmul.mubr.bf16.vlgmr.msra.gmra.mrb[72].mxu0 %v23562_v25  ;;  %18358 = vmatmul.mubr.bf16.gmra.mrb[12].mxu1 %v23566_v49 }
 0x50b   : > { %17397 = vmatprep.mubr.bf16.mxu0 %v23569_v59  ;;  %17402 = vmatpush3.bf16.msra.mxu0 %v23397_v15 }
 0x50c   : > { %18366 = vmatpush3.bf16.msra.mxu1 %v23403_v51  ;;  %18377 = vmatprep.mubr.bf16.mxu1 %v23344_v2 }
 0x50d   : > { %17403 = vmatprep.subr.bf16.mxu0 %v23418_v45  ;;  %18367 = vmatprep.subr.bf16.mxu1 %v23423_v3 }
 0x50f   : > { %17404 = vmatpush3.bf16.msra.mxu0 %v23418_v45 }
 0x510   : > { %18368 = vmatpush3.bf16.msra.mxu1 %v23423_v3  ;;  %17405 = vmatprep.subr.bf16.mxu0 %v23434_v43 }
 0x511   : > { %18369 = vmatprep.subr.bf16.mxu1 %v23441_v22 }
 0x512   : > { %17398 = vmatmul.mubr.bf16.gmra.mrb[76].mxu0 %v23581_v62 }
 0x513   : > { %17406 = vmatpush3.bf16.msra.mxu0 %v23434_v43  ;;  %17417 = vmatprep.mubr.bf16.mxu0 %v23355_v23 }
 0x514   : > { %18370 = vmatpush3.bf16.msra.mxu1 %v23441_v22  ;;  %17407 = vmatprep.subr.bf16.mxu0 %v23451_v46 }
 0x515   : > { %18371 = vmatprep.subr.bf16.mxu1 %v23457_v42 }
 0x517   : > { %17408 = vmatpush3.bf16.msra.mxu0 %v23451_v46 }
 0x518   : > { %18372 = vmatpush3.bf16.msra.mxu1 %v23457_v42  ;;  %17409 = vmatprep.subr.bf16.mxu0 %v23467_v4 }
 0x519   : > { %18373 = vmatprep.subr.bf16.mxu1 %v23473_v47 }
 0x51b   : > { %17410 = vmatpush3.bf16.msra.mxu0 %v23467_v4 }
 0x51c   : > { %18374 = vmatpush3.bf16.msra.mxu1 %v23473_v47  ;;  %17411 = vmatprep.subr.bf16.mxu0 %v23481_v5 }
 0x51d   : > { %18375 = vmatprep.subr.bf16.mxu1 %v23487_v1 }
 0x51f   : > { %17412 = vmatpush3.bf16.msra.mxu0 %v23481_v5 }
 0x520   : > { %18376 = vmatpush3.bf16.msra.mxu1 %v23487_v1  ;;  %17413 = vmatprep.subr.bf16.mxu0 %v23495_v33 }
 0x521   : > { %18385 = vmatprep.subr.bf16.mxu1 %v23374_v10 }
 0x523   : > { %18378 = vmatmul.mubr.bf16.vlgmr.msra.gmra.mrb[16].mxu1 %v23379_v52  ;;  %17414 = vmatpush3.bf16.msra.mxu0 %v23495_v33 }
 0x524   : > { %18381 = vmatprep.mubr.bf16.mxu1 %v23382_v57  ;;  %18386 = vmatpush3.bf16.msra.mxu1 %v23374_v10  ;;  %v23616_v10 = vpack.c.bf16 %v10101_v13, %v10100_v61 }
 0x525   : > { %17415 = vmatprep.subr.bf16.mxu0 %v23505_v19  ;;  %18387 = vmatprep.subr.bf16.mxu1 %v23387_v63 }
 0x527   : > { %17416 = vmatpush3.bf16.msra.mxu0 %v23505_v19 }
 0x528   : > { %18388 = vmatpush3.bf16.msra.mxu1 %v23387_v63  ;;  %17425 = vmatprep.subr.bf16.mxu0 %v23397_v15  ;;  %v6370_v63 = vld [vmem:[#allocation2 + $0x142] sm:$0xff] }
 0x529   : > { %18389 = vmatprep.subr.bf16.mxu1 %v23403_v51  ;;  %v23627_v53 = vpack.c.bf16 %v10100_v61, %v6370_v63  ;;  %v23690_v61 = vld [vmem:[%s25964_s3 + $0x108] sm:$0xff]   ;;  %v23706_v63 = vld [vmem:[%s25964_s3 + $0x110] sm:$0xff]  }
 0x52a   : > { %17418 = vmatmul.mubr.bf16.vlgmr.msra.gmra.mrb[80].mxu0 %v23406_v12 }
 0x52b   : > { %18382 = vmatmul.mubr.bf16.gmra.mrb[20].mxu1 %v23410_v34  ;;  %17421 = vmatprep.mubr.bf16.mxu0 %v23413_v44  ;;  %v6593_v44 = vld [vmem:[#allocation2 + $0xa2] sm:$0xff]  ;;  %v8616_v34 = vld [vmem:[#allocation2 + $0x112] sm:$0xff] }
 0x52c   : > { %17426 = vmatpush3.bf16.msra.mxu0 %v23397_v15  ;;  %18390 = vmatpush3.bf16.msra.mxu1 %v23403_v51  ;;  %v23646_v15 = vld [vmem:[%s25964_s3 + $0x380] sm:$0xff]  }
 0x52d   : > { %18401 = vmatprep.mubr.bf16.mxu1 %v23616_v10  ;;  %17427 = vmatprep.subr.bf16.mxu0 %v23418_v45  ;;  %v10103_v51 = vld [vmem:[#allocation2 + $0x182] sm:$0xff] }
 0x52e   : > { %18391 = vmatprep.subr.bf16.mxu1 %v23423_v3 }
 0x530   : > { %17428 = vmatpush3.bf16.msra.mxu0 %v23418_v45  ;;  %18392 = vmatpush3.bf16.msra.mxu1 %v23423_v3  ;;  %v10105_v45 = vld [vmem:[#allocation2 + $0x1a2] sm:$0xff]  ;;  %v10102_v3 = vld [vmem:[#allocation2 + $0x172] sm:$0xff] }
 0x531   : > { %17429 = vmatprep.subr.bf16.mxu0 %v23434_v43  ;;  %18393 = vmatprep.subr.bf16.mxu1 %v23441_v22 }
 0x532   : > { %17422 = vmatmul.mubr.bf16.gmra.mrb[84].mxu0 %v23445_v60  ;;  %v8611_v60 = vld [vmem:[#allocation2 + $0xc2] sm:$0xff] }
 0x533   : > { %17441 = vmatprep.mubr.bf16.mxu0 %v23627_v53 }
 0x534   : > { %17430 = vmatpush3.bf16.msra.mxu0 %v23434_v43  ;;  %18394 = vmatpush3.bf16.msra.mxu1 %v23441_v22  ;;  %v23651_v43 = vpack.c.bf16 %v10103_v51, %v10102_v3  ;;  %v10104_v22 = vld [vmem:[#allocation2 + $0x192] sm:$0xff]  ;;  %v23717_v3 = vpack.c.bf16 %v10106_v56, %v10105_v45 }
 0x535   : > { %17431 = vmatprep.subr.bf16.mxu0 %v23451_v46  ;;  %18395 = vmatprep.subr.bf16.mxu1 %v23457_v42  ;;  %v23685_v13 = vpack.c.bf16 %v10104_v22, %v10103_v51  ;;  %v23713_v51 = vld [vmem:[%s25964_s3 + $0x3a0] sm:$0xff]  }
 0x538   : > { %17432 = vmatpush3.bf16.msra.mxu0 %v23451_v46  ;;  %18396 = vmatpush3.bf16.msra.mxu1 %v23457_v42  ;;  %v23654_v46 = vpack.c.bf16 %v10105_v45, %v10104_v22  ;;  %v23659_v42 = vld [vmem:[%s25964_s3 + $0x388] sm:$0xff]   ;;  %v23723_v22 = vld [vmem:[%s25964_s3 + $0x118] sm:$0xff]   ;;  %v23739_v45 = vld [vmem:[%s25964_s3 + $0x120] sm:$0xff]  }
 0x539   : > { %17433 = vmatprep.subr.bf16.mxu0 %v23467_v4  ;;  %18397 = vmatprep.subr.bf16.mxu1 %v23473_v47 }
 0x53c   : > { %17434 = vmatpush3.bf16.msra.mxu0 %v23467_v4  ;;  %18398 = vmatpush3.bf16.msra.mxu1 %v23473_v47  ;;  %v6373_v4 = vld [vmem:[#allocation2 + $0x172] sm:$0xff]  ;;  %v23669_v47 = vld [vmem:[%s25964_s3 + $0x100] sm:$0xff]  }
 0x53d   : > { %17435 = vmatprep.subr.bf16.mxu0 %v23481_v5  ;;  %18399 = vmatprep.subr.bf16.mxu1 %v23487_v1 }
 0x540   : > { %17436 = vmatpush3.bf16.msra.mxu0 %v23481_v5  ;;  %18400 = vmatpush3.bf16.msra.mxu1 %v23487_v1  ;;  %v6372_v5 = vld [vmem:[#allocation2 + $0x162] sm:$0xff] }
 0x541   : > { %17437 = vmatprep.subr.bf16.mxu0 %v23495_v33  ;;  %18409 = vmatprep.subr.bf16.mxu1 %v23646_v15  ;;  %v10107_v1 = vld [vmem:[#allocation2 + $0x1c2] sm:$0xff]  ;;  %v23678_v0 = vpack.c.bf16 %v6373_v4, %v6372_v5  ;;  %v23745_v5 = vld [vmem:[%s25964_s3 + $0x3b0] sm:$0xff]  }
 0x542   : > { %v23682_v11 = vpack.c.bf16 %v10107_v1, %v10106_v56  ;;  %v23729_v4 = vld [vmem:[%s25964_s3 + $0x3a8] sm:$0xff]   ;;  %v23759_v1 = vld [vmem:[%s25964_s3 + $0x3b8] sm:$0xff]   ;;  %v23767_v56 = vld [vmem:[%s25964_s3 + $0x130] sm:$0xff]  }
 0x543   : > { %18402 = vmatmul.mubr.bf16.vlgmr.msra.gmra.mrb[24].mxu1 %v23651_v43 }
 0x544   : > { %17438 = vmatpush3.bf16.msra.mxu0 %v23495_v33  ;;  %18405 = vmatprep.mubr.bf16.mxu1 %v23654_v46  ;;  %v23675_v33 = vld [vmem:[%s25964_s3 + $0x390] sm:$0xff]  }
 0x545   : > { %18410 = vmatpush3.bf16.msra.mxu1 %v23646_v15  ;;  %17439 = vmatprep.subr.bf16.mxu0 %v23505_v19 }
 0x546   : > { %18411 = vmatprep.subr.bf16.mxu1 %v23659_v42 }
 0x548   : > { %17440 = vmatpush3.bf16.msra.mxu0 %v23505_v19  ;;  %v23695_v19 = vld [vmem:[%s25964_s3 + $0x398] sm:$0xff]  }
 0x549   : > { %18412 = vmatpush3.bf16.msra.mxu1 %v23659_v42  ;;  %17449 = vmatprep.subr.bf16.mxu0 %v23669_v47 }
 0x54a   : > { %18413 = vmatprep.subr.bf16.mxu1 %v23675_v33 }
 0x54b   : > { %17442 = vmatmul.mubr.bf16.vlgmr.msra.gmra.mrb[88].mxu0 %v23678_v0  ;;  %18406 = vmatmul.mubr.bf16.gmra.mrb[28].mxu1 %v23682_v11 }
 0x54c   : > { %17445 = vmatprep.mubr.bf16.mxu0 %v23685_v13  ;;  %17450 = vmatpush3.bf16.msra.mxu0 %v23669_v47 }
 0x54d   : > { %18414 = vmatpush3.bf16.msra.mxu1 %v23675_v33  ;;  %18425 = vmatprep.mubr.bf16.mxu1 %v23520_v31  ;;  %v23777_v31 = vld [vmem:[%s25964_s3 + $0x138] sm:$0xff]  }
 0x54e   : > { %17451 = vmatprep.subr.bf16.mxu0 %v23690_v61  ;;  %18415 = vmatprep.subr.bf16.mxu1 %v23695_v19 }
 0x550   : > { %17452 = vmatpush3.bf16.msra.mxu0 %v23690_v61 }
 0x551   : > { %18416 = vmatpush3.bf16.msra.mxu1 %v23695_v19  ;;  %17453 = vmatprep.subr.bf16.mxu0 %v23706_v63 }
 0x552   : > { %18417 = vmatprep.subr.bf16.mxu1 %v23713_v51 }
 0x553   : > { %17446 = vmatmul.mubr.bf16.gmra.mrb[92].mxu0 %v23717_v3 }
 0x554   : > { %17454 = vmatpush3.bf16.msra.mxu0 %v23706_v63  ;;  %17465 = vmatprep.mubr.bf16.mxu0 %v23531_v17  ;;  %v23753_v17 = vld [vmem:[%s25964_s3 + $0x128] sm:$0xff]  }
 0x555   : > { %18418 = vmatpush3.bf16.msra.mxu1 %v23713_v51  ;;  %17455 = vmatprep.subr.bf16.mxu0 %v23723_v22 }
 0x556   : > { %18419 = vmatprep.subr.bf16.mxu1 %v23729_v4 }
 0x558   : > { %17456 = vmatpush3.bf16.msra.mxu0 %v23723_v22 }
 0x559   : > { %18420 = vmatpush3.bf16.msra.mxu1 %v23729_v4  ;;  %17457 = vmatprep.subr.bf16.mxu0 %v23739_v45 }
 0x55a   : > { %18421 = vmatprep.subr.bf16.mxu1 %v23745_v5 }
 0x55c   : > { %17458 = vmatpush3.bf16.msra.mxu0 %v23739_v45 }
 0x55d   : > { %18422 = vmatpush3.bf16.msra.mxu1 %v23745_v5  ;;  %17459 = vmatprep.subr.bf16.mxu0 %v23753_v17 }
 0x55e   : > { %18423 = vmatprep.subr.bf16.mxu1 %v23759_v1 }
 0x560   : > { %17460 = vmatpush3.bf16.msra.mxu0 %v23753_v17 }
 0x561   : > { %18424 = vmatpush3.bf16.msra.mxu1 %v23759_v1  ;;  %17461 = vmatprep.subr.bf16.mxu0 %v23767_v56 }
 0x562   : > { %18433 = vmatprep.subr.bf16.mxu1 %v23646_v15 }
 0x564   : > { %18426 = vmatmul.mubr.bf16.vlgmr.msra.gmra.mrb[0].mxu1 %v23550_v32  ;;  %17462 = vmatpush3.bf16.msra.mxu0 %v23767_v56  ;;  %v8610_v32 = vld [vmem:[#allocation2 + $0xb2] sm:$0xff] }
 0x565   : > { %18429 = vmatprep.mubr.bf16.mxu1 %v23553_v41  ;;  %18434 = vmatpush3.bf16.msra.mxu1 %v23646_v15  ;;  %v23792_v41 = vpack.c.bf16 %v8611_v60, %v8610_v32  ;;  %v8612_v60 = vld [vmem:[#allocation2 + $0xd2] sm:$0xff] }
 0x566   : > { %17463 = vmatprep.subr.bf16.mxu0 %v23777_v31  ;;  %18435 = vmatprep.subr.bf16.mxu1 %v23659_v42 }
 0x567   : > { %26597 = vst [vmem:[#allocation27_spill] sm:$0xff] %v23792_v41 }
 0x568   : > { %17464 = vmatpush3.bf16.msra.mxu0 %v23777_v31 }
 0x569   : > { %18436 = vmatpush3.bf16.msra.mxu1 %v23659_v42  ;;  %17473 = vmatprep.subr.bf16.mxu0 %v23669_v47 }
 0x56a   : > { %18437 = vmatprep.subr.bf16.mxu1 %v23675_v33 }
 0x56b   : > { %17466 = vmatmul.mubr.bf16.vlgmr.msra.gmra.mrb[64].mxu0 %v23562_v25  ;;  %v6601_v25 = vpack.c.bf16 %v8610_v32, %v6593_v44  ;;  %v8615_v44 = vld [vmem:[#allocation2 + $0x102] sm:$0xff] }
 0x56c   : > { %18430 = vmatmul.mubr.bf16.gmra.mrb[4].mxu1 %v23566_v49  ;;  %17469 = vmatprep.mubr.bf16.mxu0 %v23569_v59  ;;  %v8613_v59 = vld [vmem:[#allocation2 + $0xe2] sm:$0xff] }
 0x56d   : > { %17474 = vmatpush3.bf16.msra.mxu0 %v23669_v47  ;;  %18438 = vmatpush3.bf16.msra.mxu1 %v23675_v33  ;;  %v23819_v32 = vpack.c.bf16 %v8613_v59, %v8612_v60  ;;  %v6595_v49 = vld [vmem:[#allocation2 + $0xc2] sm:$0xff] }
 0x56e   : > { %18449 = vmatprep.mubr.bf16.mxu1 %v23792_v41  ;;  %17475 = vmatprep.subr.bf16.mxu0 %v23690_v61  ;;  %v6596_v41 = vld [vmem:[#allocation2 + $0xd2] sm:$0xff]  ;;  %v8617_v60 = vld [vmem:[#allocation2 + $0x122] sm:$0xff] }
 0x56f   : > { %18439 = vmatprep.subr.bf16.mxu1 %v23695_v19  ;;  %26598 = vst [vmem:[#allocation95_spill] sm:$0xff] %v23819_v32  ;;  %v6602_v12 = vpack.c.bf16 %v6596_v41, %v6595_v49  ;;  %v6604_v41 = vpack.c.bf16 %v8616_v34, %v8615_v44  ;;  %v10470_v49 = vld [vmem:[#allocation2 + $0x202] sm:$0xff] }
 0x571   : > { %17476 = vmatpush3.bf16.msra.mxu0 %v23690_v61  ;;  %18440 = vmatpush3.bf16.msra.mxu1 %v23695_v19 }
 0x572   : > { %17477 = vmatprep.subr.bf16.mxu0 %v23706_v63  ;;  %18441 = vmatprep.subr.bf16.mxu1 %v23713_v51 }
 0x573   : > { %17470 = vmatmul.mubr.bf16.gmra.mrb[68].mxu0 %v23581_v62  ;;  %v8614_v62 = vld [vmem:[#allocation2 + $0xf2] sm:$0xff] }
 0x574   : > { %17489 = vmatprep.mubr.bf16.mxu0 %v6601_v25  ;;  %v23822_v25 = vpack.c.bf16 %v8615_v44, %v8614_v62 }
 0x575   : > { %17478 = vmatpush3.bf16.msra.mxu0 %v23706_v63  ;;  %18442 = vmatpush3.bf16.msra.mxu1 %v23713_v51 }
 0x576   : > { %17479 = vmatprep.subr.bf16.mxu0 %v23723_v22  ;;  %18443 = vmatprep.subr.bf16.mxu1 %v23729_v4  ;;  %26599 = vst [vmem:[#allocation28_spill] sm:$0xff] %v23822_v25 }
 0x579   : > { %17480 = vmatpush3.bf16.msra.mxu0 %v23723_v22  ;;  %18444 = vmatpush3.bf16.msra.mxu1 %v23729_v4 }
 0x57a   : > { %17481 = vmatprep.subr.bf16.mxu0 %v23739_v45  ;;  %18445 = vmatprep.subr.bf16.mxu1 %v23745_v5 }
 0x57d   : > { %17482 = vmatpush3.bf16.msra.mxu0 %v23739_v45  ;;  %18446 = vmatpush3.bf16.msra.mxu1 %v23745_v5 }
 0x57e   : > { %17483 = vmatprep.subr.bf16.mxu0 %v23753_v17  ;;  %18447 = vmatprep.subr.bf16.mxu1 %v23759_v1 }
 0x581   : > { %17484 = vmatpush3.bf16.msra.mxu0 %v23753_v17  ;;  %18448 = vmatpush3.bf16.msra.mxu1 %v23759_v1 }
 0x582   : > { %17485 = vmatprep.subr.bf16.mxu0 %v23767_v56  ;;  %18457 = vmatprep.subr.bf16.mxu1 %v23646_v15 }
 0x584   : > { %18450 = vmatmul.mubr.bf16.vlgmr.msra.gmra.mrb[8].mxu1 %v23819_v32  ;;  %v23833_v32 = vpack.c.bf16 %v8617_v60, %v8616_v34  ;;  %v23950_v60 = vld [vmem:[%s25964_s3 + $0x148] sm:$0xff]  }
 0x585   : > { %17486 = vmatpush3.bf16.msra.mxu0 %v23767_v56  ;;  %18453 = vmatprep.mubr.bf16.mxu1 %v23822_v25  ;;  %v6603_v25 = vpack.c.bf16 %v8614_v62, %v8613_v59  ;;  %v10475_v59 = vld [vmem:[#allocation2 + $0x252] sm:$0xff] }
 0x586   : > { %18458 = vmatpush3.bf16.msra.mxu1 %v23646_v15  ;;  %17487 = vmatprep.subr.bf16.mxu0 %v23777_v31 }
 0x587   : > { %18459 = vmatprep.subr.bf16.mxu1 %v23659_v42 }
 0x589   : > { %17488 = vmatpush3.bf16.msra.mxu0 %v23777_v31 }
 0x58a   : > { %18460 = vmatpush3.bf16.msra.mxu1 %v23659_v42  ;;  %17497 = vmatprep.subr.bf16.mxu0 %v23669_v47 }
 0x58b   : > { %18461 = vmatprep.subr.bf16.mxu1 %v23675_v33 }
 0x58c   : > { %17490 = vmatmul.mubr.bf16.vlgmr.msra.gmra.mrb[72].mxu0 %v6602_v12  ;;  %18454 = vmatmul.mubr.bf16.gmra.mrb[12].mxu1 %v23833_v32  ;;  %v10469_v12 = vld [vmem:[#allocation2 + $0x1f2] sm:$0xff] }
 0x58d   : > { %17493 = vmatprep.mubr.bf16.mxu0 %v6603_v25  ;;  %17498 = vmatpush3.bf16.msra.mxu0 %v23669_v47  ;;  %v23876_v34 = vpack.c.bf16 %v10470_v49, %v10469_v12  ;;  %v23973_v49 = vld [vmem:[%s25964_s3 + $0x3e0] sm:$0xff]  }
 0x58e   : > { %18462 = vmatpush3.bf16.msra.mxu1 %v23675_v33  ;;  %18473 = vmatprep.mubr.bf16.mxu1 %v23616_v10 }
 0x58f   : > { %17499 = vmatprep.subr.bf16.mxu0 %v23690_v61  ;;  %18463 = vmatprep.subr.bf16.mxu1 %v23695_v19 }
 0x591   : > { %17500 = vmatpush3.bf16.msra.mxu0 %v23690_v61 }
 0x592   : > { %18464 = vmatpush3.bf16.msra.mxu1 %v23695_v19  ;;  %17501 = vmatprep.subr.bf16.mxu0 %v23706_v63 }
 0x593   : > { %18465 = vmatprep.subr.bf16.mxu1 %v23713_v51 }
 0x594   : > { %17494 = vmatmul.mubr.bf16.gmra.mrb[76].mxu0 %v6604_v41  ;;  %v23966_v41 = vld [vmem:[%s25964_s3 + $0x150] sm:$0xff]  }
 0x595   : > { %17502 = vmatpush3.bf16.msra.mxu0 %v23706_v63  ;;  %17513 = vmatprep.mubr.bf16.mxu0 %v23627_v53 }
 0x596   : > { %18466 = vmatpush3.bf16.msra.mxu1 %v23713_v51  ;;  %17503 = vmatprep.subr.bf16.mxu0 %v23723_v22 }
 0x597   : > { %18467 = vmatprep.subr.bf16.mxu1 %v23729_v4 }
 0x599   : > { %17504 = vmatpush3.bf16.msra.mxu0 %v23723_v22 }
 0x59a   : > { %18468 = vmatpush3.bf16.msra.mxu1 %v23729_v4  ;;  %17505 = vmatprep.subr.bf16.mxu0 %v23739_v45 }
 0x59b   : > { %18469 = vmatprep.subr.bf16.mxu1 %v23745_v5 }
 0x59d   : > { %17506 = vmatpush3.bf16.msra.mxu0 %v23739_v45 }
 0x59e   : > { %18470 = vmatpush3.bf16.msra.mxu1 %v23745_v5  ;;  %17507 = vmatprep.subr.bf16.mxu0 %v23753_v17 }
 0x59f   : > { %18471 = vmatprep.subr.bf16.mxu1 %v23759_v1 }
 0x5a1   : > { %17508 = vmatpush3.bf16.msra.mxu0 %v23753_v17 }
 0x5a2   : > { %18472 = vmatpush3.bf16.msra.mxu1 %v23759_v1  ;;  %17509 = vmatprep.subr.bf16.mxu0 %v23767_v56 }
 0x5a3   : > { %18481 = vmatprep.subr.bf16.mxu1 %v23646_v15 }
 0x5a5   : > { %18474 = vmatmul.mubr.bf16.vlgmr.msra.gmra.mrb[16].mxu1 %v23651_v43  ;;  %17510 = vmatpush3.bf16.msra.mxu0 %v23767_v56 }
 0x5a6   : > { %18477 = vmatprep.mubr.bf16.mxu1 %v23654_v46  ;;  %18482 = vmatpush3.bf16.msra.mxu1 %v23646_v15  ;;  %v6751_v15 = vld [vmem:[#allocation2 + $0x1e2] sm:$0xff] }
 0x5a7   : > { %17511 = vmatprep.subr.bf16.mxu0 %v23777_v31  ;;  %18483 = vmatprep.subr.bf16.mxu1 %v23659_v42 }
 0x5a9   : > { %17512 = vmatpush3.bf16.msra.mxu0 %v23777_v31 }
 0x5aa   : > { %18484 = vmatpush3.bf16.msra.mxu1 %v23659_v42  ;;  %17521 = vmatprep.subr.bf16.mxu0 %v23669_v47  ;;  %v23887_v42 = vpack.c.bf16 %v10469_v12, %v6751_v15  ;;  %v23989_v15 = vld [vmem:[%s25964_s3 + $0x3e8] sm:$0xff]  }
 0x5ab   : > { %18485 = vmatprep.subr.bf16.mxu1 %v23675_v33 }
 0x5ac   : > { %17514 = vmatmul.mubr.bf16.vlgmr.msra.gmra.mrb[80].mxu0 %v23678_v0 }
 0x5ad   : > { %18478 = vmatmul.mubr.bf16.gmra.mrb[20].mxu1 %v23682_v11  ;;  %17517 = vmatprep.mubr.bf16.mxu0 %v23685_v13 }
 0x5ae   : > { %17522 = vmatpush3.bf16.msra.mxu0 %v23669_v47  ;;  %18486 = vmatpush3.bf16.msra.mxu1 %v23675_v33  ;;  %v23906_v47 = vld [vmem:[%s25964_s3 + $0x3c0] sm:$0xff]  }
 0x5af   : > { %18497 = vmatprep.mubr.bf16.mxu1 %v23876_v34  ;;  %17523 = vmatprep.subr.bf16.mxu0 %v23690_v61  ;;  %v10472_v33 = vld [vmem:[#allocation2 + $0x222] sm:$0xff] }
 0x5b0   : > { %18487 = vmatprep.subr.bf16.mxu1 %v23695_v19 }
 0x5b2   : > { %17524 = vmatpush3.bf16.msra.mxu0 %v23690_v61  ;;  %18488 = vmatpush3.bf16.msra.mxu1 %v23695_v19  ;;  %v10474_v61 = vld [vmem:[#allocation2 + $0x242] sm:$0xff]  ;;  %v10471_v19 = vld [vmem:[#allocation2 + $0x212] sm:$0xff] }
 0x5b3   : > { %17525 = vmatprep.subr.bf16.mxu0 %v23706_v63  ;;  %18489 = vmatprep.subr.bf16.mxu1 %v23713_v51  ;;  %v23977_v12 = vpack.c.bf16 %v10475_v59, %v10474_v61 }
 0x5b4   : > { %17518 = vmatmul.mubr.bf16.gmra.mrb[84].mxu0 %v23717_v3 }
 0x5b5   : > { %17537 = vmatprep.mubr.bf16.mxu0 %v23887_v42 }
 0x5b6   : > { %17526 = vmatpush3.bf16.msra.mxu0 %v23706_v63  ;;  %18490 = vmatpush3.bf16.msra.mxu1 %v23713_v51  ;;  %v23911_v63 = vpack.c.bf16 %v10472_v33, %v10471_v19  ;;  %v10473_v51 = vld [vmem:[#allocation2 + $0x232] sm:$0xff] }
 0x5b7   : > { %17527 = vmatprep.subr.bf16.mxu0 %v23723_v22  ;;  %18491 = vmatprep.subr.bf16.mxu1 %v23729_v4  ;;  %v23945_v25 = vpack.c.bf16 %v10473_v51, %v10472_v33  ;;  %v23999_v33 = vld [vmem:[%s25964_s3 + $0x160] sm:$0xff]   ;;  %v24019_v19 = vld [vmem:[%s25964_s3 + $0x3f8] sm:$0xff]  }
 0x5ba   : > { %17528 = vmatpush3.bf16.msra.mxu0 %v23723_v22  ;;  %18492 = vmatpush3.bf16.msra.mxu1 %v23729_v4  ;;  %v23914_v22 = vpack.c.bf16 %v10474_v61, %v10473_v51  ;;  %v23919_v4 = vld [vmem:[%s25964_s3 + $0x3c8] sm:$0xff]   ;;  %v24005_v61 = vld [vmem:[%s25964_s3 + $0x3f0] sm:$0xff]  }
 0x5bb   : > { %17529 = vmatprep.subr.bf16.mxu0 %v23739_v45  ;;  %18493 = vmatprep.subr.bf16.mxu1 %v23745_v5  ;;  %v24027_v51 = vld [vmem:[%s25964_s3 + $0x170] sm:$0xff]  }
 0x5be   : > { %17530 = vmatpush3.bf16.msra.mxu0 %v23739_v45  ;;  %18494 = vmatpush3.bf16.msra.mxu1 %v23745_v5  ;;  %v6754_v45 = vld [vmem:[#allocation2 + $0x212] sm:$0xff]  ;;  %v23929_v5 = vld [vmem:[%s25964_s3 + $0x140] sm:$0xff]  }
 0x5bf   : > { %17531 = vmatprep.subr.bf16.mxu0 %v23753_v17  ;;  %18495 = vmatprep.subr.bf16.mxu1 %v23759_v1 }
 0x5c2   : > { %17532 = vmatpush3.bf16.msra.mxu0 %v23753_v17  ;;  %18496 = vmatpush3.bf16.msra.mxu1 %v23759_v1  ;;  %v6753_v17 = vld [vmem:[#allocation2 + $0x202] sm:$0xff] }
 0x5c3   : > { %17533 = vmatprep.subr.bf16.mxu0 %v23767_v56  ;;  %18505 = vmatprep.subr.bf16.mxu1 %v23906_v47  ;;  %v10476_v1 = vld [vmem:[#allocation2 + $0x262] sm:$0xff]  ;;  %v23938_v44 = vpack.c.bf16 %v6754_v45, %v6753_v17  ;;  %v24037_v45 = vld [vmem:[%s25964_s3 + $0x178] sm:$0xff]  }
 0x5c4   : > { %v23942_v62 = vpack.c.bf16 %v10476_v1, %v10475_v59  ;;  %v10772_v59 = vld [vmem:[#allocation2 + $0x80] sm:$0xff] }
 0x5c5   : > { %18498 = vmatmul.mubr.bf16.vlgmr.msra.gmra.mrb[24].mxu1 %v23911_v63 }
 0x5c6   : > { %17534 = vmatpush3.bf16.msra.mxu0 %v23767_v56  ;;  %18501 = vmatprep.mubr.bf16.mxu1 %v23914_v22  ;;  %v23935_v56 = vld [vmem:[%s25964_s3 + $0x3d0] sm:$0xff]  }
 0x5c7   : > { %18506 = vmatpush3.bf16.msra.mxu1 %v23906_v47  ;;  %17535 = vmatprep.subr.bf16.mxu0 %v23777_v31 }
 0x5c8   : > { %18507 = vmatprep.subr.bf16.mxu1 %v23919_v4 }
 0x5ca   : > { %17536 = vmatpush3.bf16.msra.mxu0 %v23777_v31  ;;  %v23955_v31 = vld [vmem:[%s25964_s3 + $0x3d8] sm:$0xff]  }
 0x5cb   : > { %18508 = vmatpush3.bf16.msra.mxu1 %v23919_v4  ;;  %17545 = vmatprep.subr.bf16.mxu0 %v23929_v5 }
 0x5cc   : > { %18509 = vmatprep.subr.bf16.mxu1 %v23935_v56 }
 0x5cd   : > { %17538 = vmatmul.mubr.bf16.vlgmr.msra.gmra.mrb[88].mxu0 %v23938_v44  ;;  %18502 = vmatmul.mubr.bf16.gmra.mrb[28].mxu1 %v23942_v62 }
 0x5ce   : > { %17541 = vmatprep.mubr.bf16.mxu0 %v23945_v25  ;;  %17546 = vmatpush3.bf16.msra.mxu0 %v23929_v5 }
 0x5cf   : > { %18510 = vmatpush3.bf16.msra.mxu1 %v23935_v56  ;;  %18521 = vmatprep.mubr.bf16.mxu1 %v22663_v18  ;;  %v23983_v18 = vld [vmem:[%s25964_s3 + $0x158] sm:$0xff]  }
 0x5d0   : > { %17547 = vmatprep.subr.bf16.mxu0 %v23950_v60  ;;  %18511 = vmatprep.subr.bf16.mxu1 %v23955_v31 }
 0x5d2   : > { %17548 = vmatpush3.bf16.msra.mxu0 %v23950_v60 }
 0x5d3   : > { %18512 = vmatpush3.bf16.msra.mxu1 %v23955_v31  ;;  %17549 = vmatprep.subr.bf16.mxu0 %v23966_v41 }
 0x5d4   : > { %18513 = vmatprep.subr.bf16.mxu1 %v23973_v49 }
 0x5d5   : > { %17542 = vmatmul.mubr.bf16.gmra.mrb[92].mxu0 %v23977_v12 }
 0x5d6   : > { %17550 = vmatpush3.bf16.msra.mxu0 %v23966_v41  ;;  %17561 = vmatprep.mubr.bf16.mxu0 %v22636_v58  ;;  %v24013_v58 = vld [vmem:[%s25964_s3 + $0x168] sm:$0xff]  }
 0x5d7   : > { %18514 = vmatpush3.bf16.msra.mxu1 %v23973_v49  ;;  %17551 = vmatprep.subr.bf16.mxu0 %v23983_v18 }
 0x5d8   : > { %18515 = vmatprep.subr.bf16.mxu1 %v23989_v15 }
 0x5da   : > { %17552 = vmatpush3.bf16.msra.mxu0 %v23983_v18 }
 0x5db   : > { %18516 = vmatpush3.bf16.msra.mxu1 %v23989_v15  ;;  %17553 = vmatprep.subr.bf16.mxu0 %v23999_v33 }
 0x5dc   : > { %18517 = vmatprep.subr.bf16.mxu1 %v24005_v61 }
 0x5de   : > { %17554 = vmatpush3.bf16.msra.mxu0 %v23999_v33 }
 0x5df   : > { %18518 = vmatpush3.bf16.msra.mxu1 %v24005_v61  ;;  %17555 = vmatprep.subr.bf16.mxu0 %v24013_v58 }
 0x5e0   : > { %18519 = vmatprep.subr.bf16.mxu1 %v24019_v19 }
 0x5e2   : > { %17556 = vmatpush3.bf16.msra.mxu0 %v24013_v58 }
 0x5e3   : > { %18520 = vmatpush3.bf16.msra.mxu1 %v24019_v19  ;;  %17557 = vmatprep.subr.bf16.mxu0 %v24027_v51 }
 0x5e4   : > { %18529 = vmatprep.subr.bf16.mxu1 %v23906_v47 }
 0x5e6   : > { %18522 = vmatmul.mubr.bf16.vlgmr.msra.gmra.mrb[0].mxu1 %v22689_v39  ;;  %17558 = vmatpush3.bf16.msra.mxu0 %v24027_v51  ;;  %v10767_v39 = vld [vmem:[#allocation2 + $0x30] sm:$0xff] }
 0x5e7   : > { %18525 = vmatprep.mubr.bf16.mxu1 %v22709_v38  ;;  %18530 = vmatpush3.bf16.msra.mxu1 %v23906_v47  ;;  %v10769_v38 = vld [vmem:[#allocation2 + $0x50] sm:$0xff] }
 0x5e8   : > { %17559 = vmatprep.subr.bf16.mxu0 %v24037_v45  ;;  %18531 = vmatprep.subr.bf16.mxu1 %v23919_v4 }
 0x5ea   : > { %17560 = vmatpush3.bf16.msra.mxu0 %v24037_v45 }
 0x5eb   : > { %18532 = vmatpush3.bf16.msra.mxu1 %v23919_v4  ;;  %17569 = vmatprep.subr.bf16.mxu0 %v23929_v5 }
 0x5ec   : > { %18533 = vmatprep.subr.bf16.mxu1 %v23935_v56 }
 0x5ed   : > { %17562 = vmatmul.mubr.bf16.vlgmr.msra.gmra.mrb[64].mxu0 %v22660_v24  ;;  %v10766_v24 = vld [vmem:[#allocation2 + $0x20] sm:$0xff] }
 0x5ee   : > { %18526 = vmatmul.mubr.bf16.gmra.mrb[4].mxu1 %v22736_v20  ;;  %17565 = vmatprep.mubr.bf16.mxu0 %v22691_v48  ;;  %v24091_v48 = vpack.c.bf16 %v10767_v39, %v10766_v24  ;;  %v10771_v20 = vld [vmem:[#allocation2 + $0x70] sm:$0xff]  ;;  %v10852_v39 = vld [vmem:[#allocation2 + $0xc0] sm:$0xff] }
 0x5ef   : > { %17570 = vmatpush3.bf16.msra.mxu0 %v23929_v5  ;;  %18534 = vmatpush3.bf16.msra.mxu1 %v23935_v56  ;;  %v10773_v24 = vld [vmem:[#allocation2 + $0x90] sm:$0xff] }
 0x5f0   : > { %18545 = vmatprep.mubr.bf16.mxu1 %v22803_v54  ;;  %17571 = vmatprep.subr.bf16.mxu0 %v23950_v60 }
 0x5f1   : > { %18535 = vmatprep.subr.bf16.mxu1 %v23955_v31 }
 0x5f3   : > { %17572 = vmatpush3.bf16.msra.mxu0 %v23950_v60  ;;  %18536 = vmatpush3.bf16.msra.mxu1 %v23955_v31 }
 0x5f4   : > { %17573 = vmatprep.subr.bf16.mxu0 %v23966_v41  ;;  %18537 = vmatprep.subr.bf16.mxu1 %v23973_v49 }
 0x5f5   : > { %17566 = vmatmul.mubr.bf16.gmra.mrb[68].mxu0 %v22714_v8  ;;  %v10770_v8 = vld [vmem:[#allocation2 + $0x60] sm:$0xff] }
 0x5f6   : > { %17585 = vmatprep.mubr.bf16.mxu0 %v22774_v55  ;;  %v24123_v1 = vpack.c.bf16 %v10771_v20, %v10770_v8  ;;  %v24255_v8 = vld [vmem:[%s25964_s3 + $0x1a0] sm:$0xff]   ;;  %v24261_v20 = vld [vmem:[%s25964_s3 + $0x430] sm:$0xff]  }
 0x5f7   : > { %17574 = vmatpush3.bf16.msra.mxu0 %v23966_v41  ;;  %18538 = vmatpush3.bf16.msra.mxu1 %v23973_v49 }
 0x5f8   : > { %17575 = vmatprep.subr.bf16.mxu0 %v23983_v18  ;;  %18539 = vmatprep.subr.bf16.mxu1 %v23989_v15 }
 0x5fb   : > { %17576 = vmatpush3.bf16.msra.mxu0 %v23983_v18  ;;  %18540 = vmatpush3.bf16.msra.mxu1 %v23989_v15 }
 0x5fc   : > { %17577 = vmatprep.subr.bf16.mxu0 %v23999_v33  ;;  %18541 = vmatprep.subr.bf16.mxu1 %v24005_v61 }
 0x5ff   : > { %17578 = vmatpush3.bf16.msra.mxu0 %v23999_v33  ;;  %18542 = vmatpush3.bf16.msra.mxu1 %v24005_v61 }
 0x600   : > { %17579 = vmatprep.subr.bf16.mxu0 %v24013_v58  ;;  %18543 = vmatprep.subr.bf16.mxu1 %v24019_v19 }
 0x603   : > { %17580 = vmatpush3.bf16.msra.mxu0 %v24013_v58  ;;  %18544 = vmatpush3.bf16.msra.mxu1 %v24019_v19 }
 0x604   : > { %17581 = vmatprep.subr.bf16.mxu0 %v24027_v51  ;;  %18553 = vmatprep.subr.bf16.mxu1 %v23906_v47 }
 0x606   : > { %18546 = vmatmul.mubr.bf16.vlgmr.msra.gmra.mrb[8].mxu1 %v22824_v27 }
 0x607   : > { %17582 = vmatpush3.bf16.msra.mxu0 %v24027_v51  ;;  %18549 = vmatprep.mubr.bf16.mxu1 %v22860_v36 }
 0x608   : > { %18554 = vmatpush3.bf16.msra.mxu1 %v23906_v47  ;;  %17583 = vmatprep.subr.bf16.mxu0 %v24037_v45 }
 0x609   : > { %18555 = vmatprep.subr.bf16.mxu1 %v23919_v4 }
 0x60b   : > { %17584 = vmatpush3.bf16.msra.mxu0 %v24037_v45 }
 0x60c   : > { %18556 = vmatpush3.bf16.msra.mxu1 %v23919_v4  ;;  %17593 = vmatprep.subr.bf16.mxu0 %v23929_v5 }
 0x60d   : > { %18557 = vmatprep.subr.bf16.mxu1 %v23935_v56 }
 0x60e   : > { %17586 = vmatmul.mubr.bf16.vlgmr.msra.gmra.mrb[72].mxu0 %v22800_v35  ;;  %18550 = vmatmul.mubr.bf16.gmra.mrb[12].mxu1 %v22902_v14 }
 0x60f   : > { %17589 = vmatprep.mubr.bf16.mxu0 %v22831_v28  ;;  %17594 = vmatpush3.bf16.msra.mxu0 %v23929_v5 }
 0x610   : > { %18558 = vmatpush3.bf16.msra.mxu1 %v23935_v56  ;;  %18569 = vmatprep.mubr.bf16.mxu1 %v24091_v48 }
 0x611   : > { %17595 = vmatprep.subr.bf16.mxu0 %v23950_v60  ;;  %18559 = vmatprep.subr.bf16.mxu1 %v23955_v31 }
 0x613   : > { %17596 = vmatpush3.bf16.msra.mxu0 %v23950_v60 }
 0x614   : > { %18560 = vmatpush3.bf16.msra.mxu1 %v23955_v31  ;;  %17597 = vmatprep.subr.bf16.mxu0 %v23966_v41 }
 0x615   : > { %18561 = vmatprep.subr.bf16.mxu1 %v23973_v49 }
 0x616   : > { %17590 = vmatmul.mubr.bf16.gmra.mrb[76].mxu0 %v22862_v29 }
 0x617   : > { %17598 = vmatpush3.bf16.msra.mxu0 %v23966_v41  ;;  %17609 = vmatprep.mubr.bf16.mxu0 %v22420_v26  ;;  %v10768_v26 = vld [vmem:[#allocation2 + $0x40] sm:$0xff] }
 0x618   : > { %18562 = vmatpush3.bf16.msra.mxu1 %v23973_v49  ;;  %17599 = vmatprep.subr.bf16.mxu0 %v23983_v18  ;;  %v24120_v17 = vpack.c.bf16 %v10769_v38, %v10768_v26  ;;  %v10853_v26 = vld [vmem:[#allocation2 + $0xd0] sm:$0xff]  ;;  %v24134_v38 = vpack.c.bf16 %v10773_v24, %v10772_v59  ;;  %v24275_v59 = vld [vmem:[%s25964_s3 + $0x438] sm:$0xff]  }
 0x619   : > { %18563 = vmatprep.subr.bf16.mxu1 %v23989_v15  ;;  %v24283_v24 = vld [vmem:[%s25964_s3 + $0x1b0] sm:$0xff]  }
 0x61b   : > { %17600 = vmatpush3.bf16.msra.mxu0 %v23983_v18 }
 0x61c   : > { %18564 = vmatpush3.bf16.msra.mxu1 %v23989_v15  ;;  %17601 = vmatprep.subr.bf16.mxu0 %v23999_v33 }
 0x61d   : > { %18565 = vmatprep.subr.bf16.mxu1 %v24005_v61 }
 0x61f   : > { %17602 = vmatpush3.bf16.msra.mxu0 %v23999_v33 }
 0x620   : > { %18566 = vmatpush3.bf16.msra.mxu1 %v24005_v61  ;;  %17603 = vmatprep.subr.bf16.mxu0 %v24013_v58 }
 0x621   : > { %18567 = vmatprep.subr.bf16.mxu1 %v24019_v19 }
 0x623   : > { %17604 = vmatpush3.bf16.msra.mxu0 %v24013_v58 }
 0x624   : > { %18568 = vmatpush3.bf16.msra.mxu1 %v24019_v19  ;;  %17605 = vmatprep.subr.bf16.mxu0 %v24027_v51 }
 0x625   : > { %18577 = vmatprep.subr.bf16.mxu1 %v23906_v47 }
 0x627   : > { %18570 = vmatmul.mubr.bf16.vlgmr.msra.gmra.mrb[16].mxu1 %v24120_v17  ;;  %17606 = vmatpush3.bf16.msra.mxu0 %v24027_v51 }
 0x628   : > { %18573 = vmatprep.mubr.bf16.mxu1 %v24123_v1  ;;  %18578 = vmatpush3.bf16.msra.mxu1 %v23906_v47  ;;  %v24140_v47 = vpack.c.bf16 %v10853_v26, %v10852_v39  ;;  %v24293_v39 = vld [vmem:[%s25964_s3 + $0x1b8] sm:$0xff]  }
 0x629   : > { %17607 = vmatprep.subr.bf16.mxu0 %v24037_v45  ;;  %18579 = vmatprep.subr.bf16.mxu1 %v23919_v4  ;;  %v11222_v26 = vld [vmem:[#allocation2 + $0x31] sm:$0xff] }
 0x62b   : > { %17608 = vmatpush3.bf16.msra.mxu0 %v24037_v45 }
 0x62c   : > { %18580 = vmatpush3.bf16.msra.mxu1 %v23919_v4  ;;  %17617 = vmatprep.subr.bf16.mxu0 %v23929_v5  ;;  %v10856_v4 = vld [vmem:[#allocation2 + $0x100] sm:$0xff] }
 0x62d   : > { %18581 = vmatprep.subr.bf16.mxu1 %v23935_v56 }
 0x62e   : > { %17610 = vmatmul.mubr.bf16.vlgmr.msra.gmra.mrb[80].mxu0 %v22439_v16  ;;  %v24168_v16 = vld [vmem:[%s25964_s3 + $0x400] sm:$0xff]  }
 0x62f   : > { %18574 = vmatmul.mubr.bf16.gmra.mrb[20].mxu1 %v24134_v38  ;;  %17613 = vmatprep.mubr.bf16.mxu0 %v22463_v37  ;;  %v10854_v37 = vld [vmem:[#allocation2 + $0xe0] sm:$0xff] }
 0x630   : > { %17618 = vmatpush3.bf16.msra.mxu0 %v23929_v5  ;;  %18582 = vmatpush3.bf16.msra.mxu1 %v23935_v56  ;;  %v10857_v5 = vld [vmem:[#allocation2 + $0x110] sm:$0xff] }
 0x631   : > { %18593 = vmatprep.mubr.bf16.mxu1 %v24140_v47  ;;  %17619 = vmatprep.subr.bf16.mxu0 %v23950_v60 }
 0x632   : > { %18583 = vmatprep.subr.bf16.mxu1 %v23955_v31 }
 0x634   : > { %17620 = vmatpush3.bf16.msra.mxu0 %v23950_v60  ;;  %18584 = vmatpush3.bf16.msra.mxu1 %v23955_v31  ;;  %v24176_v60 = vpack.c.bf16 %v10857_v5, %v10856_v4  ;;  %v24181_v31 = vld [vmem:[%s25964_s3 + $0x408] sm:$0xff]   ;;  %v11226_v4 = vld [vmem:[#allocation2 + $0x71] sm:$0xff] }
 0x635   : > { %17621 = vmatprep.subr.bf16.mxu0 %v23966_v41  ;;  %18585 = vmatprep.subr.bf16.mxu1 %v23973_v49 }
 0x636   : > { %17614 = vmatmul.mubr.bf16.gmra.mrb[84].mxu0 %v22481_v40  ;;  %v10855_v40 = vld [vmem:[#allocation2 + $0xf0] sm:$0xff] }
 0x637   : > { %17633 = vmatprep.mubr.bf16.mxu0 %v22521_v9  ;;  %v24173_v56 = vpack.c.bf16 %v10855_v40, %v10854_v37  ;;  %v11224_v37 = vld [vmem:[#allocation2 + $0x51] sm:$0xff]  ;;  %v11225_v40 = vld [vmem:[#allocation2 + $0x61] sm:$0xff] }
 0x638   : > { %17622 = vmatpush3.bf16.msra.mxu0 %v23966_v41  ;;  %18586 = vmatpush3.bf16.msra.mxu1 %v23973_v49  ;;  %v24191_v41 = vld [vmem:[%s25964_s3 + $0x180] sm:$0xff]  }
 0x639   : > { %17623 = vmatprep.subr.bf16.mxu0 %v23983_v18  ;;  %18587 = vmatprep.subr.bf16.mxu1 %v23989_v15  ;;  %v10858_v49 = vld [vmem:[#allocation2 + $0x120] sm:$0xff] }
 0x63c   : > { %17624 = vmatpush3.bf16.msra.mxu0 %v23983_v18  ;;  %18588 = vmatpush3.bf16.msra.mxu1 %v23989_v15  ;;  %v10859_v18 = vld [vmem:[#allocation2 + $0x130] sm:$0xff] }
 0x63d   : > { %17625 = vmatprep.subr.bf16.mxu0 %v23999_v33  ;;  %18589 = vmatprep.subr.bf16.mxu1 %v24005_v61  ;;  %v24197_v15 = vld [vmem:[%s25964_s3 + $0x410] sm:$0xff]  }
 0x640   : > { %17626 = vmatpush3.bf16.msra.mxu0 %v23999_v33  ;;  %18590 = vmatpush3.bf16.msra.mxu1 %v24005_v61  ;;  %v24202_v33 = vpack.c.bf16 %v10859_v18, %v10858_v49  ;;  %v24208_v61 = vld [vmem:[%s25964_s3 + $0x188] sm:$0xff]   ;;  %v24439_v49 = vld [vmem:[%s25964_s3 + $0x1c0] sm:$0xff]  }
 0x641   : > { %17627 = vmatprep.subr.bf16.mxu0 %v24013_v58  ;;  %18591 = vmatprep.subr.bf16.mxu1 %v24019_v19  ;;  %v11227_v18 = vld [vmem:[#allocation2 + $0x81] sm:$0xff] }
 0x644   : > { %17628 = vmatpush3.bf16.msra.mxu0 %v24013_v58  ;;  %18592 = vmatpush3.bf16.msra.mxu1 %v24019_v19  ;;  %v24213_v58 = vld [vmem:[%s25964_s3 + $0x418] sm:$0xff]   ;;  %v24224_v19 = vld [vmem:[%s25964_s3 + $0x190] sm:$0xff]  }
 0x645   : > { %17629 = vmatprep.subr.bf16.mxu0 %v24027_v51  ;;  %18601 = vmatprep.subr.bf16.mxu1 %v24168_v16 }
 0x647   : > { %18594 = vmatmul.mubr.bf16.vlgmr.msra.gmra.mrb[24].mxu1 %v24173_v56 }
 0x648   : > { %17630 = vmatpush3.bf16.msra.mxu0 %v24027_v51  ;;  %18597 = vmatprep.mubr.bf16.mxu1 %v24176_v60  ;;  %v24231_v51 = vld [vmem:[%s25964_s3 + $0x420] sm:$0xff]  }
 0x649   : > { %18602 = vmatpush3.bf16.msra.mxu1 %v24168_v16  ;;  %17631 = vmatprep.subr.bf16.mxu0 %v24037_v45 }
 0x64a   : > { %18603 = vmatprep.subr.bf16.mxu1 %v24181_v31 }
 0x64c   : > { %17632 = vmatpush3.bf16.msra.mxu0 %v24037_v45  ;;  %v24245_v45 = vld [vmem:[%s25964_s3 + $0x428] sm:$0xff]  }
 0x64d   : > { %18604 = vmatpush3.bf16.msra.mxu1 %v24181_v31  ;;  %17641 = vmatprep.subr.bf16.mxu0 %v24191_v41 }
 0x64e   : > { %18605 = vmatprep.subr.bf16.mxu1 %v24197_v15 }
 0x64f   : > { %17634 = vmatmul.mubr.bf16.vlgmr.msra.gmra.mrb[88].mxu0 %v22550_v30  ;;  %18598 = vmatmul.mubr.bf16.gmra.mrb[28].mxu1 %v24202_v33 }
 0x650   : > { %17637 = vmatprep.mubr.bf16.mxu0 %v22581_v21  ;;  %17642 = vmatpush3.bf16.msra.mxu0 %v24191_v41 }
 0x651   : > { %18606 = vmatpush3.bf16.msra.mxu1 %v24197_v15  ;;  %18617 = vmatprep.mubr.bf16.mxu1 %v22803_v54  ;;  %v24239_v54 = vld [vmem:[%s25964_s3 + $0x198] sm:$0xff]  }
 0x652   : > { %17643 = vmatprep.subr.bf16.mxu0 %v24208_v61  ;;  %18607 = vmatprep.subr.bf16.mxu1 %v24213_v58 }
 0x654   : > { %17644 = vmatpush3.bf16.msra.mxu0 %v24208_v61 }
 0x655   : > { %18608 = vmatpush3.bf16.msra.mxu1 %v24213_v58  ;;  %17645 = vmatprep.subr.bf16.mxu0 %v24224_v19 }
 0x656   : > { %18609 = vmatprep.subr.bf16.mxu1 %v24231_v51 }
 0x657   : > { %17638 = vmatmul.mubr.bf16.gmra.mrb[92].mxu0 %v22611_v7 }
 0x658   : > { %17646 = vmatpush3.bf16.msra.mxu0 %v24224_v19  ;;  %17657 = vmatprep.mubr.bf16.mxu0 %v22774_v55  ;;  %v24269_v55 = vld [vmem:[%s25964_s3 + $0x1a8] sm:$0xff]  }
 0x659   : > { %18610 = vmatpush3.bf16.msra.mxu1 %v24231_v51  ;;  %17647 = vmatprep.subr.bf16.mxu0 %v24239_v54 }
 0x65a   : > { %18611 = vmatprep.subr.bf16.mxu1 %v24245_v45 }
 0x65c   : > { %17648 = vmatpush3.bf16.msra.mxu0 %v24239_v54 }
 0x65d   : > { %18612 = vmatpush3.bf16.msra.mxu1 %v24245_v45  ;;  %17649 = vmatprep.subr.bf16.mxu0 %v24255_v8 }
 0x65e   : > { %18613 = vmatprep.subr.bf16.mxu1 %v24261_v20 }
 0x660   : > { %17650 = vmatpush3.bf16.msra.mxu0 %v24255_v8 }
 0x661   : > { %18614 = vmatpush3.bf16.msra.mxu1 %v24261_v20  ;;  %17651 = vmatprep.subr.bf16.mxu0 %v24269_v55 }
 0x662   : > { %18615 = vmatprep.subr.bf16.mxu1 %v24275_v59 }
 0x664   : > { %17652 = vmatpush3.bf16.msra.mxu0 %v24269_v55 }
 0x665   : > { %18616 = vmatpush3.bf16.msra.mxu1 %v24275_v59  ;;  %17653 = vmatprep.subr.bf16.mxu0 %v24283_v24 }
 0x666   : > { %18625 = vmatprep.subr.bf16.mxu1 %v24168_v16 }
 0x668   : > { %18618 = vmatmul.mubr.bf16.vlgmr.msra.gmra.mrb[0].mxu1 %v22824_v27  ;;  %17654 = vmatpush3.bf16.msra.mxu0 %v24283_v24  ;;  %v26601_v27 = vld [vmem:[#allocation20_spill] sm:$0xff] }
 0x669   : > { %18621 = vmatprep.mubr.bf16.mxu1 %v22860_v36  ;;  %18626 = vmatpush3.bf16.msra.mxu1 %v24168_v16  ;;  %v26603_v36 = vld [vmem:[#allocation88_spill] sm:$0xff] }
 0x66a   : > { %17655 = vmatprep.subr.bf16.mxu0 %v24293_v39  ;;  %18627 = vmatprep.subr.bf16.mxu1 %v24181_v31 }
 0x66c   : > { %17656 = vmatpush3.bf16.msra.mxu0 %v24293_v39 }
 0x66d   : > { %18628 = vmatpush3.bf16.msra.mxu1 %v24181_v31  ;;  %17665 = vmatprep.subr.bf16.mxu0 %v24191_v41 }
 0x66e   : > { %18629 = vmatprep.subr.bf16.mxu1 %v24197_v15 }
 0x66f   : > { %17658 = vmatmul.mubr.bf16.vlgmr.msra.gmra.mrb[64].mxu0 %v22800_v35  ;;  %v26600_v35 = vld [vmem:[#allocation87_spill] sm:$0xff] }
 0x670   : > { %18622 = vmatmul.mubr.bf16.gmra.mrb[4].mxu1 %v22902_v14  ;;  %17661 = vmatprep.mubr.bf16.mxu0 %v22831_v28  ;;  %v26602_v28 = vld [vmem:[#allocation18_spill] sm:$0xff]  ;;  %v26605_v14 = vld [vmem:[#allocation19_spill] sm:$0xff] }
 0x671   : > { %17666 = vmatpush3.bf16.msra.mxu0 %v24191_v41  ;;  %18630 = vmatpush3.bf16.msra.mxu1 %v24197_v15 }
 0x672   : > { %18641 = vmatprep.mubr.bf16.mxu1 %v23073_v6  ;;  %17667 = vmatprep.subr.bf16.mxu0 %v24208_v61 }
 0x673   : > { %18631 = vmatprep.subr.bf16.mxu1 %v24213_v58 }
 0x675   : > { %17668 = vmatpush3.bf16.msra.mxu0 %v24208_v61  ;;  %18632 = vmatpush3.bf16.msra.mxu1 %v24213_v58 }
 0x676   : > { %17669 = vmatprep.subr.bf16.mxu0 %v24224_v19  ;;  %18633 = vmatprep.subr.bf16.mxu1 %v24231_v51 }
 0x677   : > { %17662 = vmatmul.mubr.bf16.gmra.mrb[68].mxu0 %v22862_v29  ;;  %v26604_v29 = vld [vmem:[#allocation86_spill] sm:$0xff] }
 0x678   : > { %17681 = vmatprep.mubr.bf16.mxu0 %v23036_v50 }
 0x679   : > { %17670 = vmatpush3.bf16.msra.mxu0 %v24224_v19  ;;  %18634 = vmatpush3.bf16.msra.mxu1 %v24231_v51 }
 0x67a   : > { %17671 = vmatprep.subr.bf16.mxu0 %v24239_v54  ;;  %18635 = vmatprep.subr.bf16.mxu1 %v24245_v45 }
 0x67d   : > { %17672 = vmatpush3.bf16.msra.mxu0 %v24239_v54  ;;  %18636 = vmatpush3.bf16.msra.mxu1 %v24245_v45 }
 0x67e   : > { %17673 = vmatprep.subr.bf16.mxu0 %v24255_v8  ;;  %18637 = vmatprep.subr.bf16.mxu1 %v24261_v20 }
 0x681   : > { %17674 = vmatpush3.bf16.msra.mxu0 %v24255_v8  ;;  %18638 = vmatpush3.bf16.msra.mxu1 %v24261_v20 }
 0x682   : > { %17675 = vmatprep.subr.bf16.mxu0 %v24269_v55  ;;  %18639 = vmatprep.subr.bf16.mxu1 %v24275_v59 }
 0x685   : > { %17676 = vmatpush3.bf16.msra.mxu0 %v24269_v55  ;;  %18640 = vmatpush3.bf16.msra.mxu1 %v24275_v59 }
 0x686   : > { %17677 = vmatprep.subr.bf16.mxu0 %v24283_v24  ;;  %18649 = vmatprep.subr.bf16.mxu1 %v24168_v16 }
 0x688   : > { %18642 = vmatmul.mubr.bf16.vlgmr.msra.gmra.mrb[8].mxu1 %v26600_v35 }
 0x689   : > { %17678 = vmatpush3.bf16.msra.mxu0 %v24283_v24  ;;  %18645 = vmatprep.mubr.bf16.mxu1 %v26601_v27 }
 0x68a   : > { %18650 = vmatpush3.bf16.msra.mxu1 %v24168_v16  ;;  %17679 = vmatprep.subr.bf16.mxu0 %v24293_v39 }
 0x68b   : > { %18651 = vmatprep.subr.bf16.mxu1 %v24181_v31 }
 0x68d   : > { %17680 = vmatpush3.bf16.msra.mxu0 %v24293_v39 }
 0x68e   : > { %18652 = vmatpush3.bf16.msra.mxu1 %v24181_v31  ;;  %17689 = vmatprep.subr.bf16.mxu0 %v24191_v41 }
 0x68f   : > { %18653 = vmatprep.subr.bf16.mxu1 %v24197_v15 }
 0x690   : > { %17682 = vmatmul.mubr.bf16.vlgmr.msra.gmra.mrb[72].mxu0 %v26602_v28  ;;  %18646 = vmatmul.mubr.bf16.gmra.mrb[12].mxu1 %v26603_v36 }
 0x691   : > { %17685 = vmatprep.mubr.bf16.mxu0 %v26604_v29  ;;  %17690 = vmatpush3.bf16.msra.mxu0 %v24191_v41 }
 0x692   : > { %18654 = vmatpush3.bf16.msra.mxu1 %v24197_v15  ;;  %18665 = vmatprep.mubr.bf16.mxu1 %v24140_v47 }
 0x693   : > { %17691 = vmatprep.subr.bf16.mxu0 %v24208_v61  ;;  %18655 = vmatprep.subr.bf16.mxu1 %v24213_v58 }
 0x695   : > { %17692 = vmatpush3.bf16.msra.mxu0 %v24208_v61 }
 0x696   : > { %18656 = vmatpush3.bf16.msra.mxu1 %v24213_v58  ;;  %17693 = vmatprep.subr.bf16.mxu0 %v24224_v19 }
 0x697   : > { %18657 = vmatprep.subr.bf16.mxu1 %v24231_v51 }
 0x698   : > { %17686 = vmatmul.mubr.bf16.gmra.mrb[76].mxu0 %v26605_v14 }
 0x699   : > { %17694 = vmatpush3.bf16.msra.mxu0 %v24224_v19  ;;  %17705 = vmatprep.mubr.bf16.mxu0 %v22521_v9  ;;  %v11221_v9 = vld [vmem:[#allocation2 + $0x21] sm:$0xff] }
 0x69a   : > { %18658 = vmatpush3.bf16.msra.mxu1 %v24231_v51  ;;  %17695 = vmatprep.subr.bf16.mxu0 %v24239_v54 }
 0x69b   : > { %18659 = vmatprep.subr.bf16.mxu1 %v24245_v45 }
 0x69d   : > { %17696 = vmatpush3.bf16.msra.mxu0 %v24239_v54 }
 0x69e   : > { %18660 = vmatpush3.bf16.msra.mxu1 %v24245_v45  ;;  %17697 = vmatprep.subr.bf16.mxu0 %v24255_v8 }
 0x69f   : > { %18661 = vmatprep.subr.bf16.mxu1 %v24261_v20 }
 0x6a1   : > { %17698 = vmatpush3.bf16.msra.mxu0 %v24255_v8 }
 0x6a2   : > { %18662 = vmatpush3.bf16.msra.mxu1 %v24261_v20  ;;  %17699 = vmatprep.subr.bf16.mxu0 %v24269_v55 }
 0x6a3   : > { %18663 = vmatprep.subr.bf16.mxu1 %v24275_v59 }
 0x6a5   : > { %17700 = vmatpush3.bf16.msra.mxu0 %v24269_v55 }
 0x6a6   : > { %18664 = vmatpush3.bf16.msra.mxu1 %v24275_v59  ;;  %17701 = vmatprep.subr.bf16.mxu0 %v24283_v24 }
 0x6a7   : > { %18673 = vmatprep.subr.bf16.mxu1 %v24168_v16 }
 0x6a9   : > { %18666 = vmatmul.mubr.bf16.vlgmr.msra.gmra.mrb[16].mxu1 %v24173_v56  ;;  %17702 = vmatpush3.bf16.msra.mxu0 %v24283_v24 }
 0x6aa   : > { %18669 = vmatprep.mubr.bf16.mxu1 %v24176_v60  ;;  %18674 = vmatpush3.bf16.msra.mxu1 %v24168_v16  ;;  %v24388_v16 = vpack.c.bf16 %v11222_v26, %v11221_v9  ;;  %v24523_v9 = vld [vmem:[%s25964_s3 + $0x478] sm:$0xff]   ;;  %v24531_v26 = vld [vmem:[%s25964_s3 + $0x1f0] sm:$0xff]  }
 0x6ab   : > { %17703 = vmatprep.subr.bf16.mxu0 %v24293_v39  ;;  %18675 = vmatprep.subr.bf16.mxu1 %v24181_v31 }
 0x6ad   : > { %17704 = vmatpush3.bf16.msra.mxu0 %v24293_v39 }
 0x6ae   : > { %18676 = vmatpush3.bf16.msra.mxu1 %v24181_v31  ;;  %17713 = vmatprep.subr.bf16.mxu0 %v24191_v41  ;;  %v24424_v31 = vpack.c.bf16 %v11226_v4, %v11225_v40  ;;  %v11592_v40 = vld [vmem:[#allocation2 + $0xe1] sm:$0xff]  ;;  %v11593_v4 = vld [vmem:[#allocation2 + $0xf1] sm:$0xff] }
 0x6af   : > { %18677 = vmatprep.subr.bf16.mxu1 %v24197_v15 }
 0x6b0   : > { %17706 = vmatmul.mubr.bf16.vlgmr.msra.gmra.mrb[80].mxu0 %v22550_v30  ;;  %v26606_v30 = vld [vmem:[#allocation84_spill] sm:$0xff] }
 0x6b1   : > { %18670 = vmatmul.mubr.bf16.gmra.mrb[20].mxu1 %v24202_v33  ;;  %17709 = vmatprep.mubr.bf16.mxu0 %v22581_v21  ;;  %v24416_v21 = vld [vmem:[%s25964_s3 + $0x440] sm:$0xff]  }
 0x6b2   : > { %17714 = vmatpush3.bf16.msra.mxu0 %v24191_v41  ;;  %18678 = vmatpush3.bf16.msra.mxu1 %v24197_v15  ;;  %v24429_v41 = vld [vmem:[%s25964_s3 + $0x448] sm:$0xff]   ;;  %v11228_v15 = vld [vmem:[#allocation2 + $0x91] sm:$0xff] }
 0x6b3   : > { %18689 = vmatprep.mubr.bf16.mxu1 %v24388_v16  ;;  %17715 = vmatprep.subr.bf16.mxu0 %v24208_v61 }
 0x6b4   : > { %18679 = vmatprep.subr.bf16.mxu1 %v24213_v58 }
 0x6b6   : > { %17716 = vmatpush3.bf16.msra.mxu0 %v24208_v61  ;;  %18680 = vmatpush3.bf16.msra.mxu1 %v24213_v58  ;;  %v24445_v61 = vld [vmem:[%s25964_s3 + $0x450] sm:$0xff]   ;;  %v24450_v58 = vpack.c.bf16 %v11228_v15, %v11227_v18  ;;  %v24669_v18 = vpack.c.bf16 %v11593_v4, %v11592_v40  ;;  %v24789_v40 = vld [vmem:[%s25964_s3 + $0x238] sm:$0xff]  }
 0x6b7   : > { %17717 = vmatprep.subr.bf16.mxu0 %v24224_v19  ;;  %18681 = vmatprep.subr.bf16.mxu1 %v24231_v51  ;;  %v11964_v4 = vld [vmem:[#allocation2 + $0x72] sm:$0xff] }
 0x6b8   : > { %17710 = vmatmul.mubr.bf16.gmra.mrb[84].mxu0 %v22611_v7  ;;  %v11223_v7 = vld [vmem:[#allocation2 + $0x41] sm:$0xff] }
 0x6b9   : > { %17729 = vmatprep.mubr.bf16.mxu0 %v26606_v30  ;;  %v24421_v5 = vpack.c.bf16 %v11224_v37, %v11223_v7  ;;  %v24541_v7 = vld [vmem:[%s25964_s3 + $0x1f8] sm:$0xff]   ;;  %v24664_v37 = vld [vmem:[%s25964_s3 + $0x480] sm:$0xff]  }
 0x6ba   : > { %17718 = vmatpush3.bf16.msra.mxu0 %v24224_v19  ;;  %18682 = vmatpush3.bf16.msra.mxu1 %v24231_v51  ;;  %v24456_v19 = vld [vmem:[%s25964_s3 + $0x1c8] sm:$0xff]   ;;  %v24461_v51 = vld [vmem:[%s25964_s3 + $0x458] sm:$0xff]  }
 0x6bb   : > { %17719 = vmatprep.subr.bf16.mxu0 %v24239_v54  ;;  %18683 = vmatprep.subr.bf16.mxu1 %v24245_v45 }
 0x6be   : > { %17720 = vmatpush3.bf16.msra.mxu0 %v24239_v54  ;;  %18684 = vmatpush3.bf16.msra.mxu1 %v24245_v45  ;;  %v26607_v54 = vld [vmem:[#allocation17_spill] sm:$0xff]  ;;  %v26608_v45 = vld [vmem:[#allocation16_spill] sm:$0xff] }
 0x6bf   : > { %17721 = vmatprep.subr.bf16.mxu0 %v24255_v8  ;;  %18685 = vmatprep.subr.bf16.mxu1 %v24261_v20 }
 0x6c2   : > { %17722 = vmatpush3.bf16.msra.mxu0 %v24255_v8  ;;  %18686 = vmatpush3.bf16.msra.mxu1 %v24261_v20  ;;  %v24472_v8 = vld [vmem:[%s25964_s3 + $0x1d0] sm:$0xff]   ;;  %v24479_v20 = vld [vmem:[%s25964_s3 + $0x460] sm:$0xff]  }
 0x6c3   : > { %17723 = vmatprep.subr.bf16.mxu0 %v24269_v55  ;;  %18687 = vmatprep.subr.bf16.mxu1 %v24275_v59 }
 0x6c6   : > { %17724 = vmatpush3.bf16.msra.mxu0 %v24269_v55  ;;  %18688 = vmatpush3.bf16.msra.mxu1 %v24275_v59  ;;  %v24493_v55 = vld [vmem:[%s25964_s3 + $0x468] sm:$0xff]  }
 0x6c7   : > { %17725 = vmatprep.subr.bf16.mxu0 %v24283_v24  ;;  %18697 = vmatprep.subr.bf16.mxu1 %v24416_v21  ;;  %v26609_v59 = vld [vmem:[#allocation85_spill] sm:$0xff] }
 0x6c9   : > { %18690 = vmatmul.mubr.bf16.vlgmr.msra.gmra.mrb[24].mxu1 %v24421_v5 }
 0x6ca   : > { %17726 = vmatpush3.bf16.msra.mxu0 %v24283_v24  ;;  %18693 = vmatprep.mubr.bf16.mxu1 %v24424_v31  ;;  %v24503_v24 = vld [vmem:[%s25964_s3 + $0x1e0] sm:$0xff]  }
 0x6cb   : > { %18698 = vmatpush3.bf16.msra.mxu1 %v24416_v21  ;;  %17727 = vmatprep.subr.bf16.mxu0 %v24293_v39 }
 0x6cc   : > { %18699 = vmatprep.subr.bf16.mxu1 %v24429_v41 }
 0x6ce   : > { %17728 = vmatpush3.bf16.msra.mxu0 %v24293_v39  ;;  %v24509_v39 = vld [vmem:[%s25964_s3 + $0x470] sm:$0xff]  }
 0x6cf   : > { %18700 = vmatpush3.bf16.msra.mxu1 %v24429_v41  ;;  %17737 = vmatprep.subr.bf16.mxu0 %v24439_v49 }
 0x6d0   : > { %18701 = vmatprep.subr.bf16.mxu1 %v24445_v61 }
 0x6d1   : > { %17730 = vmatmul.mubr.bf16.vlgmr.msra.gmra.mrb[88].mxu0 %v26607_v54  ;;  %18694 = vmatmul.mubr.bf16.gmra.mrb[28].mxu1 %v24450_v58 }
 0x6d2   : > { %17733 = vmatprep.mubr.bf16.mxu0 %v26608_v45  ;;  %17738 = vmatpush3.bf16.msra.mxu0 %v24439_v49 }
 0x6d3   : > { %18702 = vmatpush3.bf16.msra.mxu1 %v24445_v61  ;;  %18713 = vmatprep.mubr.bf16.mxu1 %v23073_v6  ;;  %v24487_v6 = vld [vmem:[%s25964_s3 + $0x1d8] sm:$0xff]  }
 0x6d4   : > { %17739 = vmatprep.subr.bf16.mxu0 %v24456_v19  ;;  %18703 = vmatprep.subr.bf16.mxu1 %v24461_v51 }
 0x6d6   : > { %17740 = vmatpush3.bf16.msra.mxu0 %v24456_v19 }
 0x6d7   : > { %18704 = vmatpush3.bf16.msra.mxu1 %v24461_v51  ;;  %17741 = vmatprep.subr.bf16.mxu0 %v24472_v8 }
 0x6d8   : > { %18705 = vmatprep.subr.bf16.mxu1 %v24479_v20 }
 0x6d9   : > { %17734 = vmatmul.mubr.bf16.gmra.mrb[92].mxu0 %v26609_v59 }
 0x6da   : > { %17742 = vmatpush3.bf16.msra.mxu0 %v24472_v8  ;;  %17753 = vmatprep.mubr.bf16.mxu0 %v23036_v50  ;;  %v24517_v50 = vld [vmem:[%s25964_s3 + $0x1e8] sm:$0xff]  }
 0x6db   : > { %18706 = vmatpush3.bf16.msra.mxu1 %v24479_v20  ;;  %17743 = vmatprep.subr.bf16.mxu0 %v24487_v6 }
 0x6dc   : > { %18707 = vmatprep.subr.bf16.mxu1 %v24493_v55 }
 0x6de   : > { %17744 = vmatpush3.bf16.msra.mxu0 %v24487_v6 }
 0x6df   : > { %18708 = vmatpush3.bf16.msra.mxu1 %v24493_v55  ;;  %17745 = vmatprep.subr.bf16.mxu0 %v24503_v24 }
 0x6e0   : > { %18709 = vmatprep.subr.bf16.mxu1 %v24509_v39 }
 0x6e2   : > { %17746 = vmatpush3.bf16.msra.mxu0 %v24503_v24 }
 0x6e3   : > { %18710 = vmatpush3.bf16.msra.mxu1 %v24509_v39  ;;  %17747 = vmatprep.subr.bf16.mxu0 %v24517_v50 }
 0x6e4   : > { %18711 = vmatprep.subr.bf16.mxu1 %v24523_v9 }
 0x6e6   : > { %17748 = vmatpush3.bf16.msra.mxu0 %v24517_v50 }
 0x6e7   : > { %18712 = vmatpush3.bf16.msra.mxu1 %v24523_v9  ;;  %17749 = vmatprep.subr.bf16.mxu0 %v24531_v26 }
 0x6e8   : > { %18721 = vmatprep.subr.bf16.mxu1 %v24416_v21 }
 0x6ea   : > { %18714 = vmatmul.mubr.bf16.vlgmr.msra.gmra.mrb[0].mxu1 %v26600_v35  ;;  %17750 = vmatpush3.bf16.msra.mxu0 %v24531_v26  ;;  %v26610_v35 = vld [vmem:[#allocation23_spill] sm:$0xff] }
 0x6eb   : > { %18717 = vmatprep.mubr.bf16.mxu1 %v26601_v27  ;;  %18722 = vmatpush3.bf16.msra.mxu1 %v24416_v21  ;;  %v26611_v27 = vld [vmem:[#allocation91_spill] sm:$0xff] }
 0x6ec   : > { %17751 = vmatprep.subr.bf16.mxu0 %v24541_v7  ;;  %18723 = vmatprep.subr.bf16.mxu1 %v24429_v41 }
 0x6ee   : > { %17752 = vmatpush3.bf16.msra.mxu0 %v24541_v7 }
 0x6ef   : > { %18724 = vmatpush3.bf16.msra.mxu1 %v24429_v41  ;;  %17761 = vmatprep.subr.bf16.mxu0 %v24439_v49 }
 0x6f0   : > { %18725 = vmatprep.subr.bf16.mxu1 %v24445_v61 }
 0x6f1   : > { %17754 = vmatmul.mubr.bf16.vlgmr.msra.gmra.mrb[64].mxu0 %v26602_v28  ;;  %v26612_v28 = vld [vmem:[#allocation24_spill] sm:$0xff] }
 0x6f2   : > { %18718 = vmatmul.mubr.bf16.gmra.mrb[4].mxu1 %v26603_v36  ;;  %17757 = vmatprep.mubr.bf16.mxu0 %v26604_v29  ;;  %v26613_v36 = vld [vmem:[#allocation92_spill] sm:$0xff] }
 0x6f3   : > { %17762 = vmatpush3.bf16.msra.mxu0 %v24439_v49  ;;  %18726 = vmatpush3.bf16.msra.mxu1 %v24445_v61  ;;  %v11590_v29 = vld [vmem:[#allocation2 + $0xc1] sm:$0xff] }
 0x6f4   : > { %18737 = vmatprep.mubr.bf16.mxu1 %v23344_v2  ;;  %17763 = vmatprep.subr.bf16.mxu0 %v24456_v19 }
 0x6f5   : > { %18727 = vmatprep.subr.bf16.mxu1 %v24461_v51 }
 0x6f7   : > { %17764 = vmatpush3.bf16.msra.mxu0 %v24456_v19  ;;  %18728 = vmatpush3.bf16.msra.mxu1 %v24461_v51 }
 0x6f8   : > { %17765 = vmatprep.subr.bf16.mxu0 %v24472_v8  ;;  %18729 = vmatprep.subr.bf16.mxu1 %v24479_v20 }
 0x6f9   : > { %17758 = vmatmul.mubr.bf16.gmra.mrb[68].mxu0 %v26605_v14  ;;  %v11591_v14 = vld [vmem:[#allocation2 + $0xd1] sm:$0xff] }
 0x6fa   : > { %17777 = vmatprep.mubr.bf16.mxu0 %v23355_v23 }
 0x6fb   : > { %17766 = vmatpush3.bf16.msra.mxu0 %v24472_v8  ;;  %18730 = vmatpush3.bf16.msra.mxu1 %v24479_v20 }
 0x6fc   : > { %17767 = vmatprep.subr.bf16.mxu0 %v24487_v6  ;;  %18731 = vmatprep.subr.bf16.mxu1 %v24493_v55 }
 0x6ff   : > { %17768 = vmatpush3.bf16.msra.mxu0 %v24487_v6  ;;  %18732 = vmatpush3.bf16.msra.mxu1 %v24493_v55 }
 0x700   : > { %17769 = vmatprep.subr.bf16.mxu0 %v24503_v24  ;;  %18733 = vmatprep.subr.bf16.mxu1 %v24509_v39 }
 0x703   : > { %17770 = vmatpush3.bf16.msra.mxu0 %v24503_v24  ;;  %18734 = vmatpush3.bf16.msra.mxu1 %v24509_v39 }
 0x704   : > { %17771 = vmatprep.subr.bf16.mxu0 %v24517_v50  ;;  %18735 = vmatprep.subr.bf16.mxu1 %v24523_v9 }
 0x707   : > { %17772 = vmatpush3.bf16.msra.mxu0 %v24517_v50  ;;  %18736 = vmatpush3.bf16.msra.mxu1 %v24523_v9 }
 0x708   : > { %17773 = vmatprep.subr.bf16.mxu0 %v24531_v26  ;;  %18745 = vmatprep.subr.bf16.mxu1 %v24416_v21 }
 0x70a   : > { %18738 = vmatmul.mubr.bf16.vlgmr.msra.gmra.mrb[8].mxu1 %v23379_v52 }
 0x70b   : > { %17774 = vmatpush3.bf16.msra.mxu0 %v24531_v26  ;;  %18741 = vmatprep.mubr.bf16.mxu1 %v23382_v57 }
 0x70c   : > { %18746 = vmatpush3.bf16.msra.mxu1 %v24416_v21  ;;  %17775 = vmatprep.subr.bf16.mxu0 %v24541_v7 }
 0x70d   : > { %18747 = vmatprep.subr.bf16.mxu1 %v24429_v41 }
 0x70f   : > { %17776 = vmatpush3.bf16.msra.mxu0 %v24541_v7 }
 0x710   : > { %18748 = vmatpush3.bf16.msra.mxu1 %v24429_v41  ;;  %17785 = vmatprep.subr.bf16.mxu0 %v24439_v49 }
 0x711   : > { %18749 = vmatprep.subr.bf16.mxu1 %v24445_v61 }
 0x712   : > { %17778 = vmatmul.mubr.bf16.vlgmr.msra.gmra.mrb[72].mxu0 %v26610_v35  ;;  %18742 = vmatmul.mubr.bf16.gmra.mrb[12].mxu1 %v26611_v27 }
 0x713   : > { %17781 = vmatprep.mubr.bf16.mxu0 %v26612_v28  ;;  %17786 = vmatpush3.bf16.msra.mxu0 %v24439_v49 }
 0x714   : > { %18750 = vmatpush3.bf16.msra.mxu1 %v24445_v61  ;;  %18761 = vmatprep.mubr.bf16.mxu1 %v24388_v16 }
 0x715   : > { %17787 = vmatprep.subr.bf16.mxu0 %v24456_v19  ;;  %18751 = vmatprep.subr.bf16.mxu1 %v24461_v51 }
 0x717   : > { %17788 = vmatpush3.bf16.msra.mxu0 %v24456_v19 }
 0x718   : > { %18752 = vmatpush3.bf16.msra.mxu1 %v24461_v51  ;;  %17789 = vmatprep.subr.bf16.mxu0 %v24472_v8 }
 0x719   : > { %18753 = vmatprep.subr.bf16.mxu1 %v24479_v20 }
 0x71a   : > { %17782 = vmatmul.mubr.bf16.gmra.mrb[76].mxu0 %v26613_v36 }
 0x71b   : > { %17790 = vmatpush3.bf16.msra.mxu0 %v24472_v8  ;;  %17801 = vmatprep.mubr.bf16.mxu0 %v26606_v30  ;;  %v24636_v30 = vpack.c.bf16 %v11591_v14, %v11590_v29  ;;  %v24771_v29 = vld [vmem:[%s25964_s3 + $0x4b8] sm:$0xff]   ;;  %v24779_v14 = vld [vmem:[%s25964_s3 + $0x230] sm:$0xff]  }
 0x71c   : > { %18754 = vmatpush3.bf16.msra.mxu1 %v24479_v20  ;;  %17791 = vmatprep.subr.bf16.mxu0 %v24487_v6 }
 0x71d   : > { %18755 = vmatprep.subr.bf16.mxu1 %v24493_v55 }
 0x71f   : > { %17792 = vmatpush3.bf16.msra.mxu0 %v24487_v6 }
 0x720   : > { %18756 = vmatpush3.bf16.msra.mxu1 %v24493_v55  ;;  %17793 = vmatprep.subr.bf16.mxu0 %v24503_v24 }
 0x721   : > { %18757 = vmatprep.subr.bf16.mxu1 %v24509_v39 }
 0x723   : > { %17794 = vmatpush3.bf16.msra.mxu0 %v24503_v24 }
 0x724   : > { %18758 = vmatpush3.bf16.msra.mxu1 %v24509_v39  ;;  %17795 = vmatprep.subr.bf16.mxu0 %v24517_v50 }
 0x725   : > { %18759 = vmatprep.subr.bf16.mxu1 %v24523_v9 }
 0x727   : > { %17796 = vmatpush3.bf16.msra.mxu0 %v24517_v50 }
 0x728   : > { %18760 = vmatpush3.bf16.msra.mxu1 %v24523_v9  ;;  %17797 = vmatprep.subr.bf16.mxu0 %v24531_v26 }
 0x729   : > { %18769 = vmatprep.subr.bf16.mxu1 %v24416_v21 }
 0x72b   : > { %18762 = vmatmul.mubr.bf16.vlgmr.msra.gmra.mrb[16].mxu1 %v24421_v5  ;;  %17798 = vmatpush3.bf16.msra.mxu0 %v24531_v26 }
 0x72c   : > { %18765 = vmatprep.mubr.bf16.mxu1 %v24424_v31  ;;  %18770 = vmatpush3.bf16.msra.mxu1 %v24416_v21  ;;  %v26614_v21 = vld [vmem:[#allocation21_spill] sm:$0xff] }
 0x72d   : > { %17799 = vmatprep.subr.bf16.mxu0 %v24541_v7  ;;  %18771 = vmatprep.subr.bf16.mxu1 %v24429_v41 }
 0x72f   : > { %17800 = vmatpush3.bf16.msra.mxu0 %v24541_v7 }
 0x730   : > { %18772 = vmatpush3.bf16.msra.mxu1 %v24429_v41  ;;  %17809 = vmatprep.subr.bf16.mxu0 %v24439_v49  ;;  %v11594_v41 = vld [vmem:[#allocation2 + $0x101] sm:$0xff] }
 0x731   : > { %18773 = vmatprep.subr.bf16.mxu1 %v24445_v61 }
 0x732   : > { %17802 = vmatmul.mubr.bf16.vlgmr.msra.gmra.mrb[80].mxu0 %v26607_v54  ;;  %v11597_v54 = vld [vmem:[#allocation2 + $0x131] sm:$0xff] }
 0x733   : > { %18766 = vmatmul.mubr.bf16.gmra.mrb[20].mxu1 %v24450_v58  ;;  %17805 = vmatprep.mubr.bf16.mxu0 %v26608_v45  ;;  %v24693_v45 = vld [vmem:[%s25964_s3 + $0x490] sm:$0xff]  }
 0x734   : > { %17810 = vmatpush3.bf16.msra.mxu0 %v24439_v49  ;;  %18774 = vmatpush3.bf16.msra.mxu1 %v24445_v61  ;;  %v11595_v49 = vld [vmem:[#allocation2 + $0x111] sm:$0xff]  ;;  %v24677_v61 = vld [vmem:[%s25964_s3 + $0x488] sm:$0xff]  }
 0x735   : > { %18785 = vmatprep.mubr.bf16.mxu1 %v24636_v30  ;;  %17811 = vmatprep.subr.bf16.mxu0 %v24456_v19  ;;  %v24672_v15 = vpack.c.bf16 %v11595_v49, %v11594_v41 }
 0x736   : > { %18775 = vmatprep.subr.bf16.mxu1 %v24461_v51 }
 0x738   : > { %17812 = vmatpush3.bf16.msra.mxu0 %v24456_v19  ;;  %18776 = vmatpush3.bf16.msra.mxu1 %v24461_v51  ;;  %v24687_v19 = vld [vmem:[%s25964_s3 + $0x200] sm:$0xff]  }
 0x739   : > { %17813 = vmatprep.subr.bf16.mxu0 %v24472_v8  ;;  %18777 = vmatprep.subr.bf16.mxu1 %v24479_v20  ;;  %v11596_v51 = vld [vmem:[#allocation2 + $0x121] sm:$0xff] }
 0x73a   : > { %17806 = vmatmul.mubr.bf16.gmra.mrb[84].mxu0 %v26609_v59  ;;  %v26616_v59 = vld [vmem:[#allocation22_spill] sm:$0xff] }
 0x73b   : > { %17825 = vmatprep.mubr.bf16.mxu0 %v26614_v21 }
 0x73c   : > { %17814 = vmatpush3.bf16.msra.mxu0 %v24472_v8  ;;  %18778 = vmatpush3.bf16.msra.mxu1 %v24479_v20  ;;  %v24698_v8 = vpack.c.bf16 %v11597_v54, %v11596_v51  ;;  %v24704_v20 = vld [vmem:[%s25964_s3 + $0x208] sm:$0xff]   ;;  %v11966_v54 = vld [vmem:[#allocation2 + $0x92] sm:$0xff] }
 0x73d   : > { %17815 = vmatprep.subr.bf16.mxu0 %v24487_v6  ;;  %18779 = vmatprep.subr.bf16.mxu1 %v24493_v55  ;;  %v11965_v51 = vld [vmem:[#allocation2 + $0x82] sm:$0xff] }
 0x740   : > { %17816 = vmatpush3.bf16.msra.mxu0 %v24487_v6  ;;  %18780 = vmatpush3.bf16.msra.mxu1 %v24493_v55  ;;  %v24709_v6 = vld [vmem:[%s25964_s3 + $0x498] sm:$0xff]   ;;  %v26615_v55 = vld [vmem:[#allocation89_spill] sm:$0xff] }
 0x741   : > { %17817 = vmatprep.subr.bf16.mxu0 %v24503_v24  ;;  %18781 = vmatprep.subr.bf16.mxu1 %v24509_v39 }
 0x744   : > { %17818 = vmatpush3.bf16.msra.mxu0 %v24503_v24  ;;  %18782 = vmatpush3.bf16.msra.mxu1 %v24509_v39  ;;  %v24720_v24 = vld [vmem:[%s25964_s3 + $0x210] sm:$0xff]   ;;  %v24727_v39 = vld [vmem:[%s25964_s3 + $0x4a0] sm:$0xff]  }
 0x745   : > { %17819 = vmatprep.subr.bf16.mxu0 %v24517_v50  ;;  %18783 = vmatprep.subr.bf16.mxu1 %v24523_v9 }
 0x748   : > { %17820 = vmatpush3.bf16.msra.mxu0 %v24517_v50  ;;  %18784 = vmatpush3.bf16.msra.mxu1 %v24523_v9  ;;  %v24741_v50 = vld [vmem:[%s25964_s3 + $0x4a8] sm:$0xff]   ;;  %v26617_v9 = vld [vmem:[#allocation90_spill] sm:$0xff] }
 0x749   : > { %17821 = vmatprep.subr.bf16.mxu0 %v24531_v26  ;;  %18793 = vmatprep.subr.bf16.mxu1 %v24664_v37 }
 0x74b   : > { %18786 = vmatmul.mubr.bf16.vlgmr.msra.gmra.mrb[24].mxu1 %v24669_v18 }
 0x74c   : > { %17822 = vmatpush3.bf16.msra.mxu0 %v24531_v26  ;;  %18789 = vmatprep.mubr.bf16.mxu1 %v24672_v15  ;;  %v24751_v26 = vld [vmem:[%s25964_s3 + $0x220] sm:$0xff]  }
 0x74d   : > { %18794 = vmatpush3.bf16.msra.mxu1 %v24664_v37  ;;  %17823 = vmatprep.subr.bf16.mxu0 %v24541_v7 }
 0x74e   : > { %18795 = vmatprep.subr.bf16.mxu1 %v24677_v61 }
 0x750   : > { %17824 = vmatpush3.bf16.msra.mxu0 %v24541_v7  ;;  %v24757_v7 = vld [vmem:[%s25964_s3 + $0x4b0] sm:$0xff]  }
 0x751   : > { %18796 = vmatpush3.bf16.msra.mxu1 %v24677_v61  ;;  %17833 = vmatprep.subr.bf16.mxu0 %v24687_v19 }
 0x752   : > { %18797 = vmatprep.subr.bf16.mxu1 %v24693_v45 }
 0x753   : > { %17826 = vmatmul.mubr.bf16.vlgmr.msra.gmra.mrb[88].mxu0 %v26615_v55  ;;  %18790 = vmatmul.mubr.bf16.gmra.mrb[28].mxu1 %v24698_v8 }
 0x754   : > { %17829 = vmatprep.mubr.bf16.mxu0 %v26616_v59  ;;  %17834 = vmatpush3.bf16.msra.mxu0 %v24687_v19 }
 0x755   : > { %18798 = vmatpush3.bf16.msra.mxu1 %v24693_v45  ;;  %18809 = vmatprep.mubr.bf16.mxu1 %v23344_v2  ;;  %v24735_v2 = vld [vmem:[%s25964_s3 + $0x218] sm:$0xff]  }
 0x756   : > { %17835 = vmatprep.subr.bf16.mxu0 %v24704_v20  ;;  %18799 = vmatprep.subr.bf16.mxu1 %v24709_v6 }
 0x758   : > { %17836 = vmatpush3.bf16.msra.mxu0 %v24704_v20 }
 0x759   : > { %18800 = vmatpush3.bf16.msra.mxu1 %v24709_v6  ;;  %17837 = vmatprep.subr.bf16.mxu0 %v24720_v24 }
 0x75a   : > { %18801 = vmatprep.subr.bf16.mxu1 %v24727_v39 }
 0x75b   : > { %17830 = vmatmul.mubr.bf16.gmra.mrb[92].mxu0 %v26617_v9 }
 0x75c   : > { %17838 = vmatpush3.bf16.msra.mxu0 %v24720_v24  ;;  %17849 = vmatprep.mubr.bf16.mxu0 %v23355_v23  ;;  %v24765_v23 = vld [vmem:[%s25964_s3 + $0x228] sm:$0xff]  }
 0x75d   : > { %18802 = vmatpush3.bf16.msra.mxu1 %v24727_v39  ;;  %17839 = vmatprep.subr.bf16.mxu0 %v24735_v2 }
 0x75e   : > { %18803 = vmatprep.subr.bf16.mxu1 %v24741_v50 }
 0x760   : > { %17840 = vmatpush3.bf16.msra.mxu0 %v24735_v2 }
 0x761   : > { %18804 = vmatpush3.bf16.msra.mxu1 %v24741_v50  ;;  %17841 = vmatprep.subr.bf16.mxu0 %v24751_v26 }
 0x762   : > { %18805 = vmatprep.subr.bf16.mxu1 %v24757_v7 }
 0x764   : > { %17842 = vmatpush3.bf16.msra.mxu0 %v24751_v26 }
 0x765   : > { %18806 = vmatpush3.bf16.msra.mxu1 %v24757_v7  ;;  %17843 = vmatprep.subr.bf16.mxu0 %v24765_v23 }
 0x766   : > { %18807 = vmatprep.subr.bf16.mxu1 %v24771_v29 }
 0x768   : > { %17844 = vmatpush3.bf16.msra.mxu0 %v24765_v23 }
 0x769   : > { %18808 = vmatpush3.bf16.msra.mxu1 %v24771_v29  ;;  %17845 = vmatprep.subr.bf16.mxu0 %v24779_v14 }
 0x76a   : > { %18817 = vmatprep.subr.bf16.mxu1 %v24664_v37 }
 0x76c   : > { %18810 = vmatmul.mubr.bf16.vlgmr.msra.gmra.mrb[0].mxu1 %v23379_v52  ;;  %17846 = vmatpush3.bf16.msra.mxu0 %v24779_v14  ;;  %v11959_v52 = vld [vmem:[#allocation2 + $0x22] sm:$0xff] }
 0x76d   : > { %18813 = vmatprep.mubr.bf16.mxu1 %v23382_v57  ;;  %18818 = vmatpush3.bf16.msra.mxu1 %v24664_v37  ;;  %v11960_v57 = vld [vmem:[#allocation2 + $0x32] sm:$0xff] }
 0x76e   : > { %17847 = vmatprep.subr.bf16.mxu0 %v24789_v40  ;;  %18819 = vmatprep.subr.bf16.mxu1 %v24677_v61 }
 0x770   : > { %17848 = vmatpush3.bf16.msra.mxu0 %v24789_v40 }
 0x771   : > { %18820 = vmatpush3.bf16.msra.mxu1 %v24677_v61  ;;  %17857 = vmatprep.subr.bf16.mxu0 %v24687_v19 }
 0x772   : > { %18821 = vmatprep.subr.bf16.mxu1 %v24693_v45 }
 0x773   : > { %17850 = vmatmul.mubr.bf16.vlgmr.msra.gmra.mrb[64].mxu0 %v26610_v35  ;;  %v24884_v35 = vpack.c.bf16 %v11960_v57, %v11959_v52  ;;  %v25194_v57 = vld [vmem:[%s25964_s3 + $0x518] sm:$0xff]  }
 0x774   : > { %18814 = vmatmul.mubr.bf16.gmra.mrb[4].mxu1 %v26611_v27  ;;  %17853 = vmatprep.mubr.bf16.mxu0 %v26612_v28  ;;  %v26618_v27 = vld [vmem:[#allocation25_spill] sm:$0xff]  ;;  %v24912_v28 = vld [vmem:[%s25964_s3 + $0x4c0] sm:$0xff]  }
 0x775   : > { %17858 = vmatpush3.bf16.msra.mxu0 %v24687_v19  ;;  %18822 = vmatpush3.bf16.msra.mxu1 %v24693_v45 }
 0x776   : > { %18833 = vmatprep.mubr.bf16.mxu1 %v23616_v10  ;;  %17859 = vmatprep.subr.bf16.mxu0 %v24704_v20 }
 0x777   : > { %18823 = vmatprep.subr.bf16.mxu1 %v24709_v6 }
 0x779   : > { %17860 = vmatpush3.bf16.msra.mxu0 %v24704_v20  ;;  %18824 = vmatpush3.bf16.msra.mxu1 %v24709_v6 }
 0x77a   : > { %17861 = vmatprep.subr.bf16.mxu0 %v24720_v24  ;;  %18825 = vmatprep.subr.bf16.mxu1 %v24727_v39 }
 0x77b   : > { %17854 = vmatmul.mubr.bf16.gmra.mrb[68].mxu0 %v26613_v36  ;;  %v11961_v36 = vld [vmem:[#allocation2 + $0x42] sm:$0xff] }
 0x77c   : > { %17873 = vmatprep.mubr.bf16.mxu0 %v23627_v53 }
 0x77d   : > { %17862 = vmatpush3.bf16.msra.mxu0 %v24720_v24  ;;  %18826 = vmatpush3.bf16.msra.mxu1 %v24727_v39 }
 0x77e   : > { %17863 = vmatprep.subr.bf16.mxu0 %v24735_v2  ;;  %18827 = vmatprep.subr.bf16.mxu1 %v24741_v50 }
 0x781   : > { %17864 = vmatpush3.bf16.msra.mxu0 %v24735_v2  ;;  %18828 = vmatpush3.bf16.msra.mxu1 %v24741_v50 }
 0x782   : > { %17865 = vmatprep.subr.bf16.mxu0 %v24751_v26  ;;  %18829 = vmatprep.subr.bf16.mxu1 %v24757_v7 }
 0x785   : > { %17866 = vmatpush3.bf16.msra.mxu0 %v24751_v26  ;;  %18830 = vmatpush3.bf16.msra.mxu1 %v24757_v7 }
 0x786   : > { %17867 = vmatprep.subr.bf16.mxu0 %v24765_v23  ;;  %18831 = vmatprep.subr.bf16.mxu1 %v24771_v29 }
 0x789   : > { %17868 = vmatpush3.bf16.msra.mxu0 %v24765_v23  ;;  %18832 = vmatpush3.bf16.msra.mxu1 %v24771_v29 }
 0x78a   : > { %17869 = vmatprep.subr.bf16.mxu0 %v24779_v14  ;;  %18841 = vmatprep.subr.bf16.mxu1 %v24664_v37 }
 0x78c   : > { %18834 = vmatmul.mubr.bf16.vlgmr.msra.gmra.mrb[8].mxu1 %v23651_v43 }
 0x78d   : > { %17870 = vmatpush3.bf16.msra.mxu0 %v24779_v14  ;;  %18837 = vmatprep.mubr.bf16.mxu1 %v23654_v46 }
 0x78e   : > { %18842 = vmatpush3.bf16.msra.mxu1 %v24664_v37  ;;  %17871 = vmatprep.subr.bf16.mxu0 %v24789_v40 }
 0x78f   : > { %18843 = vmatprep.subr.bf16.mxu1 %v24677_v61 }
 0x791   : > { %17872 = vmatpush3.bf16.msra.mxu0 %v24789_v40 }
 0x792   : > { %18844 = vmatpush3.bf16.msra.mxu1 %v24677_v61  ;;  %17881 = vmatprep.subr.bf16.mxu0 %v24687_v19 }
 0x793   : > { %18845 = vmatprep.subr.bf16.mxu1 %v24693_v45 }
 0x794   : > { %17874 = vmatmul.mubr.bf16.vlgmr.msra.gmra.mrb[72].mxu0 %v23678_v0  ;;  %18838 = vmatmul.mubr.bf16.gmra.mrb[12].mxu1 %v23682_v11 }
 0x795   : > { %17877 = vmatprep.mubr.bf16.mxu0 %v23685_v13  ;;  %17882 = vmatpush3.bf16.msra.mxu0 %v24687_v19 }
 0x796   : > { %18846 = vmatpush3.bf16.msra.mxu1 %v24693_v45  ;;  %18857 = vmatprep.mubr.bf16.mxu1 %v24636_v30 }
 0x797   : > { %17883 = vmatprep.subr.bf16.mxu0 %v24704_v20  ;;  %18847 = vmatprep.subr.bf16.mxu1 %v24709_v6 }
 0x799   : > { %17884 = vmatpush3.bf16.msra.mxu0 %v24704_v20 }
 0x79a   : > { %18848 = vmatpush3.bf16.msra.mxu1 %v24709_v6  ;;  %17885 = vmatprep.subr.bf16.mxu0 %v24720_v24 }
 0x79b   : > { %18849 = vmatprep.subr.bf16.mxu1 %v24727_v39 }
 0x79c   : > { %17878 = vmatmul.mubr.bf16.gmra.mrb[76].mxu0 %v23717_v3 }
 0x79d   : > { %17886 = vmatpush3.bf16.msra.mxu0 %v24720_v24  ;;  %17897 = vmatprep.mubr.bf16.mxu0 %v26614_v21  ;;  %v11962_v21 = vld [vmem:[#allocation2 + $0x52] sm:$0xff] }
 0x79e   : > { %18850 = vmatpush3.bf16.msra.mxu1 %v24727_v39  ;;  %17887 = vmatprep.subr.bf16.mxu0 %v24735_v2  ;;  %v24917_v41 = vpack.c.bf16 %v11962_v21, %v11961_v36  ;;  %v25205_v36 = vld [vmem:[%s25964_s3 + $0x520] sm:$0xff]   ;;  %v25212_v21 = vld [vmem:[%s25964_s3 + $0x528] sm:$0xff]  }
 0x79f   : > { %18851 = vmatprep.subr.bf16.mxu1 %v24741_v50 }
 0x7a1   : > { %17888 = vmatpush3.bf16.msra.mxu0 %v24735_v2 }
 0x7a2   : > { %18852 = vmatpush3.bf16.msra.mxu1 %v24741_v50  ;;  %17889 = vmatprep.subr.bf16.mxu0 %v24751_v26 }
 0x7a3   : > { %18853 = vmatprep.subr.bf16.mxu1 %v24757_v7 }
 0x7a5   : > { %17890 = vmatpush3.bf16.msra.mxu0 %v24751_v26 }
 0x7a6   : > { %18854 = vmatpush3.bf16.msra.mxu1 %v24757_v7  ;;  %17891 = vmatprep.subr.bf16.mxu0 %v24765_v23 }
 0x7a7   : > { %18855 = vmatprep.subr.bf16.mxu1 %v24771_v29 }
 0x7a9   : > { %17892 = vmatpush3.bf16.msra.mxu0 %v24765_v23 }
 0x7aa   : > { %18856 = vmatpush3.bf16.msra.mxu1 %v24771_v29  ;;  %17893 = vmatprep.subr.bf16.mxu0 %v24779_v14 }
 0x7ab   : > { %18865 = vmatprep.subr.bf16.mxu1 %v24664_v37 }
 0x7ad   : > { %18858 = vmatmul.mubr.bf16.vlgmr.msra.gmra.mrb[16].mxu1 %v24669_v18  ;;  %17894 = vmatpush3.bf16.msra.mxu0 %v24779_v14 }
 0x7ae   : > { %18861 = vmatprep.mubr.bf16.mxu1 %v24672_v15  ;;  %18866 = vmatpush3.bf16.msra.mxu1 %v24664_v37  ;;  %v11963_v37 = vld [vmem:[#allocation2 + $0x62] sm:$0xff] }
 0x7af   : > { %17895 = vmatprep.subr.bf16.mxu0 %v24789_v40  ;;  %18867 = vmatprep.subr.bf16.mxu1 %v24677_v61  ;;  %v24920_v49 = vpack.c.bf16 %v11964_v4, %v11963_v37  ;;  %v25227_v37 = vld [vmem:[%s25964_s3 + $0x538] sm:$0xff]   ;;  %v12628_v4 = vld [vmem:[#allocation2 + $0x190] sm:$0xff] }
 0x7b1   : > { %17896 = vmatpush3.bf16.msra.mxu0 %v24789_v40 }
 0x7b2   : > { %18868 = vmatpush3.bf16.msra.mxu1 %v24677_v61  ;;  %17905 = vmatprep.subr.bf16.mxu0 %v24687_v19  ;;  %v24925_v61 = vld [vmem:[%s25964_s3 + $0x4c8] sm:$0xff]  }
 0x7b3   : > { %18869 = vmatprep.subr.bf16.mxu1 %v24693_v45 }
 0x7b4   : > { %17898 = vmatmul.mubr.bf16.vlgmr.msra.gmra.mrb[80].mxu0 %v26615_v55  ;;  %v24957_v55 = vld [vmem:[%s25964_s3 + $0x4d8] sm:$0xff]  }
 0x7b5   : > { %18862 = vmatmul.mubr.bf16.gmra.mrb[20].mxu1 %v24698_v8  ;;  %17901 = vmatprep.mubr.bf16.mxu0 %v26616_v59  ;;  %v26619_v59 = vld [vmem:[#allocation93_spill] sm:$0xff] }
 0x7b6   : > { %17906 = vmatpush3.bf16.msra.mxu0 %v24687_v19  ;;  %18870 = vmatpush3.bf16.msra.mxu1 %v24693_v45  ;;  %v24935_v19 = vld [vmem:[%s25964_s3 + $0x240] sm:$0xff]   ;;  %v24941_v45 = vld [vmem:[%s25964_s3 + $0x4d0] sm:$0xff]  }
 0x7b7   : > { %18881 = vmatprep.mubr.bf16.mxu1 %v24884_v35  ;;  %17907 = vmatprep.subr.bf16.mxu0 %v24704_v20 }
 0x7b8   : > { %18871 = vmatprep.subr.bf16.mxu1 %v24709_v6 }
 0x7ba   : > { %17908 = vmatpush3.bf16.msra.mxu0 %v24704_v20  ;;  %18872 = vmatpush3.bf16.msra.mxu1 %v24709_v6  ;;  %v24946_v20 = vpack.c.bf16 %v11966_v54, %v11965_v51  ;;  %v24952_v6 = vld [vmem:[%s25964_s3 + $0x248] sm:$0xff]  }
 0x7bb   : > { %17909 = vmatprep.subr.bf16.mxu0 %v24720_v24  ;;  %18873 = vmatprep.subr.bf16.mxu1 %v24727_v39 }
 0x7bc   : > { %17902 = vmatmul.mubr.bf16.gmra.mrb[84].mxu0 %v26617_v9  ;;  %v26621_v9 = vld [vmem:[#allocation94_spill] sm:$0xff] }
 0x7bd   : > { %17921 = vmatprep.mubr.bf16.mxu0 %v26618_v27 }
 0x7be   : > { %17910 = vmatpush3.bf16.msra.mxu0 %v24720_v24  ;;  %18874 = vmatpush3.bf16.msra.mxu1 %v24727_v39  ;;  %v26620_v24 = vld [vmem:[#allocation26_spill] sm:$0xff] }
 0x7bf   : > { %17911 = vmatprep.subr.bf16.mxu0 %v24735_v2  ;;  %18875 = vmatprep.subr.bf16.mxu1 %v24741_v50  ;;  %v24968_v39 = vld [vmem:[%s25964_s3 + $0x250] sm:$0xff]  }
 0x7c2   : > { %17912 = vmatpush3.bf16.msra.mxu0 %v24735_v2  ;;  %18876 = vmatpush3.bf16.msra.mxu1 %v24741_v50  ;;  %v24975_v2 = vld [vmem:[%s25964_s3 + $0x4e0] sm:$0xff]   ;;  %v24989_v50 = vld [vmem:[%s25964_s3 + $0x4e8] sm:$0xff]  }
 0x7c3   : > { %17913 = vmatprep.subr.bf16.mxu0 %v24751_v26  ;;  %18877 = vmatprep.subr.bf16.mxu1 %v24757_v7 }
 0x7c6   : > { %17914 = vmatpush3.bf16.msra.mxu0 %v24751_v26  ;;  %18878 = vmatpush3.bf16.msra.mxu1 %v24757_v7  ;;  %v24999_v26 = vld [vmem:[%s25964_s3 + $0x260] sm:$0xff]   ;;  %v25005_v7 = vld [vmem:[%s25964_s3 + $0x4f0] sm:$0xff]  }
 0x7c7   : > { %17915 = vmatprep.subr.bf16.mxu0 %v24765_v23  ;;  %18879 = vmatprep.subr.bf16.mxu1 %v24771_v29 }
 0x7ca   : > { %17916 = vmatpush3.bf16.msra.mxu0 %v24765_v23  ;;  %18880 = vmatpush3.bf16.msra.mxu1 %v24771_v29  ;;  %v25019_v23 = vld [vmem:[%s25964_s3 + $0x4f8] sm:$0xff]   ;;  %v25027_v29 = vld [vmem:[%s25964_s3 + $0x270] sm:$0xff]  }
 0x7cb   : > { %17917 = vmatprep.subr.bf16.mxu0 %v24779_v14  ;;  %18889 = vmatprep.subr.bf16.mxu1 %v24912_v28 }
 0x7cd   : > { %18882 = vmatmul.mubr.bf16.vlgmr.msra.gmra.mrb[24].mxu1 %v24917_v41 }
 0x7ce   : > { %17918 = vmatpush3.bf16.msra.mxu0 %v24779_v14  ;;  %18885 = vmatprep.mubr.bf16.mxu1 %v24920_v49  ;;  %v25037_v14 = vld [vmem:[%s25964_s3 + $0x278] sm:$0xff]  }
 0x7cf   : > { %18890 = vmatpush3.bf16.msra.mxu1 %v24912_v28  ;;  %17919 = vmatprep.subr.bf16.mxu0 %v24789_v40 }
 0x7d0   : > { %18891 = vmatprep.subr.bf16.mxu1 %v24925_v61 }
 0x7d2   : > { %17920 = vmatpush3.bf16.msra.mxu0 %v24789_v40  ;;  %v25184_v40 = vld [vmem:[%s25964_s3 + $0x510] sm:$0xff]  }
 0x7d3   : > { %18892 = vmatpush3.bf16.msra.mxu1 %v24925_v61  ;;  %17929 = vmatprep.subr.bf16.mxu0 %v24935_v19 }
 0x7d4   : > { %18893 = vmatprep.subr.bf16.mxu1 %v24941_v45 }
 0x7d5   : > { %17922 = vmatmul.mubr.bf16.vlgmr.msra.gmra.mrb[88].mxu0 %v26619_v59  ;;  %18886 = vmatmul.mubr.bf16.gmra.mrb[28].mxu1 %v24946_v20 }
 0x7d6   : > { %17925 = vmatprep.mubr.bf16.mxu0 %v26620_v24  ;;  %17930 = vmatpush3.bf16.msra.mxu0 %v24935_v19 }
 0x7d7   : > { %18894 = vmatpush3.bf16.msra.mxu1 %v24941_v45  ;;  %18905 = vmatprep.mubr.bf16.mxu1 %v23616_v10  ;;  %v24983_v10 = vld [vmem:[%s25964_s3 + $0x258] sm:$0xff]  }
 0x7d8   : > { %17931 = vmatprep.subr.bf16.mxu0 %v24952_v6  ;;  %18895 = vmatprep.subr.bf16.mxu1 %v24957_v55 }
 0x7da   : > { %17932 = vmatpush3.bf16.msra.mxu0 %v24952_v6 }
 0x7db   : > { %18896 = vmatpush3.bf16.msra.mxu1 %v24957_v55  ;;  %17933 = vmatprep.subr.bf16.mxu0 %v24968_v39 }
 0x7dc   : > { %18897 = vmatprep.subr.bf16.mxu1 %v24975_v2 }
 0x7dd   : > { %17926 = vmatmul.mubr.bf16.gmra.mrb[92].mxu0 %v26621_v9 }
 0x7de   : > { %17934 = vmatpush3.bf16.msra.mxu0 %v24968_v39  ;;  %17945 = vmatprep.mubr.bf16.mxu0 %v23627_v53  ;;  %v25013_v53 = vld [vmem:[%s25964_s3 + $0x268] sm:$0xff]  }
 0x7df   : > { %18898 = vmatpush3.bf16.msra.mxu1 %v24975_v2  ;;  %17935 = vmatprep.subr.bf16.mxu0 %v24983_v10 }
 0x7e0   : > { %18899 = vmatprep.subr.bf16.mxu1 %v24989_v50 }
 0x7e2   : > { %17936 = vmatpush3.bf16.msra.mxu0 %v24983_v10 }
 0x7e3   : > { %18900 = vmatpush3.bf16.msra.mxu1 %v24989_v50  ;;  %17937 = vmatprep.subr.bf16.mxu0 %v24999_v26 }
 0x7e4   : > { %18901 = vmatprep.subr.bf16.mxu1 %v25005_v7 }
 0x7e6   : > { %17938 = vmatpush3.bf16.msra.mxu0 %v24999_v26 }
 0x7e7   : > { %18902 = vmatpush3.bf16.msra.mxu1 %v25005_v7  ;;  %17939 = vmatprep.subr.bf16.mxu0 %v25013_v53 }
 0x7e8   : > { %18903 = vmatprep.subr.bf16.mxu1 %v25019_v23 }
 0x7ea   : > { %17940 = vmatpush3.bf16.msra.mxu0 %v25013_v53 }
 0x7eb   : > { %18904 = vmatpush3.bf16.msra.mxu1 %v25019_v23  ;;  %17941 = vmatprep.subr.bf16.mxu0 %v25027_v29 }
 0x7ec   : > { %18913 = vmatprep.subr.bf16.mxu1 %v24912_v28 }
 0x7ee   : > { %18906 = vmatmul.mubr.bf16.vlgmr.msra.gmra.mrb[0].mxu1 %v23651_v43  ;;  %17942 = vmatpush3.bf16.msra.mxu0 %v25027_v29  ;;  %v12328_v43 = vld [vmem:[#allocation2 + $0xc2] sm:$0xff] }
 0x7ef   : > { %18909 = vmatprep.mubr.bf16.mxu1 %v23654_v46  ;;  %18914 = vmatpush3.bf16.msra.mxu1 %v24912_v28  ;;  %v12329_v46 = vld [vmem:[#allocation2 + $0xd2] sm:$0xff] }
 0x7f0   : > { %17943 = vmatprep.subr.bf16.mxu0 %v25037_v14  ;;  %18915 = vmatprep.subr.bf16.mxu1 %v24925_v61 }
 0x7f2   : > { %17944 = vmatpush3.bf16.msra.mxu0 %v25037_v14 }
 0x7f3   : > { %18916 = vmatpush3.bf16.msra.mxu1 %v24925_v61  ;;  %17953 = vmatprep.subr.bf16.mxu0 %v24935_v19 }
 0x7f4   : > { %18917 = vmatprep.subr.bf16.mxu1 %v24941_v45 }
 0x7f5   : > { %17946 = vmatmul.mubr.bf16.vlgmr.msra.gmra.mrb[64].mxu0 %v23678_v0  ;;  %v25132_v0 = vpack.c.bf16 %v12329_v46, %v12328_v43  ;;  %v25309_v43 = vld [vmem:[%s25964_s3 + $0x548] sm:$0xff]  }
 0x7f6   : > { %18910 = vmatmul.mubr.bf16.gmra.mrb[4].mxu1 %v23682_v11  ;;  %17949 = vmatprep.mubr.bf16.mxu0 %v23685_v13  ;;  %v26622_v11 = vld [vmem:[#allocation27_spill] sm:$0xff]  ;;  %v25160_v13 = vld [vmem:[%s25964_s3 + $0x500] sm:$0xff]  }
 0x7f7   : > { %17954 = vmatpush3.bf16.msra.mxu0 %v24935_v19  ;;  %18918 = vmatpush3.bf16.msra.mxu1 %v24941_v45 }
 0x7f8   : > { %18929 = vmatprep.mubr.bf16.mxu1 %v23876_v34  ;;  %17955 = vmatprep.subr.bf16.mxu0 %v24952_v6  ;;  %v12331_v34 = vld [vmem:[#allocation2 + $0xf2] sm:$0xff] }
 0x7f9   : > { %18919 = vmatprep.subr.bf16.mxu1 %v24957_v55 }
 0x7fb   : > { %17956 = vmatpush3.bf16.msra.mxu0 %v24952_v6  ;;  %18920 = vmatpush3.bf16.msra.mxu1 %v24957_v55 }
 0x7fc   : > { %17957 = vmatprep.subr.bf16.mxu0 %v24968_v39  ;;  %18921 = vmatprep.subr.bf16.mxu1 %v24975_v2 }
 0x7fd   : > { %17950 = vmatmul.mubr.bf16.gmra.mrb[68].mxu0 %v23717_v3  ;;  %v12330_v3 = vld [vmem:[#allocation2 + $0xe2] sm:$0xff] }
 0x7fe   : > { %17969 = vmatprep.mubr.bf16.mxu0 %v23887_v42  ;;  %v12332_v42 = vld [vmem:[#allocation2 + $0x102] sm:$0xff] }
 0x7ff   : > { %17958 = vmatpush3.bf16.msra.mxu0 %v24968_v39  ;;  %18922 = vmatpush3.bf16.msra.mxu1 %v24975_v2 }
 0x800   : > { %17959 = vmatprep.subr.bf16.mxu0 %v24983_v10  ;;  %18923 = vmatprep.subr.bf16.mxu1 %v24989_v50 }
 0x803   : > { %17960 = vmatpush3.bf16.msra.mxu0 %v24983_v10  ;;  %18924 = vmatpush3.bf16.msra.mxu1 %v24989_v50 }
 0x804   : > { %17961 = vmatprep.subr.bf16.mxu0 %v24999_v26  ;;  %18925 = vmatprep.subr.bf16.mxu1 %v25005_v7 }
 0x807   : > { %17962 = vmatpush3.bf16.msra.mxu0 %v24999_v26  ;;  %18926 = vmatpush3.bf16.msra.mxu1 %v25005_v7 }
 0x808   : > { %17963 = vmatprep.subr.bf16.mxu0 %v25013_v53  ;;  %18927 = vmatprep.subr.bf16.mxu1 %v25019_v23 }
 0x80b   : > { %17964 = vmatpush3.bf16.msra.mxu0 %v25013_v53  ;;  %18928 = vmatpush3.bf16.msra.mxu1 %v25019_v23 }
 0x80c   : > { %17965 = vmatprep.subr.bf16.mxu0 %v25027_v29  ;;  %18937 = vmatprep.subr.bf16.mxu1 %v24912_v28 }
 0x80e   : > { %18930 = vmatmul.mubr.bf16.vlgmr.msra.gmra.mrb[8].mxu1 %v23911_v63  ;;  %v12333_v63 = vld [vmem:[#allocation2 + $0x112] sm:$0xff] }
 0x80f   : > { %17966 = vmatpush3.bf16.msra.mxu0 %v25027_v29  ;;  %18933 = vmatprep.mubr.bf16.mxu1 %v23914_v22  ;;  %v25165_v22 = vpack.c.bf16 %v12331_v34, %v12330_v3  ;;  %v25326_v34 = vld [vmem:[%s25964_s3 + $0x550] sm:$0xff]  }
 0x810   : > { %18938 = vmatpush3.bf16.msra.mxu1 %v24912_v28  ;;  %17967 = vmatprep.subr.bf16.mxu0 %v25037_v14 }
 0x811   : > { %18939 = vmatprep.subr.bf16.mxu1 %v24925_v61 }
 0x813   : > { %17968 = vmatpush3.bf16.msra.mxu0 %v25037_v14 }
 0x814   : > { %18940 = vmatpush3.bf16.msra.mxu1 %v24925_v61  ;;  %17977 = vmatprep.subr.bf16.mxu0 %v24935_v19 }
 0x815   : > { %18941 = vmatprep.subr.bf16.mxu1 %v24941_v45 }
 0x816   : > { %17970 = vmatmul.mubr.bf16.vlgmr.msra.gmra.mrb[72].mxu0 %v23938_v44  ;;  %18934 = vmatmul.mubr.bf16.gmra.mrb[12].mxu1 %v23942_v62  ;;  %v25168_v44 = vpack.c.bf16 %v12333_v63, %v12332_v42  ;;  %v25173_v62 = vld [vmem:[%s25964_s3 + $0x508] sm:$0xff]   ;;  %v12717_v63 = vld [vmem:[#allocation2 + $0x260] sm:$0xff] }
 0x817   : > { %17973 = vmatprep.mubr.bf16.mxu0 %v23945_v25  ;;  %17978 = vmatpush3.bf16.msra.mxu0 %v24935_v19  ;;  %v12334_v25 = vld [vmem:[#allocation2 + $0x122] sm:$0xff] }
 0x818   : > { %18942 = vmatpush3.bf16.msra.mxu1 %v24941_v45  ;;  %18953 = vmatprep.mubr.bf16.mxu1 %v24884_v35 }
 0x819   : > { %17979 = vmatprep.subr.bf16.mxu0 %v24952_v6  ;;  %18943 = vmatprep.subr.bf16.mxu1 %v24957_v55 }
 0x81b   : > { %17980 = vmatpush3.bf16.msra.mxu0 %v24952_v6 }
 0x81c   : > { %18944 = vmatpush3.bf16.msra.mxu1 %v24957_v55  ;;  %17981 = vmatprep.subr.bf16.mxu0 %v24968_v39 }
 0x81d   : > { %18945 = vmatprep.subr.bf16.mxu1 %v24975_v2 }
 0x81e   : > { %17974 = vmatmul.mubr.bf16.gmra.mrb[76].mxu0 %v23977_v12  ;;  %v12335_v12 = vld [vmem:[#allocation2 + $0x132] sm:$0xff] }
 0x81f   : > { %17982 = vmatpush3.bf16.msra.mxu0 %v24968_v39  ;;  %17993 = vmatprep.mubr.bf16.mxu0 %v26618_v27  ;;  %v25188_v52 = vpack.c.bf16 %v12335_v12, %v12334_v25  ;;  %v26623_v27 = vld [vmem:[#allocation95_spill] sm:$0xff] }
 0x820   : > { %18946 = vmatpush3.bf16.msra.mxu1 %v24975_v2  ;;  %17983 = vmatprep.subr.bf16.mxu0 %v24983_v10  ;;  %v25337_v12 = vld [vmem:[%s25964_s3 + $0x558] sm:$0xff]  }
 0x821   : > { %18947 = vmatprep.subr.bf16.mxu1 %v24989_v50 }
 0x823   : > { %17984 = vmatpush3.bf16.msra.mxu0 %v24983_v10 }
 0x824   : > { %18948 = vmatpush3.bf16.msra.mxu1 %v24989_v50  ;;  %17985 = vmatprep.subr.bf16.mxu0 %v24999_v26 }
 0x825   : > { %18949 = vmatprep.subr.bf16.mxu1 %v25005_v7 }
 0x827   : > { %17986 = vmatpush3.bf16.msra.mxu0 %v24999_v26 }
 0x828   : > { %18950 = vmatpush3.bf16.msra.mxu1 %v25005_v7  ;;  %17987 = vmatprep.subr.bf16.mxu0 %v25013_v53 }
 0x829   : > { %18951 = vmatprep.subr.bf16.mxu1 %v25019_v23 }
 0x82b   : > { %17988 = vmatpush3.bf16.msra.mxu0 %v25013_v53 }
 0x82c   : > { %18952 = vmatpush3.bf16.msra.mxu1 %v25019_v23  ;;  %17989 = vmatprep.subr.bf16.mxu0 %v25027_v29 }
 0x82d   : > { %18961 = vmatprep.subr.bf16.mxu1 %v24912_v28 }
 0x82f   : > { %18954 = vmatmul.mubr.bf16.vlgmr.msra.gmra.mrb[16].mxu1 %v24917_v41  ;;  %17990 = vmatpush3.bf16.msra.mxu0 %v25027_v29 }
 0x830   : > { %18957 = vmatprep.mubr.bf16.mxu1 %v24920_v49  ;;  %18962 = vmatpush3.bf16.msra.mxu1 %v24912_v28  ;;  %v26624_v28 = vld [vmem:[#allocation28_spill] sm:$0xff] }
 0x831   : > { %17991 = vmatprep.subr.bf16.mxu0 %v25037_v14  ;;  %18963 = vmatprep.subr.bf16.mxu1 %v24925_v61 }
 0x833   : > { %17992 = vmatpush3.bf16.msra.mxu0 %v25037_v14 }
 0x834   : > { %18964 = vmatpush3.bf16.msra.mxu1 %v24925_v61  ;;  %18001 = vmatprep.subr.bf16.mxu0 %v24935_v19  ;;  %v12629_v61 = vld [vmem:[#allocation2 + $0x1a0] sm:$0xff] }
 0x835   : > { %18965 = vmatprep.subr.bf16.mxu1 %v24941_v45 }
 0x836   : > { %17994 = vmatmul.mubr.bf16.vlgmr.msra.gmra.mrb[80].mxu0 %v26619_v59  ;;  %v12712_v59 = vld [vmem:[#allocation2 + $0x210] sm:$0xff] }
 0x837   : > { %18958 = vmatmul.mubr.bf16.gmra.mrb[20].mxu1 %v24946_v20  ;;  %17997 = vmatprep.mubr.bf16.mxu0 %v26620_v24 }
 0x838   : > { %18002 = vmatpush3.bf16.msra.mxu0 %v24935_v19  ;;  %18966 = vmatpush3.bf16.msra.mxu1 %v24941_v45  ;;  %v12630_v19 = vld [vmem:[#allocation2 + $0x1b0] sm:$0xff]  ;;  %v12631_v45 = vld [vmem:[#allocation2 + $0x1c0] sm:$0xff] }
 0x839   : > { %18977 = vmatprep.mubr.bf16.mxu1 %v25132_v0  ;;  %18003 = vmatprep.subr.bf16.mxu0 %v24952_v6  ;;  %v12635_v54 = vpack.c.bf16 %v12630_v19, %v12629_v61 }
 0x83a   : > { %18967 = vmatprep.subr.bf16.mxu1 %v24957_v55 }
 0x83c   : > { %18004 = vmatpush3.bf16.msra.mxu0 %v24952_v6  ;;  %18968 = vmatpush3.bf16.msra.mxu1 %v24957_v55  ;;  %v12632_v6 = vld [vmem:[#allocation2 + $0x1d0] sm:$0xff]  ;;  %v12711_v55 = vld [vmem:[#allocation2 + $0x200] sm:$0xff] }
 0x83d   : > { %18005 = vmatprep.subr.bf16.mxu0 %v24968_v39  ;;  %18969 = vmatprep.subr.bf16.mxu1 %v24975_v2  ;;  %v12636_v24 = vpack.c.bf16 %v12632_v6, %v12631_v45 }
 0x83e   : > { %17998 = vmatmul.mubr.bf16.gmra.mrb[84].mxu0 %v26621_v9  ;;  %v25298_v9 = vld [vmem:[%s25964_s3 + $0x540] sm:$0xff]  }
 0x83f   : > { %18017 = vmatprep.mubr.bf16.mxu0 %v26622_v11 }
 0x840   : > { %18006 = vmatpush3.bf16.msra.mxu0 %v24968_v39  ;;  %18970 = vmatpush3.bf16.msra.mxu1 %v24975_v2  ;;  %v25276_v39 = vpack.c.bf16 %v12712_v59, %v12711_v55 }
 0x841   : > { %18007 = vmatprep.subr.bf16.mxu0 %v24983_v10  ;;  %18971 = vmatprep.subr.bf16.mxu1 %v24989_v50 }
 0x844   : > { %18008 = vmatpush3.bf16.msra.mxu0 %v24983_v10  ;;  %18972 = vmatpush3.bf16.msra.mxu1 %v24989_v50 }
 0x845   : > { %18009 = vmatprep.subr.bf16.mxu0 %v24999_v26  ;;  %18973 = vmatprep.subr.bf16.mxu1 %v25005_v7 }
 0x848   : > { %18010 = vmatpush3.bf16.msra.mxu0 %v24999_v26  ;;  %18974 = vmatpush3.bf16.msra.mxu1 %v25005_v7  ;;  %v12713_v7 = vld [vmem:[#allocation2 + $0x220] sm:$0xff] }
 0x849   : > { %18011 = vmatprep.subr.bf16.mxu0 %v25013_v53  ;;  %18975 = vmatprep.subr.bf16.mxu1 %v25019_v23 }
 0x84c   : > { %18012 = vmatpush3.bf16.msra.mxu0 %v25013_v53  ;;  %18976 = vmatpush3.bf16.msra.mxu1 %v25019_v23  ;;  %v12714_v53 = vld [vmem:[#allocation2 + $0x230] sm:$0xff]  ;;  %v12715_v23 = vld [vmem:[#allocation2 + $0x240] sm:$0xff] }
 0x84d   : > { %18013 = vmatprep.subr.bf16.mxu0 %v25027_v29  ;;  %18985 = vmatprep.subr.bf16.mxu1 %v25160_v13 }
 0x84f   : > { %18978 = vmatmul.mubr.bf16.vlgmr.msra.gmra.mrb[24].mxu1 %v25165_v22 }
 0x850   : > { %18014 = vmatpush3.bf16.msra.mxu0 %v25027_v29  ;;  %18981 = vmatprep.mubr.bf16.mxu1 %v25168_v44  ;;  %v12716_v29 = vld [vmem:[#allocation2 + $0x250] sm:$0xff] }
 0x851   : > { %18986 = vmatpush3.bf16.msra.mxu1 %v25160_v13  ;;  %18015 = vmatprep.subr.bf16.mxu0 %v25037_v14  ;;  %v25311_v46 = vpack.c.bf16 %v12716_v29, %v12715_v23 }
 0x852   : > { %18987 = vmatprep.subr.bf16.mxu1 %v25173_v62 }
 0x854   : > { %18016 = vmatpush3.bf16.msra.mxu0 %v25037_v14  ;;  %v25303_v14 = vpack.c.bf16 %v12714_v53, %v12713_v7  ;;  %v13080_v7 = vld [vmem:[#allocation2 + $0x161] sm:$0xff]  ;;  %v13081_v53 = vld [vmem:[#allocation2 + $0x171] sm:$0xff] }
 0x855   : > { %18988 = vmatpush3.bf16.msra.mxu1 %v25173_v62  ;;  %v25467_v29 = vpack.c.bf16 %v13081_v53, %v13080_v7  ;;  %v25522_v7 = vld [vmem:[%s25964_s3 + $0x5a0] sm:$0xff]   ;;  %v25529_v53 = vld [vmem:[%s25964_s3 + $0x5a8] sm:$0xff]  }
 0x856   : > { %18989 = vmatprep.subr.bf16.mxu1 %v25184_v40 }
 0x857   : > { %18018 = vmatmul.mubr.bf16.vlgmr.msra.gmra.mrb[88].mxu0 %v26623_v27  ;;  %18982 = vmatmul.mubr.bf16.gmra.mrb[28].mxu1 %v25188_v52  ;;  %v25367_v27 = vld [vmem:[%s25964_s3 + $0x578] sm:$0xff]  }
 0x858   : > { %18021 = vmatprep.mubr.bf16.mxu0 %v26624_v28  ;;  %19001 = vmatprep.mubr.bf16.mxu1 %v24091_v48  ;;  %v25220_v48 = vld [vmem:[%s25964_s3 + $0x530] sm:$0xff]  }
 0x859   : > { %18990 = vmatpush3.bf16.msra.mxu1 %v25184_v40 }
 0x85a   : > { %18991 = vmatprep.subr.bf16.mxu1 %v25194_v57 }
 0x85d   : > { %18992 = vmatpush3.bf16.msra.mxu1 %v25194_v57 }
 0x85e   : > { %18993 = vmatprep.subr.bf16.mxu1 %v25205_v36 }
 0x85f   : > { %18022 = vmatmul.mubr.bf16.gmra.mrb[92].mxu0 %v23833_v32  ;;  %v12625_v32 = vld [vmem:[#allocation2 + $0x160] sm:$0xff] }
 0x861   : > { %18994 = vmatpush3.bf16.msra.mxu1 %v25205_v36 }
 0x862   : > { %18995 = vmatprep.subr.bf16.mxu1 %v25212_v21 }
 0x865   : > { %18996 = vmatpush3.bf16.msra.mxu1 %v25212_v21 }
 0x866   : > { %18997 = vmatprep.subr.bf16.mxu1 %v25220_v48 }
 0x869   : > { %18998 = vmatpush3.bf16.msra.mxu1 %v25220_v48 }
 0x86a   : > { %18999 = vmatprep.subr.bf16.mxu1 %v25227_v37 }
 0x86d   : > { %19000 = vmatpush3.bf16.msra.mxu1 %v25227_v37 }
 0x86e   : > { %19009 = vmatprep.subr.bf16.mxu1 %v25160_v13 }
 0x870   : > { %19002 = vmatmul.mubr.bf16.vlgmr.msra.gmra.mrb[0].mxu1 %v24120_v17  ;;  %v12626_v17 = vld [vmem:[#allocation2 + $0x170] sm:$0xff] }
 0x871   : > { %19005 = vmatprep.mubr.bf16.mxu1 %v24123_v1  ;;  %19010 = vmatpush3.bf16.msra.mxu1 %v25160_v13  ;;  %v12633_v1 = vpack.c.bf16 %v12626_v17, %v12625_v32 }
 0x872   : > { %19011 = vmatprep.subr.bf16.mxu1 %v25173_v62 }
 0x875   : > { %19012 = vmatpush3.bf16.msra.mxu1 %v25173_v62 }
 0x876   : > { %19013 = vmatprep.subr.bf16.mxu1 %v25184_v40 }
 0x878   : > { %19006 = vmatmul.mubr.bf16.gmra.mrb[4].mxu1 %v24134_v38  ;;  %v12627_v38 = vld [vmem:[#allocation2 + $0x180] sm:$0xff] }
 0x879   : > { %19014 = vmatpush3.bf16.msra.mxu1 %v25184_v40  ;;  %19025 = vmatprep.mubr.bf16.mxu1 %v24140_v47  ;;  %v12634_v51 = vpack.c.bf16 %v12628_v4, %v12627_v38 }
 0x87a   : > { %19015 = vmatprep.subr.bf16.mxu1 %v25194_v57 }
 0x87d   : > { %19016 = vmatpush3.bf16.msra.mxu1 %v25194_v57 }
 0x87e   : > { %19017 = vmatprep.subr.bf16.mxu1 %v25205_v36 }
 0x881   : > { %19018 = vmatpush3.bf16.msra.mxu1 %v25205_v36 }
 0x882   : > { %19019 = vmatprep.subr.bf16.mxu1 %v25212_v21 }
 0x885   : > { %19020 = vmatpush3.bf16.msra.mxu1 %v25212_v21 }
 0x886   : > { %19021 = vmatprep.subr.bf16.mxu1 %v25220_v48 }
 0x889   : > { %19022 = vmatpush3.bf16.msra.mxu1 %v25220_v48 }
 0x88a   : > { %19023 = vmatprep.subr.bf16.mxu1 %v25227_v37 }
 0x88d   : > { %19024 = vmatpush3.bf16.msra.mxu1 %v25227_v37 }
 0x88e   : > { %19033 = vmatprep.subr.bf16.mxu1 %v25160_v13 }
 0x890   : > { %19026 = vmatmul.mubr.bf16.vlgmr.msra.gmra.mrb[8].mxu1 %v24173_v56 }
 0x891   : > { %19029 = vmatprep.mubr.bf16.mxu1 %v24176_v60  ;;  %19034 = vmatpush3.bf16.msra.mxu1 %v25160_v13 }
 0x892   : > { %19035 = vmatprep.subr.bf16.mxu1 %v25173_v62 }
 0x895   : > { %19036 = vmatpush3.bf16.msra.mxu1 %v25173_v62 }
 0x896   : > { %19037 = vmatprep.subr.bf16.mxu1 %v25184_v40 }
 0x898   : > { %19030 = vmatmul.mubr.bf16.gmra.mrb[12].mxu1 %v24202_v33 }
 0x899   : > { %19038 = vmatpush3.bf16.msra.mxu1 %v25184_v40  ;;  %19049 = vmatprep.mubr.bf16.mxu1 %v12633_v1 }
 0x89a   : > { %19039 = vmatprep.subr.bf16.mxu1 %v25194_v57 }
 0x89d   : > { %19040 = vmatpush3.bf16.msra.mxu1 %v25194_v57 }
 0x89e   : > { %19041 = vmatprep.subr.bf16.mxu1 %v25205_v36 }
 0x8a1   : > { %19042 = vmatpush3.bf16.msra.mxu1 %v25205_v36 }
 0x8a2   : > { %19043 = vmatprep.subr.bf16.mxu1 %v25212_v21 }
 0x8a5   : > { %19044 = vmatpush3.bf16.msra.mxu1 %v25212_v21 }
 0x8a6   : > { %19045 = vmatprep.subr.bf16.mxu1 %v25220_v48 }
 0x8a9   : > { %19046 = vmatpush3.bf16.msra.mxu1 %v25220_v48 }
 0x8aa   : > { %19047 = vmatprep.subr.bf16.mxu1 %v25227_v37 }
 0x8ad   : > { %19048 = vmatpush3.bf16.msra.mxu1 %v25227_v37 }
 0x8ae   : > { %19057 = vmatprep.subr.bf16.mxu1 %v25160_v13 }
 0x8b0   : > { %19050 = vmatmul.mubr.bf16.vlgmr.msra.gmra.mrb[16].mxu1 %v12634_v51 }
 0x8b1   : > { %19053 = vmatprep.mubr.bf16.mxu1 %v12635_v54  ;;  %19058 = vmatpush3.bf16.msra.mxu1 %v25160_v13 }
 0x8b2   : > { %19059 = vmatprep.subr.bf16.mxu1 %v25173_v62 }
 0x8b5   : > { %19060 = vmatpush3.bf16.msra.mxu1 %v25173_v62  ;;  %v12718_v62 = vld [vmem:[#allocation2 + $0x270] sm:$0xff] }
 0x8b6   : > { %19061 = vmatprep.subr.bf16.mxu1 %v25184_v40  ;;  %v25331_v25 = vpack.c.bf16 %v12718_v62, %v12717_v63  ;;  %v25493_v62 = vld [vmem:[%s25964_s3 + $0x588] sm:$0xff]  }
 0x8b8   : > { %19054 = vmatmul.mubr.bf16.gmra.mrb[20].mxu1 %v12636_v24 }
 0x8b9   : > { %19062 = vmatpush3.bf16.msra.mxu1 %v25184_v40  ;;  %19073 = vmatprep.mubr.bf16.mxu1 %v25276_v39  ;;  %v25346_v40 = vld [vmem:[%s25964_s3 + $0x560] sm:$0xff]  }
 0x8ba   : > { %19063 = vmatprep.subr.bf16.mxu1 %v25194_v57 }
 0x8bd   : > { %19064 = vmatpush3.bf16.msra.mxu1 %v25194_v57  ;;  %v25353_v57 = vld [vmem:[%s25964_s3 + $0x568] sm:$0xff]  }
 0x8be   : > { %19065 = vmatprep.subr.bf16.mxu1 %v25205_v36 }
 0x8c1   : > { %19066 = vmatpush3.bf16.msra.mxu1 %v25205_v36 }
 0x8c2   : > { %19067 = vmatprep.subr.bf16.mxu1 %v25212_v21 }
 0x8c5   : > { %19068 = vmatpush3.bf16.msra.mxu1 %v25212_v21 }
 0x8c6   : > { %19069 = vmatprep.subr.bf16.mxu1 %v25220_v48 }
 0x8c8   : > { %v25287_v2 = vpop.f32.mrb[64].mxu0 }
 0x8c9   : > { %19070 = vmatpush3.bf16.msra.mxu1 %v25220_v48  ;;  %v25290_v10 = vpop.f32.mrb[65].mxu0 }
 0x8ca   : > { %19071 = vmatprep.subr.bf16.mxu1 %v25227_v37  ;;  %v25293_v50 = vpop.f32.mrb[66].mxu0 }
 0x8cb   : > { %v25300_v26 = vpop.f32.mrb[67].mxu0 }
 0x8cd   : > { %19072 = vmatpush3.bf16.msra.mxu1 %v25227_v37 }
 0x8ce   : > { %19081 = vmatprep.subr.bf16.mxu1 %v25298_v9 }
 0x8d0   : > { %19074 = vmatmul.mubr.bf16.vlgmr.msra.gmra.mrb[24].mxu1 %v25303_v14  ;;  %v25314_v11 = vpop.f32.mrb[68].mxu0 }
 0x8d1   : > { %19077 = vmatprep.mubr.bf16.mxu1 %v25311_v46  ;;  %19082 = vmatpush3.bf16.msra.mxu1 %v25298_v9  ;;  %v25318_v13 = vpop.f32.mrb[69].mxu0 }
 0x8d2   : > { %19083 = vmatprep.subr.bf16.mxu1 %v25309_v43  ;;  %v25321_v3 = vpop.f32.mrb[70].mxu0 }
 0x8d3   : > { %v25328_v42 = vpop.f32.mrb[71].mxu0 }
 0x8d5   : > { %19084 = vmatpush3.bf16.msra.mxu1 %v25309_v43 }
 0x8d6   : > { %19085 = vmatprep.subr.bf16.mxu1 %v25326_v34 }
 0x8d8   : > { %19078 = vmatmul.mubr.bf16.gmra.mrb[28].mxu1 %v25331_v25 }
 0x8d9   : > { %19086 = vmatpush3.bf16.msra.mxu1 %v25326_v34  ;;  %19097 = vmatprep.mubr.bf16.mxu1 %v24140_v47  ;;  %v25360_v47 = vld [vmem:[%s25964_s3 + $0x570] sm:$0xff]  }
 0x8da   : > { %19087 = vmatprep.subr.bf16.mxu1 %v25337_v12 }
 0x8dd   : > { %19088 = vmatpush3.bf16.msra.mxu1 %v25337_v12 }
 0x8de   : > { %19089 = vmatprep.subr.bf16.mxu1 %v25346_v40 }
 0x8e1   : > { %19090 = vmatpush3.bf16.msra.mxu1 %v25346_v40 }
 0x8e2   : > { %19091 = vmatprep.subr.bf16.mxu1 %v25353_v57 }
 0x8e5   : > { %19092 = vmatpush3.bf16.msra.mxu1 %v25353_v57 }
 0x8e6   : > { %19093 = vmatprep.subr.bf16.mxu1 %v25360_v47 }
 0x8e9   : > { %19094 = vmatpush3.bf16.msra.mxu1 %v25360_v47  ;;  %v25370_v28 = vpop.f32.mrb[72].mxu0 }
 0x8ea   : > { %v25372_v36 = vpop.f32.mrb[73].mxu0  ;;  %19095 = vmatprep.subr.bf16.mxu1 %v25367_v27 }
 0x8eb   : > { %v25375_v21 = vpop.f32.mrb[74].mxu0 }
 0x8ec   : > { %v25377_v48 = vpop.f32.mrb[75].mxu0 }
 0x8ed   : > { %19096 = vmatpush3.bf16.msra.mxu1 %v25367_v27 }
 0x8ee   : > { %19105 = vmatprep.subr.bf16.mxu1 %v25298_v9 }
 0x8f0   : > { %19098 = vmatmul.mubr.bf16.vlgmr.msra.gmra.mrb[0].mxu1 %v24173_v56 }
 0x8f1   : > { %19101 = vmatprep.mubr.bf16.mxu1 %v24176_v60  ;;  %19106 = vmatpush3.bf16.msra.mxu1 %v25298_v9  ;;  %v25384_v37 = vpop.f32.mrb[76].mxu0 }
 0x8f2   : > { %v25386_v32 = vpop.f32.mrb[77].mxu0  ;;  %19107 = vmatprep.subr.bf16.mxu1 %v25309_v43 }
 0x8f3   : > { %v25389_v17 = vpop.f32.mrb[78].mxu0 }
 0x8f4   : > { %v25391_v1 = vpop.f32.mrb[79].mxu0 }
 0x8f5   : > { %19108 = vmatpush3.bf16.msra.mxu1 %v25309_v43 }
 0x8f6   : > { %19109 = vmatprep.subr.bf16.mxu1 %v25326_v34 }
 0x8f8   : > { %19102 = vmatmul.mubr.bf16.gmra.mrb[4].mxu1 %v24202_v33 }
 0x8f9   : > { %19110 = vmatpush3.bf16.msra.mxu1 %v25326_v34  ;;  %19121 = vmatprep.mubr.bf16.mxu1 %v24388_v16 }
 0x8fa   : > { %19111 = vmatprep.subr.bf16.mxu1 %v25337_v12 }
 0x8fd   : > { %19112 = vmatpush3.bf16.msra.mxu1 %v25337_v12 }
 0x8fe   : > { %19113 = vmatprep.subr.bf16.mxu1 %v25346_v40 }
 0x901   : > { %19114 = vmatpush3.bf16.msra.mxu1 %v25346_v40 }
 0x902   : > { %19115 = vmatprep.subr.bf16.mxu1 %v25353_v57 }
 0x905   : > { %19116 = vmatpush3.bf16.msra.mxu1 %v25353_v57 }
 0x906   : > { %19117 = vmatprep.subr.bf16.mxu1 %v25360_v47 }
 0x909   : > { %19118 = vmatpush3.bf16.msra.mxu1 %v25360_v47  ;;  %v25406_v56 = vpop.f32.mrb[80].mxu0 }
 0x90a   : > { %v25408_v60 = vpop.f32.mrb[81].mxu0  ;;  %19119 = vmatprep.subr.bf16.mxu1 %v25367_v27 }
 0x90b   : > { %v25411_v33 = vpop.f32.mrb[82].mxu0 }
 0x90c   : > { %v25413_v38 = vpop.f32.mrb[83].mxu0 }
 0x90d   : > { %19120 = vmatpush3.bf16.msra.mxu1 %v25367_v27 }
 0x90e   : > { %19129 = vmatprep.subr.bf16.mxu1 %v25298_v9 }
 0x910   : > { %19122 = vmatmul.mubr.bf16.vlgmr.msra.gmra.mrb[8].mxu1 %v24421_v5 }
 0x911   : > { %19125 = vmatprep.mubr.bf16.mxu1 %v24424_v31  ;;  %19130 = vmatpush3.bf16.msra.mxu1 %v25298_v9  ;;  %v25420_v4 = vpop.f32.mrb[84].mxu0 }
 0x912   : > { %v25422_v61 = vpop.f32.mrb[85].mxu0  ;;  %19131 = vmatprep.subr.bf16.mxu1 %v25309_v43 }
 0x913   : > { %v25425_v19 = vpop.f32.mrb[86].mxu0 }
 0x914   : > { %v25427_v51 = vpop.f32.mrb[87].mxu0 }
 0x915   : > { %19132 = vmatpush3.bf16.msra.mxu1 %v25309_v43 }
 0x916   : > { %19133 = vmatprep.subr.bf16.mxu1 %v25326_v34 }
 0x918   : > { %19126 = vmatmul.mubr.bf16.gmra.mrb[12].mxu1 %v24450_v58 }
 0x919   : > { %19134 = vmatpush3.bf16.msra.mxu1 %v25326_v34  ;;  %19145 = vmatprep.mubr.bf16.mxu1 %v25276_v39 }
 0x91a   : > { %19135 = vmatprep.subr.bf16.mxu1 %v25337_v12 }
 0x91d   : > { %19136 = vmatpush3.bf16.msra.mxu1 %v25337_v12 }
 0x91e   : > { %19137 = vmatprep.subr.bf16.mxu1 %v25346_v40 }
 0x921   : > { %19138 = vmatpush3.bf16.msra.mxu1 %v25346_v40 }
 0x922   : > { %19139 = vmatprep.subr.bf16.mxu1 %v25353_v57 }
 0x925   : > { %19140 = vmatpush3.bf16.msra.mxu1 %v25353_v57 }
 0x926   : > { %19141 = vmatprep.subr.bf16.mxu1 %v25360_v47 }
 0x929   : > { %19142 = vmatpush3.bf16.msra.mxu1 %v25360_v47 }
 0x92a   : > { %v25442_v54 = vpop.f32.mrb[88].mxu0  ;;  %19143 = vmatprep.subr.bf16.mxu1 %v25367_v27 }
 0x92b   : > { %v25445_v45 = vpop.f32.mrb[89].mxu0 }
 0x92c   : > { %v25447_v6 = vpop.f32.mrb[90].mxu0 }
 0x92d   : > { %19144 = vmatpush3.bf16.msra.mxu1 %v25367_v27  ;;  %v25450_v55 = vpop.f32.mrb[91].mxu0 }
 0x92e   : > { %19153 = vmatprep.subr.bf16.mxu1 %v25298_v9 }
 0x930   : > { %19146 = vmatmul.mubr.bf16.vlgmr.msra.gmra.mrb[16].mxu1 %v25303_v14  ;;  %v13082_v14 = vld [vmem:[#allocation2 + $0x181] sm:$0xff] }
 0x931   : > { %19149 = vmatprep.mubr.bf16.mxu1 %v25311_v46  ;;  %19154 = vmatpush3.bf16.msra.mxu1 %v25298_v9  ;;  %v25484_v9 = vld [vmem:[%s25964_s3 + $0x580] sm:$0xff]  }
 0x932   : > { %v25456_v59 = vpop.f32.mrb[92].mxu0  ;;  %19155 = vmatprep.subr.bf16.mxu1 %v25309_v43  ;;  %v13084_v46 = vld [vmem:[#allocation2 + $0x1a1] sm:$0xff] }
 0x933   : > { %v25459_v24 = vpop.f32.mrb[93].mxu0 }
 0x934   : > { %v25461_v39 = vpop.f32.mrb[94].mxu0 }
 0x935   : > { %19156 = vmatpush3.bf16.msra.mxu1 %v25309_v43  ;;  %v25464_v23 = vpop.f32.mrb[95].mxu0  ;;  %v13083_v43 = vld [vmem:[#allocation2 + $0x191] sm:$0xff] }
 0x936   : > { %19157 = vmatprep.subr.bf16.mxu1 %v25326_v34  ;;  %v25487_v63 = vpack.c.bf16 %v13083_v43, %v13082_v14  ;;  %v25543_v14 = vld [vmem:[%s25964_s3 + $0x5b8] sm:$0xff]  }
 0x937   : > { %v13452_v43 = vld [vmem:[#allocation2 + $0x231] sm:$0xff] }
 0x938   : > { %19150 = vmatmul.mubr.bf16.gmra.mrb[20].mxu1 %v25331_v25 }
 0x939   : > { %19158 = vmatpush3.bf16.msra.mxu1 %v25326_v34  ;;  %19169 = vmatprep.mubr.bf16.mxu1 %v25467_v29  ;;  %v13085_v34 = vld [vmem:[#allocation2 + $0x1b1] sm:$0xff] }
 0x93a   : > { %19159 = vmatprep.subr.bf16.mxu1 %v25337_v12  ;;  %v25495_v25 = vpack.c.bf16 %v13085_v34, %v13084_v46  ;;  %v13453_v46 = vld [vmem:[#allocation2 + $0x241] sm:$0xff]  ;;  %v13454_v34 = vld [vmem:[#allocation2 + $0x251] sm:$0xff] }
 0x93d   : > { %19160 = vmatpush3.bf16.msra.mxu1 %v25337_v12  ;;  %v25504_v12 = vld [vmem:[%s25964_s3 + $0x590] sm:$0xff]  }
 0x93e   : > { %19161 = vmatprep.subr.bf16.mxu1 %v25346_v40 }
 0x941   : > { %19162 = vmatpush3.bf16.msra.mxu1 %v25346_v40  ;;  %v13086_v40 = vld [vmem:[#allocation2 + $0x1c1] sm:$0xff] }
 0x942   : > { %19163 = vmatprep.subr.bf16.mxu1 %v25353_v57 }
 0x945   : > { %19164 = vmatpush3.bf16.msra.mxu1 %v25353_v57  ;;  %v13087_v57 = vld [vmem:[#allocation2 + $0x1d1] sm:$0xff] }
 0x946   : > { %19165 = vmatprep.subr.bf16.mxu1 %v25360_v47 }
 0x949   : > { %19166 = vmatpush3.bf16.msra.mxu1 %v25360_v47  ;;  %v25507_v47 = vpack.c.bf16 %v13087_v57, %v13086_v40  ;;  %v13455_v40 = vld [vmem:[#allocation2 + $0x261] sm:$0xff]  ;;  %v13456_v57 = vld [vmem:[#allocation2 + $0x271] sm:$0xff] }
 0x94a   : > { %19167 = vmatprep.subr.bf16.mxu1 %v25367_v27 }
 0x94d   : > { %19168 = vmatpush3.bf16.msra.mxu1 %v25367_v27  ;;  %v25513_v27 = vld [vmem:[%s25964_s3 + $0x598] sm:$0xff]  }
 0x94e   : > { %19177 = vmatprep.subr.bf16.mxu1 %v25484_v9 }
 0x950   : > { %19170 = vmatmul.mubr.bf16.vlgmr.msra.gmra.mrb[24].mxu1 %v25487_v63 }
 0x951   : > { %19173 = vmatprep.mubr.bf16.mxu1 %v25495_v25  ;;  %19178 = vmatpush3.bf16.msra.mxu1 %v25484_v9 }
 0x952   : > { %19179 = vmatprep.subr.bf16.mxu1 %v25493_v62 }
 0x955   : > { %19180 = vmatpush3.bf16.msra.mxu1 %v25493_v62 }
 0x956   : > { %19181 = vmatprep.subr.bf16.mxu1 %v25504_v12 }
 0x958   : > { %19174 = vmatmul.mubr.bf16.gmra.mrb[28].mxu1 %v25507_v47 }
 0x959   : > { %19182 = vmatpush3.bf16.msra.mxu1 %v25504_v12  ;;  %19193 = vmatprep.mubr.bf16.mxu1 %v24388_v16  ;;  %v25536_v16 = vld [vmem:[%s25964_s3 + $0x5b0] sm:$0xff]  }
 0x95a   : > { %19183 = vmatprep.subr.bf16.mxu1 %v25513_v27 }
 0x95d   : > { %19184 = vmatpush3.bf16.msra.mxu1 %v25513_v27 }
 0x95e   : > { %19185 = vmatprep.subr.bf16.mxu1 %v25522_v7 }
 0x961   : > { %19186 = vmatpush3.bf16.msra.mxu1 %v25522_v7 }
 0x962   : > { %19187 = vmatprep.subr.bf16.mxu1 %v25529_v53 }
 0x965   : > { %19188 = vmatpush3.bf16.msra.mxu1 %v25529_v53 }
 0x966   : > { %19189 = vmatprep.subr.bf16.mxu1 %v25536_v16 }
 0x969   : > { %19190 = vmatpush3.bf16.msra.mxu1 %v25536_v16 }
 0x96a   : > { %19191 = vmatprep.subr.bf16.mxu1 %v25543_v14 }
 0x96d   : > { %19192 = vmatpush3.bf16.msra.mxu1 %v25543_v14 }
 0x96e   : > { %19201 = vmatprep.subr.bf16.mxu1 %v25484_v9 }
 0x970   : > { %19194 = vmatmul.mubr.bf16.vlgmr.msra.gmra.mrb[0].mxu1 %v24421_v5  ;;  %v13449_v5 = vld [vmem:[#allocation2 + $0x201] sm:$0xff] }
 0x971   : > { %19197 = vmatprep.mubr.bf16.mxu1 %v24424_v31  ;;  %19202 = vmatpush3.bf16.msra.mxu1 %v25484_v9  ;;  %v13450_v31 = vld [vmem:[#allocation2 + $0x211] sm:$0xff] }
 0x972   : > { %19203 = vmatprep.subr.bf16.mxu1 %v25493_v62 }
 0x975   : > { %19204 = vmatpush3.bf16.msra.mxu1 %v25493_v62 }
 0x976   : > { %19205 = vmatprep.subr.bf16.mxu1 %v25504_v12 }
 0x978   : > { %19198 = vmatmul.mubr.bf16.gmra.mrb[4].mxu1 %v24450_v58  ;;  %v25595_v58 = vpack.c.bf16 %v13450_v31, %v13449_v5  ;;  %v13820_v5 = vld [vmem:[#allocation2 + $0x182] sm:$0xff]  ;;  %v13821_v31 = vld [vmem:[#allocation2 + $0x192] sm:$0xff] }
 0x979   : > { %19206 = vmatpush3.bf16.msra.mxu1 %v25504_v12  ;;  %19217 = vmatprep.mubr.bf16.mxu1 %v24636_v30 }
 0x97a   : > { %19207 = vmatprep.subr.bf16.mxu1 %v25513_v27 }
 0x97d   : > { %19208 = vmatpush3.bf16.msra.mxu1 %v25513_v27 }
 0x97e   : > { %19209 = vmatprep.subr.bf16.mxu1 %v25522_v7 }
 0x981   : > { %19210 = vmatpush3.bf16.msra.mxu1 %v25522_v7 }
 0x982   : > { %19211 = vmatprep.subr.bf16.mxu1 %v25529_v53 }
 0x985   : > { %19212 = vmatpush3.bf16.msra.mxu1 %v25529_v53 }
 0x986   : > { %19213 = vmatprep.subr.bf16.mxu1 %v25536_v16 }
 0x989   : > { %19214 = vmatpush3.bf16.msra.mxu1 %v25536_v16 }
 0x98a   : > { %19215 = vmatprep.subr.bf16.mxu1 %v25543_v14 }
 0x98d   : > { %19216 = vmatpush3.bf16.msra.mxu1 %v25543_v14 }
 0x98e   : > { %19225 = vmatprep.subr.bf16.mxu1 %v25484_v9 }
 0x990   : > { %19218 = vmatmul.mubr.bf16.vlgmr.msra.gmra.mrb[8].mxu1 %v24669_v18 }
 0x991   : > { %19221 = vmatprep.mubr.bf16.mxu1 %v24672_v15  ;;  %19226 = vmatpush3.bf16.msra.mxu1 %v25484_v9 }
 0x992   : > { %19227 = vmatprep.subr.bf16.mxu1 %v25493_v62 }
 0x995   : > { %19228 = vmatpush3.bf16.msra.mxu1 %v25493_v62 }
 0x996   : > { %19229 = vmatprep.subr.bf16.mxu1 %v25504_v12 }
 0x998   : > { %19222 = vmatmul.mubr.bf16.gmra.mrb[12].mxu1 %v24698_v8 }
 0x999   : > { %19230 = vmatpush3.bf16.msra.mxu1 %v25504_v12  ;;  %19241 = vmatprep.mubr.bf16.mxu1 %v25467_v29  ;;  %v25612_v29 = vld [vmem:[%s25964_s3 + $0x5c0] sm:$0xff]  }
 0x99a   : > { %19231 = vmatprep.subr.bf16.mxu1 %v25513_v27 }
 0x99d   : > { %19232 = vmatpush3.bf16.msra.mxu1 %v25513_v27 }
 0x99e   : > { %19233 = vmatprep.subr.bf16.mxu1 %v25522_v7 }
 0x9a1   : > { %19234 = vmatpush3.bf16.msra.mxu1 %v25522_v7 }
 0x9a2   : > { %19235 = vmatprep.subr.bf16.mxu1 %v25529_v53 }
 0x9a5   : > { %19236 = vmatpush3.bf16.msra.mxu1 %v25529_v53 }
 0x9a6   : > { %19237 = vmatprep.subr.bf16.mxu1 %v25536_v16 }
 0x9a9   : > { %19238 = vmatpush3.bf16.msra.mxu1 %v25536_v16 }
 0x9aa   : > { %19239 = vmatprep.subr.bf16.mxu1 %v25543_v14 }
 0x9ad   : > { %19240 = vmatpush3.bf16.msra.mxu1 %v25543_v14 }
 0x9ae   : > { %19249 = vmatprep.subr.bf16.mxu1 %v25484_v9 }
 0x9b0   : > { %19242 = vmatmul.mubr.bf16.vlgmr.msra.gmra.mrb[16].mxu1 %v25487_v63 }
 0x9b1   : > { %19245 = vmatprep.mubr.bf16.mxu1 %v25495_v25  ;;  %19250 = vmatpush3.bf16.msra.mxu1 %v25484_v9  ;;  %v13451_v9 = vld [vmem:[#allocation2 + $0x221] sm:$0xff]  ;;  %v25623_v25 = vpack.c.bf16 %v13454_v34, %v13453_v46  ;;  %v25760_v34 = vld [vmem:[%s25964_s3 + $0x610] sm:$0xff]  }
 0x9b2   : > { %19251 = vmatprep.subr.bf16.mxu1 %v25493_v62  ;;  %v25615_v63 = vpack.c.bf16 %v13452_v43, %v13451_v9  ;;  %v25743_v9 = vpack.c.bf16 %v13821_v31, %v13820_v5  ;;  %v25749_v43 = vld [vmem:[%s25964_s3 + $0x608] sm:$0xff]  }
 0x9b5   : > { %19252 = vmatpush3.bf16.msra.mxu1 %v25493_v62  ;;  %v25621_v62 = vld [vmem:[%s25964_s3 + $0x5c8] sm:$0xff]  }
 0x9b6   : > { %19253 = vmatprep.subr.bf16.mxu1 %v25504_v12 }
 0x9b8   : > { %19246 = vmatmul.mubr.bf16.gmra.mrb[20].mxu1 %v25507_v47  ;;  %v25635_v47 = vpack.c.bf16 %v13456_v57, %v13455_v40  ;;  %v25778_v40 = vld [vmem:[%s25964_s3 + $0x620] sm:$0xff]   ;;  %v25785_v57 = vld [vmem:[%s25964_s3 + $0x628] sm:$0xff]  }
 0x9b9   : > { %19254 = vmatpush3.bf16.msra.mxu1 %v25504_v12  ;;  %19265 = vmatprep.mubr.bf16.mxu1 %v25595_v58  ;;  %v25632_v12 = vld [vmem:[%s25964_s3 + $0x5d0] sm:$0xff]  }
 0x9ba   : > { %19255 = vmatprep.subr.bf16.mxu1 %v25513_v27 }
 0x9bd   : > { %19256 = vmatpush3.bf16.msra.mxu1 %v25513_v27  ;;  %v25641_v27 = vld [vmem:[%s25964_s3 + $0x5d8] sm:$0xff]  }
 0x9be   : > { %19257 = vmatprep.subr.bf16.mxu1 %v25522_v7 }
 0x9c1   : > { %19258 = vmatpush3.bf16.msra.mxu1 %v25522_v7  ;;  %v25650_v7 = vld [vmem:[%s25964_s3 + $0x5e0] sm:$0xff]  }
 0x9c2   : > { %19259 = vmatprep.subr.bf16.mxu1 %v25529_v53 }
 0x9c5   : > { %19260 = vmatpush3.bf16.msra.mxu1 %v25529_v53  ;;  %v25657_v53 = vld [vmem:[%s25964_s3 + $0x5e8] sm:$0xff]  }
 0x9c6   : > { %19261 = vmatprep.subr.bf16.mxu1 %v25536_v16 }
 0x9c9   : > { %19262 = vmatpush3.bf16.msra.mxu1 %v25536_v16  ;;  %v25671_v16 = vld [vmem:[%s25964_s3 + $0x5f8] sm:$0xff]  }
 0x9ca   : > { %19263 = vmatprep.subr.bf16.mxu1 %v25543_v14 }
 0x9cd   : > { %19264 = vmatpush3.bf16.msra.mxu1 %v25543_v14  ;;  %v25740_v14 = vld [vmem:[%s25964_s3 + $0x600] sm:$0xff]  }
 0x9ce   : > { %19273 = vmatprep.subr.bf16.mxu1 %v25612_v29 }
 0x9d0   : > { %19266 = vmatmul.mubr.bf16.vlgmr.msra.gmra.mrb[24].mxu1 %v25615_v63 }
 0x9d1   : > { %19269 = vmatprep.mubr.bf16.mxu1 %v25623_v25  ;;  %19274 = vmatpush3.bf16.msra.mxu1 %v25612_v29 }
 0x9d2   : > { %19275 = vmatprep.subr.bf16.mxu1 %v25621_v62 }
 0x9d5   : > { %19276 = vmatpush3.bf16.msra.mxu1 %v25621_v62 }
 0x9d6   : > { %19277 = vmatprep.subr.bf16.mxu1 %v25632_v12 }
 0x9d8   : > { %19270 = vmatmul.mubr.bf16.gmra.mrb[28].mxu1 %v25635_v47 }
 0x9d9   : > { %19278 = vmatpush3.bf16.msra.mxu1 %v25632_v12  ;;  %19289 = vmatprep.mubr.bf16.mxu1 %v24636_v30  ;;  %v25664_v30 = vld [vmem:[%s25964_s3 + $0x5f0] sm:$0xff]  }
 0x9da   : > { %19279 = vmatprep.subr.bf16.mxu1 %v25641_v27 }
 0x9dd   : > { %19280 = vmatpush3.bf16.msra.mxu1 %v25641_v27 }
 0x9de   : > { %19281 = vmatprep.subr.bf16.mxu1 %v25650_v7 }
 0x9e1   : > { %19282 = vmatpush3.bf16.msra.mxu1 %v25650_v7 }
 0x9e2   : > { %19283 = vmatprep.subr.bf16.mxu1 %v25657_v53 }
 0x9e5   : > { %19284 = vmatpush3.bf16.msra.mxu1 %v25657_v53 }
 0x9e6   : > { %19285 = vmatprep.subr.bf16.mxu1 %v25664_v30 }
 0x9e9   : > { %19286 = vmatpush3.bf16.msra.mxu1 %v25664_v30 }
 0x9ea   : > { %19287 = vmatprep.subr.bf16.mxu1 %v25671_v16 }
 0x9ed   : > { %19288 = vmatpush3.bf16.msra.mxu1 %v25671_v16 }
 0x9ee   : > { %19297 = vmatprep.subr.bf16.mxu1 %v25612_v29 }
 0x9f0   : > { %19290 = vmatmul.mubr.bf16.vlgmr.msra.gmra.mrb[0].mxu1 %v24669_v18  ;;  %v13818_v18 = vld [vmem:[#allocation2 + $0x162] sm:$0xff] }
 0x9f1   : > { %19293 = vmatprep.mubr.bf16.mxu1 %v24672_v15  ;;  %19298 = vmatpush3.bf16.msra.mxu1 %v25612_v29  ;;  %v13819_v15 = vld [vmem:[#allocation2 + $0x172] sm:$0xff] }
 0x9f2   : > { %19299 = vmatprep.subr.bf16.mxu1 %v25621_v62 }
 0x9f5   : > { %19300 = vmatpush3.bf16.msra.mxu1 %v25621_v62 }
 0x9f6   : > { %19301 = vmatprep.subr.bf16.mxu1 %v25632_v12 }
 0x9f8   : > { %19294 = vmatmul.mubr.bf16.gmra.mrb[4].mxu1 %v24698_v8  ;;  %v25723_v8 = vpack.c.bf16 %v13819_v15, %v13818_v18 }
 0x9f9   : > { %19302 = vmatpush3.bf16.msra.mxu1 %v25632_v12  ;;  %19313 = vmatprep.mubr.bf16.mxu1 %v24884_v35 }
 0x9fa   : > { %19303 = vmatprep.subr.bf16.mxu1 %v25641_v27 }
 0x9fd   : > { %19304 = vmatpush3.bf16.msra.mxu1 %v25641_v27 }
 0x9fe   : > { %19305 = vmatprep.subr.bf16.mxu1 %v25650_v7 }
 0xa01   : > { %19306 = vmatpush3.bf16.msra.mxu1 %v25650_v7 }
 0xa02   : > { %19307 = vmatprep.subr.bf16.mxu1 %v25657_v53 }
 0xa05   : > { %19308 = vmatpush3.bf16.msra.mxu1 %v25657_v53 }
 0xa06   : > { %19309 = vmatprep.subr.bf16.mxu1 %v25664_v30 }
 0xa09   : > { %19310 = vmatpush3.bf16.msra.mxu1 %v25664_v30 }
 0xa0a   : > { %19311 = vmatprep.subr.bf16.mxu1 %v25671_v16 }
 0xa0d   : > { %19312 = vmatpush3.bf16.msra.mxu1 %v25671_v16 }
 0xa0e   : > { %19321 = vmatprep.subr.bf16.mxu1 %v25612_v29 }
 0xa10   : > { %19314 = vmatmul.mubr.bf16.vlgmr.msra.gmra.mrb[8].mxu1 %v24917_v41 }
 0xa11   : > { %19317 = vmatprep.mubr.bf16.mxu1 %v24920_v49  ;;  %19322 = vmatpush3.bf16.msra.mxu1 %v25612_v29 }
 0xa12   : > { %19323 = vmatprep.subr.bf16.mxu1 %v25621_v62 }
 0xa15   : > { %19324 = vmatpush3.bf16.msra.mxu1 %v25621_v62 }
 0xa16   : > { %19325 = vmatprep.subr.bf16.mxu1 %v25632_v12 }
 0xa18   : > { %19318 = vmatmul.mubr.bf16.gmra.mrb[12].mxu1 %v24946_v20 }
 0xa19   : > { %19326 = vmatpush3.bf16.msra.mxu1 %v25632_v12  ;;  %19337 = vmatprep.mubr.bf16.mxu1 %v25595_v58  ;;  %v13822_v58 = vld [vmem:[#allocation2 + $0x1a2] sm:$0xff] }
 0xa1a   : > { %19327 = vmatprep.subr.bf16.mxu1 %v25641_v27 }
 0xa1d   : > { %19328 = vmatpush3.bf16.msra.mxu1 %v25641_v27 }
 0xa1e   : > { %19329 = vmatprep.subr.bf16.mxu1 %v25650_v7 }
 0xa21   : > { %19330 = vmatpush3.bf16.msra.mxu1 %v25650_v7 }
 0xa22   : > { %19331 = vmatprep.subr.bf16.mxu1 %v25657_v53 }
 0xa25   : > { %19332 = vmatpush3.bf16.msra.mxu1 %v25657_v53 }
 0xa26   : > { %19333 = vmatprep.subr.bf16.mxu1 %v25664_v30 }
 0xa29   : > { %19334 = vmatpush3.bf16.msra.mxu1 %v25664_v30 }
 0xa2a   : > { %19335 = vmatprep.subr.bf16.mxu1 %v25671_v16 }
 0xa2d   : > { %19336 = vmatpush3.bf16.msra.mxu1 %v25671_v16 }
 0xa2e   : > { %19345 = vmatprep.subr.bf16.mxu1 %v25612_v29 }
 0xa30   : > { %19338 = vmatmul.mubr.bf16.vlgmr.msra.gmra.mrb[16].mxu1 %v25615_v63  ;;  %v13824_v63 = vld [vmem:[#allocation2 + $0x1c2] sm:$0xff] }
 0xa31   : > { %19341 = vmatprep.mubr.bf16.mxu1 %v25623_v25  ;;  %19346 = vmatpush3.bf16.msra.mxu1 %v25612_v29  ;;  %v13823_v29 = vld [vmem:[#allocation2 + $0x1b2] sm:$0xff] }
 0xa32   : > { %19347 = vmatprep.subr.bf16.mxu1 %v25621_v62  ;;  %v25751_v46 = vpack.c.bf16 %v13823_v29, %v13822_v58 }
 0xa35   : > { %19348 = vmatpush3.bf16.msra.mxu1 %v25621_v62  ;;  %v13825_v62 = vld [vmem:[#allocation2 + $0x1d2] sm:$0xff] }
 0xa36   : > { %19349 = vmatprep.subr.bf16.mxu1 %v25632_v12  ;;  %v25763_v25 = vpack.c.bf16 %v13825_v62, %v13824_v63 }
 0xa38   : > { %19342 = vmatmul.mubr.bf16.gmra.mrb[20].mxu1 %v25635_v47  ;;  %v25799_v47 = vld [vmem:[%s25964_s3 + $0x638] sm:$0xff]  }
 0xa39   : > { %19350 = vmatpush3.bf16.msra.mxu1 %v25632_v12  ;;  %19361 = vmatprep.mubr.bf16.mxu1 %v25723_v8  ;;  %v25769_v12 = vld [vmem:[%s25964_s3 + $0x618] sm:$0xff]  }
 0xa3a   : > { %19351 = vmatprep.subr.bf16.mxu1 %v25641_v27 }
 0xa3d   : > { %19352 = vmatpush3.bf16.msra.mxu1 %v25641_v27 }
 0xa3e   : > { %19353 = vmatprep.subr.bf16.mxu1 %v25650_v7 }
 0xa41   : > { %19354 = vmatpush3.bf16.msra.mxu1 %v25650_v7 }
 0xa42   : > { %19355 = vmatprep.subr.bf16.mxu1 %v25657_v53 }
 0xa45   : > { %19356 = vmatpush3.bf16.msra.mxu1 %v25657_v53  ;;  %v14193_v53 = vld [vmem:[#allocation2 + $0x262] sm:$0xff] }
 0xa46   : > { %19357 = vmatprep.subr.bf16.mxu1 %v25664_v30 }
 0xa49   : > { %19358 = vmatpush3.bf16.msra.mxu1 %v25664_v30  ;;  %v14194_v30 = vld [vmem:[#allocation2 + $0x272] sm:$0xff] }
 0xa4a   : > { %19359 = vmatprep.subr.bf16.mxu1 %v25671_v16 }
 0xa4d   : > { %19360 = vmatpush3.bf16.msra.mxu1 %v25671_v16  ;;  %v14198_v16 = vpack.c.bf16 %v14194_v30, %v14193_v53 }
 0xa4e   : > { %19369 = vmatprep.subr.bf16.mxu1 %v25740_v14 }
 0xa50   : > { %19362 = vmatmul.mubr.bf16.vlgmr.msra.gmra.mrb[24].mxu1 %v25743_v9 }
 0xa51   : > { %19365 = vmatprep.mubr.bf16.mxu1 %v25751_v46  ;;  %19370 = vmatpush3.bf16.msra.mxu1 %v25740_v14 }
 0xa52   : > { %19371 = vmatprep.subr.bf16.mxu1 %v25749_v43 }
 0xa55   : > { %19372 = vmatpush3.bf16.msra.mxu1 %v25749_v43 }
 0xa56   : > { %19373 = vmatprep.subr.bf16.mxu1 %v25760_v34 }
 0xa58   : > { %19366 = vmatmul.mubr.bf16.gmra.mrb[28].mxu1 %v25763_v25 }
 0xa59   : > { %19374 = vmatpush3.bf16.msra.mxu1 %v25760_v34  ;;  %19385 = vmatprep.mubr.bf16.mxu1 %v24884_v35  ;;  %v25792_v35 = vld [vmem:[%s25964_s3 + $0x630] sm:$0xff]  }
 0xa5a   : > { %19375 = vmatprep.subr.bf16.mxu1 %v25769_v12 }
 0xa5d   : > { %19376 = vmatpush3.bf16.msra.mxu1 %v25769_v12 }
 0xa5e   : > { %19377 = vmatprep.subr.bf16.mxu1 %v25778_v40 }
 0xa61   : > { %19378 = vmatpush3.bf16.msra.mxu1 %v25778_v40 }
 0xa62   : > { %19379 = vmatprep.subr.bf16.mxu1 %v25785_v57 }
 0xa65   : > { %19380 = vmatpush3.bf16.msra.mxu1 %v25785_v57 }
 0xa66   : > { %19381 = vmatprep.subr.bf16.mxu1 %v25792_v35 }
 0xa69   : > { %19382 = vmatpush3.bf16.msra.mxu1 %v25792_v35 }
 0xa6a   : > { %19383 = vmatprep.subr.bf16.mxu1 %v25799_v47 }
 0xa6d   : > { %19384 = vmatpush3.bf16.msra.mxu1 %v25799_v47 }
 0xa6e   : > { %19393 = vmatprep.subr.bf16.mxu1 %v25740_v14 }
 0xa70   : > { %19386 = vmatmul.mubr.bf16.vlgmr.msra.gmra.mrb[0].mxu1 %v24917_v41  ;;  %v14187_v41 = vld [vmem:[#allocation2 + $0x202] sm:$0xff] }
 0xa71   : > { %19389 = vmatprep.mubr.bf16.mxu1 %v24920_v49  ;;  %19394 = vmatpush3.bf16.msra.mxu1 %v25740_v14  ;;  %v14188_v49 = vld [vmem:[#allocation2 + $0x212] sm:$0xff] }
 0xa72   : > { %19395 = vmatprep.subr.bf16.mxu1 %v25749_v43 }
 0xa75   : > { %19396 = vmatpush3.bf16.msra.mxu1 %v25749_v43 }
 0xa76   : > { %19397 = vmatprep.subr.bf16.mxu1 %v25760_v34 }
 0xa78   : > { %19390 = vmatmul.mubr.bf16.gmra.mrb[4].mxu1 %v24946_v20  ;;  %v14195_v20 = vpack.c.bf16 %v14188_v49, %v14187_v41 }
 0xa79   : > { %19398 = vmatpush3.bf16.msra.mxu1 %v25760_v34  ;;  %19409 = vmatprep.mubr.bf16.mxu1 %v25132_v0  ;;  %v14189_v0 = vld [vmem:[#allocation2 + $0x222] sm:$0xff] }
 0xa7a   : > { %19399 = vmatprep.subr.bf16.mxu1 %v25769_v12 }
 0xa7d   : > { %19400 = vmatpush3.bf16.msra.mxu1 %v25769_v12 }
 0xa7e   : > { %19401 = vmatprep.subr.bf16.mxu1 %v25778_v40 }
 0xa81   : > { %19402 = vmatpush3.bf16.msra.mxu1 %v25778_v40 }
 0xa82   : > { %19403 = vmatprep.subr.bf16.mxu1 %v25785_v57 }
 0xa85   : > { %19404 = vmatpush3.bf16.msra.mxu1 %v25785_v57 }
 0xa86   : > { %19405 = vmatprep.subr.bf16.mxu1 %v25792_v35 }
 0xa89   : > { %19406 = vmatpush3.bf16.msra.mxu1 %v25792_v35 }
 0xa8a   : > { %19407 = vmatprep.subr.bf16.mxu1 %v25799_v47 }
 0xa8d   : > { %19408 = vmatpush3.bf16.msra.mxu1 %v25799_v47 }
 0xa8e   : > { %19417 = vmatprep.subr.bf16.mxu1 %v25740_v14 }
 0xa90   : > { %19410 = vmatmul.mubr.bf16.vlgmr.msra.gmra.mrb[8].mxu1 %v25165_v22  ;;  %v14190_v22 = vld [vmem:[#allocation2 + $0x232] sm:$0xff] }
 0xa91   : > { %19413 = vmatprep.mubr.bf16.mxu1 %v25168_v44  ;;  %19418 = vmatpush3.bf16.msra.mxu1 %v25740_v14  ;;  %v14191_v44 = vld [vmem:[#allocation2 + $0x242] sm:$0xff]  ;;  %v14196_v27 = vpack.c.bf16 %v14190_v22, %v14189_v0 }
 0xa92   : > { %19419 = vmatprep.subr.bf16.mxu1 %v25749_v43 }
 0xa95   : > { %19420 = vmatpush3.bf16.msra.mxu1 %v25749_v43 }
 0xa96   : > { %19421 = vmatprep.subr.bf16.mxu1 %v25760_v34 }
 0xa98   : > { %19414 = vmatmul.mubr.bf16.gmra.mrb[12].mxu1 %v25188_v52  ;;  %v14192_v52 = vld [vmem:[#allocation2 + $0x252] sm:$0xff] }
 0xa99   : > { %19422 = vmatpush3.bf16.msra.mxu1 %v25760_v34  ;;  %19433 = vmatprep.mubr.bf16.mxu1 %v25723_v8  ;;  %v14197_v7 = vpack.c.bf16 %v14192_v52, %v14191_v44 }
 0xa9a   : > { %19423 = vmatprep.subr.bf16.mxu1 %v25769_v12 }
 0xa9d   : > { %19424 = vmatpush3.bf16.msra.mxu1 %v25769_v12 }
 0xa9e   : > { %19425 = vmatprep.subr.bf16.mxu1 %v25778_v40 }
 0xaa1   : > { %19426 = vmatpush3.bf16.msra.mxu1 %v25778_v40 }
 0xaa2   : > { %19427 = vmatprep.subr.bf16.mxu1 %v25785_v57 }
 0xaa5   : > { %19428 = vmatpush3.bf16.msra.mxu1 %v25785_v57 }
 0xaa6   : > { %19429 = vmatprep.subr.bf16.mxu1 %v25792_v35 }
 0xaa9   : > { %19430 = vmatpush3.bf16.msra.mxu1 %v25792_v35 }
 0xaaa   : > { %19431 = vmatprep.subr.bf16.mxu1 %v25799_v47 }
 0xaad   : > { %19432 = vmatpush3.bf16.msra.mxu1 %v25799_v47 }
 0xaae   : > { %19441 = vmatprep.subr.bf16.mxu1 %v25740_v14 }
 0xab0   : > { %19434 = vmatmul.mubr.bf16.vlgmr.msra.gmra.mrb[16].mxu1 %v25743_v9 }
 0xab1   : > { %19437 = vmatprep.mubr.bf16.mxu1 %v25751_v46  ;;  %19442 = vmatpush3.bf16.msra.mxu1 %v25740_v14 }
 0xab2   : > { %19443 = vmatprep.subr.bf16.mxu1 %v25749_v43 }
 0xab5   : > { %19444 = vmatpush3.bf16.msra.mxu1 %v25749_v43 }
 0xab6   : > { %19445 = vmatprep.subr.bf16.mxu1 %v25760_v34 }
 0xab8   : > { %19438 = vmatmul.mubr.bf16.gmra.mrb[20].mxu1 %v25763_v25 }
 0xab9   : > { %19446 = vmatpush3.bf16.msra.mxu1 %v25760_v34  ;;  %19457 = vmatprep.mubr.bf16.mxu1 %v14195_v20 }
 0xaba   : > { %19447 = vmatprep.subr.bf16.mxu1 %v25769_v12 }
 0xabd   : > { %19448 = vmatpush3.bf16.msra.mxu1 %v25769_v12 }
 0xabe   : > { %19449 = vmatprep.subr.bf16.mxu1 %v25778_v40 }
 0xac1   : > { %19450 = vmatpush3.bf16.msra.mxu1 %v25778_v40 }
 0xac2   : > { %19451 = vmatprep.subr.bf16.mxu1 %v25785_v57 }
 0xac5   : > { %19452 = vmatpush3.bf16.msra.mxu1 %v25785_v57 }
 0xac6   : > { %19453 = vmatprep.subr.bf16.mxu1 %v25792_v35 }
 0xac9   : > { %19454 = vmatpush3.bf16.msra.mxu1 %v25792_v35 }
 0xaca   : > { %19455 = vmatprep.subr.bf16.mxu1 %v25799_v47 }
 0xacd   : > { %19456 = vmatpush3.bf16.msra.mxu1 %v25799_v47 }
 0xad0   : > { %19458 = vmatmul.mubr.bf16.vlgmr.msra.gmra.mrb[24].mxu1 %v14196_v27 }
 0xad1   : > { %19461 = vmatprep.mubr.bf16.mxu1 %v14197_v7 }
 0xad8   : > { %19462 = vmatmul.mubr.bf16.gmra.mrb[28].mxu1 %v14198_v16 }
 0xb43   : > { %v19387_v18 = vpop.f32.mrb[0].mxu1 }
 0xb44   : > { %v25864_v15 = vadd.f32 %v19387_v18, %v25287_v2  ;;  %v14002_v8 = vpop.f32.mrb[1].mxu1 }
 0xb45   : > { %v25867_v14 = vadd.f32 %v14002_v8, %v25290_v10  ;;  %v19388_v5 = vpop.f32.mrb[2].mxu1 }
 0xb46   : > { %v25870_v31 = vadd.f32 %v19388_v5, %v25293_v50  ;;  %v14005_v58 = vpop.f32.mrb[3].mxu1 }
 0xb47   : > { %v25873_v29 = vadd.f32 %v14005_v58, %v25300_v26 }
 0xb4b   : > { %v19391_v9 = vpop.f32.mrb[4].mxu1 }
 0xb4c   : > { %v25876_v43 = vadd.f32 %v19391_v9, %v25314_v11  ;;  %v14018_v46 = vpop.f32.mrb[5].mxu1 }
 0xb4d   : > { %v25879_v2 = vadd.f32 %v14018_v46, %v25318_v13  ;;  %v19392_v34 = vpop.f32.mrb[6].mxu1 }
 0xb4e   : > { %v25882_v10 = vadd.f32 %v19392_v34, %v25321_v3  ;;  %v14021_v63 = vpop.f32.mrb[7].mxu1 }
 0xb4f   : > { %v25885_v50 = vadd.f32 %v14021_v63, %v25328_v42 }
 0xb63   : > { %v19411_v62 = vpop.f32.mrb[8].mxu1 }
 0xb64   : > { %v19473_v26 = vadd.f32 %v19411_v62, %v25370_v28  ;;  %v14075_v25 = vpop.f32.mrb[9].mxu1 }
 0xb65   : > { %v19474_v12 = vadd.f32 %v14075_v25, %v25372_v36  ;;  %v19412_v11 = vpop.f32.mrb[10].mxu1 }
 0xb66   : > { %v14274_v40 = vmax.f32 %v25864_v15, %v19473_v26  ;;  %v19475_v13 = vadd.f32 %v19412_v11, %v25375_v21  ;;  %v14078_v57 = vpop.f32.mrb[11].mxu1 }
 0xb67   : > { %v14272_v35 = vmax.f32 %v25867_v14, %v19474_v12  ;;  %v19476_v3 = vadd.f32 %v14078_v57, %v25377_v48 }
 0xb68   : > { %v14275_v47 = vmax.f32 %v25870_v31, %v19475_v13 }
 0xb69   : > { %v14273_v42 = vmax.f32 %v25873_v29, %v19476_v3 }
 0xb6b   : > { %v19415_v41 = vpop.f32.mrb[12].mxu1 }
 0xb6c   : > { %v25896_v28 = vadd.f32 %v19415_v41, %v25384_v37  ;;  %v14091_v49 = vpop.f32.mrb[13].mxu1 }
 0xb6d   : > { %v25899_v36 = vadd.f32 %v14091_v49, %v25386_v32  ;;  %v19416_v20 = vpop.f32.mrb[14].mxu1 }
 0xb6e   : > { %v14278_v21 = vmax.f32 %v25876_v43, %v25896_v28  ;;  %v25904_v0 = vadd.f32 %v19416_v20, %v25389_v17  ;;  %v14094_v48 = vpop.f32.mrb[15].mxu1 }
 0xb6f   : > { %v14276_v22 = vmax.f32 %v25879_v2, %v25899_v36  ;;  %v25909_v44 = vadd.f32 %v14094_v48, %v25391_v1 }
 0xb70   : > { %v14279_v37 = vmax.f32 %v25882_v10, %v25904_v0 }
 0xb71   : > { %v14277_v32 = vmax.f32 %v25885_v50, %v25909_v44 }
 0xb83   : > { %v19435_v52 = vpop.f32.mrb[16].mxu1 }
 0xb84   : > { %v19481_v27 = vadd.f32 %v19435_v52, %v25406_v56  ;;  %v14148_v7 = vpop.f32.mrb[17].mxu1 }
 0xb85   : > { %v19482_v17 = vadd.f32 %v14148_v7, %v25408_v60  ;;  %v19436_v53 = vpop.f32.mrb[18].mxu1 }
 0xb86   : > { %v19483_v30 = vadd.f32 %v19436_v53, %v25411_v33  ;;  %v14151_v16 = vpop.f32.mrb[19].mxu1 }
 0xb87   : > { %v19484_v1 = vadd.f32 %v14151_v16, %v25413_v38 }
 0xb8b   : > { %v19439_v18 = vpop.f32.mrb[20].mxu1 }
 0xb8c   : > { %v19485_v15 = vadd.f32 %v19439_v18, %v25420_v4  ;;  %v14164_v8 = vpop.f32.mrb[21].mxu1 }
 0xb8d   : > { %v19486_v14 = vadd.f32 %v14164_v8, %v25422_v61  ;;  %v19440_v5 = vpop.f32.mrb[22].mxu1 }
 0xb8e   : > { %v19487_v31 = vadd.f32 %v19440_v5, %v25425_v19  ;;  %v14167_v58 = vpop.f32.mrb[23].mxu1  ;;  %v15336_v19 = vld [vmem:[%s25965_s4] ss:$0 sm:$0xff] }
 0xb8f   : > { %v19488_v56 = vadd.f32 %v14167_v58, %v25427_v51 }
 0xba3   : > { %v19459_v60 = vpop.f32.mrb[24].mxu1 }
 0xba4   : > { %v19489_v33 = vadd.f32 %v19459_v60, %v25442_v54  ;;  %v14233_v29 = vpop.f32.mrb[25].mxu1 }
 0xba5   : > { %v19490_v38 = vadd.f32 %v14233_v29, %v25445_v45  ;;  %v19460_v9 = vpop.f32.mrb[26].mxu1 }
 0xba6   : > { %v14282_v4 = vmax.f32 %v19481_v27, %v19489_v33  ;;  %v19491_v46 = vadd.f32 %v19460_v9, %v25447_v6  ;;  %v14236_v61 = vpop.f32.mrb[27].mxu1 }
 0xba7   : > { %v14280_v34 = vmax.f32 %v19482_v17, %v19490_v38  ;;  %v19492_v51 = vadd.f32 %v14236_v61, %v25450_v55 }
 0xba8   : > { %v14290_v63 = vmax.f32 %v14274_v40, %v14282_v4  ;;  %v14283_v62 = vmax.f32 %v19483_v30, %v19491_v46 }
 0xba9   : > { %v14288_v54 = vmax.f32 %v14272_v35, %v14280_v34  ;;  %v14281_v26 = vmax.f32 %v19484_v1, %v19492_v51 }
 0xbaa   : > { %v14305_v25 = vadd.f32 %v15336_v19, %v14290_v63  ;;  %v14291_v12 = vmax.f32 %v14275_v47, %v14283_v62 }
 0xbab   : > { %v14303_v45 = vadd.f32 %v15336_v19, %v14288_v54  ;;  %v14289_v11 = vmax.f32 %v14273_v42, %v14281_v26  ;;  %v19463_v13 = vpop.f32.mrb[28].mxu1 }
 0xbac   : > { %v14306_v6 = vadd.f32 %v15336_v19, %v14291_v12  ;;  %v19493_v57 = vadd.f32 %v19463_v13, %v25456_v59  ;;  %v14249_v3 = vpop.f32.mrb[29].mxu1  ;;  %v14313_v55 = vmax.f32 %v14305_v25, 0.0 }
 0xbad   : > { %v14304_v41 = vadd.f32 %v15336_v19, %v14289_v11  ;;  %v19494_v49 = vadd.f32 %v14249_v3, %v25459_v24  ;;  %v19464_v20 = vpop.f32.mrb[30].mxu1  ;;  %v14311_v27 = vmax.f32 %v14303_v45, 0.0 }
 0xbae   : > { %v14314_v40 = vmax.f32 %v14306_v6, 0.0  ;;  %v14286_v48 = vmax.f32 %v19485_v15, %v19493_v57  ;;  %v19495_v35 = vadd.f32 %v19464_v20, %v25461_v39  ;;  %v14252_v52 = vpop.f32.mrb[31].mxu1 }
 0xbaf   : > { %v14312_v47 = vmax.f32 %v14304_v41, 0.0  ;;  %v14284_v42 = vmax.f32 %v19486_v14, %v19494_v49  ;;  %v19496_v59 = vadd.f32 %v14252_v52, %v25464_v23 }
 0xbb0   : > { %v15364_v7 = vpack.c.bf16 %v14314_v40, %v14313_v55  ;;  %v14294_v24 = vmax.f32 %v14278_v21, %v14286_v48  ;;  %v14287_v17 = vmax.f32 %v19487_v31, %v19495_v35 }
 0xbb1   : > { %v15359_v53 = vpack.c.bf16 %v14312_v47, %v14311_v27  ;;  %v14292_v39 = vmax.f32 %v14276_v22, %v14284_v42  ;;  %v14285_v30 = vmax.f32 %v19488_v56, %v19496_v59 }
 0xbb2   : > { %15376 = vst [vmem:[%s1543_s8 + $0x8] sm:$0xff] %v15364_v7   ;;  %v14309_v16 = vadd.f32 %v15336_v19, %v14294_v24  ;;  %v14295_v1 = vmax.f32 %v14279_v37, %v14287_v17 }
 0xbb3   : > { %15360 = vst [vmem:[%s1543_s8] sm:$0xff] %v15359_v53   ;;  %v14307_v23 = vadd.f32 %v15336_v19, %v14292_v39  ;;  %v14293_v43 = vmax.f32 %v14277_v32, %v14285_v30 }
 0xbb4   : > { %v14310_v28 = vadd.f32 %v15336_v19, %v14295_v1  ;;  %v14317_v18 = vmax.f32 %v14309_v16, 0.0 }
 0xbb5   : > { %v14308_v21 = vadd.f32 %v15336_v19, %v14293_v43  ;;  %v14315_v8 = vmax.f32 %v14307_v23, 0.0 }
 0xbb6   : > { %v14318_v15 = vmax.f32 %v14310_v28, 0.0 }
 0xbb7   : > { %v14316_v2 = vmax.f32 %v14308_v21, 0.0 }
 0xbb8   : > { %v15374_v36 = vpack.c.bf16 %v14318_v15, %v14317_v18 }
 0xbb9   : > { %v15369_v22 = vpack.c.bf16 %v14316_v2, %v14315_v8 }
 0xbba   : > { %15378 = vst [vmem:[%s1543_s8 + $0x18] sm:$0xff] %v15374_v36  }
 0xbbb   : > { %15377 = vst [vmem:[%s1543_s8 + $0x10] sm:$0xff] %v15369_v22  }
 0xbbc PF: > { %p12_p9 = scmp.ge.s32.totalorder %s20717_s22, 4   ;;  %s26625_s18 = smov %s20663_s19 }
 0xbbd   : > { %s26626_s19 = smov %s20726_s25  ;;  %s26627_s20 = smov %s20717_s22 }
 0xbbe   :  { %14 = sbr.rel (!%p12_p9) target bundleno = 2 (0x2), region = 151 }

</bundles_post_ra>
